<compile_context>
chip_gen: v7x
topology: tpu7x:2x2x1
jax: 0.10.0
libtpu: 0.0.40
codegen_flags: <defaults>
</compile_context>

<pallas_src>
import functools

import jax
import jax.numpy as jnp
from jax.experimental import pallas as pl
from jax.experimental.pallas import tpu as pltpu

N_EMBED = 384
NUM_HEADS = 6
HEAD_SIZE = N_EMBED // NUM_HEADS  # 64


# ---------------------------------------------------------------------------
# Fused kernel: one grid step handles Bt batch elements: QKV projection for
# all heads at once, causal softmax attention per head, and the output
# projection distributed over heads (+ bias).
# ---------------------------------------------------------------------------
def _mha_fused_kernel(x_ref, wqkv_ref, wproj_ref, bproj_ref, out_ref,
                      qkv_scr, acc_scr, *, batch_tile, num_heads, head_size):
    Bt = batch_tile
    H, hs = num_heads, head_size
    _, T, C = x_ref.shape                      # (Bt, T, C)
    rows = Bt * T

    # Flatten batch tile into the row (sublane) axis; bf16 only for the MXU.
    x = x_ref[...].reshape(rows, C).astype(jnp.bfloat16)

    # Single lane-dense QKV projection: (rows, C) @ (C, 3*H*hs), f32 accumulate.
    # Column layout: [q_h0 .. q_h(H-1) | k_h0 .. k_h(H-1) | v_h0 .. v_h(H-1)]
    # (scale C**-0.5 is already folded into the Q columns at pack time).
    # Staged once as bf16 in VMEM so the head loop does cheap ref slices.
    qkv_scr[...] = jnp.dot(
        x, wqkv_ref[...], preferred_element_type=jnp.float32
    ).astype(jnp.bfloat16)

    # Causal mask, built once; large finite negative avoids inf arithmetic.
    row_ids = jax.lax.broadcasted_iota(jnp.int32, (T, T), 0)
    col_ids = jax.lax.broadcasted_iota(jnp.int32, (T, T), 1)
    causal = (col_ids <= row_ids)[None]        # (1, T, T), broadcasts over Bt

    for h in range(H):                          # static unroll, H = 6
        q = qkv_scr[:, h * hs:(h + 1) * hs].reshape(Bt, T, hs)              # bf16
        k = qkv_scr[:, (H + h) * hs:(H + h + 1) * hs].reshape(Bt, T, hs)     # bf16
        v = qkv_scr[:, (2 * H + h) * hs:(2 * H + h + 1) * hs].reshape(Bt, T, hs)

        # scores = q @ k^T per batch element (bf16 operands, f32 MXU accum).
        s = jnp.einsum("btd,bsd->bts", q, k,
                       preferred_element_type=jnp.float32)                  # (Bt,T,T)
        s = jnp.where(causal, s, jnp.float32(-1e30))

        # numerically-stable softmax, all math in f32 (v5e-friendly)
        m = jnp.max(s, axis=-1, keepdims=True)
        e = jnp.exp(s - m)
        inv_l = pl.reciprocal(jnp.sum(e, axis=-1, keepdims=True), approx=True)
        p = (e * inv_l).astype(jnp.bfloat16)

        o_h = jnp.einsum("bts,bsd->btd", p, v,
                         preferred_element_type=jnp.float32)                 # (Bt,T,hs)
        o_h = o_h.reshape(rows, hs).astype(jnp.bfloat16)

        # Distributed output projection: accumulate this head's K-slice of
        # W_proj (cheap 64-row sublane slice) into the f32 accumulator.
        contrib = jnp.dot(o_h, wproj_ref[h * hs:(h + 1) * hs, :],
                          preferred_element_type=jnp.float32)                # (rows, C)
        if h == 0:
            acc_scr[...] = contrib
        else:
            acc_scr[...] += contrib

    # Bias add + single lane-dense (rows, 384) store.
    out_ref[...] = (acc_scr[...] + bproj_ref[...]).reshape(Bt, T, C)


# ---------------------------------------------------------------------------
# Weight packing (done ONCE, outside the per-call path)
# ---------------------------------------------------------------------------
def pack_params(params):
    """Pack per-head weights into the fused layout used by the kernel."""
    H, C, hs = params["wq"].shape
    # NOTE: PyTorch reference scales scores by C ** -0.5 with C = n_embed
    # (not head_size). Folded into the Q columns so the kernel never scales.
    scale = jnp.float32(C) ** jnp.float32(-0.5)

    def stack(w):  # (H, C, hs) -> (C, H*hs)
        return jnp.transpose(w, (1, 0, 2)).reshape(C, H * hs)

    wqkv = jnp.concatenate(
        [stack(params["wq"]) * scale, stack(params["wk"]), stack(params["wv"])],
        axis=-1).astype(jnp.bfloat16)                         # (C, 3*H*hs)
    return {
        "wqkv": wqkv,
        "wproj": params["w_proj"].astype(jnp.bfloat16),       # (C, C)
        "bproj": params["b_proj"].astype(jnp.float32),        # (1, C)
        "num_heads": H,
        "head_size": hs,
    }


def _choose_batch_tile(B, T, target_rows=256):
    """Largest Bt dividing B with Bt*T >= target_rows, but keep >= 2 grid
    steps whenever B >= 2 so v7x's two TensorCores both get work."""
    candidates = [bt for bt in range(1, B + 1) if B % bt == 0]
    if B >= 2:
        candidates = [bt for bt in candidates if B // bt >= 2]
    best = candidates[0]
    for bt in candidates:
        best = bt
        if bt * T >= target_rows:
            break
    return best


# ---------------------------------------------------------------------------
# Module wrapper
# ---------------------------------------------------------------------------
def multi_head_attention(x, packed):
    """x: (B, T, C) float32, packed: output of pack_params -> (B, T, C) f32."""
    B, T, C = x.shape
    H, hs = packed["num_heads"], packed["head_size"]
    Bt = _choose_batch_tile(B, T)
    rows = Bt * T

    kernel = functools.partial(_mha_fused_kernel,
                               batch_tile=Bt, num_heads=H, head_size=hs)

    return pl.pallas_call(
        kernel,
        out_shape=jax.ShapeDtypeStruct((B, T, C), jnp.float32),
        grid_spec=pltpu.PrefetchScalarGridSpec(
            num_scalar_prefetch=0,
            grid=(B // Bt,),
            in_specs=[
                pl.BlockSpec((Bt, T, C), lambda b: (b, 0, 0)),        # x tile
                pl.BlockSpec((C, 3 * H * hs), lambda b: (0, 0)),      # W_qkv (resident)
                pl.BlockSpec((C, C), lambda b: (0, 0)),               # W_proj (resident)
                pl.BlockSpec((1, C), lambda b: (0, 0)),               # b_proj (resident)
            ],
            out_specs=pl.BlockSpec((Bt, T, C), lambda b: (b, 0, 0)),  # lane-dense
            scratch_shapes=[
                pltpu.VMEM((rows, 3 * H * hs), jnp.bfloat16),         # staged QKV
                pltpu.VMEM((rows, C), jnp.float32),                   # out-proj acc
            ],
        ),
        compiler_params=pltpu.CompilerParams(
            dimension_semantics=("parallel",),      # megacore: shard batch tiles
            vmem_limit_bytes=32 * 1024 * 1024,
        ),
    )(x, packed["wqkv"], packed["wproj"], packed["bproj"])


def init_params(key):
    ks = jax.random.split(key, 5)
    scale = 0.02
    return {
        # Per-head projection weights stored as (H, C, hs); equivalent to the
        # transpose of nn.Linear's (hs, C) weight (y = x @ W).
        "wq": scale * jax.random.normal(ks[0], (NUM_HEADS, N_EMBED, HEAD_SIZE), jnp.float32),
        "wk": scale * jax.random.normal(ks[1], (NUM_HEADS, N_EMBED, HEAD_SIZE), jnp.float32),
        "wv": scale * jax.random.normal(ks[2], (NUM_HEADS, N_EMBED, HEAD_SIZE), jnp.float32),
        "w_proj": scale * jax.random.normal(ks[3], (N_EMBED, N_EMBED), jnp.float32),
        "b_proj": scale * jax.random.normal(ks[4], (1, N_EMBED), jnp.float32),
    }


if __name__ == "__main__":
    key = jax.random.PRNGKey(0)
    k_param, k_x = jax.random.split(key)
    params = init_params(k_param)
    packed = pack_params(params)          # one-time weight packing

    B, T = 8, 64                          # T <= block_size (256); Bt*T = 256, grid=(2,)
    x = jax.random.normal(k_x, (B, T, N_EMBED), jnp.float32)

    out = multi_head_attention(x, packed)
    out = jax.block_until_ready(out)

    # Pure-JAX f32 reference (same math as the PyTorch module, eval-mode dropout).
    def ref(x, p):
        q = jnp.einsum("btc,hcd->bhtd", x, p["wq"])
        k = jnp.einsum("btc,hcd->bhtd", x, p["wk"])
        v = jnp.einsum("btc,hcd->bhtd", x, p["wv"])
        s = jnp.einsum("bhtd,bhsd->bhts", q, k) * (N_EMBED ** -0.5)
        mask = jnp.tril(jnp.ones((T, T), bool))
        s = jnp.where(mask[None, None], s, -jnp.inf)
        a = jax.nn.softmax(s, axis=-1)
        o = jnp.einsum("bhts,bhsd->bhtd", a, v)
        o = jnp.transpose(o, (0, 2, 1, 3)).reshape(B, T, N_EMBED)
        return o @ p["w_proj"] + p["b_proj"]

    expected = ref(x, params)
    # bf16 MXU operands (f32 accumulation) -> loosened tolerance vs f32 reference.
    assert jnp.allclose(out, expected, atol=3e-2, rtol=3e-2), "mismatch vs reference"
    print("KERNEL_OK")
</pallas_src>

<mosaic_0001>
module attributes {stable_mosaic.version = 11 : i64} {
  func.func @_mha_fused_kernel(%arg0: i32, %arg1: memref<4x64x384xf32, #tpu.memory_space<vmem>>, %arg2: memref<384x1152xbf16, #tpu.memory_space<vmem>>, %arg3: memref<384x384xbf16, #tpu.memory_space<vmem>>, %arg4: memref<1x384xf32, #tpu.memory_space<vmem>>, %arg5: memref<4x64x384xf32, #tpu.memory_space<vmem>>, %arg6: memref<256x1152xbf16, #tpu.memory_space<vmem>>, %arg7: memref<256x384xf32, #tpu.memory_space<vmem>>) attributes {dimension_semantics = [#tpu.dimension_semantics<parallel>], iteration_bounds = array<i64: 2>, scalar_prefetch = 0 : i64, scratch_operands = 2 : i64, tpu.core_type = #tpu.core_type<tc>, window_params = [{transform_indices = @transform_0, window_bounds = array<i64: 4, 64, 384>}, {pipeline_mode = #tpu.pipeline_mode<synchronous>, transform_indices = @transform_1, window_bounds = array<i64: 384, 1152>}, {pipeline_mode = #tpu.pipeline_mode<synchronous>, transform_indices = @transform_2, window_bounds = array<i64: 384, 384>}, {pipeline_mode = #tpu.pipeline_mode<synchronous>, transform_indices = @transform_3, window_bounds = array<i64: 1, 384>}, {transform_indices = @transform_4, window_bounds = array<i64: 4, 64, 384>}]} {
    %c0 = arith.constant 0 : index
    %c0_0 = arith.constant 0 : index
    %c0_1 = arith.constant 0 : index
    %0 = vector.load %arg1[%c0, %c0_0, %c0_1] : memref<4x64x384xf32, #tpu.memory_space<vmem>>, vector<4x64x384xf32>
    %1 = vector.shape_cast %0 : vector<4x64x384xf32> to vector<256x384xf32>
    %2 = arith.truncf %1 : vector<256x384xf32> to vector<256x384xbf16>
    %c0_2 = arith.constant 0 : index
    %c0_3 = arith.constant 0 : index
    %3 = vector.load %arg2[%c0_2, %c0_3] : memref<384x1152xbf16, #tpu.memory_space<vmem>>, vector<384x1152xbf16>
    %cst = arith.constant dense<0.000000e+00> : vector<256x1152xf32>
    %4 = tpu.matmul %2, %3, %cst {dimension_numbers = #tpu.dot_dimension_numbers<[1], [0], [0], [1], [0, 0, 1, 1], [], []>} : vector<256x384xbf16>, vector<384x1152xbf16>, vector<256x1152xf32> -> vector<256x1152xf32>
    %5 = arith.truncf %4 : vector<256x1152xf32> to vector<256x1152xbf16>
    %c0_4 = arith.constant 0 : index
    %c0_5 = arith.constant 0 : index
    %6 = vector.load %arg6[%c0_4, %c0_5] : memref<256x1152xbf16, #tpu.memory_space<vmem>>, vector<256x1152xbf16>
    tpu.vector_store %arg6[%c0_4, %c0_5], %5 {strides = array<i32>} : memref<256x1152xbf16, #tpu.memory_space<vmem>>, vector<256x1152xbf16>,
    %7 = tpu.iota {dimensions = array<i32: 0>} : vector<64x64xi32>
    %8 = tpu.iota {dimensions = array<i32: 1>} : vector<64x64xi32>
    %9 = arith.cmpi sle, %8, %7 : vector<64x64xi32>
    %10 = vector.shape_cast %9 : vector<64x64xi1> to vector<1x64x64xi1>
    %c0_6 = arith.constant 0 : index
    %c0_7 = arith.constant 0 : index
    %11 = vector.load %arg6[%c0_6, %c0_7] : memref<256x1152xbf16, #tpu.memory_space<vmem>>, vector<256x64xbf16>
    %12 = vector.shape_cast %11 : vector<256x64xbf16> to vector<4x64x64xbf16>
    %c0_8 = arith.constant 0 : index
    %c384 = arith.constant 384 : index
    %13 = vector.load %arg6[%c0_8, %c384] : memref<256x1152xbf16, #tpu.memory_space<vmem>>, vector<256x64xbf16>
    %14 = vector.shape_cast %13 : vector<256x64xbf16> to vector<4x64x64xbf16>
    %c0_9 = arith.constant 0 : index
    %c768 = arith.constant 768 : index
    %15 = vector.load %arg6[%c0_9, %c768] : memref<256x1152xbf16, #tpu.memory_space<vmem>>, vector<256x64xbf16>
    %16 = vector.shape_cast %15 : vector<256x64xbf16> to vector<4x64x64xbf16>
    "tpu.trace_start"() <{level = 10 : i32, message = "btd,bsd->bts"}> : () -> ()
    %cst_10 = arith.constant dense<0.000000e+00> : vector<4x64x64xf32>
    %17 = tpu.matmul %12, %14, %cst_10 {dimension_numbers = #tpu.dot_dimension_numbers<[2], [2], [1], [1], [0, 0, 0, 1, 1, 1], [0], [0]>} : vector<4x64x64xbf16>, vector<4x64x64xbf16>, vector<4x64x64xf32> -> vector<4x64x64xf32>
    %cst_11 = arith.constant -1.000000e+30 : f32
    "tpu.trace_stop"() : () -> ()
    %18 = vector.shape_cast %10 : vector<1x64x64xi1> to vector<1x64x64xi1>
    %19 = vector.broadcast %18 : vector<1x64x64xi1> to vector<4x64x64xi1>
    %20 = vector.broadcast %cst_11 : f32 to vector<4x64x64xf32>
    %21 = arith.select %19, %17, %20 : vector<4x64x64xi1>, vector<4x64x64xf32>
    %cst_12 = arith.constant dense<0xFF800000> : vector<4x64xf32>
    %22 = vector.multi_reduction <maximumf>, %21, %cst_12 [2] : vector<4x64x64xf32> to vector<4x64xf32>
    %23 = vector.shape_cast %22 : vector<4x64xf32> to vector<4x64x1xf32>
    %24 = vector.broadcast %23 : vector<4x64x1xf32> to vector<4x64x64xf32>
    %25 = arith.subf %21, %24 : vector<4x64x64xf32>
    %26 = math.exp %25 : vector<4x64x64xf32>
    %cst_13 = arith.constant dense<0.000000e+00> : vector<4x64xf32>
    %27 = vector.multi_reduction <add>, %26, %cst_13 [2] : vector<4x64x64xf32> to vector<4x64xf32>
    %28 = vector.shape_cast %27 : vector<4x64xf32> to vector<4x64x1xf32>
    %29 = tpu.reciprocal %28 {approx = true} : vector<4x64x1xf32> -> vector<4x64x1xf32>
    %30 = vector.broadcast %29 : vector<4x64x1xf32> to vector<4x64x64xf32>
    %31 = arith.mulf %26, %30 : vector<4x64x64xf32>
    %32 = arith.truncf %31 : vector<4x64x64xf32> to vector<4x64x64xbf16>
    "tpu.trace_start"() <{level = 10 : i32, message = "bts,bsd->btd"}> : () -> ()
    %cst_14 = arith.constant dense<0.000000e+00> : vector<4x64x64xf32>
    %33 = tpu.matmul %32, %16, %cst_14 {dimension_numbers = #tpu.dot_dimension_numbers<[2], [1], [1], [2], [0, 0, 0, 1, 1, 2], [0], [0]>} : vector<4x64x64xbf16>, vector<4x64x64xbf16>, vector<4x64x64xf32> -> vector<4x64x64xf32>
    "tpu.trace_stop"() : () -> ()
    %34 = vector.shape_cast %33 : vector<4x64x64xf32> to vector<256x64xf32>
    %35 = arith.truncf %34 : vector<256x64xf32> to vector<256x64xbf16>
    %c0_15 = arith.constant 0 : index
    %c0_16 = arith.constant 0 : index
    %36 = vector.load %arg3[%c0_15, %c0_16] : memref<384x384xbf16, #tpu.memory_space<vmem>>, vector<64x384xbf16>
    %cst_17 = arith.constant dense<0.000000e+00> : vector<256x384xf32>
    %37 = tpu.matmul %35, %36, %cst_17 {dimension_numbers = #tpu.dot_dimension_numbers<[1], [0], [0], [1], [0, 0, 1, 1], [], []>} : vector<256x64xbf16>, vector<64x384xbf16>, vector<256x384xf32> -> vector<256x384xf32>
    %c0_18 = arith.constant 0 : index
    %c0_19 = arith.constant 0 : index
    %38 = vector.load %arg7[%c0_18, %c0_19] : memref<256x384xf32, #tpu.memory_space<vmem>>, vector<256x384xf32>
    tpu.vector_store %arg7[%c0_18, %c0_19], %37 {strides = array<i32>} : memref<256x384xf32, #tpu.memory_space<vmem>>, vector<256x384xf32>,
    %c0_20 = arith.constant 0 : index
    %c64 = arith.constant 64 : index
    %39 = vector.load %arg6[%c0_20, %c64] : memref<256x1152xbf16, #tpu.memory_space<vmem>>, vector<256x64xbf16>
    %40 = vector.shape_cast %39 : vector<256x64xbf16> to vector<4x64x64xbf16>
    %c0_21 = arith.constant 0 : index
    %c448 = arith.constant 448 : index
    %41 = vector.load %arg6[%c0_21, %c448] : memref<256x1152xbf16, #tpu.memory_space<vmem>>, vector<256x64xbf16>
    %42 = vector.shape_cast %41 : vector<256x64xbf16> to vector<4x64x64xbf16>
    %c0_22 = arith.constant 0 : index
    %c832 = arith.constant 832 : index
    %43 = vector.load %arg6[%c0_22, %c832] : memref<256x1152xbf16, #tpu.memory_space<vmem>>, vector<256x64xbf16>
    %44 = vector.shape_cast %43 : vector<256x64xbf16> to vector<4x64x64xbf16>
    "tpu.trace_start"() <{level = 10 : i32, message = "btd,bsd->bts"}> : () -> ()
    %cst_23 = arith.constant dense<0.000000e+00> : vector<4x64x64xf32>
    %45 = tpu.matmul %40, %42, %cst_23 {dimension_numbers = #tpu.dot_dimension_numbers<[2], [2], [1], [1], [0, 0, 0, 1, 1, 1], [0], [0]>} : vector<4x64x64xbf16>, vector<4x64x64xbf16>, vector<4x64x64xf32> -> vector<4x64x64xf32>
    %cst_24 = arith.constant -1.000000e+30 : f32
    "tpu.trace_stop"() : () -> ()
    %46 = vector.shape_cast %10 : vector<1x64x64xi1> to vector<1x64x64xi1>
    %47 = vector.broadcast %46 : vector<1x64x64xi1> to vector<4x64x64xi1>
    %48 = vector.broadcast %cst_24 : f32 to vector<4x64x64xf32>
    %49 = arith.select %47, %45, %48 : vector<4x64x64xi1>, vector<4x64x64xf32>
    %cst_25 = arith.constant dense<0xFF800000> : vector<4x64xf32>
    %50 = vector.multi_reduction <maximumf>, %49, %cst_25 [2] : vector<4x64x64xf32> to vector<4x64xf32>
    %51 = vector.shape_cast %50 : vector<4x64xf32> to vector<4x64x1xf32>
    %52 = vector.broadcast %51 : vector<4x64x1xf32> to vector<4x64x64xf32>
    %53 = arith.subf %49, %52 : vector<4x64x64xf32>
    %54 = math.exp %53 : vector<4x64x64xf32>
    %cst_26 = arith.constant dense<0.000000e+00> : vector<4x64xf32>
    %55 = vector.multi_reduction <add>, %54, %cst_26 [2] : vector<4x64x64xf32> to vector<4x64xf32>
    %56 = vector.shape_cast %55 : vector<4x64xf32> to vector<4x64x1xf32>
    %57 = tpu.reciprocal %56 {approx = true} : vector<4x64x1xf32> -> vector<4x64x1xf32>
    %58 = vector.broadcast %57 : vector<4x64x1xf32> to vector<4x64x64xf32>
    %59 = arith.mulf %54, %58 : vector<4x64x64xf32>
    %60 = arith.truncf %59 : vector<4x64x64xf32> to vector<4x64x64xbf16>
    "tpu.trace_start"() <{level = 10 : i32, message = "bts,bsd->btd"}> : () -> ()
    %cst_27 = arith.constant dense<0.000000e+00> : vector<4x64x64xf32>
    %61 = tpu.matmul %60, %44, %cst_27 {dimension_numbers = #tpu.dot_dimension_numbers<[2], [1], [1], [2], [0, 0, 0, 1, 1, 2], [0], [0]>} : vector<4x64x64xbf16>, vector<4x64x64xbf16>, vector<4x64x64xf32> -> vector<4x64x64xf32>
    "tpu.trace_stop"() : () -> ()
    %62 = vector.shape_cast %61 : vector<4x64x64xf32> to vector<256x64xf32>
    %63 = arith.truncf %62 : vector<256x64xf32> to vector<256x64xbf16>
    %c64_28 = arith.constant 64 : index
    %c0_29 = arith.constant 0 : index
    %64 = vector.load %arg3[%c64_28, %c0_29] : memref<384x384xbf16, #tpu.memory_space<vmem>>, vector<64x384xbf16>
    %cst_30 = arith.constant dense<0.000000e+00> : vector<256x384xf32>
    %65 = tpu.matmul %63, %64, %cst_30 {dimension_numbers = #tpu.dot_dimension_numbers<[1], [0], [0], [1], [0, 0, 1, 1], [], []>} : vector<256x64xbf16>, vector<64x384xbf16>, vector<256x384xf32> -> vector<256x384xf32>
    %c0_31 = arith.constant 0 : index
    %c0_32 = arith.constant 0 : index
    %66 = vector.load %arg7[%c0_31, %c0_32] : memref<256x384xf32, #tpu.memory_space<vmem>>, vector<256x384xf32>
    %67 = arith.addf %66, %65 : vector<256x384xf32>
    %c0_33 = arith.constant 0 : index
    %c0_34 = arith.constant 0 : index
    %68 = vector.load %arg7[%c0_33, %c0_34] : memref<256x384xf32, #tpu.memory_space<vmem>>, vector<256x384xf32>
    tpu.vector_store %arg7[%c0_33, %c0_34], %67 {strides = array<i32>} : memref<256x384xf32, #tpu.memory_space<vmem>>, vector<256x384xf32>,
    %c0_35 = arith.constant 0 : index
    %c128 = arith.constant 128 : index
    %69 = vector.load %arg6[%c0_35, %c128] : memref<256x1152xbf16, #tpu.memory_space<vmem>>, vector<256x64xbf16>
    %70 = vector.shape_cast %69 : vector<256x64xbf16> to vector<4x64x64xbf16>
    %c0_36 = arith.constant 0 : index
    %c512 = arith.constant 512 : index
    %71 = vector.load %arg6[%c0_36, %c512] : memref<256x1152xbf16, #tpu.memory_space<vmem>>, vector<256x64xbf16>
    %72 = vector.shape_cast %71 : vector<256x64xbf16> to vector<4x64x64xbf16>
    %c0_37 = arith.constant 0 : index
    %c896 = arith.constant 896 : index
    %73 = vector.load %arg6[%c0_37, %c896] : memref<256x1152xbf16, #tpu.memory_space<vmem>>, vector<256x64xbf16>
    %74 = vector.shape_cast %73 : vector<256x64xbf16> to vector<4x64x64xbf16>
    "tpu.trace_start"() <{level = 10 : i32, message = "btd,bsd->bts"}> : () -> ()
    %cst_38 = arith.constant dense<0.000000e+00> : vector<4x64x64xf32>
    %75 = tpu.matmul %70, %72, %cst_38 {dimension_numbers = #tpu.dot_dimension_numbers<[2], [2], [1], [1], [0, 0, 0, 1, 1, 1], [0], [0]>} : vector<4x64x64xbf16>, vector<4x64x64xbf16>, vector<4x64x64xf32> -> vector<4x64x64xf32>
    %cst_39 = arith.constant -1.000000e+30 : f32
    "tpu.trace_stop"() : () -> ()
    %76 = vector.shape_cast %10 : vector<1x64x64xi1> to vector<1x64x64xi1>
    %77 = vector.broadcast %76 : vector<1x64x64xi1> to vector<4x64x64xi1>
    %78 = vector.broadcast %cst_39 : f32 to vector<4x64x64xf32>
    %79 = arith.select %77, %75, %78 : vector<4x64x64xi1>, vector<4x64x64xf32>
    %cst_40 = arith.constant dense<0xFF800000> : vector<4x64xf32>
    %80 = vector.multi_reduction <maximumf>, %79, %cst_40 [2] : vector<4x64x64xf32> to vector<4x64xf32>
    %81 = vector.shape_cast %80 : vector<4x64xf32> to vector<4x64x1xf32>
    %82 = vector.broadcast %81 : vector<4x64x1xf32> to vector<4x64x64xf32>
    %83 = arith.subf %79, %82 : vector<4x64x64xf32>
    %84 = math.exp %83 : vector<4x64x64xf32>
    %cst_41 = arith.constant dense<0.000000e+00> : vector<4x64xf32>
    %85 = vector.multi_reduction <add>, %84, %cst_41 [2] : vector<4x64x64xf32> to vector<4x64xf32>
    %86 = vector.shape_cast %85 : vector<4x64xf32> to vector<4x64x1xf32>
    %87 = tpu.reciprocal %86 {approx = true} : vector<4x64x1xf32> -> vector<4x64x1xf32>
    %88 = vector.broadcast %87 : vector<4x64x1xf32> to vector<4x64x64xf32>
    %89 = arith.mulf %84, %88 : vector<4x64x64xf32>
    %90 = arith.truncf %89 : vector<4x64x64xf32> to vector<4x64x64xbf16>
    "tpu.trace_start"() <{level = 10 : i32, message = "bts,bsd->btd"}> : () -> ()
    %cst_42 = arith.constant dense<0.000000e+00> : vector<4x64x64xf32>
    %91 = tpu.matmul %90, %74, %cst_42 {dimension_numbers = #tpu.dot_dimension_numbers<[2], [1], [1], [2], [0, 0, 0, 1, 1, 2], [0], [0]>} : vector<4x64x64xbf16>, vector<4x64x64xbf16>, vector<4x64x64xf32> -> vector<4x64x64xf32>
    "tpu.trace_stop"() : () -> ()
    %92 = vector.shape_cast %91 : vector<4x64x64xf32> to vector<256x64xf32>
    %93 = arith.truncf %92 : vector<256x64xf32> to vector<256x64xbf16>
    %c128_43 = arith.constant 128 : index
    %c0_44 = arith.constant 0 : index
    %94 = vector.load %arg3[%c128_43, %c0_44] : memref<384x384xbf16, #tpu.memory_space<vmem>>, vector<64x384xbf16>
    %cst_45 = arith.constant dense<0.000000e+00> : vector<256x384xf32>
    %95 = tpu.matmul %93, %94, %cst_45 {dimension_numbers = #tpu.dot_dimension_numbers<[1], [0], [0], [1], [0, 0, 1, 1], [], []>} : vector<256x64xbf16>, vector<64x384xbf16>, vector<256x384xf32> -> vector<256x384xf32>
    %c0_46 = arith.constant 0 : index
    %c0_47 = arith.constant 0 : index
    %96 = vector.load %arg7[%c0_46, %c0_47] : memref<256x384xf32, #tpu.memory_space<vmem>>, vector<256x384xf32>
    %97 = arith.addf %96, %95 : vector<256x384xf32>
    %c0_48 = arith.constant 0 : index
    %c0_49 = arith.constant 0 : index
    %98 = vector.load %arg7[%c0_48, %c0_49] : memref<256x384xf32, #tpu.memory_space<vmem>>, vector<256x384xf32>
    tpu.vector_store %arg7[%c0_48, %c0_49], %97 {strides = array<i32>} : memref<256x384xf32, #tpu.memory_space<vmem>>, vector<256x384xf32>,
    %c0_50 = arith.constant 0 : index
    %c192 = arith.constant 192 : index
    %99 = vector.load %arg6[%c0_50, %c192] : memref<256x1152xbf16, #tpu.memory_space<vmem>>, vector<256x64xbf16>
    %100 = vector.shape_cast %99 : vector<256x64xbf16> to vector<4x64x64xbf16>
    %c0_51 = arith.constant 0 : index
    %c576 = arith.constant 576 : index
    %101 = vector.load %arg6[%c0_51, %c576] : memref<256x1152xbf16, #tpu.memory_space<vmem>>, vector<256x64xbf16>
    %102 = vector.shape_cast %101 : vector<256x64xbf16> to vector<4x64x64xbf16>
    %c0_52 = arith.constant 0 : index
    %c960 = arith.constant 960 : index
    %103 = vector.load %arg6[%c0_52, %c960] : memref<256x1152xbf16, #tpu.memory_space<vmem>>, vector<256x64xbf16>
    %104 = vector.shape_cast %103 : vector<256x64xbf16> to vector<4x64x64xbf16>
    "tpu.trace_start"() <{level = 10 : i32, message = "btd,bsd->bts"}> : () -> ()
    %cst_53 = arith.constant dense<0.000000e+00> : vector<4x64x64xf32>
    %105 = tpu.matmul %100, %102, %cst_53 {dimension_numbers = #tpu.dot_dimension_numbers<[2], [2], [1], [1], [0, 0, 0, 1, 1, 1], [0], [0]>} : vector<4x64x64xbf16>, vector<4x64x64xbf16>, vector<4x64x64xf32> -> vector<4x64x64xf32>
    %cst_54 = arith.constant -1.000000e+30 : f32
    "tpu.trace_stop"() : () -> ()
    %106 = vector.shape_cast %10 : vector<1x64x64xi1> to vector<1x64x64xi1>
    %107 = vector.broadcast %106 : vector<1x64x64xi1> to vector<4x64x64xi1>
    %108 = vector.broadcast %cst_54 : f32 to vector<4x64x64xf32>
    %109 = arith.select %107, %105, %108 : vector<4x64x64xi1>, vector<4x64x64xf32>
    %cst_55 = arith.constant dense<0xFF800000> : vector<4x64xf32>
    %110 = vector.multi_reduction <maximumf>, %109, %cst_55 [2] : vector<4x64x64xf32> to vector<4x64xf32>
    %111 = vector.shape_cast %110 : vector<4x64xf32> to vector<4x64x1xf32>
    %112 = vector.broadcast %111 : vector<4x64x1xf32> to vector<4x64x64xf32>
    %113 = arith.subf %109, %112 : vector<4x64x64xf32>
    %114 = math.exp %113 : vector<4x64x64xf32>
    %cst_56 = arith.constant dense<0.000000e+00> : vector<4x64xf32>
    %115 = vector.multi_reduction <add>, %114, %cst_56 [2] : vector<4x64x64xf32> to vector<4x64xf32>
    %116 = vector.shape_cast %115 : vector<4x64xf32> to vector<4x64x1xf32>
    %117 = tpu.reciprocal %116 {approx = true} : vector<4x64x1xf32> -> vector<4x64x1xf32>
    %118 = vector.broadcast %117 : vector<4x64x1xf32> to vector<4x64x64xf32>
    %119 = arith.mulf %114, %118 : vector<4x64x64xf32>
    %120 = arith.truncf %119 : vector<4x64x64xf32> to vector<4x64x64xbf16>
    "tpu.trace_start"() <{level = 10 : i32, message = "bts,bsd->btd"}> : () -> ()
    %cst_57 = arith.constant dense<0.000000e+00> : vector<4x64x64xf32>
    %121 = tpu.matmul %120, %104, %cst_57 {dimension_numbers = #tpu.dot_dimension_numbers<[2], [1], [1], [2], [0, 0, 0, 1, 1, 2], [0], [0]>} : vector<4x64x64xbf16>, vector<4x64x64xbf16>, vector<4x64x64xf32> -> vector<4x64x64xf32>
    "tpu.trace_stop"() : () -> ()
    %122 = vector.shape_cast %121 : vector<4x64x64xf32> to vector<256x64xf32>
    %123 = arith.truncf %122 : vector<256x64xf32> to vector<256x64xbf16>
    %c192_58 = arith.constant 192 : index
    %c0_59 = arith.constant 0 : index
    %124 = vector.load %arg3[%c192_58, %c0_59] : memref<384x384xbf16, #tpu.memory_space<vmem>>, vector<64x384xbf16>
    %cst_60 = arith.constant dense<0.000000e+00> : vector<256x384xf32>
    %125 = tpu.matmul %123, %124, %cst_60 {dimension_numbers = #tpu.dot_dimension_numbers<[1], [0], [0], [1], [0, 0, 1, 1], [], []>} : vector<256x64xbf16>, vector<64x384xbf16>, vector<256x384xf32> -> vector<256x384xf32>
    %c0_61 = arith.constant 0 : index
    %c0_62 = arith.constant 0 : index
    %126 = vector.load %arg7[%c0_61, %c0_62] : memref<256x384xf32, #tpu.memory_space<vmem>>, vector<256x384xf32>
    %127 = arith.addf %126, %125 : vector<256x384xf32>
    %c0_63 = arith.constant 0 : index
    %c0_64 = arith.constant 0 : index
    %128 = vector.load %arg7[%c0_63, %c0_64] : memref<256x384xf32, #tpu.memory_space<vmem>>, vector<256x384xf32>
    tpu.vector_store %arg7[%c0_63, %c0_64], %127 {strides = array<i32>} : memref<256x384xf32, #tpu.memory_space<vmem>>, vector<256x384xf32>,
    %c0_65 = arith.constant 0 : index
    %c256 = arith.constant 256 : index
    %129 = vector.load %arg6[%c0_65, %c256] : memref<256x1152xbf16, #tpu.memory_space<vmem>>, vector<256x64xbf16>
    %130 = vector.shape_cast %129 : vector<256x64xbf16> to vector<4x64x64xbf16>
    %c0_66 = arith.constant 0 : index
    %c640 = arith.constant 640 : index
    %131 = vector.load %arg6[%c0_66, %c640] : memref<256x1152xbf16, #tpu.memory_space<vmem>>, vector<256x64xbf16>
    %132 = vector.shape_cast %131 : vector<256x64xbf16> to vector<4x64x64xbf16>
    %c0_67 = arith.constant 0 : index
    %c1024 = arith.constant 1024 : index
    %133 = vector.load %arg6[%c0_67, %c1024] : memref<256x1152xbf16, #tpu.memory_space<vmem>>, vector<256x64xbf16>
    %134 = vector.shape_cast %133 : vector<256x64xbf16> to vector<4x64x64xbf16>
    "tpu.trace_start"() <{level = 10 : i32, message = "btd,bsd->bts"}> : () -> ()
    %cst_68 = arith.constant dense<0.000000e+00> : vector<4x64x64xf32>
    %135 = tpu.matmul %130, %132, %cst_68 {dimension_numbers = #tpu.dot_dimension_numbers<[2], [2], [1], [1], [0, 0, 0, 1, 1, 1], [0], [0]>} : vector<4x64x64xbf16>, vector<4x64x64xbf16>, vector<4x64x64xf32> -> vector<4x64x64xf32>
    %cst_69 = arith.constant -1.000000e+30 : f32
    "tpu.trace_stop"() : () -> ()
    %136 = vector.shape_cast %10 : vector<1x64x64xi1> to vector<1x64x64xi1>
    %137 = vector.broadcast %136 : vector<1x64x64xi1> to vector<4x64x64xi1>
    %138 = vector.broadcast %cst_69 : f32 to vector<4x64x64xf32>
    %139 = arith.select %137, %135, %138 : vector<4x64x64xi1>, vector<4x64x64xf32>
    %cst_70 = arith.constant dense<0xFF800000> : vector<4x64xf32>
    %140 = vector.multi_reduction <maximumf>, %139, %cst_70 [2] : vector<4x64x64xf32> to vector<4x64xf32>
    %141 = vector.shape_cast %140 : vector<4x64xf32> to vector<4x64x1xf32>
    %142 = vector.broadcast %141 : vector<4x64x1xf32> to vector<4x64x64xf32>
    %143 = arith.subf %139, %142 : vector<4x64x64xf32>
    %144 = math.exp %143 : vector<4x64x64xf32>
    %cst_71 = arith.constant dense<0.000000e+00> : vector<4x64xf32>
    %145 = vector.multi_reduction <add>, %144, %cst_71 [2] : vector<4x64x64xf32> to vector<4x64xf32>
    %146 = vector.shape_cast %145 : vector<4x64xf32> to vector<4x64x1xf32>
    %147 = tpu.reciprocal %146 {approx = true} : vector<4x64x1xf32> -> vector<4x64x1xf32>
    %148 = vector.broadcast %147 : vector<4x64x1xf32> to vector<4x64x64xf32>
    %149 = arith.mulf %144, %148 : vector<4x64x64xf32>
    %150 = arith.truncf %149 : vector<4x64x64xf32> to vector<4x64x64xbf16>
    "tpu.trace_start"() <{level = 10 : i32, message = "bts,bsd->btd"}> : () -> ()
    %cst_72 = arith.constant dense<0.000000e+00> : vector<4x64x64xf32>
    %151 = tpu.matmul %150, %134, %cst_72 {dimension_numbers = #tpu.dot_dimension_numbers<[2], [1], [1], [2], [0, 0, 0, 1, 1, 2], [0], [0]>} : vector<4x64x64xbf16>, vector<4x64x64xbf16>, vector<4x64x64xf32> -> vector<4x64x64xf32>
    "tpu.trace_stop"() : () -> ()
    %152 = vector.shape_cast %151 : vector<4x64x64xf32> to vector<256x64xf32>
    %153 = arith.truncf %152 : vector<256x64xf32> to vector<256x64xbf16>
    %c256_73 = arith.constant 256 : index
    %c0_74 = arith.constant 0 : index
    %154 = vector.load %arg3[%c256_73, %c0_74] : memref<384x384xbf16, #tpu.memory_space<vmem>>, vector<64x384xbf16>
    %cst_75 = arith.constant dense<0.000000e+00> : vector<256x384xf32>
    %155 = tpu.matmul %153, %154, %cst_75 {dimension_numbers = #tpu.dot_dimension_numbers<[1], [0], [0], [1], [0, 0, 1, 1], [], []>} : vector<256x64xbf16>, vector<64x384xbf16>, vector<256x384xf32> -> vector<256x384xf32>
    %c0_76 = arith.constant 0 : index
    %c0_77 = arith.constant 0 : index
    %156 = vector.load %arg7[%c0_76, %c0_77] : memref<256x384xf32, #tpu.memory_space<vmem>>, vector<256x384xf32>
    %157 = arith.addf %156, %155 : vector<256x384xf32>
    %c0_78 = arith.constant 0 : index
    %c0_79 = arith.constant 0 : index
    %158 = vector.load %arg7[%c0_78, %c0_79] : memref<256x384xf32, #tpu.memory_space<vmem>>, vector<256x384xf32>
    tpu.vector_store %arg7[%c0_78, %c0_79], %157 {strides = array<i32>} : memref<256x384xf32, #tpu.memory_space<vmem>>, vector<256x384xf32>,
    %c0_80 = arith.constant 0 : index
    %c320 = arith.constant 320 : index
    %159 = vector.load %arg6[%c0_80, %c320] : memref<256x1152xbf16, #tpu.memory_space<vmem>>, vector<256x64xbf16>
    %160 = vector.shape_cast %159 : vector<256x64xbf16> to vector<4x64x64xbf16>
    %c0_81 = arith.constant 0 : index
    %c704 = arith.constant 704 : index
    %161 = vector.load %arg6[%c0_81, %c704] : memref<256x1152xbf16, #tpu.memory_space<vmem>>, vector<256x64xbf16>
    %162 = vector.shape_cast %161 : vector<256x64xbf16> to vector<4x64x64xbf16>
    %c0_82 = arith.constant 0 : index
    %c1088 = arith.constant 1088 : index
    %163 = vector.load %arg6[%c0_82, %c1088] : memref<256x1152xbf16, #tpu.memory_space<vmem>>, vector<256x64xbf16>
    %164 = vector.shape_cast %163 : vector<256x64xbf16> to vector<4x64x64xbf16>
    "tpu.trace_start"() <{level = 10 : i32, message = "btd,bsd->bts"}> : () -> ()
    %cst_83 = arith.constant dense<0.000000e+00> : vector<4x64x64xf32>
    %165 = tpu.matmul %160, %162, %cst_83 {dimension_numbers = #tpu.dot_dimension_numbers<[2], [2], [1], [1], [0, 0, 0, 1, 1, 1], [0], [0]>} : vector<4x64x64xbf16>, vector<4x64x64xbf16>, vector<4x64x64xf32> -> vector<4x64x64xf32>
    %cst_84 = arith.constant -1.000000e+30 : f32
    "tpu.trace_stop"() : () -> ()
    %166 = vector.shape_cast %10 : vector<1x64x64xi1> to vector<1x64x64xi1>
    %167 = vector.broadcast %166 : vector<1x64x64xi1> to vector<4x64x64xi1>
    %168 = vector.broadcast %cst_84 : f32 to vector<4x64x64xf32>
    %169 = arith.select %167, %165, %168 : vector<4x64x64xi1>, vector<4x64x64xf32>
    %cst_85 = arith.constant dense<0xFF800000> : vector<4x64xf32>
    %170 = vector.multi_reduction <maximumf>, %169, %cst_85 [2] : vector<4x64x64xf32> to vector<4x64xf32>
    %171 = vector.shape_cast %170 : vector<4x64xf32> to vector<4x64x1xf32>
    %172 = vector.broadcast %171 : vector<4x64x1xf32> to vector<4x64x64xf32>
    %173 = arith.subf %169, %172 : vector<4x64x64xf32>
    %174 = math.exp %173 : vector<4x64x64xf32>
    %cst_86 = arith.constant dense<0.000000e+00> : vector<4x64xf32>
    %175 = vector.multi_reduction <add>, %174, %cst_86 [2] : vector<4x64x64xf32> to vector<4x64xf32>
    %176 = vector.shape_cast %175 : vector<4x64xf32> to vector<4x64x1xf32>
    %177 = tpu.reciprocal %176 {approx = true} : vector<4x64x1xf32> -> vector<4x64x1xf32>
    %178 = vector.broadcast %177 : vector<4x64x1xf32> to vector<4x64x64xf32>
    %179 = arith.mulf %174, %178 : vector<4x64x64xf32>
    %180 = arith.truncf %179 : vector<4x64x64xf32> to vector<4x64x64xbf16>
    "tpu.trace_start"() <{level = 10 : i32, message = "bts,bsd->btd"}> : () -> ()
    %cst_87 = arith.constant dense<0.000000e+00> : vector<4x64x64xf32>
    %181 = tpu.matmul %180, %164, %cst_87 {dimension_numbers = #tpu.dot_dimension_numbers<[2], [1], [1], [2], [0, 0, 0, 1, 1, 2], [0], [0]>} : vector<4x64x64xbf16>, vector<4x64x64xbf16>, vector<4x64x64xf32> -> vector<4x64x64xf32>
    "tpu.trace_stop"() : () -> ()
    %182 = vector.shape_cast %181 : vector<4x64x64xf32> to vector<256x64xf32>
    %183 = arith.truncf %182 : vector<256x64xf32> to vector<256x64xbf16>
    %c320_88 = arith.constant 320 : index
    %c0_89 = arith.constant 0 : index
    %184 = vector.load %arg3[%c320_88, %c0_89] : memref<384x384xbf16, #tpu.memory_space<vmem>>, vector<64x384xbf16>
    %cst_90 = arith.constant dense<0.000000e+00> : vector<256x384xf32>
    %185 = tpu.matmul %183, %184, %cst_90 {dimension_numbers = #tpu.dot_dimension_numbers<[1], [0], [0], [1], [0, 0, 1, 1], [], []>} : vector<256x64xbf16>, vector<64x384xbf16>, vector<256x384xf32> -> vector<256x384xf32>
    %c0_91 = arith.constant 0 : index
    %c0_92 = arith.constant 0 : index
    %186 = vector.load %arg7[%c0_91, %c0_92] : memref<256x384xf32, #tpu.memory_space<vmem>>, vector<256x384xf32>
    %187 = arith.addf %186, %185 : vector<256x384xf32>
    %c0_93 = arith.constant 0 : index
    %c0_94 = arith.constant 0 : index
    %188 = vector.load %arg7[%c0_93, %c0_94] : memref<256x384xf32, #tpu.memory_space<vmem>>, vector<256x384xf32>
    tpu.vector_store %arg7[%c0_93, %c0_94], %187 {strides = array<i32>} : memref<256x384xf32, #tpu.memory_space<vmem>>, vector<256x384xf32>,
    %c0_95 = arith.constant 0 : index
    %c0_96 = arith.constant 0 : index
    %189 = vector.load %arg7[%c0_95, %c0_96] : memref<256x384xf32, #tpu.memory_space<vmem>>, vector<256x384xf32>
    %c0_97 = arith.constant 0 : index
    %c0_98 = arith.constant 0 : index
    %190 = vector.load %arg4[%c0_97, %c0_98] : memref<1x384xf32, #tpu.memory_space<vmem>>, vector<1x384xf32>
    %191 = vector.broadcast %190 : vector<1x384xf32> to vector<256x384xf32>
    %192 = arith.addf %189, %191 : vector<256x384xf32>
    %193 = vector.shape_cast %192 : vector<256x384xf32> to vector<4x64x384xf32>
    %c0_99 = arith.constant 0 : index
    %c0_100 = arith.constant 0 : index
    %c0_101 = arith.constant 0 : index
    %194 = vector.load %arg5[%c0_99, %c0_100, %c0_101] : memref<4x64x384xf32, #tpu.memory_space<vmem>>, vector<4x64x384xf32>
    tpu.vector_store %arg5[%c0_99, %c0_100, %c0_101], %193 {strides = array<i32>} : memref<4x64x384xf32, #tpu.memory_space<vmem>>, vector<4x64x384xf32>,
    return
  }
  func.func @transform_0(%arg0: i32) -> (i32, i32, i32) {
    %c0_i32 = arith.constant 0 : i32
    %c0_i32_0 = arith.constant 0 : i32
    %c0_i32_1 = arith.constant 0 : i32
    return %arg0, %c0_i32, %c0_i32_0 : i32, i32, i32
  }
  func.func @transform_1(%arg0: i32) -> (i32, i32) {
    %c0_i32 = arith.constant 0 : i32
    %c0_i32_0 = arith.constant 0 : i32
    %c0_i32_1 = arith.constant 0 : i32
    return %c0_i32, %c0_i32_0 : i32, i32
  }
  func.func @transform_2(%arg0: i32) -> (i32, i32) {
    %c0_i32 = arith.constant 0 : i32
    %c0_i32_0 = arith.constant 0 : i32
    %c0_i32_1 = arith.constant 0 : i32
    return %c0_i32, %c0_i32_0 : i32, i32
  }
  func.func @transform_3(%arg0: i32) -> (i32, i32) {
    %c0_i32 = arith.constant 0 : i32
    %c0_i32_0 = arith.constant 0 : i32
    %c0_i32_1 = arith.constant 0 : i32
    return %c0_i32, %c0_i32_0 : i32, i32
  }
  func.func @transform_4(%arg0: i32) -> (i32, i32, i32) {
    %c0_i32 = arith.constant 0 : i32
    %c0_i32_0 = arith.constant 0 : i32
    %c0_i32_1 = arith.constant 0 : i32
    return %arg0, %c0_i32, %c0_i32_0 : i32, i32, i32
  }
}

</mosaic_0001>

<bundles_post_ra>
// kernel: tpu_custom_call.1
= control target key start
LH: loop header
LB: loop body
LE: loop exit
PB: predicated region body
PF: predicated region fallthrough
CT: control target
= control target key end

     0   :  { %9 = vsyncpa [#allocation5], 0  ;;  %s26000_s0 = inlined_call_operand.hbm [shape: f32[8,64,384], index: 0, kind: input, shape index: {}]   ;;  %s26001_s1 = inlined_call_operand.hbm [shape: bf16[384,1152], index: 1, kind: input, shape index: {}]   ;;  %s26002_s2 = inlined_call_operand.hbm [shape: bf16[384,384], index: 2, kind: input, shape index: {}]   ;;  %s26003_s3 = inlined_call_operand.vmem [shape: f32[1,384], index: 3, kind: input, shape index: {}]   ;;  %s26004_s4 = inlined_call_operand.hbm [shape: f32[8,64,384], index: 4, kind: output, shape index: {}]  }
   0x1   :  { %11 = vsyncpa [#allocation5 + $0x1], 0 }
   0x2   :  { %12 = vsyncpa [#allocation8], 0 }
   0x3   :  { %13 = vsyncpa [#allocation6], 0 }
   0x4   :  { %15 = vsyncpa [#allocation6 + $0x1], 0  ;;  %s20701_s15 = smov 0   ;;  %s20703_s16 = smov 0  }
   0x5   :  { %s20705_s17 = smov 0   ;;  %s20707_s18 = smov 0  }
   0x6 LB: > { %s20722_s19 = sadd.s32 4294967295, %s20660_s18   ;;  %s16015_s20 = sadd.s32 4294967294, %s20660_s18   ;;  %s20660_s18 = sphi %s20707_s18, %s26723_s18   ;;  %s20656_s17 = sphi %s20705_s17, %s26722_s17   ;;  %s20652_s16 = sphi %s20703_s16, %s26721_s16   ;;  %s20648_s15 = sphi %s20701_s15, %s26720_s15  }
   0x7   : > { %p41_p0 = scmp.ne.s32.totalorder %s20652_s16, %s20648_s15  ;;  %p26005_p1 = scmp.eq.s32.totalorder %s20722_s19, 0 }
   0x8   : > { %p134_p3 = scmp.eq.s32.totalorder %s16015_s20, 1  ;;  %p16016_p5 = scmp.ge.s32.totalorder %s20660_s18, 1 }
   0x9   : > { %p20731_p4 = por %p26005_p1, %p41_p0  ;;  %p141_p7 = scmp.lt.s32.totalorder %s20660_s18, 3 }
   0xa   : > { %p20736_p6 = por %p134_p3, %p41_p0  ;;  %s20662_s24 = smov [#allocation7]  }
   0xb   : > { %s26263_s21 = scalar_select %p20731_p4, 1, 0 }
   0xc   : > { %s26264_s22 = scalar_select %p20736_p6, 1, 0 }
   0xd   : > { %p20741_p8 = pnand %p16016_p5, %p141_p7  ;;  %s153_s25 = sshll.u32 %s20662_s24, 4  ;;  %s20745_s25 = int_to_ptr.vmem [resolvable:$true] %s153_s25 }
   0xe   : > { %s20663_s27 = smov [#allocation9]   ;;  %s20504_s5 = scalar_lea.hbm %s26001_s1, 27648 }
   0xf   : > { %p19263_p9 = pneg %p20741_p8  ;;  %s166_s28 = sshll.u32 %s20663_s27, 4  ;;  %s20756_s28 = int_to_ptr.vmem [resolvable:$true] %s166_s28 }
  0x10   : > { %p20505_p12 = scmp.ne.s32.totalorder %s26001_s1, %s20504_s5  ;;  %p20511_p5 = scmp.lt.u32.totalorder %s20504_s5, %s26001_s1 }
  0x11   : > { %p20752_p11 = pnand %p19263_p9, %p26005_p1 }
  0x13   : > { %p20506_p13 = pneg %p20752_p11 }
  0x15   : > { %p20507_p0 = pnand %p20506_p13, %p20505_p12 }
  0x17   : > { %p20508_p3 = pneg %p20507_p0 }
  0x19   : > { %p20513_p7 = pnand %p20511_p5, %p20508_p3 }
  0x1b   : > { %20516 = shalt.err (!%p20513_p7)
}
  0x1c   : > { %s20517_s10 = scalar_lea.vmem %s20745_s25, 27648  ;;  %p20525_p2 = scmp.lt.s32.totalorder %s20745_s25, %s20745_s25 }
  0x1d   : > { %p20518_p9 = scmp.ne.s32.totalorder %s20745_s25, %s20517_s10  ;;  %p20526_p12 = scmp.lt.s32.totalorder %s20517_s10, %s20517_s10 }
  0x1f   : > { %p20520_p10 = pnand %p20518_p9, %p20506_p13  ;;  %p20527_p0 = por %p20526_p12, %p20525_p2 }
  0x21   : > { %p20521_p1 = pneg %p20520_p10 }
  0x23   : > { %p20528_p6 = pnand %p20527_p0, %p20521_p1 }
  0x25   : > { %20531 = shalt.err (!%p20528_p6)
}
  0x26   : > { %s20664_s11 = smov 576   ;;  %s20665_s12 = smov 36  }
  0x27   : > { %19266 = dma.hbm_to_vmem [thread:$0]  (!%p20752_p11), %s26001_s1, 27648, %s20745_s25, [#allocation8], %s20664_s11, %s20664_s11, %s20665_s12  }
  0x28   : > { %s20532_s27 = scalar_lea.hbm %s26002_s2, 9216 }
  0x29   : > { %p20533_p2 = scmp.ne.s32.totalorder %s26002_s2, %s20532_s27  ;;  %p20539_p10 = scmp.lt.u32.totalorder %s20532_s27, %s26002_s2 }
  0x2b   : > { %p20535_p1 = pnand %p20533_p2, %p20506_p13 }
  0x2d   : > { %p20536_p6 = pneg %p20535_p1 }
  0x2f   : > { %p20541_p3 = pnand %p20539_p10, %p20536_p6 }
  0x31   : > { %20544 = shalt.err (!%p20541_p3)
}
  0x32   : > { %s20545_s25 = scalar_lea.vmem %s20756_s28, 9216  ;;  %p20553_p12 = scmp.lt.s32.totalorder %s20756_s28, %s20756_s28 }
  0x33   : > { %p20546_p5 = scmp.ne.s32.totalorder %s20756_s28, %s20545_s25  ;;  %p20554_p0 = scmp.lt.s32.totalorder %s20545_s25, %s20545_s25 }
  0x35   : > { %p20548_p7 = pnand %p20546_p5, %p20506_p13  ;;  %p20555_p2 = por %p20554_p0, %p20553_p12 }
  0x37   : > { %p20549_p9 = pneg %p20548_p7 }
  0x39   : > { %p20556_p1 = pnand %p20555_p2, %p20549_p9 }
  0x3b   : > { %20559 = shalt.err (!%p20556_p1)
}
  0x3c   : > { %s20666_s7 = smov 192   ;;  %s20667_s8 = smov 12  }
  0x3d   : > { %19269 = dma.hbm_to_vmem [thread:$0]  (!%p20752_p11), %s26002_s2, 9216, %s20756_s28, [#allocation8], %s20666_s7, %s20666_s7, %s20667_s8  }
  0x3e   : > { %s20811_s11 = sadd.s32 1, %s20660_s18   ;;  %s28_s13 = sadd.s32 1, %s20656_s17 }
  0x3f   : > { %s25_s12 = ssub.s32 %s20660_s18, %s20811_s11  ;;  %p35_p6 = scmp.ne.s32.totalorder %s20656_s17, %s20652_s16 }
  0x40   : > { %p26_p13 = scmp.eq.s32.totalorder %s25_s12, 0  ;;  %p36_p10 = scmp.eq.s32.totalorder %s20660_s18, 0 }
  0x41   : > { %p26267_p5 = scmp.eq.s32.totalorder %s20722_s19, 1  ;;  %p19280_p9 = scmp.lt.s32.totalorder %s20660_s18, 2 }
  0x42   : > { %s20820_s14 = scalar_select %p26_p13, %s20656_s17, %s28_s13  }
  0x43   : > { %p37_p3 = por %p36_p10, %p35_p6  ;;  %p20824_p7 = por %p26267_p5, %p35_p6 }
  0x44   : > { %s183_s26 = sand.u32 1, %s20656_s17   ;;  %s19248_s28 = smul.u32 12288, %s20660_s18 }
  0x45   : > { %s26268_s20 = scalar_select %p20824_p7, 1, 0 }
  0x46   : > { %s19247_s24 = smul.u32 768, %s183_s26  ;;  %p20831_p11 = pnand %p19280_p9, %p37_p3 }
  0x47   : > { %s20838_s5 = scalar_lea.hbm %s26000_s0, %s19248_s28  ;;  %s20842_s7 = scalar_lea.sflag [#allocation5], %s183_s26 }
  0x48   : > { %s187_s6 = scalar_lea.vmem [#allocation4], %s19247_s24  ;;  %s20560_s8 = scalar_lea.hbm %s20838_s5, 12288 }
  0x49   : > { %s195_s25 = sshll.u32 %s187_s6, 4  ;;  %p20561_p12 = scmp.ne.s32.totalorder %s20838_s5, %s20560_s8  ;;  %s20840_s25 = int_to_ptr.vmem [resolvable:$true] %s195_s25 }
  0x4a   : > { %p20562_p0 = pneg %p20831_p11  ;;  %s20565_s12 = scalar_lea.hbm %s26000_s0, 24576 }
  0x4b   : > { %p20566_p13 = scmp.lt.u32.totalorder %s20838_s5, %s26000_s0  ;;  %p20567_p6 = scmp.lt.u32.totalorder %s20565_s12, %s20560_s8 }
  0x4c   : > { %p20563_p2 = pnand %p20562_p0, %p20561_p12  ;;  %p20569_p3 = scmp.lt.u32.totalorder %s20560_s8, %s20838_s5 }
  0x4d   : > { %p20568_p10 = por %p20567_p6, %p20566_p13 }
  0x4e   : > { %p20564_p1 = pneg %p20563_p2 }
  0x4f   : > { %p20570_p5 = por %p20569_p3, %p20568_p10 }
  0x51   : > { %p20571_p9 = pnand %p20570_p5, %p20564_p1 }
  0x53   : > { %20574 = shalt.err (!%p20571_p9)
}
  0x54   : > { %s20575_s26 = scalar_lea.vmem %s20840_s25, 12288  ;;  %s20668_s24 = smov [#allocation4]  }
  0x55   : > { %p20576_p12 = scmp.ne.s32.totalorder %s20840_s25, %s20575_s26  ;;  %s20580_s29 = sshll.u32 %s20668_s24, 4  ;;  %s20581_s29 = int_to_ptr.vmem [resolvable:$false] %s20580_s29 }
  0x56   : > { %s20582_s30 = scalar_lea.vmem %s20581_s29, 24576  ;;  %p20583_p4 = scmp.lt.s32.totalorder %s20840_s25, %s20581_s29 }
  0x57   : > { %p20578_p2 = pnand %p20576_p12, %p20562_p0  ;;  %p20584_p13 = scmp.lt.s32.totalorder %s20582_s30, %s20575_s26 }
  0x59   : > { %p20579_p7 = pneg %p20578_p2  ;;  %p20585_p6 = por %p20584_p13, %p20583_p4 }
  0x5b   : > { %p20586_p10 = pnand %p20585_p6, %p20579_p7 }
  0x5d   : > { %20589 = shalt.err (!%p20586_p10)
}
  0x5e   : > { %s20669_s6 = smov 384   ;;  %s20670_s8 = smov 24  }
  0x5f   : > { %19273 = dma.hbm_to_vmem [thread:$0]  (!%p20831_p11), %s20838_s5, 12288, %s20840_s25, %s20842_s7, %s20669_s6, %s20669_s6, %s20670_s8  }
  0x60   : > { %207 = sbr.rel (%p20741_p8) target bundleno = 6230 (0x1856), region = 36 }
  0x67   : > { %s20873_s9 = sand.u32 1, %s20652_s16   ;;  %p26270_p4 = scmp.ne.s32.totalorder %s26263_s21, 0 }
  0x68   : > { %s19249_s10 = smul.u32 768, %s20873_s9  ;;  %s210_s12 = scalar_lea.sflag [#allocation5], %s20873_s9 }
  0x6a   : > { %s20879_s13 = scalar_lea.vmem [#allocation4], %s19249_s10 }
  0x6b   : > { %20635 = dma.done.wait (%p26270_p4), %s210_s12, 12288  }
  0x6c   : > { %20637 = vsyncadd (%p26270_p4), %s210_s12, 4294955008  ;;  %p26271_p7 = scmp.eq.s32.totalorder %s20722_s19, 0 }
  0x6e   : > { %20639 = dma.done.wait (%p26271_p7), [#allocation8], 36864   ;;  %p26272_p8 = pmov %p26271_p7 }
  0x6f   : > { %v26010_v0 = vmov 0   ;;  %v19328_v1 = vld [vmem:[#allocation7 + $0x4] ss:$36 sps:$4 sm:$0xff]   ;;  %v19334_v5 = vld [vmem:[#allocation7 + $0x4c] ss:$36 sps:$4 sm:$0xff]   ;;  %v308_v46 = vld [vmem:[%s20879_s13 + $0x1d8] sm:$0xff] }
  0x70   : > { %20641 = vsyncadd (%p26272_p8), [#allocation8], 4294930432  ;;  %2042 = vmatprep.mubr.bf16.mxu1 %v26010_v0  ;;  %v20890_v2 = vld [vmem:[#allocation7 + $0x484] ss:$36 sps:$4 sm:$0xff]   ;;  %1737 = vmatprep.subr.bf16.mxu0 %v19328_v1  ;;  %v20896_v6 = vld [vmem:[#allocation7 + $0x4cc] ss:$36 sps:$4 sm:$0xff]  }
  0x71   : > { %v19332_v3 = vld [vmem:[#allocation7] ss:$36 sps:$4 sm:$0xff]   ;;  %18399 = vmatprep.subr.bf16.mxu1 %v20890_v2  ;;  %v19338_v7 = vld [vmem:[#allocation7 + $0x48] ss:$36 sps:$4 sm:$0xff]   ;;  %v19340_v9 = vld [vmem:[#allocation7 + $0x94] ss:$36 sps:$4 sm:$0xff]  }
  0x72   : > { %v20892_v4 = vld [vmem:[#allocation7 + $0x480] ss:$36 sps:$4 sm:$0xff]   ;;  %1738 = vmatpush1.bf16.msra.mxu0 %v19332_v3  ;;  %v20898_v8 = vld [vmem:[#allocation7 + $0x4c8] ss:$36 sps:$4 sm:$0xff]   ;;  %v20901_v10 = vld [vmem:[#allocation7 + $0x514] ss:$36 sps:$4 sm:$0xff]  }
  0x73   : > { %18407 = vmatpush1.bf16.msra.mxu1 %v20892_v4  ;;  %1739 = vmatprep.subr.bf16.mxu0 %v19334_v5  ;;  %v19344_v11 = vld [vmem:[#allocation7 + $0x90] ss:$36 sps:$4 sm:$0xff]   ;;  %v19346_v13 = vld [vmem:[#allocation7 + $0xdc] ss:$36 sps:$4 sm:$0xff]   ;;  %v19352_v17 = vld [vmem:[#allocation7 + $0x124] ss:$36 sps:$4 sm:$0xff]  }
  0x74   : > { %18400 = vmatprep.subr.bf16.mxu1 %v20896_v6  ;;  %v20903_v12 = vld [vmem:[#allocation7 + $0x510] ss:$36 sps:$4 sm:$0xff]   ;;  %v20907_v14 = vld [vmem:[#allocation7 + $0x55c] ss:$36 sps:$4 sm:$0xff]   ;;  %v20913_v18 = vld [vmem:[#allocation7 + $0x5a4] ss:$36 sps:$4 sm:$0xff]  }
  0x75   : > { %v19350_v15 = vld [vmem:[#allocation7 + $0xd8] ss:$36 sps:$4 sm:$0xff]   ;;  %v19356_v19 = vld [vmem:[#allocation7 + $0x120] ss:$36 sps:$4 sm:$0xff]   ;;  %v19358_v21 = vld [vmem:[#allocation7 + $0x16c] ss:$36 sps:$4 sm:$0xff]  }
  0x76   : > { %1740 = vmatpush1.bf16.msra.mxu0 %v19338_v7  ;;  %v20910_v16 = vld [vmem:[#allocation7 + $0x558] ss:$36 sps:$4 sm:$0xff]   ;;  %v20915_v20 = vld [vmem:[#allocation7 + $0x5a0] ss:$36 sps:$4 sm:$0xff]   ;;  %v20919_v22 = vld [vmem:[#allocation7 + $0x5ec] ss:$36 sps:$4 sm:$0xff]  }
  0x77   : > { %18408 = vmatpush1.bf16.msra.mxu1 %v20898_v8  ;;  %1741 = vmatprep.subr.bf16.mxu0 %v19340_v9  ;;  %v19362_v23 = vld [vmem:[#allocation7 + $0x168] ss:$36 sps:$4 sm:$0xff]   ;;  %v19364_v25 = vld [vmem:[#allocation7 + $0x1b4] ss:$36 sps:$4 sm:$0xff]   ;;  %v19370_v29 = vld [vmem:[#allocation7 + $0x1fc] ss:$36 sps:$4 sm:$0xff]  }
  0x78   : > { %18401 = vmatprep.subr.bf16.mxu1 %v20901_v10  ;;  %v20922_v24 = vld [vmem:[#allocation7 + $0x5e8] ss:$36 sps:$4 sm:$0xff]   ;;  %v20925_v26 = vld [vmem:[#allocation7 + $0x634] ss:$36 sps:$4 sm:$0xff]   ;;  %v20931_v30 = vld [vmem:[#allocation7 + $0x67c] ss:$36 sps:$4 sm:$0xff]  }
  0x79   : > { %v19368_v27 = vld [vmem:[#allocation7 + $0x1b0] ss:$36 sps:$4 sm:$0xff]   ;;  %v19374_v31 = vld [vmem:[#allocation7 + $0x1f8] ss:$36 sps:$4 sm:$0xff]   ;;  %v19376_v33 = vld [vmem:[#allocation7 + $0x244] ss:$36 sps:$4 sm:$0xff]  }
  0x7a   : > { %1742 = vmatpush1.bf16.msra.mxu0 %v19344_v11  ;;  %v20928_v28 = vld [vmem:[#allocation7 + $0x630] ss:$36 sps:$4 sm:$0xff]   ;;  %v20933_v32 = vld [vmem:[#allocation7 + $0x678] ss:$36 sps:$4 sm:$0xff]   ;;  %v302_v35 = vld [vmem:[%s20879_s13 + $0x1a8] sm:$0xff]  ;;  %vm3958_vm0 = vcmask 523264  }
  0x7b   : > { %18409 = vmatpush1.bf16.msra.mxu1 %v20903_v12  ;;  %1743 = vmatprep.subr.bf16.mxu0 %v19346_v13  ;;  %v299_v34 = vld [vmem:[%s20879_s13 + $0x190] sm:$0xff]  ;;  %v19378_v38 = vld [vmem:[#allocation7 + $0x8] ss:$36 sps:$4 sm:$0xff]   ;;  %v19381_v39 = vld [vmem:[#allocation7 + $0x240] ss:$36 sps:$4 sm:$0xff]   ;;  %s20672_s21 = smov 64  }
  0x7c   : > { %18402 = vmatprep.subr.bf16.mxu1 %v20907_v14  ;;  %v19380_v36 = vld [vmem:[#allocation7 + $0xc] ss:$36 sps:$4 sm:$0xff]   ;;  %v20939_v37 = vpack.c.bf16 %v302_v35, %v299_v34  ;;  %v19386_v41 = vld [vmem:[#allocation7 + $0x54] ss:$36 sps:$4 sm:$0xff]   ;;  %v305_v45 = vld [vmem:[%s20879_s13 + $0x1c0] sm:$0xff]  ;;  %s25758_s5 = scalar_lea.vmem [#allocation10], %s19249_s10 }
  0x7d   : > { %v19382_v40 = vld [vmem:[#allocation7 + $0x28c] ss:$36 sps:$4 sm:$0xff]   ;;  %v19388_v44 = vld [vmem:[#allocation7 + $0x2d4] ss:$36 sps:$4 sm:$0xff]   ;;  %v19392_v47 = vld [vmem:[#allocation7 + $0x9c] ss:$36 sps:$4 sm:$0xff]   ;;  %v20946_v48 = vpack.c.bf16 %v308_v46, %v305_v45 }
  0x7e   : > { %1744 = vmatpush1.bf16.msra.mxu0 %v19350_v15  ;;  %26273 = vst [vmem:[#allocation14_spill] sm:$0xff] %v20939_v37  ;;  %v19384_v42 = vld [vmem:[#allocation7 + $0x50] ss:$36 sps:$4 sm:$0xff]   ;;  %v19387_v43 = vld [vmem:[#allocation7 + $0x288] ss:$36 sps:$4 sm:$0xff]   ;;  %v253_v60 = vld [vmem:[%s20879_s13 + $0x20] sm:$0xff] }
  0x7f   : > { %18410 = vmatpush1.bf16.msra.mxu1 %v20910_v16  ;;  %1745 = vmatprep.subr.bf16.mxu0 %v19352_v17  ;;  %26274 = vst [vmem:[#allocation15_spill] sm:$0xff] %v20946_v48  ;;  %v19390_v49 = vld [vmem:[#allocation7 + $0x98] ss:$36 sps:$4 sm:$0xff]   ;;  %v19393_v50 = vld [vmem:[#allocation7 + $0x2d0] ss:$36 sps:$4 sm:$0xff]   ;;  %v314_v57 = vld [vmem:[%s20879_s13 + $0x208] sm:$0xff] }
  0x80   : > { %18403 = vmatprep.subr.bf16.mxu1 %v20913_v18  ;;  %v19394_v51 = vld [vmem:[#allocation7 + $0x31c] ss:$36 sps:$4 sm:$0xff]   ;;  %v19398_v52 = vld [vmem:[#allocation7 + $0xe4] ss:$36 sps:$4 sm:$0xff]   ;;  %v311_v56 = vld [vmem:[%s20879_s13 + $0x1f0] sm:$0xff]  ;;  %s19250_s25 = smul.u32 12288, %s20722_s19 }
  0x81   : > { %v19396_v53 = vld [vmem:[#allocation7 + $0xe0] ss:$36 sps:$4 sm:$0xff]   ;;  %v19399_v54 = vld [vmem:[#allocation7 + $0x318] ss:$36 sps:$4 sm:$0xff]   ;;  %v19404_v58 = vld [vmem:[#allocation7 + $0x12c] ss:$36 sps:$4 sm:$0xff]   ;;  %v20956_v62 = vpack.c.bf16 %v314_v57, %v311_v56 }
  0x82   : > { %1746 = vmatpush1.bf16.msra.mxu0 %v19356_v19  ;;  %v19400_v55 = vld [vmem:[#allocation7 + $0x364] ss:$36 sps:$4 sm:$0xff]   ;;  %v19406_v3 = vld [vmem:[#allocation7 + $0x3ac] ss:$36 sps:$4 sm:$0xff]   ;;  %v19410_v5 = vld [vmem:[#allocation7 + $0x174] ss:$36 sps:$4 sm:$0xff]   ;;  %s25950_s24 = scalar_lea.hbm %s26004_s4, %s19250_s25 }
  0x83   : > { %18411 = vmatpush1.bf16.msra.mxu1 %v20915_v20  ;;  %1747 = vmatprep.subr.bf16.mxu0 %v19358_v21  ;;  %v250_v59 = vld [vmem:[%s20879_s13 + $0x8] sm:$0xff]  ;;  %26275 = vst [vmem:[#allocation16_spill] sm:$0xff] %v20956_v62  ;;  %v19405_v1 = vld [vmem:[#allocation7 + $0x360] ss:$36 sps:$4 sm:$0xff]   ;;  %v19408_v7 = vld [vmem:[#allocation7 + $0x170] ss:$36 sps:$4 sm:$0xff]  }
  0x84   : > { %18404 = vmatprep.subr.bf16.mxu1 %v20919_v22  ;;  %v20954_v61 = vpack.c.bf16 %v253_v60, %v250_v59  ;;  %v19402_v63 = vld [vmem:[#allocation7 + $0x128] ss:$36 sps:$4 sm:$0xff]   ;;  %v19412_v11 = vld [vmem:[#allocation7 + $0x3f4] ss:$36 sps:$4 sm:$0xff]   ;;  %v317_v13 = vld [vmem:[%s20879_s13 + $0x220] sm:$0xff]  ;;  %s15923_s7 = sshll.u32 %s25758_s5, 4  ;;  %s25952_s7 = int_to_ptr.vmem [resolvable:$true] %s15923_s7 }
  0x85   : > { %v19411_v9 = vld [vmem:[#allocation7 + $0x3a8] ss:$36 sps:$4 sm:$0xff]   ;;  %v320_v15 = vld [vmem:[%s20879_s13 + $0x238] sm:$0xff]  ;;  %v323_v35 = vld [vmem:[%s20879_s13 + $0x250] sm:$0xff]  ;;  %s15909_s19 = scalar_lea.sflag [#allocation6], %s20873_s9  ;;  %s20590_s29 = scalar_lea.vmem %s25952_s7, 12288 }
  0x86   : > { %1748 = vmatpush1.bf16.msra.mxu0 %v19362_v23  ;;  %1769 = vmatprep.mubr.bf16.mxu0 %v20954_v61  ;;  %v19416_v17 = vld [vmem:[#allocation7 + $0x1bc] ss:$36 sps:$4 sm:$0xff]   ;;  %v20963_v19 = vpack.c.bf16 %v320_v15, %v317_v13  ;;  %v19417_v23 = vld [vmem:[#allocation7 + $0x3f0] ss:$36 sps:$4 sm:$0xff]   ;;  %p20591_p11 = scmp.ne.s32.totalorder %s25952_s7, %s20590_s29  ;;  %p26717_p0 = scmp.ne.s32.totalorder %s26268_s20, 0 }
  0x87   : > { %18412 = vmatpush1.bf16.msra.mxu1 %v20922_v24  ;;  %1749 = vmatprep.subr.bf16.mxu0 %v19364_v25  ;;  %v19414_v21 = vld [vmem:[#allocation7 + $0x1b8] ss:$36 sps:$4 sm:$0xff]   ;;  %v19427_v46 = vld [vmem:[#allocation7 + $0x290] ss:$36 sps:$4 sm:$0xff]   ;;  %v19433_v59 = vld [vmem:[#allocation7 + $0x320] ss:$36 sps:$4 sm:$0xff]  }
  0x88   : > { %18405 = vmatprep.subr.bf16.mxu1 %v20925_v26  ;;  %26276 = vst [vmem:[#allocation17_spill] sm:$0xff] %v20963_v19  ;;  %v19418_v25 = vld [vmem:[#allocation7 + $0x43c] ss:$36 sps:$4 sm:$0xff]   ;;  %v19429_v45 = vld [vmem:[#allocation7 + $0x294] ss:$36 sps:$4 sm:$0xff]   ;;  %p20592_p1 = pnand %p20591_p11, %p26717_p0  ;;  %s20673_s30 = smov [#allocation10]  }
  0x89   : > { %v252_v34 = vld [vmem:[%s20879_s13 + $0x18] sm:$0xff]  ;;  %v19439_v15 = vld [vmem:[#allocation7 + $0x3b0] ss:$36 sps:$4 sm:$0xff]   ;;  %s20594_s6 = sshll.u32 %s20673_s30, 4  ;;  %s20595_s6 = int_to_ptr.vmem [resolvable:$false] %s20594_s6 }
  0x8a   : > { %1750 = vmatpush1.bf16.msra.mxu0 %v19368_v27  ;;  %v19422_v27 = vld [vmem:[#allocation7 + $0x204] ss:$36 sps:$4 sm:$0xff]   ;;  %v19430_v56 = vld [vmem:[#allocation7 + $0x2d8] ss:$36 sps:$4 sm:$0xff]   ;;  %p20593_p3 = pneg %p20592_p1  ;;  %s20596_s8 = scalar_lea.vmem %s20595_s6, 24576 }
  0x8b   : > { %18413 = vmatpush1.bf16.msra.mxu1 %v20928_v28  ;;  %1751 = vmatprep.subr.bf16.mxu0 %v19370_v29  ;;  %v19420_v29 = vld [vmem:[#allocation7 + $0x200] ss:$36 sps:$4 sm:$0xff]   ;;  %v264_v60 = vld [vmem:[%s20879_s13 + $0x78] sm:$0xff]  ;;  %p20597_p5 = scmp.lt.s32.totalorder %s25952_s7, %s20595_s6  ;;  %p20598_p9 = scmp.lt.s32.totalorder %s20596_s8, %s20590_s29 }
  0x8c   : > { %18406 = vmatprep.subr.bf16.mxu1 %v20931_v30  ;;  %v19441_v13 = vld [vmem:[#allocation7 + $0x3b4] ss:$36 sps:$4 sm:$0xff]  }
  0x8d   : > { %p20599_p12 = por %p20598_p9, %p20597_p5 }
  0x8e   : > { %1752 = vmatpush1.bf16.msra.mxu0 %v19374_v31  ;;  %v19423_v31 = vld [vmem:[#allocation7 + $0x438] ss:$36 sps:$4 sm:$0xff]  }
  0x8f   : > { %18414 = vmatpush1.bf16.msra.mxu1 %v20933_v32  ;;  %1753 = vmatprep.subr.bf16.mxu0 %v19376_v33  ;;  %v249_v33 = vld [vmem:[%s20879_s13] sm:$0xff]  ;;  %p20600_p2 = pnand %p20599_p12, %p20593_p3 }
  0x90   : > { %2123 = vmatprep.subr.bf16.mxu1 %v19380_v36  ;;  %v326_v36 = vld [vmem:[%s20879_s13 + $0x268] sm:$0xff] }
  0x92   : > { %2043 = vmatmul.mubr.bf16.vlgmr.msra.gmra.mrb[0].mxu1 %v20939_v37  ;;  %1754 = vmatpush1.bf16.msra.mxu0 %v19381_v39  ;;  %v256_v39 = vld [vmem:[%s20879_s13 + $0x38] sm:$0xff] }
  0x93   : > { %2124 = vmatpush1.bf16.msra.mxu1 %v19378_v38  ;;  %1755 = vmatprep.subr.bf16.mxu0 %v19382_v40  ;;  %v19426_v38 = vld [vmem:[#allocation7 + $0x24c] ss:$36 sps:$4 sm:$0xff]  }
  0x94   : > { %2125 = vmatprep.subr.bf16.mxu1 %v19386_v41  ;;  %2052 = vmatprep.mubr.bf16.mxu1 %v26010_v0  ;;  %v259_v40 = vld [vmem:[%s20879_s13 + $0x50] sm:$0xff]  ;;  %v20973_v41 = vpack.c.bf16 %v252_v34, %v249_v33  ;;  %v19447_v34 = vld [vmem:[#allocation7 + $0x444] ss:$36 sps:$4 sm:$0xff]  }
  0x96   : > { %1756 = vmatpush1.bf16.msra.mxu0 %v19387_v43  ;;  %v19424_v43 = vld [vmem:[#allocation7 + $0x248] ss:$36 sps:$4 sm:$0xff]  }
  0x97   : > { %2126 = vmatpush1.bf16.msra.mxu1 %v19384_v42  ;;  %1757 = vmatprep.subr.bf16.mxu0 %v19388_v44  ;;  %v20975_v42 = vpack.c.bf16 %v326_v36, %v323_v35  ;;  %v20977_v44 = vpack.c.bf16 %v259_v40, %v256_v39  ;;  %v19445_v35 = vld [vmem:[#allocation7 + $0x440] ss:$36 sps:$4 sm:$0xff]   ;;  %v19450_v36 = vld [vmem:[#allocation7 + $0x48c] ss:$36 sps:$4 sm:$0xff]  }
  0x98   : > { %2127 = vmatprep.subr.bf16.mxu1 %v19392_v47  ;;  %v255_v47 = vld [vmem:[%s20879_s13 + $0x30] sm:$0xff]  ;;  %v19448_v40 = vld [vmem:[#allocation7 + $0x488] ss:$36 sps:$4 sm:$0xff]  }
  0x99   : > { %26277 = vst [vmem:[#allocation18_spill] sm:$0xff] %v20975_v42  ;;  %v283_v39 = vld [vmem:[%s20879_s13 + $0x110] sm:$0xff] }
  0x9a   : > { %2053 = vmatmul.mubr.bf16.gmra.mrb[4].mxu1 %v20946_v48  ;;  %1758 = vmatpush1.bf16.msra.mxu0 %v19393_v50  ;;  %v329_v50 = vld [vmem:[%s20879_s13 + $0x280] sm:$0xff] }
  0x9b   : > { %2128 = vmatpush1.bf16.msra.mxu1 %v19390_v49  ;;  %1759 = vmatprep.subr.bf16.mxu0 %v19394_v51  ;;  %v258_v49 = vld [vmem:[%s20879_s13 + $0x48] sm:$0xff]  ;;  %v332_v51 = vld [vmem:[%s20879_s13 + $0x298] sm:$0xff] }
  0x9c   : > { %2129 = vmatprep.subr.bf16.mxu1 %v19398_v52  ;;  %2062 = vmatprep.mubr.bf16.mxu1 %v26010_v0  ;;  %v19432_v52 = vld [vmem:[#allocation7 + $0x2dc] ss:$36 sps:$4 sm:$0xff]  }
  0x9e   : > { %1760 = vmatpush1.bf16.msra.mxu0 %v19399_v54  ;;  %v20991_v54 = vpack.c.bf16 %v258_v49, %v255_v47  ;;  %v282_v47 = vld [vmem:[%s20879_s13 + $0x108] sm:$0xff]  ;;  %v289_v49 = vld [vmem:[%s20879_s13 + $0x140] sm:$0xff] }
  0x9f   : > { %2130 = vmatpush1.bf16.msra.mxu1 %v19396_v53  ;;  %1761 = vmatprep.subr.bf16.mxu0 %v19400_v55  ;;  %v262_v53 = vld [vmem:[%s20879_s13 + $0x68] sm:$0xff]  ;;  %v20993_v55 = vpack.c.bf16 %v332_v51, %v329_v50  ;;  %v19456_v50 = vld [vmem:[#allocation7 + $0x51c] ss:$36 sps:$4 sm:$0xff]  }
  0xa0   : > { %2131 = vmatprep.subr.bf16.mxu1 %v19404_v58  ;;  %26278 = vst [vmem:[#allocation19_spill] sm:$0xff] %v20991_v54  ;;  %v19435_v58 = vld [vmem:[#allocation7 + $0x324] ss:$36 sps:$4 sm:$0xff]  }
  0xa1   : > { %26279 = vst [vmem:[#allocation20_spill] sm:$0xff] %v20993_v55 }
  0xa2   : > { %2063 = vmatmul.mubr.bf16.gmra.mrb[8].mxu1 %v20956_v62  ;;  %1762 = vmatpush1.bf16.msra.mxu0 %v19405_v1  ;;  %v19438_v1 = vld [vmem:[#allocation7 + $0x36c] ss:$36 sps:$4 sm:$0xff]  }
  0xa3   : > { %2132 = vmatpush1.bf16.msra.mxu1 %v19402_v63  ;;  %1763 = vmatprep.subr.bf16.mxu0 %v19406_v3  ;;  %v335_v63 = vld [vmem:[%s20879_s13 + $0x2b0] sm:$0xff]  ;;  %v268_v3 = vld [vmem:[%s20879_s13 + $0x98] sm:$0xff] }
  0xa4   : > { %2133 = vmatprep.subr.bf16.mxu1 %v19410_v5  ;;  %2072 = vmatprep.mubr.bf16.mxu1 %v26010_v0  ;;  %v271_v5 = vld [vmem:[%s20879_s13 + $0xb0] sm:$0xff] }
  0xa6   : > { %1764 = vmatpush1.bf16.msra.mxu0 %v19411_v9  ;;  %v19436_v9 = vld [vmem:[#allocation7 + $0x368] ss:$36 sps:$4 sm:$0xff]  }
  0xa7   : > { %2134 = vmatpush1.bf16.msra.mxu1 %v19408_v7  ;;  %1765 = vmatprep.subr.bf16.mxu0 %v19412_v11  ;;  %v21015_v11 = vpack.c.bf16 %v271_v5, %v268_v3  ;;  %v294_v3 = vld [vmem:[%s20879_s13 + $0x168] sm:$0xff] }
  0xa8   : > { %2135 = vmatprep.subr.bf16.mxu1 %v19416_v17  ;;  %v270_v17 = vld [vmem:[%s20879_s13 + $0xa8] sm:$0xff] }
  0xa9   : > { %v298_v5 = vld [vmem:[%s20879_s13 + $0x188] sm:$0xff] }
  0xaa   : > { %2073 = vmatmul.mubr.bf16.gmra.mrb[12].mxu1 %v20963_v19  ;;  %1766 = vmatpush1.bf16.msra.mxu0 %v19417_v23  ;;  %v19444_v23 = vld [vmem:[#allocation7 + $0x3fc] ss:$36 sps:$4 sm:$0xff]  }
  0xab   : > { %2136 = vmatpush1.bf16.msra.mxu1 %v19414_v21  ;;  %1767 = vmatprep.subr.bf16.mxu0 %v19418_v25  ;;  %v341_v21 = vld [vmem:[%s20879_s13 + $0x2e0] sm:$0xff]  ;;  %v274_v25 = vld [vmem:[%s20879_s13 + $0xc8] sm:$0xff] }
  0xac   : > { %2137 = vmatprep.subr.bf16.mxu1 %v19422_v27  ;;  %2082 = vmatprep.mubr.bf16.mxu1 %v26010_v0 }
  0xae   : > { %1768 = vmatpush1.bf16.msra.mxu0 %v19423_v31  ;;  %v19442_v31 = vld [vmem:[#allocation7 + $0x3f8] ss:$36 sps:$4 sm:$0xff]  }
  0xaf   : > { %2138 = vmatpush1.bf16.msra.mxu1 %v19420_v29  ;;  %1930 = vmatprep.subr.bf16.mxu0 %v20890_v2  ;;  %v265_v2 = vld [vmem:[%s20879_s13 + $0x80] sm:$0xff] }
  0xb0   : > { %2139 = vmatprep.subr.bf16.mxu1 %v19426_v38  ;;  %v20996_v57 = vpack.c.bf16 %v265_v2, %v262_v53  ;;  %v280_v38 = vld [vmem:[%s20879_s13 + $0xf8] sm:$0xff]  ;;  %v19459_v2 = vld [vmem:[#allocation7 + $0x564] ss:$36 sps:$4 sm:$0xff]  }
  0xb1   : > { %1770 = vmatmul.mubr.bf16.vlgmr.msra.gmra.mrb[0].mxu0 %v20973_v41  ;;  %v19471_v53 = vld [vmem:[#allocation7 + $0x14] ss:$36 sps:$4 sm:$0xff]  }
  0xb2   : > { %2083 = vmatmul.mubr.bf16.gmra.mrb[16].mxu1 %v20975_v42  ;;  %1779 = vmatprep.mubr.bf16.mxu0 %v20977_v44 }
  0xb3   : > { %2140 = vmatpush1.bf16.msra.mxu1 %v19424_v43  ;;  %2092 = vmatprep.mubr.bf16.mxu1 %v26010_v0  ;;  %v21049_v43 = vpack.c.bf16 %v283_v39, %v280_v38  ;;  %v306_v38 = vld [vmem:[%s20879_s13 + $0x1c8] sm:$0xff] }
  0xb4   : > { %2141 = vmatprep.subr.bf16.mxu1 %v19429_v45  ;;  %1931 = vmatpush1.bf16.msra.mxu0 %v20892_v4  ;;  %v261_v4 = vld [vmem:[%s20879_s13 + $0x60] sm:$0xff]  ;;  %v19453_v45 = vld [vmem:[#allocation7 + $0x4d4] ss:$36 sps:$4 sm:$0xff]   ;;  %v310_v39 = vld [vmem:[%s20879_s13 + $0x1e8] sm:$0xff] }
  0xb5   : > { %1932 = vmatprep.subr.bf16.mxu0 %v20896_v6  ;;  %v338_v6 = vld [vmem:[%s20879_s13 + $0x2c8] sm:$0xff] }
  0xb6   : > { %v21012_v7 = vpack.c.bf16 %v338_v6, %v335_v63  ;;  %v19460_v63 = vld [vmem:[#allocation7 + $0x5a8] ss:$36 sps:$4 sm:$0xff]   ;;  %v291_v6 = vld [vmem:[%s20879_s13 + $0x150] sm:$0xff] }
  0xb7   : > { %2142 = vmatpush1.bf16.msra.mxu1 %v19427_v46  ;;  %v279_v46 = vld [vmem:[%s20879_s13 + $0xf0] sm:$0xff] }
  0xb8   : > { %2143 = vmatprep.subr.bf16.mxu1 %v19432_v52  ;;  %1933 = vmatpush1.bf16.msra.mxu0 %v20898_v8  ;;  %v21010_v8 = vpack.c.bf16 %v264_v60, %v261_v4  ;;  %26281 = vst [vmem:[#allocation22_spill] sm:$0xff] %v21012_v7  ;;  %v19454_v52 = vld [vmem:[#allocation7 + $0x518] ss:$36 sps:$4 sm:$0xff]  }
  0xb9   : > { %1780 = vmatmul.mubr.bf16.gmra.mrb[4].mxu0 %v20991_v54  ;;  %1934 = vmatprep.subr.bf16.mxu0 %v20901_v10  ;;  %v267_v10 = vld [vmem:[%s20879_s13 + $0x90] sm:$0xff] }
  0xba   : > { %2093 = vmatmul.mubr.bf16.gmra.mrb[20].mxu1 %v20993_v55  ;;  %1789 = vmatprep.mubr.bf16.mxu0 %v20996_v57  ;;  %26280 = vst [vmem:[#allocation21_spill] sm:$0xff] %v21010_v8  ;;  %v21029_v27 = vpack.c.bf16 %v270_v17, %v267_v10  ;;  %v21087_v10 = vpack.c.bf16 %v294_v3, %v291_v6  ;;  %v331_v6 = vld [vmem:[%s20879_s13 + $0x290] sm:$0xff] }
  0xbb   : > { %2144 = vmatpush1.bf16.msra.mxu1 %v19430_v56  ;;  %2102 = vmatprep.mubr.bf16.mxu1 %v26010_v0  ;;  %v292_v56 = vld [vmem:[%s20879_s13 + $0x158] sm:$0xff] }
  0xbc   : > { %2145 = vmatprep.subr.bf16.mxu1 %v19435_v58  ;;  %1935 = vmatpush1.bf16.msra.mxu0 %v20903_v12  ;;  %v344_v12 = vld [vmem:[%s20879_s13 + $0x2f8] sm:$0xff]  ;;  %26282 = vst [vmem:[#allocation23_spill] sm:$0xff] %v21029_v27  ;;  %v295_v58 = vld [vmem:[%s20879_s13 + $0x170] sm:$0xff] }
  0xbd   : > { %1936 = vmatprep.subr.bf16.mxu0 %v20907_v14  ;;  %v277_v14 = vld [vmem:[%s20879_s13 + $0xe0] sm:$0xff]  ;;  %v21031_v29 = vpack.c.bf16 %v344_v12, %v341_v21  ;;  %v21077_v60 = vpack.c.bf16 %v295_v58, %v292_v56  ;;  %v19466_v21 = vld [vmem:[#allocation7 + $0x638] ss:$36 sps:$4 sm:$0xff]  }
  0xbe   : > { %v21034_v33 = vpack.c.bf16 %v277_v14, %v274_v25  ;;  %v297_v12 = vld [vmem:[%s20879_s13 + $0x180] sm:$0xff]  ;;  %v304_v14 = vld [vmem:[%s20879_s13 + $0x1b8] sm:$0xff] }
  0xbf   : > { %2146 = vmatpush1.bf16.msra.mxu1 %v19433_v59  ;;  %26283 = vst [vmem:[#allocation24_spill] sm:$0xff] %v21031_v29  ;;  %v19457_v59 = vld [vmem:[#allocation7 + $0x560] ss:$36 sps:$4 sm:$0xff]  }
  0xc0   : > { %2147 = vmatprep.subr.bf16.mxu1 %v19438_v1  ;;  %1937 = vmatpush1.bf16.msra.mxu0 %v20910_v16  ;;  %v273_v16 = vld [vmem:[%s20879_s13 + $0xc0] sm:$0xff]  ;;  %v19465_v1 = vld [vmem:[#allocation7 + $0x5f4] ss:$36 sps:$4 sm:$0xff]  }
  0xc1   : > { %1790 = vmatmul.mubr.bf16.gmra.mrb[8].mxu0 %v21010_v8  ;;  %1938 = vmatprep.subr.bf16.mxu0 %v20913_v18  ;;  %v276_v18 = vld [vmem:[%s20879_s13 + $0xd8] sm:$0xff]  ;;  %v19483_v25 = vld [vmem:[#allocation7 + $0x684] ss:$36 sps:$4 sm:$0xff]  }
  0xc2   : > { %2103 = vmatmul.mubr.bf16.gmra.mrb[24].mxu1 %v21012_v7  ;;  %1799 = vmatprep.mubr.bf16.mxu0 %v21015_v11 }
  0xc3   : > { %2148 = vmatpush1.bf16.msra.mxu1 %v19436_v9  ;;  %2112 = vmatprep.mubr.bf16.mxu1 %v26010_v0  ;;  %v301_v9 = vld [vmem:[%s20879_s13 + $0x1a0] sm:$0xff] }
  0xc4   : > { %2149 = vmatprep.subr.bf16.mxu1 %v19441_v13  ;;  %1939 = vmatpush1.bf16.msra.mxu0 %v20915_v20  ;;  %v21046_v20 = vpack.c.bf16 %v276_v18, %v273_v16  ;;  %v19463_v13 = vld [vmem:[#allocation7 + $0x5f0] ss:$36 sps:$4 sm:$0xff]   ;;  %v21089_v17 = vpack.c.bf16 %v301_v9, %v298_v5  ;;  %v330_v9 = vld [vmem:[%s20879_s13 + $0x288] sm:$0xff] }
  0xc5   : > { %1940 = vmatprep.subr.bf16.mxu0 %v20919_v22  ;;  %v286_v22 = vld [vmem:[%s20879_s13 + $0x128] sm:$0xff]  ;;  %v327_v5 = vld [vmem:[%s20879_s13 + $0x270] sm:$0xff] }
  0xc6   : > { %v21064_v51 = vpack.c.bf16 %v289_v49, %v286_v22  ;;  %v312_v22 = vld [vmem:[%s20879_s13 + $0x1f8] sm:$0xff] }
  0xc7   : > { %2150 = vmatpush1.bf16.msra.mxu1 %v19439_v15  ;;  %v19468_v15 = vld [vmem:[#allocation7 + $0x63c] ss:$36 sps:$4 sm:$0xff]  }
  0xc8   : > { %2151 = vmatprep.subr.bf16.mxu1 %v19444_v23  ;;  %1941 = vmatpush1.bf16.msra.mxu0 %v20922_v24  ;;  %v19451_v24 = vld [vmem:[#allocation7 + $0x4d0] ss:$36 sps:$4 sm:$0xff]   ;;  %v300_v23 = vld [vmem:[%s20879_s13 + $0x198] sm:$0xff] }
  0xc9   : > { %1800 = vmatmul.mubr.bf16.gmra.mrb[12].mxu0 %v21029_v27  ;;  %1942 = vmatprep.subr.bf16.mxu0 %v20925_v26  ;;  %v21061_v26 = vpack.c.bf16 %v282_v47, %v279_v46  ;;  %v21099_v16 = vpack.c.bf16 %v300_v23, %v297_v12  ;;  %v309_v47 = vld [vmem:[%s20879_s13 + $0x1e0] sm:$0xff]  ;;  %v316_v49 = vld [vmem:[%s20879_s13 + $0x218] sm:$0xff] }
  0xca   : > { %2113 = vmatmul.mubr.bf16.gmra.mrb[28].mxu1 %v21031_v29  ;;  %1809 = vmatprep.mubr.bf16.mxu0 %v21034_v33  ;;  %v333_v23 = vld [vmem:[%s20879_s13 + $0x2a0] sm:$0xff] }
  0xcb   : > { %2152 = vmatpush1.bf16.msra.mxu1 %v19442_v31  ;;  %2155 = vmatprep.mubr.bf16.mxu1 %v20954_v61  ;;  %v307_v31 = vld [vmem:[%s20879_s13 + $0x1d0] sm:$0xff] }
  0xcc   : > { %2153 = vmatprep.subr.bf16.mxu1 %v19447_v34  ;;  %1943 = vmatpush1.bf16.msra.mxu0 %v20928_v28  ;;  %v285_v28 = vld [vmem:[%s20879_s13 + $0x120] sm:$0xff]  ;;  %v21101_v18 = vpack.c.bf16 %v307_v31, %v304_v14  ;;  %v340_v14 = vld [vmem:[%s20879_s13 + $0x2d8] sm:$0xff]  ;;  %v343_v31 = vld [vmem:[%s20879_s13 + $0x2f0] sm:$0xff] }
  0xcd   : > { %1944 = vmatprep.subr.bf16.mxu0 %v20931_v30  ;;  %v288_v30 = vld [vmem:[%s20879_s13 + $0x138] sm:$0xff]  ;;  %v19481_v34 = vld [vmem:[#allocation7 + $0x680] ss:$36 sps:$4 sm:$0xff]  }
  0xce   : > { %v21075_v4 = vpack.c.bf16 %v288_v30, %v285_v28  ;;  %v322_v28 = vld [vmem:[%s20879_s13 + $0x248] sm:$0xff]  ;;  %v325_v30 = vld [vmem:[%s20879_s13 + $0x260] sm:$0xff] }
  0xcf   : > { %2154 = vmatpush1.bf16.msra.mxu1 %v19445_v35  ;;  %v19501_v35 = vld [vmem:[#allocation7 + $0x1c] ss:$36 sps:$4 sm:$0xff]   ;;  %v21137_v58 = vpack.c.bf16 %v325_v30, %v322_v28  ;;  %v19477_v30 = vld [vmem:[#allocation7 + $0xa4] ss:$36 sps:$4 sm:$0xff]  }
  0xd0   : > { %2316 = vmatprep.subr.bf16.mxu1 %v19450_v36  ;;  %1945 = vmatpush1.bf16.msra.mxu0 %v20933_v32  ;;  %v19462_v32 = vld [vmem:[#allocation7 + $0x5ac] ss:$36 sps:$4 sm:$0xff]   ;;  %v260_v28 = vld [vmem:[%s20879_s13 + $0x58] sm:$0xff] }
  0xd1   : > { %1810 = vmatmul.mubr.bf16.gmra.mrb[16].mxu0 %v21046_v20  ;;  %2509 = vmatprep.subr.bf16.mxu0 %v19471_v53  ;;  %v303_v36 = vld [vmem:[%s20879_s13 + $0x1b0] sm:$0xff] }
  0xd2   : > { %2156 = vmatmul.mubr.bf16.vlgmr.msra.gmra.mrb[32].mxu1 %v20973_v41  ;;  %1819 = vmatprep.mubr.bf16.mxu0 %v21049_v43  ;;  %v315_v53 = vld [vmem:[%s20879_s13 + $0x210] sm:$0xff] }
  0xd3   : > { %2317 = vmatpush1.bf16.msra.mxu1 %v19448_v40  ;;  %2165 = vmatprep.mubr.bf16.mxu1 %v20977_v44  ;;  %v313_v40 = vld [vmem:[%s20879_s13 + $0x200] sm:$0xff] }
  0xd4   : > { %2318 = vmatprep.subr.bf16.mxu1 %v19453_v45  ;;  %v21111_v45 = vpack.c.bf16 %v306_v38, %v303_v36  ;;  %v21113_v46 = vpack.c.bf16 %v313_v40, %v310_v39  ;;  %v339_v36 = vld [vmem:[%s20879_s13 + $0x2d0] sm:$0xff]  ;;  %v342_v38 = vld [vmem:[%s20879_s13 + $0x2e8] sm:$0xff] }
  0xd5   : > { %v21181_v39 = vpack.c.bf16 %v342_v38, %v339_v36  ;;  %v251_v40 = vld [vmem:[%s20879_s13 + $0x10] sm:$0xff]  ;;  %v272_v36 = vld [vmem:[%s20879_s13 + $0xb8] sm:$0xff]  ;;  %v19492_v38 = vld [vmem:[#allocation7 + $0x1c4] ss:$36 sps:$4 sm:$0xff]  }
  0xd6   : > { %26284 = vst [vmem:[#allocation25_spill] sm:$0xff] %v21113_v46 }
  0xd7   : > { %2319 = vmatpush1.bf16.msra.mxu1 %v19451_v24  ;;  %v319_v24 = vld [vmem:[%s20879_s13 + $0x230] sm:$0xff]  ;;  %26289 = vst [vmem:[#allocation30_spill] sm:$0xff] %v21181_v39 }
  0xd8   : > { %2320 = vmatprep.subr.bf16.mxu1 %v19456_v50  ;;  %v21123_v50 = vpack.c.bf16 %v312_v22, %v309_v47  ;;  %v254_v47 = vld [vmem:[%s20879_s13 + $0x28] sm:$0xff]  ;;  %v19469_v22 = vld [vmem:[#allocation7 + $0x10] ss:$36 sps:$4 sm:$0xff]  }
  0xd9   : > { %1820 = vmatmul.mubr.bf16.gmra.mrb[20].mxu0 %v21061_v26 }
  0xda   : > { %2166 = vmatmul.mubr.bf16.gmra.mrb[36].mxu1 %v20991_v54  ;;  %1829 = vmatprep.mubr.bf16.mxu0 %v21064_v51  ;;  %26285 = vst [vmem:[#allocation26_spill] sm:$0xff] %v21123_v50 }
  0xdb   : > { %2175 = vmatprep.mubr.bf16.mxu1 %v20996_v57  ;;  %2321 = vmatpush1.bf16.msra.mxu1 %v19454_v52  ;;  %v21125_v52 = vpack.c.bf16 %v319_v24, %v316_v49  ;;  %v21189_v49 = vpack.c.bf16 %v254_v47, %v251_v40  ;;  %v19474_v24 = vld [vmem:[#allocation7 + $0x5c] ss:$36 sps:$4 sm:$0xff]  }
  0xdc   : > { %2322 = vmatprep.subr.bf16.mxu1 %v19459_v2  ;;  %v318_v2 = vld [vmem:[%s20879_s13 + $0x228] sm:$0xff]  ;;  %v19490_v47 = vld [vmem:[#allocation7 + $0x1c0] ss:$36 sps:$4 sm:$0xff]  }
  0xdd   : > { %v21135_v56 = vpack.c.bf16 %v318_v2, %v315_v53  ;;  %26290 = vst [vmem:[#allocation31_spill] sm:$0xff] %v21189_v49  ;;  %v19472_v53 = vld [vmem:[#allocation7 + $0x58] ss:$36 sps:$4 sm:$0xff]   ;;  %v257_v2 = vld [vmem:[%s20879_s13 + $0x40] sm:$0xff] }
  0xdf   : > { %2323 = vmatpush1.bf16.msra.mxu1 %v19457_v59  ;;  %v321_v59 = vld [vmem:[%s20879_s13 + $0x240] sm:$0xff] }
  0xe0   : > { %2324 = vmatprep.subr.bf16.mxu1 %v19462_v32  ;;  %v324_v32 = vld [vmem:[%s20879_s13 + $0x258] sm:$0xff] }
  0xe1   : > { %1830 = vmatmul.mubr.bf16.gmra.mrb[24].mxu0 %v21075_v4 }
  0xe2   : > { %2176 = vmatmul.mubr.bf16.gmra.mrb[40].mxu1 %v21010_v8  ;;  %1839 = vmatprep.mubr.bf16.mxu0 %v21077_v60 }
  0xe3   : > { %2185 = vmatprep.mubr.bf16.mxu1 %v21015_v11  ;;  %2325 = vmatpush1.bf16.msra.mxu1 %v19460_v63  ;;  %v328_v63 = vld [vmem:[%s20879_s13 + $0x278] sm:$0xff] }
  0xe4   : > { %2326 = vmatprep.subr.bf16.mxu1 %v19465_v1  ;;  %v21147_v1 = vpack.c.bf16 %v324_v32, %v321_v59  ;;  %v21149_v3 = vpack.c.bf16 %v331_v6, %v328_v63  ;;  %v21197_v59 = vpack.c.bf16 %v260_v28, %v257_v2  ;;  %v19475_v32 = vld [vmem:[#allocation7 + $0xa0] ss:$36 sps:$4 sm:$0xff]   ;;  %v19480_v63 = vld [vmem:[#allocation7 + $0xec] ss:$36 sps:$4 sm:$0xff]   ;;  %v19498_v28 = vld [vmem:[#allocation7 + $0x254] ss:$36 sps:$4 sm:$0xff]  }
  0xe5   : > { %v19478_v6 = vld [vmem:[#allocation7 + $0xe8] ss:$36 sps:$4 sm:$0xff]  }
  0xe6   : > { %26291 = vst [vmem:[#allocation32_spill] sm:$0xff] %v21197_v59  ;;  %v278_v2 = vld [vmem:[%s20879_s13 + $0xe8] sm:$0xff] }
  0xe7   : > { %2327 = vmatpush1.bf16.msra.mxu1 %v19463_v13  ;;  %v334_v13 = vld [vmem:[%s20879_s13 + $0x2a8] sm:$0xff] }
  0xe8   : > { %2328 = vmatprep.subr.bf16.mxu1 %v19468_v15  ;;  %v337_v15 = vld [vmem:[%s20879_s13 + $0x2c0] sm:$0xff] }
  0xe9   : > { %1840 = vmatmul.mubr.bf16.gmra.mrb[28].mxu0 %v21087_v10  ;;  %v21161_v12 = vpack.c.bf16 %v337_v15, %v334_v13  ;;  %v19486_v13 = vld [vmem:[#allocation7 + $0x134] ss:$36 sps:$4 sm:$0xff]  }
  0xea   : > { %2186 = vmatmul.mubr.bf16.gmra.mrb[44].mxu1 %v21029_v27  ;;  %1849 = vmatprep.mubr.bf16.mxu0 %v21089_v17 }
  0xeb   : > { %2195 = vmatprep.mubr.bf16.mxu1 %v21034_v33  ;;  %2329 = vmatpush1.bf16.msra.mxu1 %v19466_v21  ;;  %v21159_v21 = vpack.c.bf16 %v330_v9, %v327_v5  ;;  %26286 = vst [vmem:[#allocation27_spill] sm:$0xff] %v21161_v12  ;;  %v263_v5 = vld [vmem:[%s20879_s13 + $0x70] sm:$0xff]  ;;  %v266_v9 = vld [vmem:[%s20879_s13 + $0x88] sm:$0xff] }
  0xec   : > { %2330 = vmatprep.subr.bf16.mxu1 %v19483_v25  ;;  %v336_v25 = vld [vmem:[%s20879_s13 + $0x2b8] sm:$0xff]  ;;  %v21205_v15 = vpack.c.bf16 %v266_v9, %v263_v5  ;;  %v19510_v5 = vld [vmem:[#allocation7 + $0x64] ss:$36 sps:$4 sm:$0xff]  }
  0xed   : > { %v19502_v9 = vld [vmem:[#allocation7 + $0x298] ss:$36 sps:$4 sm:$0xff]  }
  0xee   : > { %26292 = vst [vmem:[#allocation33_spill] sm:$0xff] %v21205_v15 }
  0xef   : > { %2331 = vmatpush1.bf16.msra.mxu1 %v19481_v34  ;;  %v21171_v34 = vpack.c.bf16 %v336_v25, %v333_v23  ;;  %v19484_v23 = vld [vmem:[#allocation7 + $0x130] ss:$36 sps:$4 sm:$0xff]   ;;  %v19489_v25 = vld [vmem:[#allocation7 + $0x17c] ss:$36 sps:$4 sm:$0xff]  }
  0xf0   : > { %2895 = vmatprep.subr.bf16.mxu1 %v19501_v35  ;;  %v21173_v35 = vpack.c.bf16 %v343_v31, %v340_v14  ;;  %v19487_v14 = vld [vmem:[#allocation7 + $0x178] ss:$36 sps:$4 sm:$0xff]   ;;  %v269_v31 = vld [vmem:[%s20879_s13 + $0xa0] sm:$0xff] }
  0xf1   : > { %1850 = vmatmul.mubr.bf16.gmra.mrb[32].mxu0 %v21099_v16  ;;  %26287 = vst [vmem:[#allocation28_spill] sm:$0xff] %v21171_v34  ;;  %v21213_v40 = vpack.c.bf16 %v272_v36, %v269_v31  ;;  %v19519_v31 = vld [vmem:[#allocation7 + $0xac] ss:$36 sps:$4 sm:$0xff]  }
  0xf2   : > { %2196 = vmatmul.mubr.bf16.gmra.mrb[48].mxu1 %v21046_v20  ;;  %1859 = vmatprep.mubr.bf16.mxu0 %v21101_v18  ;;  %26288 = vst [vmem:[#allocation29_spill] sm:$0xff] %v21173_v35 }
  0xf3   : > { %2205 = vmatprep.mubr.bf16.mxu1 %v21049_v43  ;;  %26293 = vst [vmem:[#allocation34_spill] sm:$0xff] %v21213_v40 }
  0xf9   : > { %1860 = vmatmul.mubr.bf16.gmra.mrb[36].mxu0 %v21111_v45 }
  0xfa   : > { %2206 = vmatmul.mubr.bf16.gmra.mrb[52].mxu1 %v21061_v26  ;;  %1869 = vmatprep.mubr.bf16.mxu0 %v21113_v46 }
  0xfb   : > { %2215 = vmatprep.mubr.bf16.mxu1 %v21064_v51 }
 0x101   : > { %1870 = vmatmul.mubr.bf16.gmra.mrb[40].mxu0 %v21123_v50 }
 0x102   : > { %2216 = vmatmul.mubr.bf16.gmra.mrb[56].mxu1 %v21075_v4  ;;  %1879 = vmatprep.mubr.bf16.mxu0 %v21125_v52 }
 0x103   : > { %2225 = vmatprep.mubr.bf16.mxu1 %v21077_v60 }
 0x109   : > { %1880 = vmatmul.mubr.bf16.gmra.mrb[44].mxu0 %v21135_v56 }
 0x10a   : > { %2226 = vmatmul.mubr.bf16.gmra.mrb[60].mxu1 %v21087_v10  ;;  %1889 = vmatprep.mubr.bf16.mxu0 %v21137_v58 }
 0x10b   : > { %2235 = vmatprep.mubr.bf16.mxu1 %v21089_v17 }
 0x111   : > { %1890 = vmatmul.mubr.bf16.gmra.mrb[48].mxu0 %v21147_v1 }
 0x112   : > { %2236 = vmatmul.mubr.bf16.gmra.mrb[64].mxu1 %v21099_v16  ;;  %1899 = vmatprep.mubr.bf16.mxu0 %v21149_v3 }
 0x113   : > { %2245 = vmatprep.mubr.bf16.mxu1 %v21101_v18 }
 0x119   : > { %1900 = vmatmul.mubr.bf16.gmra.mrb[52].mxu0 %v21159_v21 }
 0x11a   : > { %2246 = vmatmul.mubr.bf16.gmra.mrb[68].mxu1 %v21111_v45  ;;  %1909 = vmatprep.mubr.bf16.mxu0 %v21161_v12 }
 0x11b   : > { %2255 = vmatprep.mubr.bf16.mxu1 %v21113_v46 }
 0x121   : > { %1910 = vmatmul.mubr.bf16.gmra.mrb[56].mxu0 %v21171_v34 }
 0x122   : > { %2256 = vmatmul.mubr.bf16.gmra.mrb[72].mxu1 %v21123_v50  ;;  %1919 = vmatprep.mubr.bf16.mxu0 %v21173_v35 }
 0x123   : > { %2265 = vmatprep.mubr.bf16.mxu1 %v21125_v52 }
 0x129   : > { %1920 = vmatmul.mubr.bf16.gmra.mrb[60].mxu0 %v21181_v39 }
 0x12a   : > { %2266 = vmatmul.mubr.bf16.gmra.mrb[76].mxu1 %v21135_v56  ;;  %1962 = vmatprep.mubr.bf16.mxu0 %v26010_v0 }
 0x12b   : > { %2275 = vmatprep.mubr.bf16.mxu1 %v21137_v58 }
 0x131   : > { %1963 = vmatmul.mubr.bf16.vlgmr.msra.gmra.mrb[0].mxu0 %v21189_v49 }
 0x132   : > { %2276 = vmatmul.mubr.bf16.gmra.mrb[80].mxu1 %v21147_v1  ;;  %2510 = vmatpush1.bf16.msra.mxu0 %v19469_v22  ;;  %v19495_v22 = vld [vmem:[#allocation7 + $0x20c] ss:$36 sps:$4 sm:$0xff]  }
 0x133   : > { %1972 = vmatprep.mubr.bf16.mxu0 %v26010_v0  ;;  %2511 = vmatprep.subr.bf16.mxu0 %v19474_v24  ;;  %v19493_v24 = vld [vmem:[#allocation7 + $0x208] ss:$36 sps:$4 sm:$0xff]  }
 0x134   : > { %2285 = vmatprep.mubr.bf16.mxu1 %v21149_v3 }
 0x136   : > { %2512 = vmatpush1.bf16.msra.mxu0 %v19472_v53  ;;  %v275_v53 = vld [vmem:[%s20879_s13 + $0xd0] sm:$0xff] }
 0x137   : > { %2513 = vmatprep.subr.bf16.mxu0 %v19477_v30  ;;  %v21221_v30 = vpack.c.bf16 %v278_v2, %v275_v53  ;;  %v19511_v53 = vld [vmem:[#allocation7 + $0x328] ss:$36 sps:$4 sm:$0xff]   ;;  %v287_v2 = vld [vmem:[%s20879_s13 + $0x130] sm:$0xff] }
 0x139   : > { %1973 = vmatmul.mubr.bf16.gmra.mrb[4].mxu0 %v21197_v59  ;;  %26294 = vst [vmem:[#allocation35_spill] sm:$0xff] %v21221_v30 }
 0x13a   : > { %2286 = vmatmul.mubr.bf16.gmra.mrb[84].mxu1 %v21159_v21  ;;  %2514 = vmatpush1.bf16.msra.mxu0 %v19475_v32  ;;  %v19496_v32 = vld [vmem:[#allocation7 + $0x250] ss:$36 sps:$4 sm:$0xff]  }
 0x13b   : > { %1982 = vmatprep.mubr.bf16.mxu0 %v26010_v0  ;;  %2515 = vmatprep.subr.bf16.mxu0 %v19480_v63  ;;  %v19499_v63 = vld [vmem:[#allocation7 + $0x18] ss:$36 sps:$4 sm:$0xff]  }
 0x13c   : > { %2295 = vmatprep.mubr.bf16.mxu1 %v21161_v12  ;;  %v19555_v12 = vld [vmem:[#allocation7 + $0x334] ss:$36 sps:$4 sm:$0xff]  }
 0x13e   : > { %2516 = vmatpush1.bf16.msra.mxu0 %v19478_v6  ;;  %v19504_v6 = vld [vmem:[#allocation7 + $0x29c] ss:$36 sps:$4 sm:$0xff]  }
 0x13f   : > { %2517 = vmatprep.subr.bf16.mxu0 %v19486_v13  ;;  %v281_v13 = vld [vmem:[%s20879_s13 + $0x100] sm:$0xff] }
 0x141   : > { %1983 = vmatmul.mubr.bf16.gmra.mrb[8].mxu0 %v21205_v15 }
 0x142   : > { %2296 = vmatmul.mubr.bf16.gmra.mrb[88].mxu1 %v21171_v34  ;;  %2518 = vmatpush1.bf16.msra.mxu0 %v19484_v23  ;;  %v284_v23 = vld [vmem:[%s20879_s13 + $0x118] sm:$0xff] }
 0x143   : > { %1992 = vmatprep.mubr.bf16.mxu0 %v26010_v0  ;;  %2519 = vmatprep.subr.bf16.mxu0 %v19489_v25  ;;  %v19508_v25 = vld [vmem:[#allocation7 + $0x60] ss:$36 sps:$4 sm:$0xff]   ;;  %v21229_v36 = vpack.c.bf16 %v284_v23, %v281_v13  ;;  %v19520_v23 = vld [vmem:[#allocation7 + $0x3b8] ss:$36 sps:$4 sm:$0xff]  }
 0x144   : > { %2305 = vmatprep.mubr.bf16.mxu1 %v21173_v35  ;;  %v19534_v13 = vld [vmem:[#allocation7 + $0x13c] ss:$36 sps:$4 sm:$0xff]  }
 0x145   : > { %26295 = vst [vmem:[#allocation36_spill] sm:$0xff] %v21229_v36  ;;  %v19577_v35 = vld [vmem:[#allocation7 + $0x520] ss:$36 sps:$4 sm:$0xff]  }
 0x146   : > { %2520 = vmatpush1.bf16.msra.mxu0 %v19487_v14  ;;  %v19507_v14 = vld [vmem:[#allocation7 + $0x2e4] ss:$36 sps:$4 sm:$0xff]  }
 0x147   : > { %2521 = vmatprep.subr.bf16.mxu0 %v19492_v38  ;;  %v19505_v38 = vld [vmem:[#allocation7 + $0x2e0] ss:$36 sps:$4 sm:$0xff]  }
 0x149   : > { %1993 = vmatmul.mubr.bf16.gmra.mrb[12].mxu0 %v21213_v40 }
 0x14a   : > { %2306 = vmatmul.mubr.bf16.gmra.mrb[92].mxu1 %v21181_v39  ;;  %2522 = vmatpush1.bf16.msra.mxu0 %v19490_v47  ;;  %v19513_v47 = vld [vmem:[#allocation7 + $0x32c] ss:$36 sps:$4 sm:$0xff]   ;;  %v19549_v39 = vld [vmem:[#allocation7 + $0x2a4] ss:$36 sps:$4 sm:$0xff]  }
 0x14b   : > { %2002 = vmatprep.mubr.bf16.mxu0 %v26010_v0  ;;  %2523 = vmatprep.subr.bf16.mxu0 %v19495_v22  ;;  %v19517_v22 = vld [vmem:[#allocation7 + $0xa8] ss:$36 sps:$4 sm:$0xff]  }
 0x14c   : > { %2348 = vmatprep.mubr.bf16.mxu1 %v26010_v0 }
 0x14e   : > { %2524 = vmatpush1.bf16.msra.mxu0 %v19493_v24  ;;  %v19528_v24 = vld [vmem:[#allocation7 + $0xf4] ss:$36 sps:$4 sm:$0xff]  }
 0x14f   : > { %2525 = vmatprep.subr.bf16.mxu0 %v19498_v28  ;;  %v290_v28 = vld [vmem:[%s20879_s13 + $0x148] sm:$0xff] }
 0x151   : > { %2003 = vmatmul.mubr.bf16.gmra.mrb[16].mxu0 %v21221_v30 }
 0x152   : > { %2349 = vmatmul.mubr.bf16.vlgmr.msra.gmra.mrb[32].mxu1 %v21189_v49  ;;  %2526 = vmatpush1.bf16.msra.mxu0 %v19496_v32  ;;  %v19516_v32 = vld [vmem:[#allocation7 + $0x374] ss:$36 sps:$4 sm:$0xff]  }
 0x153   : > { %2896 = vmatpush1.bf16.msra.mxu1 %v19499_v63  ;;  %2527 = vmatprep.subr.bf16.mxu0 %v19504_v6  ;;  %v19526_v63 = vld [vmem:[#allocation7 + $0xf0] ss:$36 sps:$4 sm:$0xff]   ;;  %v21237_v6 = vpack.c.bf16 %v290_v28, %v287_v2  ;;  %v19523_v28 = vld [vmem:[#allocation7 + $0x400] ss:$36 sps:$4 sm:$0xff]  }
 0x154   : > { %2012 = vmatprep.mubr.bf16.mxu0 %v26010_v0  ;;  %2358 = vmatprep.mubr.bf16.mxu1 %v26010_v0 }
 0x155   : > { %2897 = vmatprep.subr.bf16.mxu1 %v19510_v5  ;;  %26296 = vst [vmem:[#allocation37_spill] sm:$0xff] %v21237_v6  ;;  %v19514_v5 = vld [vmem:[#allocation7 + $0x370] ss:$36 sps:$4 sm:$0xff]  }
 0x156   : > { %2528 = vmatpush1.bf16.msra.mxu0 %v19502_v9  ;;  %v19522_v9 = vld [vmem:[#allocation7 + $0x3bc] ss:$36 sps:$4 sm:$0xff]  }
 0x157   : > { %2898 = vmatpush1.bf16.msra.mxu1 %v19508_v25  ;;  %2529 = vmatprep.subr.bf16.mxu0 %v19507_v14  ;;  %v19532_v25 = vld [vmem:[#allocation7 + $0x138] ss:$36 sps:$4 sm:$0xff]   ;;  %v293_v14 = vld [vmem:[%s20879_s13 + $0x160] sm:$0xff] }
 0x158   : > { %2899 = vmatprep.subr.bf16.mxu1 %v19519_v31  ;;  %v296_v31 = vld [vmem:[%s20879_s13 + $0x178] sm:$0xff] }
 0x159   : > { %2013 = vmatmul.mubr.bf16.gmra.mrb[20].mxu0 %v21229_v36 }
 0x15a   : > { %2359 = vmatmul.mubr.bf16.gmra.mrb[36].mxu1 %v21197_v59  ;;  %2530 = vmatpush1.bf16.msra.mxu0 %v19505_v38  ;;  %v19537_v38 = vld [vmem:[#allocation7 + $0x184] ss:$36 sps:$4 sm:$0xff]   ;;  %v19544_v59 = vld [vmem:[#allocation7 + $0x258] ss:$36 sps:$4 sm:$0xff]  }
 0x15b   : > { %2022 = vmatprep.mubr.bf16.mxu0 %v26010_v0  ;;  %2531 = vmatprep.subr.bf16.mxu0 %v19513_v47  ;;  %v19525_v47 = vld [vmem:[#allocation7 + $0x404] ss:$36 sps:$4 sm:$0xff]  }
 0x15c   : > { %2368 = vmatprep.mubr.bf16.mxu1 %v26010_v0  ;;  %2900 = vmatpush1.bf16.msra.mxu1 %v19517_v22 }
 0x15d   : > { %2901 = vmatprep.subr.bf16.mxu1 %v19528_v24 }
 0x15e   : > { %2532 = vmatpush1.bf16.msra.mxu0 %v19511_v53  ;;  %v21249_v53 = vpack.c.bf16 %v296_v31, %v293_v14  ;;  %v19538_v14 = vld [vmem:[#allocation7 + $0x1c8] ss:$36 sps:$4 sm:$0xff]  }
 0x15f   : > { %2533 = vmatprep.subr.bf16.mxu0 %v19516_v32 }
 0x160   : > { %2902 = vmatpush1.bf16.msra.mxu1 %v19526_v63  ;;  %26297 = vst [vmem:[#allocation38_spill] sm:$0xff] %v21249_v53  ;;  %v19531_v63 = vld [vmem:[#allocation7 + $0x44c] ss:$36 sps:$4 sm:$0xff]  }
 0x161   : > { %2023 = vmatmul.mubr.bf16.gmra.mrb[24].mxu0 %v21237_v6  ;;  %2903 = vmatprep.subr.bf16.mxu1 %v19534_v13  ;;  %v19529_v13 = vld [vmem:[#allocation7 + $0x448] ss:$36 sps:$4 sm:$0xff]  }
 0x162   : > { %2369 = vmatmul.mubr.bf16.gmra.mrb[40].mxu1 %v21205_v15  ;;  %2534 = vmatpush1.bf16.msra.mxu0 %v19514_v5  ;;  %v19535_v5 = vld [vmem:[#allocation7 + $0x180] ss:$36 sps:$4 sm:$0xff]   ;;  %v26298_v15 = vmov 0  }
 0x163   : > { %2032 = vmatprep.mubr.bf16.mxu0 %v26010_v0  ;;  %2535 = vmatprep.subr.bf16.mxu0 %v19522_v9  ;;  %v19540_v9 = vld [vmem:[#allocation7 + $0x1cc] ss:$36 sps:$4 sm:$0xff]  }
 0x164   : > { %2378 = vmatprep.mubr.bf16.mxu1 %v26010_v0  ;;  %2904 = vmatpush1.bf16.msra.mxu1 %v19532_v25 }
 0x165   : > { %v21245_v22 = vpop.f32.mrb[0].mxu1  ;;  %2905 = vmatprep.subr.bf16.mxu1 %v19537_v38 }
 0x166   : > { %v21247_v24 = vpop.f32.mrb[1].mxu1  ;;  %2536 = vmatpush1.bf16.msra.mxu0 %v19520_v23  ;;  %v19567_v23 = vld [vmem:[#allocation7 + $0x494] ss:$36 sps:$4 sm:$0xff]  }
 0x167   : > { %v21251_v2 = vpop.f32.mrb[2].mxu1  ;;  %2537 = vmatprep.subr.bf16.mxu0 %v19525_v47 }
 0x168   : > { %v21253_v32 = vpop.f32.mrb[3].mxu1  ;;  %2906 = vmatpush1.bf16.msra.mxu1 %v19535_v5  ;;  %v19546_v5 = vld [vmem:[#allocation7 + $0x25c] ss:$36 sps:$4 sm:$0xff]  }
 0x169   : > { %2033 = vmatmul.mubr.bf16.gmra.mrb[28].mxu0 %v21249_v53  ;;  %2907 = vmatprep.subr.bf16.mxu1 %v19540_v9  ;;  %v19574_v9 = vld [vmem:[#allocation7 + $0x4d8] ss:$36 sps:$4 sm:$0xff]  }
 0x16a   : > { %2379 = vmatmul.mubr.bf16.gmra.mrb[44].mxu1 %v21213_v40  ;;  %2538 = vmatpush1.bf16.msra.mxu0 %v19523_v28  ;;  %v19543_v28 = vld [vmem:[#allocation7 + $0x214] ss:$36 sps:$4 sm:$0xff]  }
 0x16b   : > { %2388 = vmatprep.mubr.bf16.mxu1 %v26010_v0  ;;  %2539 = vmatprep.subr.bf16.mxu0 %v19531_v63  ;;  %v19565_v40 = vld [vmem:[#allocation7 + $0x490] ss:$36 sps:$4 sm:$0xff]   ;;  %v19576_v0 = vld [vmem:[#allocation7 + $0x4dc] ss:$36 sps:$4 sm:$0xff]  }
 0x16c   : > { %2541 = vmatprep.mubr.bf16.mxu0 %v20954_v61  ;;  %2908 = vmatpush1.bf16.msra.mxu1 %v19538_v14  ;;  %v19541_v63 = vld [vmem:[#allocation7 + $0x210] ss:$36 sps:$4 sm:$0xff]  }
 0x16d   : > { %v21259_v25 = vpop.f32.mrb[4].mxu1  ;;  %2909 = vmatprep.subr.bf16.mxu1 %v19543_v28  ;;  %v19547_v28 = vld [vmem:[#allocation7 + $0x2a0] ss:$36 sps:$4 sm:$0xff]  }
 0x16e   : > { %v21261_v31 = vpop.f32.mrb[5].mxu1  ;;  %2540 = vmatpush1.bf16.msra.mxu0 %v19529_v13 }
 0x16f   : > { %v21263_v38 = vpop.f32.mrb[6].mxu1  ;;  %2702 = vmatprep.subr.bf16.mxu0 %v19567_v23  ;;  %v19579_v23 = vld [vmem:[#allocation7 + $0x524] ss:$36 sps:$4 sm:$0xff]  }
 0x170   : > { %v21265_v47 = vpop.f32.mrb[7].mxu1  ;;  %2910 = vmatpush1.bf16.msra.mxu1 %v19541_v63  ;;  %v19580_v63 = vld [vmem:[#allocation7 + $0x568] ss:$36 sps:$4 sm:$0xff]  }
 0x171   : > { %2542 = vmatmul.mubr.bf16.vlgmr.msra.gmra.mrb[64].mxu0 %v20973_v41  ;;  %2911 = vmatprep.subr.bf16.mxu1 %v19546_v5 }
 0x172   : > { %2389 = vmatmul.mubr.bf16.gmra.mrb[48].mxu1 %v21221_v30  ;;  %2551 = vmatprep.mubr.bf16.mxu0 %v20977_v44 }
 0x173   : > { %2398 = vmatprep.mubr.bf16.mxu1 %v26298_v15  ;;  %2703 = vmatpush1.bf16.msra.mxu0 %v19565_v40  ;;  %v19582_v40 = vld [vmem:[#allocation7 + $0x56c] ss:$36 sps:$4 sm:$0xff]  }
 0x174   : > { %2704 = vmatprep.subr.bf16.mxu0 %v19576_v0  ;;  %2912 = vmatpush1.bf16.msra.mxu1 %v19544_v59  ;;  %v19552_v0 = vld [vmem:[#allocation7 + $0x2ec] ss:$36 sps:$4 sm:$0xff]   ;;  %v19585_v59 = vld [vmem:[#allocation7 + $0x5b4] ss:$36 sps:$4 sm:$0xff]  }
 0x175   : > { %v21271_v13 = vpop.f32.mrb[8].mxu1  ;;  %2913 = vmatprep.subr.bf16.mxu1 %v19549_v39  ;;  %v19553_v39 = vld [vmem:[#allocation7 + $0x330] ss:$36 sps:$4 sm:$0xff]  }
 0x176   : > { %v21273_v14 = vpop.f32.mrb[9].mxu1 }
 0x177   : > { %v21275_v30 = vpop.f32.mrb[10].mxu1  ;;  %2705 = vmatpush1.bf16.msra.mxu0 %v19574_v9  ;;  %v19550_v9 = vld [vmem:[#allocation7 + $0x2e8] ss:$36 sps:$4 sm:$0xff]  }
 0x178   : > { %v21277_v49 = vpop.f32.mrb[11].mxu1  ;;  %2706 = vmatprep.subr.bf16.mxu0 %v19579_v23  ;;  %2914 = vmatpush1.bf16.msra.mxu1 %v19547_v28  ;;  %v19558_v28 = vld [vmem:[#allocation7 + $0x37c] ss:$36 sps:$4 sm:$0xff]  }
 0x179   : > { %2552 = vmatmul.mubr.bf16.gmra.mrb[68].mxu0 %v20991_v54  ;;  %2915 = vmatprep.subr.bf16.mxu1 %v19552_v0  ;;  %v19583_v54 = vld [vmem:[#allocation7 + $0x5b0] ss:$36 sps:$4 sm:$0xff]  }
 0x17a   : > { %2399 = vmatmul.mubr.bf16.gmra.mrb[52].mxu1 %v21229_v36  ;;  %2561 = vmatprep.mubr.bf16.mxu0 %v20996_v57 }
 0x17b   : > { %2408 = vmatprep.mubr.bf16.mxu1 %v26298_v15  ;;  %2707 = vmatpush1.bf16.msra.mxu0 %v19577_v35  ;;  %v19591_v35 = vld [vmem:[#allocation7 + $0x5fc] ss:$36 sps:$4 sm:$0xff]  }
 0x17c   : > { %2708 = vmatprep.subr.bf16.mxu0 %v19582_v40  ;;  %2916 = vmatpush1.bf16.msra.mxu1 %v19550_v9  ;;  %v19589_v40 = vld [vmem:[#allocation7 + $0x5f8] ss:$36 sps:$4 sm:$0xff]   ;;  %v19594_v9 = vld [vmem:[#allocation7 + $0x644] ss:$36 sps:$4 sm:$0xff]  }
 0x17d   : > { %v21283_v5 = vpop.f32.mrb[12].mxu1  ;;  %2917 = vmatprep.subr.bf16.mxu1 %v19555_v12  ;;  %v19559_v12 = vld [vmem:[#allocation7 + $0x3c0] ss:$36 sps:$4 sm:$0xff]  }
 0x17e   : > { %v21285_v23 = vpop.f32.mrb[13].mxu1 }
 0x17f   : > { %v21287_v36 = vpop.f32.mrb[14].mxu1  ;;  %2709 = vmatpush1.bf16.msra.mxu0 %v19580_v63  ;;  %v19556_v63 = vld [vmem:[#allocation7 + $0x378] ss:$36 sps:$4 sm:$0xff]  }
 0x180   : > { %26299 = vst [vmem:[#allocation39_spill] sm:$0xff] %v21287_v36  ;;  %v21289_v34 = vpop.f32.mrb[15].mxu1  ;;  %2710 = vmatprep.subr.bf16.mxu0 %v19585_v59  ;;  %2918 = vmatpush1.bf16.msra.mxu1 %v19553_v39  ;;  %v19592_v36 = vld [vmem:[#allocation7 + $0x640] ss:$36 sps:$4 sm:$0xff]   ;;  %v19564_v39 = vld [vmem:[#allocation7 + $0x40c] ss:$36 sps:$4 sm:$0xff]  }
 0x181   : > { %26300 = vst [vmem:[#allocation40_spill] sm:$0xff] %v21289_v34  ;;  %2562 = vmatmul.mubr.bf16.gmra.mrb[72].mxu0 %v21010_v8  ;;  %2919 = vmatprep.subr.bf16.mxu1 %v19558_v28  ;;  %v19561_v34 = vld [vmem:[#allocation7 + $0x3c4] ss:$36 sps:$4 sm:$0xff]  }
 0x182   : > { %2409 = vmatmul.mubr.bf16.gmra.mrb[56].mxu1 %v21237_v6  ;;  %2571 = vmatprep.mubr.bf16.mxu0 %v21015_v11 }
 0x183   : > { %2418 = vmatprep.mubr.bf16.mxu1 %v26298_v15  ;;  %2711 = vmatpush1.bf16.msra.mxu0 %v19583_v54  ;;  %v19597_v54 = vld [vmem:[#allocation7 + $0x68c] ss:$36 sps:$4 sm:$0xff]  }
 0x184   : > { %2712 = vmatprep.subr.bf16.mxu0 %v19591_v35  ;;  %2920 = vmatpush1.bf16.msra.mxu1 %v19556_v63  ;;  %v19595_v35 = vld [vmem:[#allocation7 + $0x688] ss:$36 sps:$4 sm:$0xff]  }
 0x185   : > { %v21295_v0 = vpop.f32.mrb[16].mxu1  ;;  %2921 = vmatprep.subr.bf16.mxu1 %v19561_v34  ;;  %v19573_v34 = vld [vmem:[#allocation7 + $0x49c] ss:$36 sps:$4 sm:$0xff]  }
 0x186   : > { %v21297_v59 = vpop.f32.mrb[17].mxu1 }
 0x187   : > { %v21299_v6 = vpop.f32.mrb[18].mxu1  ;;  %2713 = vmatpush1.bf16.msra.mxu0 %v19589_v40  ;;  %v19562_v40 = vld [vmem:[#allocation7 + $0x408] ss:$36 sps:$4 sm:$0xff]  }
 0x188   : > { %v21301_v8 = vpop.f32.mrb[19].mxu1  ;;  %2714 = vmatprep.subr.bf16.mxu0 %v19594_v9  ;;  %2922 = vmatpush1.bf16.msra.mxu1 %v19559_v12 }
 0x189   : > { %26301 = vst [vmem:[#allocation41_spill] sm:$0xff] %v21301_v8  ;;  %2572 = vmatmul.mubr.bf16.gmra.mrb[76].mxu0 %v21029_v27  ;;  %2923 = vmatprep.subr.bf16.mxu1 %v19564_v39  ;;  %v19570_v27 = vld [vmem:[#allocation7 + $0x454] ss:$36 sps:$4 sm:$0xff]  }
 0x18a   : > { %2419 = vmatmul.mubr.bf16.gmra.mrb[60].mxu1 %v21249_v53  ;;  %2581 = vmatprep.mubr.bf16.mxu0 %v21034_v33  ;;  %v19568_v8 = vld [vmem:[#allocation7 + $0x450] ss:$36 sps:$4 sm:$0xff]  }
 0x18b   : > { %2428 = vmatprep.mubr.bf16.mxu1 %v26298_v15  ;;  %2715 = vmatpush1.bf16.msra.mxu0 %v19592_v36 }
 0x18c   : > { %2716 = vmatprep.subr.bf16.mxu0 %v19597_v54  ;;  %2924 = vmatpush1.bf16.msra.mxu1 %v19562_v40 }
 0x18d   : > { %v21307_v28 = vpop.f32.mrb[20].mxu1  ;;  %2925 = vmatprep.subr.bf16.mxu1 %v19570_v27 }
 0x18e   : > { %v21309_v63 = vpop.f32.mrb[21].mxu1 }
 0x18f   : > { %v21311_v9 = vpop.f32.mrb[22].mxu1  ;;  %2717 = vmatpush1.bf16.msra.mxu0 %v19595_v35 }
 0x190   : > { %v21313_v53 = vpop.f32.mrb[23].mxu1  ;;  %2926 = vmatpush1.bf16.msra.mxu1 %v19568_v8 }
 0x191   : > { %2582 = vmatmul.mubr.bf16.gmra.mrb[80].mxu0 %v21046_v20  ;;  %3088 = vmatprep.subr.bf16.mxu1 %v19573_v34  ;;  %v19616_v34 = vld [vmem:[#allocation7 + $0x260] ss:$36 sps:$4 sm:$0xff]  }
 0x192   : > { %2429 = vmatmul.mubr.bf16.gmra.mrb[64].mxu1 %v20939_v37  ;;  %2591 = vmatprep.mubr.bf16.mxu0 %v21049_v43 }
 0x193   : > { %2438 = vmatprep.mubr.bf16.mxu1 %v26298_v15  ;;  %16703 = vmatprep.subr.bf16.mxu0 %v19616_v34 }
 0x195   : > { %v21319_v36 = vpop.f32.mrb[24].mxu1 }
 0x196   : > { %v21321_v12 = vpop.f32.mrb[25].mxu1 }
 0x197   : > { %v21323_v54 = vpop.f32.mrb[26].mxu1 }
 0x198   : > { %v21325_v39 = vpop.f32.mrb[27].mxu1 }
 0x199   : > { %2592 = vmatmul.mubr.bf16.gmra.mrb[84].mxu0 %v21061_v26 }
 0x19a   : > { %2439 = vmatmul.mubr.bf16.gmra.mrb[68].mxu1 %v20946_v48  ;;  %2601 = vmatprep.mubr.bf16.mxu0 %v21064_v51 }
 0x19b   : > { %2448 = vmatprep.mubr.bf16.mxu1 %v26298_v15 }
 0x19d   : > { %v21331_v35 = vpop.f32.mrb[28].mxu1 }
 0x19e   : > { %v21333_v27 = vpop.f32.mrb[29].mxu1 }
 0x19f   : > { %v21335_v8 = vpop.f32.mrb[30].mxu1 }
 0x1a0   : > { %v21337_v40 = vpop.f32.mrb[31].mxu1 }
 0x1a1   : > { %2602 = vmatmul.mubr.bf16.gmra.mrb[88].mxu0 %v21075_v4 }
 0x1a2   : > { %2449 = vmatmul.mubr.bf16.gmra.mrb[72].mxu1 %v20956_v62  ;;  %2611 = vmatprep.mubr.bf16.mxu0 %v21077_v60 }
 0x1a3   : > { %2458 = vmatprep.mubr.bf16.mxu1 %v26298_v15 }
 0x1a9   : > { %2612 = vmatmul.mubr.bf16.gmra.mrb[92].mxu0 %v21087_v10 }
 0x1aa   : > { %2459 = vmatmul.mubr.bf16.gmra.mrb[76].mxu1 %v20963_v19  ;;  %2621 = vmatprep.mubr.bf16.mxu0 %v21089_v17 }
 0x1ab   : > { %2468 = vmatprep.mubr.bf16.mxu1 %v26298_v15 }
 0x1b1   : > { %2622 = vmatmul.mubr.bf16.gmra.mrb[96].mxu0 %v21099_v16 }
 0x1b2   : > { %2469 = vmatmul.mubr.bf16.gmra.mrb[80].mxu1 %v20975_v42  ;;  %2631 = vmatprep.mubr.bf16.mxu0 %v21101_v18 }
 0x1b3   : > { %2478 = vmatprep.mubr.bf16.mxu1 %v26298_v15 }
 0x1b9   : > { %2632 = vmatmul.mubr.bf16.gmra.mrb[100].mxu0 %v21111_v45 }
 0x1ba   : > { %2479 = vmatmul.mubr.bf16.gmra.mrb[84].mxu1 %v20993_v55  ;;  %2641 = vmatprep.mubr.bf16.mxu0 %v21113_v46 }
 0x1bb   : > { %2488 = vmatprep.mubr.bf16.mxu1 %v26298_v15 }
 0x1c1   : > { %2642 = vmatmul.mubr.bf16.gmra.mrb[104].mxu0 %v21123_v50 }
 0x1c2   : > { %2489 = vmatmul.mubr.bf16.gmra.mrb[88].mxu1 %v21012_v7  ;;  %2651 = vmatprep.mubr.bf16.mxu0 %v21125_v52 }
 0x1c3   : > { %2498 = vmatprep.mubr.bf16.mxu1 %v26298_v15 }
 0x1c4   : > { %v1851_v42 = vpop.f32.mrb[32].mxu0 }
 0x1c5   : > { %v1853_v19 = vpop.f32.mrb[33].mxu0  ;;  %v2045_v55 = vadd.f32 %v21245_v22, %v1851_v42 }
 0x1c6   : > { %v1855_v62 = vpop.f32.mrb[34].mxu0  ;;  %v2047_v48 = vadd.f32 %v21247_v24, %v1853_v19 }
 0x1c7   : > { %v1857_v37 = vpop.f32.mrb[35].mxu0  ;;  %v2049_v46 = vadd.f32 %v21251_v2, %v1855_v62 }
 0x1c8   : > { %v2051_v7 = vadd.f32 %v21253_v32, %v1857_v37  ;;  %v19571_v37 = vld [vmem:[#allocation7 + $0x498] ss:$36 sps:$4 sm:$0xff]  }
 0x1c9   : > { %2652 = vmatmul.mubr.bf16.gmra.mrb[108].mxu0 %v21135_v56  ;;  %v21365_v50 = vpack.c.bf16 %v2049_v46, %v2045_v55 }
 0x1ca   : > { %2499 = vmatmul.mubr.bf16.gmra.mrb[92].mxu1 %v21031_v29  ;;  %2661 = vmatprep.mubr.bf16.mxu0 %v21137_v58  ;;  %v21369_v34 = vpack.c.bf16 %v2051_v7, %v2047_v48  ;;  %v19588_v29 = vld [vmem:[#allocation7 + $0x4e4] ss:$36 sps:$4 sm:$0xff]  }
 0x1cb   : > { %26302 = vst [vmem:[#allocation42_spill] sm:$0xff] %v21365_v50  ;;  %2927 = vmatprep.mubr.bf16.mxu1 %v20954_v61  ;;  %v19586_v7 = vld [vmem:[#allocation7 + $0x4e0] ss:$36 sps:$4 sm:$0xff]  }
 0x1cc   : > { %26303 = vst [vmem:[#allocation43_spill] sm:$0xff] %v21369_v34  ;;  %v1861_v42 = vpop.f32.mrb[36].mxu0  ;;  %v26319_v34 = vld [vmem:[#allocation30_spill] sm:$0xff] }
 0x1cd   : > { %v2055_v19 = vadd.f32 %v21259_v25, %v1861_v42  ;;  %v1863_v22 = vpop.f32.mrb[37].mxu0  ;;  %v19600_v25 = vld [vmem:[#allocation7 + $0x52c] ss:$36 sps:$4 sm:$0xff]  }
 0x1ce   : > { %v2057_v62 = vadd.f32 %v21261_v31, %v1863_v22  ;;  %v1865_v24 = vpop.f32.mrb[38].mxu0 }
 0x1cf   : > { %v2059_v2 = vadd.f32 %v21263_v38, %v1865_v24  ;;  %v1867_v32 = vpop.f32.mrb[39].mxu0  ;;  %v19598_v24 = vld [vmem:[#allocation7 + $0x528] ss:$36 sps:$4 sm:$0xff]  }
 0x1d0   : > { %v2061_v55 = vadd.f32 %v21265_v47, %v1867_v32 }
 0x1d1   : > { %v21375_v46 = vpack.c.bf16 %v2059_v2, %v2055_v19  ;;  %2662 = vmatmul.mubr.bf16.gmra.mrb[112].mxu0 %v21147_v1  ;;  %v19603_v2 = vld [vmem:[#allocation7 + $0x574] ss:$36 sps:$4 sm:$0xff]  }
 0x1d2   : > { %2928 = vmatmul.mubr.bf16.vlgmr.msra.gmra.mrb[96].mxu1 %v20973_v41  ;;  %v21379_v48 = vpack.c.bf16 %v2061_v55, %v2057_v62  ;;  %2671 = vmatprep.mubr.bf16.mxu0 %v21149_v3  ;;  %v26309_v55 = vld [vmem:[#allocation27_spill] sm:$0xff] }
 0x1d3   : > { %26304 = vst [vmem:[#allocation44_spill] sm:$0xff] %v21375_v46  ;;  %3089 = vmatpush1.bf16.msra.mxu1 %v19571_v37  ;;  %2937 = vmatprep.mubr.bf16.mxu1 %v20977_v44 }
 0x1d4   : > { %26305 = vst [vmem:[#allocation45_spill] sm:$0xff] %v21379_v48  ;;  %3090 = vmatprep.subr.bf16.mxu1 %v19588_v29  ;;  %v1871_v31 = vpop.f32.mrb[40].mxu0  ;;  %v26307_v29 = vld [vmem:[#allocation19_spill] sm:$0xff]  ;;  %v26313_v48 = vld [vmem:[#allocation28_spill] sm:$0xff] }
 0x1d5   : > { %v2065_v38 = vadd.f32 %v21271_v13, %v1871_v31  ;;  %v1873_v47 = vpop.f32.mrb[41].mxu0 }
 0x1d6   : > { %v2067_v42 = vadd.f32 %v21273_v14, %v1873_v47  ;;  %v1875_v19 = vpop.f32.mrb[42].mxu0  ;;  %v26310_v47 = vld [vmem:[#allocation39_spill] sm:$0xff] }
 0x1d7   : > { %3091 = vmatpush1.bf16.msra.mxu1 %v19586_v7  ;;  %v2069_v22 = vadd.f32 %v21275_v30, %v1875_v19  ;;  %v1877_v62 = vpop.f32.mrb[43].mxu0  ;;  %v19601_v30 = vld [vmem:[#allocation7 + $0x570] ss:$36 sps:$4 sm:$0xff]   ;;  %v19606_v7 = vld [vmem:[#allocation7 + $0x5bc] ss:$36 sps:$4 sm:$0xff]  }
 0x1d8   : > { %3092 = vmatprep.subr.bf16.mxu1 %v19600_v25  ;;  %v2071_v37 = vadd.f32 %v21277_v49, %v1877_v62  ;;  %v26311_v62 = vld [vmem:[#allocation40_spill] sm:$0xff] }
 0x1d9   : > { %v21387_v32 = vpack.c.bf16 %v2069_v22, %v2065_v38  ;;  %2672 = vmatmul.mubr.bf16.gmra.mrb[116].mxu0 %v21159_v21 }
 0x1da   : > { %2938 = vmatmul.mubr.bf16.gmra.mrb[100].mxu1 %v26307_v29  ;;  %v21391_v13 = vpack.c.bf16 %v2071_v37, %v2067_v42  ;;  %2681 = vmatprep.mubr.bf16.mxu0 %v26309_v55  ;;  %v19604_v42 = vld [vmem:[#allocation7 + $0x5b8] ss:$36 sps:$4 sm:$0xff]  }
 0x1db   : > { %26306 = vst [vmem:[#allocation46_spill] sm:$0xff] %v21387_v32  ;;  %2947 = vmatprep.mubr.bf16.mxu1 %v20996_v57  ;;  %3093 = vmatpush1.bf16.msra.mxu1 %v19598_v24 }
 0x1dc   : > { %26308 = vst [vmem:[#allocation19_spill] sm:$0xff] %v21391_v13  ;;  %v1881_v14 = vpop.f32.mrb[44].mxu0  ;;  %3094 = vmatprep.subr.bf16.mxu1 %v19603_v2  ;;  %v19609_v13 = vld [vmem:[#allocation7 + $0x604] ss:$36 sps:$4 sm:$0xff]   ;;  %v26314_v2 = vld [vmem:[#allocation21_spill] sm:$0xff] }
 0x1dd   : > { %v2075_v49 = vadd.f32 %v21283_v5, %v1881_v14  ;;  %v1883_v25 = vpop.f32.mrb[45].mxu0  ;;  %v26316_v14 = vld [vmem:[#allocation29_spill] sm:$0xff] }
 0x1de   : > { %v2077_v31 = vadd.f32 %v21285_v23, %v1883_v25  ;;  %v1885_v38 = vpop.f32.mrb[46].mxu0  ;;  %v19607_v23 = vld [vmem:[#allocation7 + $0x600] ss:$36 sps:$4 sm:$0xff]   ;;  %v19612_v25 = vld [vmem:[#allocation7 + $0x64c] ss:$36 sps:$4 sm:$0xff]  }
 0x1df   : > { %v2079_v19 = vadd.f32 %v26310_v47, %v1885_v38  ;;  %v1887_v22 = vpop.f32.mrb[47].mxu0  ;;  %3095 = vmatpush1.bf16.msra.mxu1 %v19601_v30 }
 0x1e0   : > { %v2081_v37 = vadd.f32 %v26311_v62, %v1887_v22  ;;  %3096 = vmatprep.subr.bf16.mxu1 %v19606_v7  ;;  %v26317_v62 = vld [vmem:[#allocation41_spill] sm:$0xff] }
 0x1e1   : > { %v21399_v24 = vpack.c.bf16 %v2079_v19, %v2075_v49  ;;  %2682 = vmatmul.mubr.bf16.gmra.mrb[120].mxu0 %v26313_v48 }
 0x1e2   : > { %2948 = vmatmul.mubr.bf16.gmra.mrb[104].mxu1 %v26314_v2  ;;  %v21403_v5 = vpack.c.bf16 %v2081_v37, %v2077_v31  ;;  %2691 = vmatprep.mubr.bf16.mxu0 %v26316_v14  ;;  %v19610_v31 = vld [vmem:[#allocation7 + $0x648] ss:$36 sps:$4 sm:$0xff]  }
 0x1e3   : > { %26312 = vst [vmem:[#allocation27_spill] sm:$0xff] %v21399_v24  ;;  %2957 = vmatprep.mubr.bf16.mxu1 %v21015_v11  ;;  %3097 = vmatpush1.bf16.msra.mxu1 %v19604_v42 }
 0x1e4   : > { %26315 = vst [vmem:[#allocation39_spill] sm:$0xff] %v21403_v5  ;;  %v1891_v30 = vpop.f32.mrb[48].mxu0  ;;  %3098 = vmatprep.subr.bf16.mxu1 %v19609_v13  ;;  %v19615_v5 = vld [vmem:[#allocation7 + $0x694] ss:$36 sps:$4 sm:$0xff]   ;;  %v26320_v13 = vld [vmem:[#allocation23_spill] sm:$0xff] }
 0x1e5   : > { %v2085_v7 = vadd.f32 %v21295_v0, %v1891_v30  ;;  %v1893_v38 = vpop.f32.mrb[49].mxu0 }
 0x1e6   : > { %v2087_v49 = vadd.f32 %v21297_v59, %v1893_v38  ;;  %v1895_v47 = vpop.f32.mrb[50].mxu0 }
 0x1e7   : > { %v2089_v19 = vadd.f32 %v21299_v6, %v1895_v47  ;;  %v1897_v22 = vpop.f32.mrb[51].mxu0  ;;  %3099 = vmatpush1.bf16.msra.mxu1 %v19607_v23  ;;  %v19613_v6 = vld [vmem:[#allocation7 + $0x690] ss:$36 sps:$4 sm:$0xff]   ;;  %v21419_v23 = vld [vmem:[#allocation7 + $0x4a0] ss:$36 sps:$4 sm:$0xff]  }
 0x1e8   : > { %v2091_v37 = vadd.f32 %v26317_v62, %v1897_v22  ;;  %3100 = vmatprep.subr.bf16.mxu1 %v19612_v25  ;;  %v19618_v62 = vld [vmem:[#allocation7 + $0x2a8] ss:$36 sps:$4 sm:$0xff]  }
 0x1e9   : > { %v21411_v42 = vpack.c.bf16 %v2089_v19, %v2085_v7  ;;  %2692 = vmatmul.mubr.bf16.gmra.mrb[124].mxu0 %v26319_v34  ;;  %v19617_v19 = vld [vmem:[#allocation7 + $0x20] ss:$36 sps:$4 sm:$0xff]  }
 0x1ea   : > { %2958 = vmatmul.mubr.bf16.gmra.mrb[108].mxu1 %v26320_v13  ;;  %v21415_v0 = vpack.c.bf16 %v2091_v37, %v2087_v49  ;;  %2734 = vmatprep.mubr.bf16.mxu0 %v26298_v15 }
 0x1eb   : > { %26318 = vst [vmem:[#allocation40_spill] sm:$0xff] %v21411_v42  ;;  %2967 = vmatprep.mubr.bf16.mxu1 %v21034_v33  ;;  %3101 = vmatpush1.bf16.msra.mxu1 %v19610_v31 }
 0x1ec   : > { %26321 = vst [vmem:[#allocation28_spill] sm:$0xff] %v21415_v0  ;;  %v1901_v59 = vpop.f32.mrb[52].mxu0  ;;  %3102 = vmatprep.subr.bf16.mxu1 %v19615_v5  ;;  %v26323_v5 = vld [vmem:[#allocation31_spill] sm:$0xff] }
 0x1ed   : > { %v2095_v30 = vadd.f32 %v21307_v28, %v1901_v59  ;;  %v1903_v25 = vpop.f32.mrb[53].mxu0 }
 0x1ee   : > { %v2097_v7 = vadd.f32 %v21309_v63, %v1903_v25  ;;  %v1905_v38 = vpop.f32.mrb[54].mxu0  ;;  %v19619_v63 = vld [vmem:[#allocation7 + $0x68] ss:$36 sps:$4 sm:$0xff]  }
 0x1ef   : > { %v2099_v47 = vadd.f32 %v21311_v9, %v1905_v38  ;;  %v1907_v49 = vpop.f32.mrb[55].mxu0  ;;  %3103 = vmatpush1.bf16.msra.mxu1 %v19613_v6 }
 0x1f0   : > { %v2101_v22 = vadd.f32 %v21313_v53, %v1907_v49  ;;  %17343 = vmatprep.subr.bf16.mxu1 %v21419_v23  ;;  %v19621_v53 = vld [vmem:[#allocation7 + $0x2f0] ss:$36 sps:$4 sm:$0xff]   ;;  %v19624_v49 = vld [vmem:[#allocation7 + $0x338] ss:$36 sps:$4 sm:$0xff]  }
 0x1f1   : > { %v21426_v31 = vpack.c.bf16 %v2099_v47, %v2095_v30  ;;  %2735 = vmatmul.mubr.bf16.vlgmr.msra.gmra.mrb[64].mxu0 %v26323_v5 }
 0x1f2   : > { %2968 = vmatmul.mubr.bf16.gmra.mrb[112].mxu1 %v21046_v20  ;;  %v21430_v28 = vpack.c.bf16 %v2101_v22, %v2097_v7  ;;  %2744 = vmatprep.mubr.bf16.mxu0 %v26298_v15  ;;  %v19622_v7 = vld [vmem:[#allocation7 + $0xb0] ss:$36 sps:$4 sm:$0xff]  }
 0x1f3   : > { %26322 = vst [vmem:[#allocation21_spill] sm:$0xff] %v21426_v31  ;;  %2977 = vmatprep.mubr.bf16.mxu1 %v21049_v43  ;;  %16704 = vmatpush3.bf16.msra.mxu0 %v19617_v19  ;;  %v26326_v22 = vld [vmem:[#allocation32_spill] sm:$0xff] }
 0x1f4   : > { %26324 = vst [vmem:[#allocation29_spill] sm:$0xff] %v21430_v28  ;;  %v1911_v9 = vpop.f32.mrb[56].mxu0  ;;  %16705 = vmatprep.subr.bf16.mxu0 %v19618_v62  ;;  %v19627_v62 = vld [vmem:[#allocation7 + $0x380] ss:$36 sps:$4 sm:$0xff]  }
 0x1f5   : > { %v2105_v37 = vadd.f32 %v21319_v36, %v1911_v9  ;;  %v1913_v6 = vpop.f32.mrb[57].mxu0 }
 0x1f6   : > { %v2107_v59 = vadd.f32 %v21321_v12, %v1913_v6  ;;  %v1915_v30 = vpop.f32.mrb[58].mxu0  ;;  %v19625_v12 = vld [vmem:[#allocation7 + $0xf8] ss:$36 sps:$4 sm:$0xff]  }
 0x1f7   : > { %v2109_v25 = vadd.f32 %v21323_v54, %v1915_v30  ;;  %v1917_v38 = vpop.f32.mrb[59].mxu0  ;;  %16706 = vmatpush3.bf16.msra.mxu0 %v19619_v63 }
 0x1f8   : > { %v2111_v47 = vadd.f32 %v21325_v39, %v1917_v38  ;;  %16707 = vmatprep.subr.bf16.mxu0 %v19621_v53 }
 0x1f9   : > { %v21438_v19 = vpack.c.bf16 %v2109_v25, %v2105_v37  ;;  %2745 = vmatmul.mubr.bf16.gmra.mrb[68].mxu0 %v26326_v22  ;;  %v19630_v25 = vld [vmem:[#allocation7 + $0x3c8] ss:$36 sps:$4 sm:$0xff]  }
 0x1fa   : > { %2978 = vmatmul.mubr.bf16.gmra.mrb[116].mxu1 %v21061_v26  ;;  %v21442_v36 = vpack.c.bf16 %v2111_v47, %v2107_v59  ;;  %2754 = vmatprep.mubr.bf16.mxu0 %v26298_v15  ;;  %v19628_v59 = vld [vmem:[#allocation7 + $0x140] ss:$36 sps:$4 sm:$0xff]   ;;  %v19633_v47 = vld [vmem:[#allocation7 + $0x410] ss:$36 sps:$4 sm:$0xff]  }
 0x1fb   : > { %26325 = vst [vmem:[#allocation41_spill] sm:$0xff] %v21438_v19  ;;  %2987 = vmatprep.mubr.bf16.mxu1 %v21064_v51  ;;  %16708 = vmatpush3.bf16.msra.mxu0 %v19622_v7  ;;  %v26329_v7 = vld [vmem:[#allocation33_spill] sm:$0xff]  ;;  %v26348_v19 = vld [vmem:[#allocation38_spill] sm:$0xff] }
 0x1fc   : > { %26327 = vst [vmem:[#allocation30_spill] sm:$0xff] %v21442_v36  ;;  %v1921_v54 = vpop.f32.mrb[60].mxu0  ;;  %16709 = vmatprep.subr.bf16.mxu0 %v19624_v49 }
 0x1fd   : > { %v2115_v39 = vadd.f32 %v21331_v35, %v1921_v54  ;;  %v1923_v63 = vpop.f32.mrb[61].mxu0  ;;  %v19634_v54 = vld [vmem:[#allocation7 + $0x1d0] ss:$36 sps:$4 sm:$0xff]  }
 0x1fe   : > { %v2117_v9 = vadd.f32 %v21333_v27, %v1923_v63  ;;  %v1925_v53 = vpop.f32.mrb[62].mxu0  ;;  %v19631_v27 = vld [vmem:[#allocation7 + $0x188] ss:$36 sps:$4 sm:$0xff]  }
 0x1ff   : > { %v2119_v37 = vadd.f32 %v21335_v8, %v1925_v53  ;;  %v1927_v6 = vpop.f32.mrb[63].mxu0  ;;  %16710 = vmatpush3.bf16.msra.mxu0 %v19625_v12  ;;  %v19637_v53 = vld [vmem:[#allocation7 + $0x218] ss:$36 sps:$4 sm:$0xff]  }
 0x200   : > { %v2121_v30 = vadd.f32 %v21337_v40, %v1927_v6  ;;  %16711 = vmatprep.subr.bf16.mxu0 %v19627_v62 }
 0x201   : > { %v21450_v38 = vpack.c.bf16 %v2119_v37, %v2115_v39  ;;  %2755 = vmatmul.mubr.bf16.gmra.mrb[72].mxu0 %v26329_v7  ;;  %v19636_v39 = vld [vmem:[#allocation7 + $0x458] ss:$36 sps:$4 sm:$0xff]  }
 0x202   : > { %2988 = vmatmul.mubr.bf16.gmra.mrb[120].mxu1 %v21075_v4  ;;  %v21454_v35 = vpack.c.bf16 %v2121_v30, %v2117_v9  ;;  %2764 = vmatprep.mubr.bf16.mxu0 %v26298_v15  ;;  %v26333_v9 = vld [vmem:[#allocation34_spill] sm:$0xff] }
 0x203   : > { %26328 = vst [vmem:[#allocation23_spill] sm:$0xff] %v21450_v38  ;;  %2997 = vmatprep.mubr.bf16.mxu1 %v21077_v60  ;;  %16712 = vmatpush3.bf16.msra.mxu0 %v19628_v59 }
 0x204   : > { %26330 = vst [vmem:[#allocation31_spill] sm:$0xff] %v21454_v35  ;;  %v1964_v8 = vpop.f32.mrb[0].mxu0  ;;  %16713 = vmatprep.subr.bf16.mxu0 %v19630_v25 }
 0x205   : > { %v1966_v40 = vpop.f32.mrb[1].mxu0 }
 0x206   : > { %v1968_v49 = vpop.f32.mrb[2].mxu0 }
 0x207   : > { %v1970_v12 = vpop.f32.mrb[3].mxu0  ;;  %16714 = vmatpush3.bf16.msra.mxu0 %v19631_v27  ;;  %v21458_v62 = vpack.c.bf16 %v1968_v49, %v1964_v8  ;;  %v26336_v8 = vld [vmem:[#allocation35_spill] sm:$0xff] }
 0x208   : > { %16715 = vmatprep.subr.bf16.mxu0 %v19633_v47  ;;  %v21460_v63 = vpack.c.bf16 %v1970_v12, %v1966_v40 }
 0x209   : > { %26331 = vst [vmem:[#allocation32_spill] sm:$0xff] %v21458_v62  ;;  %2765 = vmatmul.mubr.bf16.gmra.mrb[76].mxu0 %v26333_v9 }
 0x20a   : > { %26332 = vst [vmem:[#allocation33_spill] sm:$0xff] %v21460_v63  ;;  %2998 = vmatmul.mubr.bf16.gmra.mrb[124].mxu1 %v21087_v10  ;;  %2774 = vmatprep.mubr.bf16.mxu0 %v26298_v15 }
 0x20b   : > { %3007 = vmatprep.mubr.bf16.mxu1 %v21089_v17  ;;  %16716 = vmatpush3.bf16.msra.mxu0 %v19634_v54 }
 0x20c   : > { %v1974_v37 = vpop.f32.mrb[4].mxu0  ;;  %16717 = vmatprep.subr.bf16.mxu0 %v19636_v39 }
 0x20d   : > { %v1976_v6 = vpop.f32.mrb[5].mxu0 }
 0x20e   : > { %v1978_v59 = vpop.f32.mrb[6].mxu0 }
 0x20f   : > { %v1980_v30 = vpop.f32.mrb[7].mxu0  ;;  %16718 = vmatpush3.bf16.msra.mxu0 %v19637_v53  ;;  %v21466_v25 = vpack.c.bf16 %v1978_v59, %v1974_v37  ;;  %v26339_v53 = vld [vmem:[#allocation36_spill] sm:$0xff]  ;;  %v26340_v37 = vld [vmem:[#allocation25_spill] sm:$0xff] }
 0x210   : > { %v21468_v27 = vpack.c.bf16 %v1980_v30, %v1976_v6 }
 0x211   : > { %26334 = vst [vmem:[#allocation34_spill] sm:$0xff] %v21466_v25  ;;  %2775 = vmatmul.mubr.bf16.gmra.mrb[80].mxu0 %v26336_v8 }
 0x212   : > { %26335 = vst [vmem:[#allocation47_spill] sm:$0xff] %v21468_v27  ;;  %3008 = vmatmul.mubr.bf16.gmra.mrb[128].mxu1 %v21099_v16  ;;  %2784 = vmatprep.mubr.bf16.mxu0 %v26298_v15 }
 0x213   : > { %3017 = vmatprep.mubr.bf16.mxu1 %v21101_v18 }
 0x214   : > { %v1984_v47 = vpop.f32.mrb[8].mxu0 }
 0x215   : > { %v1986_v40 = vpop.f32.mrb[9].mxu0 }
 0x216   : > { %v1988_v49 = vpop.f32.mrb[10].mxu0 }
 0x217   : > { %v1990_v12 = vpop.f32.mrb[11].mxu0  ;;  %v21474_v54 = vpack.c.bf16 %v1988_v49, %v1984_v47  ;;  %v26343_v47 = vld [vmem:[#allocation37_spill] sm:$0xff] }
 0x218   : > { %v21476_v39 = vpack.c.bf16 %v1990_v12, %v1986_v40  ;;  %v26344_v40 = vld [vmem:[#allocation26_spill] sm:$0xff] }
 0x219   : > { %26337 = vst [vmem:[#allocation35_spill] sm:$0xff] %v21474_v54  ;;  %2785 = vmatmul.mubr.bf16.gmra.mrb[84].mxu0 %v26339_v53 }
 0x21a   : > { %26338 = vst [vmem:[#allocation48_spill] sm:$0xff] %v21476_v39  ;;  %3018 = vmatmul.mubr.bf16.gmra.mrb[132].mxu1 %v21111_v45  ;;  %2794 = vmatprep.mubr.bf16.mxu0 %v26298_v15 }
 0x21b   : > { %3027 = vmatprep.mubr.bf16.mxu1 %v26340_v37 }
 0x21c   : > { %v1994_v6 = vpop.f32.mrb[12].mxu0 }
 0x21d   : > { %v1996_v59 = vpop.f32.mrb[13].mxu0 }
 0x21e   : > { %v1998_v30 = vpop.f32.mrb[14].mxu0 }
 0x21f   : > { %v2000_v35 = vpop.f32.mrb[15].mxu0  ;;  %v21482_v36 = vpack.c.bf16 %v1998_v30, %v1994_v6 }
 0x220   : > { %v21484_v28 = vpack.c.bf16 %v2000_v35, %v1996_v59 }
 0x221   : > { %26341 = vst [vmem:[#allocation36_spill] sm:$0xff] %v21482_v36  ;;  %2795 = vmatmul.mubr.bf16.gmra.mrb[88].mxu0 %v26343_v47 }
 0x222   : > { %26342 = vst [vmem:[#allocation25_spill] sm:$0xff] %v21484_v28  ;;  %3028 = vmatmul.mubr.bf16.gmra.mrb[136].mxu1 %v26344_v40  ;;  %2804 = vmatprep.mubr.bf16.mxu0 %v26298_v15 }
 0x223   : > { %3037 = vmatprep.mubr.bf16.mxu1 %v21125_v52 }
 0x224   : > { %v2004_v49 = vpop.f32.mrb[16].mxu0 }
 0x225   : > { %v2350_v12 = vpop.f32.mrb[32].mxu1  ;;  %v2006_v0 = vpop.f32.mrb[17].mxu0 }
 0x226   : > { %v2352_v39 = vpop.f32.mrb[33].mxu1  ;;  %v2008_v27 = vpop.f32.mrb[18].mxu0 }
 0x227   : > { %v2354_v63 = vpop.f32.mrb[34].mxu1  ;;  %v2010_v6 = vpop.f32.mrb[19].mxu0  ;;  %v21492_v35 = vpack.c.bf16 %v2008_v27, %v2004_v49 }
 0x228   : > { %v21490_v38 = vpack.c.bf16 %v2354_v63, %v2350_v12  ;;  %v2356_v30 = vpop.f32.mrb[35].mxu1  ;;  %v21496_v28 = vpack.c.bf16 %v2010_v6, %v2006_v0 }
 0x229   : > { %26346 = vst [vmem:[#allocation26_spill] sm:$0xff] %v21492_v35  ;;  %v21494_v59 = vpack.c.bf16 %v2356_v30, %v2352_v39  ;;  %2805 = vmatmul.mubr.bf16.gmra.mrb[92].mxu0 %v26348_v19 }
 0x22a   : > { %26345 = vst [vmem:[#allocation37_spill] sm:$0xff] %v21490_v38  ;;  %26347 = vst [vmem:[#allocation49_spill] sm:$0xff] %v21496_v28  ;;  %3038 = vmatmul.mubr.bf16.gmra.mrb[140].mxu1 %v21135_v56  ;;  %2814 = vmatprep.mubr.bf16.mxu0 %v26298_v15  ;;  %v26352_v28 = vld [vmem:[#allocation14_spill] sm:$0xff] }
 0x22b   : > { %3047 = vmatprep.mubr.bf16.mxu1 %v21137_v58 }
 0x22c   : > { %v2014_v31 = vpop.f32.mrb[20].mxu0 }
 0x22d   : > { %v2360_v42 = vpop.f32.mrb[36].mxu1  ;;  %v2016_v63 = vpop.f32.mrb[21].mxu0 }
 0x22e   : > { %v2362_v12 = vpop.f32.mrb[37].mxu1  ;;  %v2018_v38 = vpop.f32.mrb[22].mxu0 }
 0x22f   : > { %v2364_v36 = vpop.f32.mrb[38].mxu1  ;;  %v2020_v39 = vpop.f32.mrb[23].mxu0  ;;  %v21504_v0 = vpack.c.bf16 %v2018_v38, %v2014_v31 }
 0x230   : > { %v21502_v27 = vpack.c.bf16 %v2364_v36, %v2360_v42  ;;  %v2366_v49 = vpop.f32.mrb[39].mxu1  ;;  %v21506_v6 = vpack.c.bf16 %v2020_v39, %v2016_v63 }
 0x231   : > { %26350 = vst [vmem:[#allocation50_spill] sm:$0xff] %v21504_v0  ;;  %v21508_v30 = vpack.c.bf16 %v2366_v49, %v2362_v12  ;;  %2815 = vmatmul.mubr.bf16.gmra.mrb[96].mxu0 %v26352_v28 }
 0x232   : > { %26349 = vst [vmem:[#allocation38_spill] sm:$0xff] %v21502_v27  ;;  %26351 = vst [vmem:[#allocation51_spill] sm:$0xff] %v21506_v6  ;;  %3048 = vmatmul.mubr.bf16.gmra.mrb[144].mxu1 %v21147_v1  ;;  %2824 = vmatprep.mubr.bf16.mxu0 %v26298_v15  ;;  %v26356_v6 = vld [vmem:[#allocation15_spill] sm:$0xff] }
 0x233   : > { %3057 = vmatprep.mubr.bf16.mxu1 %v21149_v3 }
 0x234   : > { %v2024_v35 = vpop.f32.mrb[24].mxu0 }
 0x235   : > { %v2370_v54 = vpop.f32.mrb[40].mxu1  ;;  %v2026_v42 = vpop.f32.mrb[25].mxu0 }
 0x236   : > { %v2372_v36 = vpop.f32.mrb[41].mxu1  ;;  %v2028_v27 = vpop.f32.mrb[26].mxu0 }
 0x237   : > { %v2374_v25 = vpop.f32.mrb[42].mxu1  ;;  %v2030_v38 = vpop.f32.mrb[27].mxu0  ;;  %v21516_v12 = vpack.c.bf16 %v2028_v27, %v2024_v35 }
 0x238   : > { %v21514_v31 = vpack.c.bf16 %v2374_v25, %v2370_v54  ;;  %v2376_v63 = vpop.f32.mrb[43].mxu1  ;;  %v21520_v49 = vpack.c.bf16 %v2030_v38, %v2026_v42 }
 0x239   : > { %26354 = vst [vmem:[#allocation52_spill] sm:$0xff] %v21516_v12  ;;  %v21518_v39 = vpack.c.bf16 %v2376_v63, %v2372_v36  ;;  %2825 = vmatmul.mubr.bf16.gmra.mrb[100].mxu0 %v26356_v6 }
 0x23a   : > { %26353 = vst [vmem:[#allocation14_spill] sm:$0xff] %v21514_v31  ;;  %26355 = vst [vmem:[#allocation53_spill] sm:$0xff] %v21520_v49  ;;  %3058 = vmatmul.mubr.bf16.gmra.mrb[148].mxu1 %v21159_v21  ;;  %2834 = vmatprep.mubr.bf16.mxu0 %v26298_v15  ;;  %v26360_v49 = vld [vmem:[#allocation16_spill] sm:$0xff] }
 0x23b   : > { %3067 = vmatprep.mubr.bf16.mxu1 %v26309_v55 }
 0x23c   : > { %v2034_v0 = vpop.f32.mrb[28].mxu0 }
 0x23d   : > { %v2380_v62 = vpop.f32.mrb[44].mxu1  ;;  %v2036_v25 = vpop.f32.mrb[29].mxu0 }
 0x23e   : > { %v2382_v54 = vpop.f32.mrb[45].mxu1  ;;  %v2038_v31 = vpop.f32.mrb[30].mxu0 }
 0x23f   : > { %v2384_v24 = vpop.f32.mrb[46].mxu1  ;;  %v21526_v35 = vpack.c.bf16 %v2038_v31, %v2034_v0  ;;  %v2040_v42 = vpop.f32.mrb[31].mxu0 }
 0x240   : > { %v21528_v27 = vpack.c.bf16 %v2384_v24, %v2380_v62  ;;  %v2386_v36 = vpop.f32.mrb[47].mxu1  ;;  %v21530_v38 = vpack.c.bf16 %v2040_v42, %v2036_v25  ;;  %v26363_v25 = vld [vmem:[#allocation17_spill] sm:$0xff] }
 0x241   : > { %26357 = vst [vmem:[#allocation15_spill] sm:$0xff] %v21526_v35  ;;  %v21532_v63 = vpack.c.bf16 %v2386_v36, %v2382_v54  ;;  %2835 = vmatmul.mubr.bf16.gmra.mrb[104].mxu0 %v26360_v49  ;;  %v19623_v35 = vld [vmem:[#allocation7 + $0x4e8] ss:$36 sps:$4 sm:$0xff]  }
 0x242   : > { %26358 = vst [vmem:[#allocation54_spill] sm:$0xff] %v21528_v27  ;;  %26359 = vst [vmem:[#allocation55_spill] sm:$0xff] %v21530_v38  ;;  %3068 = vmatmul.mubr.bf16.gmra.mrb[152].mxu1 %v26313_v48  ;;  %2844 = vmatprep.mubr.bf16.mxu0 %v26298_v15 }
 0x243   : > { %3077 = vmatprep.mubr.bf16.mxu1 %v26316_v14 }
 0x245   : > { %v2390_v12 = vpop.f32.mrb[48].mxu1 }
 0x246   : > { %v2392_v32 = vpop.f32.mrb[49].mxu1 }
 0x247   : > { %v2394_v0 = vpop.f32.mrb[50].mxu1 }
 0x248   : > { %v21538_v31 = vpack.c.bf16 %v2394_v0, %v2390_v12  ;;  %v2396_v24 = vpop.f32.mrb[51].mxu1  ;;  %v26366_v0 = vld [vmem:[#allocation18_spill] sm:$0xff] }
 0x249   : > { %v21540_v62 = vpack.c.bf16 %v2396_v24, %v2392_v32  ;;  %2845 = vmatmul.mubr.bf16.gmra.mrb[108].mxu0 %v26363_v25  ;;  %v19626_v32 = vld [vmem:[#allocation7 + $0x530] ss:$36 sps:$4 sm:$0xff]  }
 0x24a   : > { %26361 = vst [vmem:[#allocation16_spill] sm:$0xff] %v21538_v31  ;;  %3078 = vmatmul.mubr.bf16.gmra.mrb[156].mxu1 %v26319_v34  ;;  %2854 = vmatprep.mubr.bf16.mxu0 %v26298_v15 }
 0x24b   : > { %26362 = vst [vmem:[#allocation56_spill] sm:$0xff] %v21540_v62  ;;  %3120 = vmatprep.mubr.bf16.mxu1 %v26298_v15 }
 0x24d   : > { %v2400_v54 = vpop.f32.mrb[52].mxu1 }
 0x24e   : > { %v2402_v42 = vpop.f32.mrb[53].mxu1 }
 0x24f   : > { %v2404_v36 = vpop.f32.mrb[54].mxu1 }
 0x250   : > { %v21546_v27 = vpack.c.bf16 %v2404_v36, %v2400_v54  ;;  %v2406_v38 = vpop.f32.mrb[55].mxu1 }
 0x251   : > { %v21548_v12 = vpack.c.bf16 %v2406_v38, %v2402_v42  ;;  %2855 = vmatmul.mubr.bf16.gmra.mrb[112].mxu0 %v26366_v0  ;;  %v19629_v42 = vld [vmem:[#allocation7 + $0x578] ss:$36 sps:$4 sm:$0xff]  }
 0x252   : > { %26364 = vst [vmem:[#allocation17_spill] sm:$0xff] %v21546_v27  ;;  %3121 = vmatmul.mubr.bf16.vlgmr.msra.gmra.mrb[96].mxu1 %v26323_v5  ;;  %2864 = vmatprep.mubr.bf16.mxu0 %v26298_v15 }
 0x253   : > { %26365 = vst [vmem:[#allocation57_spill] sm:$0xff] %v21548_v12  ;;  %17344 = vmatpush3.bf16.msra.mxu1 %v21419_v23  ;;  %3130 = vmatprep.mubr.bf16.mxu1 %v26298_v15  ;;  %v26369_v12 = vld [vmem:[#allocation20_spill] sm:$0xff]  ;;  %v19632_v23 = vld [vmem:[#allocation7 + $0x5c0] ss:$36 sps:$4 sm:$0xff]  }
 0x254   : > { %17345 = vmatprep.subr.bf16.mxu1 %v19623_v35 }
 0x255   : > { %v2410_v24 = vpop.f32.mrb[56].mxu1 }
 0x256   : > { %v2412_v31 = vpop.f32.mrb[57].mxu1 }
 0x257   : > { %17346 = vmatpush3.bf16.msra.mxu1 %v19623_v35  ;;  %v2414_v54 = vpop.f32.mrb[58].mxu1 }
 0x258   : > { %v21555_v36 = vpack.c.bf16 %v2414_v54, %v2410_v24  ;;  %v2416_v38 = vpop.f32.mrb[59].mxu1  ;;  %17347 = vmatprep.subr.bf16.mxu1 %v19626_v32 }
 0x259   : > { %v21557_v27 = vpack.c.bf16 %v2416_v38, %v2412_v31  ;;  %2865 = vmatmul.mubr.bf16.gmra.mrb[116].mxu0 %v26369_v12  ;;  %v19635_v31 = vld [vmem:[#allocation7 + $0x608] ss:$36 sps:$4 sm:$0xff]  }
 0x25a   : > { %26367 = vst [vmem:[#allocation18_spill] sm:$0xff] %v21555_v36  ;;  %3131 = vmatmul.mubr.bf16.gmra.mrb[100].mxu1 %v26326_v22  ;;  %2874 = vmatprep.mubr.bf16.mxu0 %v26298_v15 }
 0x25b   : > { %26368 = vst [vmem:[#allocation58_spill] sm:$0xff] %v21557_v27  ;;  %17348 = vmatpush3.bf16.msra.mxu1 %v19626_v32  ;;  %3140 = vmatprep.mubr.bf16.mxu1 %v26298_v15  ;;  %v26372_v27 = vld [vmem:[#allocation22_spill] sm:$0xff]  ;;  %v19638_v32 = vld [vmem:[#allocation7 + $0x650] ss:$36 sps:$4 sm:$0xff]  }
 0x25c   : > { %17349 = vmatprep.subr.bf16.mxu1 %v19629_v42 }
 0x25d   : > { %v2420_v35 = vpop.f32.mrb[60].mxu1 }
 0x25e   : > { %v2422_v46 = vpop.f32.mrb[61].mxu1 }
 0x25f   : > { %17350 = vmatpush3.bf16.msra.mxu1 %v19629_v42  ;;  %v2424_v24 = vpop.f32.mrb[62].mxu1 }
 0x260   : > { %v21563_v54 = vpack.c.bf16 %v2424_v24, %v2420_v35  ;;  %v2426_v36 = vpop.f32.mrb[63].mxu1  ;;  %17351 = vmatprep.subr.bf16.mxu1 %v19632_v23 }
 0x261   : > { %v21565_v38 = vpack.c.bf16 %v2426_v36, %v2422_v46  ;;  %2875 = vmatmul.mubr.bf16.gmra.mrb[120].mxu0 %v26372_v27  ;;  %v19639_v46 = vld [vmem:[#allocation7 + $0x698] ss:$36 sps:$4 sm:$0xff]  }
 0x262   : > { %26370 = vst [vmem:[#allocation20_spill] sm:$0xff] %v21563_v54  ;;  %3141 = vmatmul.mubr.bf16.gmra.mrb[104].mxu1 %v26329_v7  ;;  %2884 = vmatprep.mubr.bf16.mxu0 %v26298_v15 }
 0x263   : > { %26371 = vst [vmem:[#allocation59_spill] sm:$0xff] %v21565_v38  ;;  %17352 = vmatpush3.bf16.msra.mxu1 %v19632_v23  ;;  %3150 = vmatprep.mubr.bf16.mxu1 %v26298_v15  ;;  %v26374_v38 = vld [vmem:[#allocation24_spill] sm:$0xff] }
 0x264   : > { %17353 = vmatprep.subr.bf16.mxu1 %v19635_v31 }
 0x265   : > { %v2430_v42 = vpop.f32.mrb[64].mxu1 }
 0x266   : > { %v2432_v62 = vpop.f32.mrb[65].mxu1 }
 0x267   : > { %17354 = vmatpush3.bf16.msra.mxu1 %v19635_v31  ;;  %v2434_v35 = vpop.f32.mrb[66].mxu1 }
 0x268   : > { %v21571_v24 = vpack.c.bf16 %v2434_v35, %v2430_v42  ;;  %v2436_v54 = vpop.f32.mrb[67].mxu1  ;;  %17355 = vmatprep.subr.bf16.mxu1 %v19638_v32 }
 0x269   : > { %v21573_v36 = vpack.c.bf16 %v2436_v54, %v2432_v62  ;;  %2885 = vmatmul.mubr.bf16.gmra.mrb[124].mxu0 %v26374_v38 }
 0x26a   : > { %26373 = vst [vmem:[#allocation22_spill] sm:$0xff] %v21571_v24  ;;  %3151 = vmatmul.mubr.bf16.gmra.mrb[108].mxu1 %v26333_v9  ;;  %3313 = vmatprep.mubr.bf16.mxu0 %v20954_v61  ;;  %v26431_v24 = vld [vmem:[#allocation50_spill] sm:$0xff] }
 0x26b   : > { %17356 = vmatpush3.bf16.msra.mxu1 %v19638_v32  ;;  %19159 = vmatprep.subr.msk.bf16.mxu0 %vm3958_vm0, %v21573_v36  ;;  %v4150_v32 = vsel %vm3958_vm0, %v21573_v36, 0 }
 0x26c   : > { %17357 = vmatprep.subr.bf16.mxu1 %v19639_v46  ;;  %3160 = vmatprep.mubr.bf16.mxu1 %v26298_v15 }
 0x26d   : > { %v2440_v23 = vpop.f32.mrb[68].mxu1 }
 0x26e   : > { %v2442_v31 = vpop.f32.mrb[69].mxu1 }
 0x26f   : > { %17358 = vmatpush3.bf16.msra.mxu1 %v19639_v46  ;;  %v2444_v42 = vpop.f32.mrb[70].mxu1 }
 0x270   : > { %v21581_v62 = vpack.c.bf16 %v2444_v42, %v2440_v23  ;;  %19151 = vmatprep.subr.msk.bf16.mxu1 %vm3958_vm0, %v21494_v59  ;;  %v2446_v54 = vpop.f32.mrb[71].mxu1 }
 0x271   : > { %v21585_v35 = vpack.c.bf16 %v2446_v54, %v2442_v31  ;;  %3314 = vmatmul.mubr.bf16.vlgmr.msra.gmra.mrb[128].mxu0 %v20973_v41 }
 0x272   : > { %26375 = vst [vmem:[#allocation24_spill] sm:$0xff] %v21581_v62  ;;  %3161 = vmatmul.mubr.bf16.gmra.mrb[112].mxu1 %v26336_v8  ;;  %17424 = vmatpush3.bf16.xpose.msra.mxu0 %v4150_v32 }
 0x273   : > { %3170 = vmatprep.mubr.bf16.mxu1 %v26298_v15  ;;  %19160 = vmatprep.subr.msk.bf16.mxu0 %vm3958_vm0, %v21585_v35  ;;  %v4153_v41 = vsel %vm3958_vm0, %v21585_v35, 0 }
 0x274   : > { %3321 = vmatprep.mubr.bf16.mxu0 %v20977_v44 }
 0x275   : > { %v2450_v61 = vpop.f32.mrb[72].mxu1 }
 0x276   : > { %v2452_v46 = vpop.f32.mrb[73].mxu1 }
 0x277   : > { %v2454_v23 = vpop.f32.mrb[74].mxu1 }
 0x278   : > { %v21595_v31 = vpack.c.bf16 %v2454_v23, %v2450_v61  ;;  %v2456_v42 = vpop.f32.mrb[75].mxu1 }
 0x279   : > { %v21597_v54 = vpack.c.bf16 %v2456_v42, %v2452_v46  ;;  %3322 = vmatmul.mubr.bf16.gmra.mrb[132].mxu0 %v26307_v29 }
 0x27a   : > { %26376 = vst [vmem:[#allocation60_spill] sm:$0xff] %v21595_v31  ;;  %3171 = vmatmul.mubr.bf16.gmra.mrb[116].mxu1 %v26339_v53  ;;  %17426 = vmatpush3.bf16.xpose.msra.mxu0 %v4153_v41 }
 0x27b   : > { %3180 = vmatprep.mubr.bf16.mxu1 %v26298_v15  ;;  %19161 = vmatprep.subr.msk.bf16.mxu0 %vm3958_vm0, %v21597_v54  ;;  %v4156_v29 = vsel %vm3958_vm0, %v21597_v54, 0 }
 0x27c   : > { %3329 = vmatprep.mubr.bf16.mxu0 %v20996_v57 }
 0x27d   : > { %v2460_v44 = vpop.f32.mrb[76].mxu1 }
 0x27e   : > { %v2462_v32 = vpop.f32.mrb[77].mxu1 }
 0x27f   : > { %v2464_v61 = vpop.f32.mrb[78].mxu1 }
 0x280   : > { %v21607_v46 = vpack.c.bf16 %v2464_v61, %v2460_v44  ;;  %v2466_v23 = vpop.f32.mrb[79].mxu1 }
 0x281   : > { %v21609_v42 = vpack.c.bf16 %v2466_v23, %v2462_v32  ;;  %3330 = vmatmul.mubr.bf16.gmra.mrb[136].mxu0 %v26314_v2 }
 0x282   : > { %26377 = vst [vmem:[#allocation61_spill] sm:$0xff] %v21607_v46  ;;  %3181 = vmatmul.mubr.bf16.gmra.mrb[120].mxu1 %v26343_v47  ;;  %17428 = vmatpush3.bf16.xpose.msra.mxu0 %v4156_v29 }
 0x283   : > { %26378 = vst [vmem:[#allocation62_spill] sm:$0xff] %v21609_v42  ;;  %3190 = vmatprep.mubr.bf16.mxu1 %v26298_v15  ;;  %19162 = vmatprep.subr.msk.bf16.mxu0 %vm3958_vm0, %v21609_v42  ;;  %v4159_v2 = vsel %vm3958_vm0, %v21609_v42, 0 }
 0x284   : > { %3337 = vmatprep.mubr.bf16.mxu0 %v21015_v11 }
 0x285   : > { %v2470_v57 = vpop.f32.mrb[80].mxu1 }
 0x286   : > { %v2472_v41 = vpop.f32.mrb[81].mxu1 }
 0x287   : > { %v2474_v44 = vpop.f32.mrb[82].mxu1 }
 0x288   : > { %v21619_v32 = vpack.c.bf16 %v2474_v44, %v2470_v57  ;;  %v2476_v61 = vpop.f32.mrb[83].mxu1 }
 0x289   : > { %v21621_v23 = vpack.c.bf16 %v2476_v61, %v2472_v41  ;;  %3338 = vmatmul.mubr.bf16.gmra.mrb[140].mxu0 %v26320_v13 }
 0x28a   : > { %26379 = vst [vmem:[#allocation63_spill] sm:$0xff] %v21619_v32  ;;  %3191 = vmatmul.mubr.bf16.gmra.mrb[124].mxu1 %v26348_v19  ;;  %17430 = vmatpush3.bf16.xpose.msra.mxu0 %v4159_v2 }
 0x28b   : > { %26380 = vst [vmem:[#allocation64_spill] sm:$0xff] %v21621_v23  ;;  %3200 = vmatprep.mubr.bf16.mxu1 %v26298_v15  ;;  %3345 = vmatprep.mubr.bf16.mxu0 %v21034_v33 }
 0x28d   : > { %v2480_v11 = vpop.f32.mrb[84].mxu1 }
 0x28e   : > { %v2482_v29 = vpop.f32.mrb[85].mxu1 }
 0x28f   : > { %v2484_v46 = vpop.f32.mrb[86].mxu1 }
 0x290   : > { %v21629_v57 = vpack.c.bf16 %v2484_v46, %v2480_v11  ;;  %v2486_v44 = vpop.f32.mrb[87].mxu1 }
 0x291   : > { %v21631_v41 = vpack.c.bf16 %v2486_v44, %v2482_v29  ;;  %3346 = vmatmul.mubr.bf16.gmra.mrb[144].mxu0 %v21046_v20 }
 0x292   : > { %26381 = vst [vmem:[#allocation65_spill] sm:$0xff] %v21629_v57  ;;  %3201 = vmatmul.mubr.bf16.gmra.mrb[128].mxu1 %v26352_v28  ;;  %3353 = vmatprep.mubr.bf16.mxu0 %v21049_v43 }
 0x293   : > { %26382 = vst [vmem:[#allocation66_spill] sm:$0xff] %v21631_v41  ;;  %3210 = vmatprep.mubr.bf16.mxu1 %v26298_v15 }
 0x295   : > { %v2490_v13 = vpop.f32.mrb[88].mxu1 }
 0x296   : > { %v2492_v61 = vpop.f32.mrb[89].mxu1 }
 0x297   : > { %v2494_v2 = vpop.f32.mrb[90].mxu1 }
 0x298   : > { %v21637_v33 = vpack.c.bf16 %v2494_v2, %v2490_v13  ;;  %v2496_v32 = vpop.f32.mrb[91].mxu1 }
 0x299   : > { %v21639_v31 = vpack.c.bf16 %v2496_v32, %v2492_v61  ;;  %3354 = vmatmul.mubr.bf16.gmra.mrb[148].mxu0 %v21061_v26  ;;  %v3972_v32 = vsel %vm3958_vm0, %v21494_v59, 0 }
 0x29a   : > { %26383 = vst [vmem:[#allocation67_spill] sm:$0xff] %v21637_v33  ;;  %3211 = vmatmul.mubr.bf16.gmra.mrb[132].mxu1 %v26356_v6  ;;  %3361 = vmatprep.mubr.bf16.mxu0 %v21064_v51 }
 0x29b   : > { %26384 = vst [vmem:[#allocation68_spill] sm:$0xff] %v21639_v31  ;;  %3220 = vmatprep.mubr.bf16.mxu1 %v26298_v15 }
 0x29d   : > { %v2500_v20 = vpop.f32.mrb[92].mxu1 }
 0x29e   : > { %v2502_v46 = vpop.f32.mrb[93].mxu1 }
 0x29f   : > { %v2504_v11 = vpop.f32.mrb[94].mxu1 }
 0x2a0   : > { %v21645_v43 = vpack.c.bf16 %v2504_v11, %v2500_v20  ;;  %v2506_v29 = vpop.f32.mrb[95].mxu1 }
 0x2a1   : > { %v21647_v44 = vpack.c.bf16 %v2506_v29, %v2502_v46  ;;  %3362 = vmatmul.mubr.bf16.gmra.mrb[152].mxu0 %v21075_v4 }
 0x2a2   : > { %26385 = vst [vmem:[#allocation69_spill] sm:$0xff] %v21645_v43  ;;  %3221 = vmatmul.mubr.bf16.gmra.mrb[136].mxu1 %v26360_v49  ;;  %3369 = vmatprep.mubr.bf16.mxu0 %v21077_v60 }
 0x2a3   : > { %26386 = vst [vmem:[#allocation70_spill] sm:$0xff] %v21647_v44  ;;  %3230 = vmatprep.mubr.bf16.mxu1 %v26298_v15 }
 0x2a9   : > { %3370 = vmatmul.mubr.bf16.gmra.mrb[156].mxu0 %v21087_v10 }
 0x2aa   : > { %3231 = vmatmul.mubr.bf16.gmra.mrb[140].mxu1 %v26363_v25  ;;  %3377 = vmatprep.mubr.bf16.mxu0 %v21089_v17 }
 0x2ab   : > { %3240 = vmatprep.mubr.bf16.mxu1 %v26298_v15 }
 0x2b1   : > { %3378 = vmatmul.mubr.bf16.gmra.mrb[160].mxu0 %v21099_v16 }
 0x2b2   : > { %3241 = vmatmul.mubr.bf16.gmra.mrb[144].mxu1 %v26366_v0  ;;  %3385 = vmatprep.mubr.bf16.mxu0 %v21101_v18 }
 0x2b3   : > { %3250 = vmatprep.mubr.bf16.mxu1 %v26298_v15 }
 0x2b9   : > { %3386 = vmatmul.mubr.bf16.gmra.mrb[164].mxu0 %v21111_v45 }
 0x2ba   : > { %3251 = vmatmul.mubr.bf16.gmra.mrb[148].mxu1 %v26369_v12  ;;  %3393 = vmatprep.mubr.bf16.mxu0 %v26340_v37 }
 0x2bb   : > { %3260 = vmatprep.mubr.bf16.mxu1 %v26298_v15 }
 0x2c1   : > { %3394 = vmatmul.mubr.bf16.gmra.mrb[168].mxu0 %v26344_v40 }
 0x2c2   : > { %3261 = vmatmul.mubr.bf16.gmra.mrb[152].mxu1 %v26372_v27  ;;  %3401 = vmatprep.mubr.bf16.mxu0 %v21125_v52 }
 0x2c3   : > { %3270 = vmatprep.mubr.bf16.mxu1 %v26298_v15 }
 0x2c4   : > { %v2736_v26 = vpop.f32.mrb[64].mxu0 }
 0x2c5   : > { %v2738_v51 = vpop.f32.mrb[65].mxu0 }
 0x2c6   : > { %v2740_v4 = vpop.f32.mrb[66].mxu0 }
 0x2c7   : > { %v21669_v60 = vpack.c.bf16 %v2740_v4, %v2736_v26  ;;  %v2742_v10 = vpop.f32.mrb[67].mxu0 }
 0x2c8   : > { %v21671_v17 = vpack.c.bf16 %v2742_v10, %v2738_v51 }
 0x2c9   : > { %26387 = vst [vmem:[#allocation71_spill] sm:$0xff] %v21669_v60  ;;  %3402 = vmatmul.mubr.bf16.gmra.mrb[172].mxu0 %v21135_v56 }
 0x2ca   : > { %26388 = vst [vmem:[#allocation72_spill] sm:$0xff] %v21671_v17  ;;  %3271 = vmatmul.mubr.bf16.gmra.mrb[156].mxu1 %v26374_v38  ;;  %3409 = vmatprep.mubr.bf16.mxu0 %v21137_v58 }
 0x2cb   : > { %17359 = vmatprep.mubr.bf16.mxu1 %v26323_v5 }
 0x2cc   : > { %v2746_v16 = vpop.f32.mrb[68].mxu0 }
 0x2cd   : > { %v2748_v18 = vpop.f32.mrb[69].mxu0 }
 0x2ce   : > { %v2750_v45 = vpop.f32.mrb[70].mxu0 }
 0x2cf   : > { %v21677_v52 = vpack.c.bf16 %v2750_v45, %v2746_v16  ;;  %v2752_v37 = vpop.f32.mrb[71].mxu0 }
 0x2d0   : > { %v21679_v40 = vpack.c.bf16 %v2752_v37, %v2748_v18  ;;  %v26401_v18 = vld [vmem:[#allocation46_spill] sm:$0xff] }
 0x2d1   : > { %26389 = vst [vmem:[#allocation73_spill] sm:$0xff] %v21677_v52  ;;  %3410 = vmatmul.mubr.bf16.gmra.mrb[176].mxu0 %v21147_v1 }
 0x2d2   : > { %26390 = vst [vmem:[#allocation74_spill] sm:$0xff] %v21679_v40  ;;  %17360 = vmatmul.mubr.bf16.vlgmr.msra.gmra.mrb[160].mxu1 %v26326_v22  ;;  %3417 = vmatprep.mubr.bf16.mxu0 %v21149_v3  ;;  %v3975_v3 = vsel %vm3958_vm0, %v21508_v30, 0  ;;  %v26438_v40 = vld [vmem:[#allocation40_spill] sm:$0xff] }
 0x2d3   : > { %17392 = vmatpush3.bf16.xpose.msra.mxu1 %v3972_v32  ;;  %17363 = vmatprep.mubr.bf16.mxu1 %v26329_v7 }
 0x2d4   : > { %19152 = vmatprep.subr.msk.bf16.mxu1 %vm3958_vm0, %v21508_v30  ;;  %v2756_v56 = vpop.f32.mrb[72].mxu0 }
 0x2d5   : > { %v2758_v58 = vpop.f32.mrb[73].mxu0 }
 0x2d6   : > { %v2760_v5 = vpop.f32.mrb[74].mxu0 }
 0x2d7   : > { %v21689_v13 = vpack.c.bf16 %v2760_v5, %v2756_v56  ;;  %v2762_v61 = vpop.f32.mrb[75].mxu0  ;;  %v26404_v5 = vld [vmem:[#allocation27_spill] sm:$0xff] }
 0x2d8   : > { %v21691_v1 = vpack.c.bf16 %v2762_v61, %v2758_v58 }
 0x2d9   : > { %26391 = vst [vmem:[#allocation75_spill] sm:$0xff] %v21689_v13  ;;  %3418 = vmatmul.mubr.bf16.gmra.mrb[180].mxu0 %v21159_v21 }
 0x2da   : > { %26392 = vst [vmem:[#allocation76_spill] sm:$0xff] %v21691_v1  ;;  %17364 = vmatmul.mubr.bf16.gmra.mrb[164].mxu1 %v26333_v9  ;;  %3425 = vmatprep.mubr.bf16.mxu0 %v26309_v55  ;;  %v3978_v55 = vsel %vm3958_vm0, %v21518_v39, 0  ;;  %v26437_v1 = vld [vmem:[#allocation15_spill] sm:$0xff] }
 0x2db   : > { %17394 = vmatpush3.bf16.xpose.msra.mxu1 %v3975_v3  ;;  %17367 = vmatprep.mubr.bf16.mxu1 %v26336_v8 }
 0x2dc   : > { %19153 = vmatprep.subr.msk.bf16.mxu1 %vm3958_vm0, %v21518_v39  ;;  %v2766_v22 = vpop.f32.mrb[76].mxu0 }
 0x2dd   : > { %v2768_v7 = vpop.f32.mrb[77].mxu0 }
 0x2de   : > { %v2770_v2 = vpop.f32.mrb[78].mxu0 }
 0x2df   : > { %v21701_v20 = vpack.c.bf16 %v2770_v2, %v2766_v22  ;;  %v2772_v46 = vpop.f32.mrb[79].mxu0 }
 0x2e0   : > { %v21703_v21 = vpack.c.bf16 %v2772_v46, %v2768_v7 }
 0x2e1   : > { %26393 = vst [vmem:[#allocation77_spill] sm:$0xff] %v21701_v20  ;;  %3426 = vmatmul.mubr.bf16.gmra.mrb[184].mxu0 %v26313_v48 }
 0x2e2   : > { %26394 = vst [vmem:[#allocation78_spill] sm:$0xff] %v21703_v21  ;;  %17368 = vmatmul.mubr.bf16.gmra.mrb[168].mxu1 %v26339_v53  ;;  %3433 = vmatprep.mubr.bf16.mxu0 %v26316_v14  ;;  %v3981_v14 = vsel %vm3958_vm0, %v21532_v63, 0  ;;  %v26397_v53 = vld [vmem:[#allocation56_spill] sm:$0xff] }
 0x2e3   : > { %17396 = vmatpush3.bf16.xpose.msra.mxu1 %v3978_v55  ;;  %17371 = vmatprep.mubr.bf16.mxu1 %v26343_v47 }
 0x2e4   : > { %19154 = vmatprep.subr.msk.bf16.mxu1 %vm3958_vm0, %v21532_v63  ;;  %v2776_v9 = vpop.f32.mrb[80].mxu0 }
 0x2e5   : > { %v2778_v8 = vpop.f32.mrb[81].mxu0 }
 0x2e6   : > { %v2780_v11 = vpop.f32.mrb[82].mxu0 }
 0x2e7   : > { %v21713_v29 = vpack.c.bf16 %v2780_v11, %v2776_v9  ;;  %v2782_v26 = vpop.f32.mrb[83].mxu0 }
 0x2e8   : > { %v21715_v48 = vpack.c.bf16 %v2782_v26, %v2778_v8 }
 0x2e9   : > { %26395 = vst [vmem:[#allocation79_spill] sm:$0xff] %v21713_v29  ;;  %3434 = vmatmul.mubr.bf16.gmra.mrb[188].mxu0 %v26319_v34 }
 0x2ea   : > { %26396 = vst [vmem:[#allocation80_spill] sm:$0xff] %v21715_v48  ;;  %17372 = vmatmul.mubr.bf16.gmra.mrb[172].mxu1 %v26348_v19  ;;  %17431 = vmatprep.mubr.msk.bf16.mxu0 %vm3958_vm0, %v21365_v50  ;;  %v26400_v19 = vld [vmem:[#allocation44_spill] sm:$0xff] }
 0x2eb   : > { %17398 = vmatpush3.bf16.xpose.msra.mxu1 %v3981_v14  ;;  %17375 = vmatprep.mubr.bf16.mxu1 %v26352_v28  ;;  %v26432_v48 = vld [vmem:[#allocation52_spill] sm:$0xff] }
 0x2ec   : > { %19155 = vmatprep.subr.msk.bf16.mxu1 %vm3958_vm0, %v26397_v53  ;;  %v2786_v47 = vpop.f32.mrb[84].mxu0 }
 0x2ed   : > { %v2788_v51 = vpop.f32.mrb[85].mxu0 }
 0x2ee   : > { %v2790_v4 = vpop.f32.mrb[86].mxu0 }
 0x2ef   : > { %v21726_v10 = vpack.c.bf16 %v2790_v4, %v2786_v47  ;;  %v2792_v34 = vpop.f32.mrb[87].mxu0  ;;  %v4061_v4 = vsel %vm3958_vm0, %v26397_v53, 0 }
 0x2f0   : > { %v21728_v16 = vpack.c.bf16 %v2792_v34, %v2788_v51  ;;  %v26412_v51 = vld [vmem:[#allocation34_spill] sm:$0xff]  ;;  %v26413_v34 = vld [vmem:[#allocation35_spill] sm:$0xff] }
 0x2f1   : > { %26398 = vst [vmem:[#allocation56_spill] sm:$0xff] %v21726_v10  ;;  %17432 = vmatmul.mubr.msk.bf16.vlgmr.msra.gmra.mrb[192].mxu0 %vm3958_vm0, %v26400_v19 }
 0x2f2   : > { %26399 = vst [vmem:[#allocation81_spill] sm:$0xff] %v21728_v16  ;;  %17376 = vmatmul.mubr.bf16.gmra.mrb[176].mxu1 %v26356_v6  ;;  %17435 = vmatprep.mubr.msk.bf16.mxu0 %vm3958_vm0, %v26401_v18  ;;  %v4239_v16 = vsel %vm3958_vm0, %v21621_v23, 0 }
 0x2f3   : > { %17379 = vmatprep.mubr.bf16.mxu1 %v26360_v49 }
 0x2f4   : > { %v2796_v45 = vpop.f32.mrb[88].mxu0 }
 0x2f5   : > { %v2798_v28 = vpop.f32.mrb[89].mxu0 }
 0x2f6   : > { %v2800_v37 = vpop.f32.mrb[90].mxu0 }
 0x2f7   : > { %v21736_v32 = vpack.c.bf16 %v2800_v37, %v2796_v45  ;;  %v2802_v56 = vpop.f32.mrb[91].mxu0 }
 0x2f8   : > { %v21738_v58 = vpack.c.bf16 %v2802_v56, %v2798_v28 }
 0x2f9   : > { %26402 = vst [vmem:[#allocation82_spill] sm:$0xff] %v21736_v32  ;;  %17436 = vmatmul.mubr.msk.bf16.gmra.mrb[196].mxu0 %vm3958_vm0, %v26404_v5 }
 0x2fa   : > { %26403 = vst [vmem:[#allocation83_spill] sm:$0xff] %v21738_v58  ;;  %17380 = vmatmul.mubr.bf16.gmra.mrb[180].mxu1 %v26363_v25 }
 0x2fb   : > { %17383 = vmatprep.mubr.bf16.mxu1 %v26366_v0  ;;  %v26409_v0 = vld [vmem:[#allocation32_spill] sm:$0xff] }
 0x2fc   : > { %v2806_v6 = vpop.f32.mrb[92].mxu0 }
 0x2fd   : > { %v2808_v61 = vpop.f32.mrb[93].mxu0 }
 0x2fe   : > { %v2810_v3 = vpop.f32.mrb[94].mxu0 }
 0x2ff   : > { %v21744_v22 = vpack.c.bf16 %v2810_v3, %v2806_v6  ;;  %v2812_v49 = vpop.f32.mrb[95].mxu0  ;;  %v26417_v3 = vld [vmem:[#allocation36_spill] sm:$0xff] }
 0x300   : > { %v21746_v7 = vpack.c.bf16 %v2812_v49, %v2808_v61 }
 0x301   : > { %26405 = vst [vmem:[#allocation84_spill] sm:$0xff] %v21744_v22 }
 0x302   : > { %26406 = vst [vmem:[#allocation85_spill] sm:$0xff] %v21746_v7  ;;  %17384 = vmatmul.mubr.bf16.gmra.mrb[184].mxu1 %v26369_v12 }
 0x303   : > { %17387 = vmatprep.mubr.bf16.mxu1 %v26372_v27 }
 0x304   : > { %v2816_v2 = vpop.f32.mrb[96].mxu0 }
 0x305   : > { %v2818_v46 = vpop.f32.mrb[97].mxu0 }
 0x306   : > { %v2820_v25 = vpop.f32.mrb[98].mxu0 }
 0x307   : > { %v21750_v55 = vpack.c.bf16 %v2820_v25, %v2816_v2  ;;  %v2822_v9 = vpop.f32.mrb[99].mxu0  ;;  %v26418_v2 = vld [vmem:[#allocation26_spill] sm:$0xff] }
 0x308   : > { %v21752_v8 = vpack.c.bf16 %v2822_v9, %v2818_v46  ;;  %v26419_v46 = vld [vmem:[#allocation58_spill] sm:$0xff] }
 0x309   : > { %26407 = vst [vmem:[#allocation86_spill] sm:$0xff] %v21750_v55 }
 0x30a   : > { %26408 = vst [vmem:[#allocation87_spill] sm:$0xff] %v21752_v8  ;;  %17388 = vmatmul.mubr.bf16.gmra.mrb[188].mxu1 %v26374_v38  ;;  %v26414_v38 = vld [vmem:[#allocation57_spill] sm:$0xff]  ;;  %v4245_v8 = vsel %vm3958_vm0, %v21639_v31, 0 }
 0x30b   : > { %17399 = vmatprep.mubr.msk.bf16.mxu1 %vm3958_vm0, %v26409_v0  ;;  %v4064_v49 = vsel %vm3958_vm0, %v26414_v38, 0 }
 0x30c   : > { %v2826_v11 = vpop.f32.mrb[100].mxu0 }
 0x30d   : > { %v2828_v26 = vpop.f32.mrb[101].mxu0 }
 0x30e   : > { %v2830_v14 = vpop.f32.mrb[102].mxu0 }
 0x30f   : > { %v21757_v47 = vpack.c.bf16 %v2830_v14, %v2826_v11  ;;  %v2832_v12 = vpop.f32.mrb[103].mxu0 }
 0x310   : > { %v21759_v27 = vpack.c.bf16 %v2832_v12, %v2828_v26 }
 0x311   : > { %26410 = vst [vmem:[#allocation32_spill] sm:$0xff] %v21757_v47 }
 0x312   : > { %26411 = vst [vmem:[#allocation88_spill] sm:$0xff] %v21759_v27  ;;  %17400 = vmatmul.mubr.msk.bf16.vlgmr.msra.gmra.mrb[192].mxu1 %vm3958_vm0, %v26412_v51 }
 0x313   : > { %17408 = vmatpush3.bf16.xpose.msra.mxu1 %v4061_v4  ;;  %17403 = vmatprep.mubr.msk.bf16.mxu1 %vm3958_vm0, %v26413_v34  ;;  %v4067_v4 = vsel %vm3958_vm0, %v26419_v46, 0 }
 0x314   : > { %19156 = vmatprep.subr.msk.bf16.mxu1 %vm3958_vm0, %v26414_v38  ;;  %v2836_v45 = vpop.f32.mrb[104].mxu0 }
 0x315   : > { %v2838_v28 = vpop.f32.mrb[105].mxu0 }
 0x316   : > { %v2840_v37 = vpop.f32.mrb[106].mxu0 }
 0x317   : > { %v21769_v56 = vpack.c.bf16 %v2840_v37, %v2836_v45  ;;  %v2842_v6 = vpop.f32.mrb[107].mxu0  ;;  %v26422_v45 = vld [vmem:[#allocation59_spill] sm:$0xff] }
 0x318   : > { %v21771_v61 = vpack.c.bf16 %v2842_v6, %v2838_v28 }
 0x319   : > { %26415 = vst [vmem:[#allocation34_spill] sm:$0xff] %v21769_v56 }
 0x31a   : > { %26416 = vst [vmem:[#allocation35_spill] sm:$0xff] %v21771_v61  ;;  %17404 = vmatmul.mubr.msk.bf16.gmra.mrb[196].mxu1 %vm3958_vm0, %v26417_v3  ;;  %v4242_v61 = vsel %vm3958_vm0, %v21631_v41, 0 }
 0x31b   : > { %17410 = vmatpush3.bf16.xpose.msra.mxu1 %v4064_v49  ;;  %17415 = vmatprep.mubr.msk.bf16.mxu1 %vm3958_vm0, %v26418_v2 }
 0x31c   : > { %19157 = vmatprep.subr.msk.bf16.mxu1 %vm3958_vm0, %v26419_v46  ;;  %v2846_v25 = vpop.f32.mrb[108].mxu0 }
 0x31d   : > { %v2848_v9 = vpop.f32.mrb[109].mxu0 }
 0x31e   : > { %v2850_v11 = vpop.f32.mrb[110].mxu0 }
 0x31f   : > { %v21781_v26 = vpack.c.bf16 %v2850_v11, %v2846_v25  ;;  %v2852_v14 = vpop.f32.mrb[111].mxu0 }
 0x320   : > { %v21783_v12 = vpack.c.bf16 %v2852_v14, %v2848_v9 }
 0x321   : > { %26420 = vst [vmem:[#allocation57_spill] sm:$0xff] %v21781_v26 }
 0x322   : > { %26421 = vst [vmem:[#allocation36_spill] sm:$0xff] %v21783_v12 }
 0x323   : > { %17412 = vmatpush3.bf16.xpose.msra.mxu1 %v4067_v4  ;;  %v4070_v4 = vsel %vm3958_vm0, %v26422_v45, 0 }
 0x324   : > { %19158 = vmatprep.subr.msk.bf16.mxu1 %vm3958_vm0, %v26422_v45  ;;  %v2856_v28 = vpop.f32.mrb[112].mxu0 }
 0x325   : > { %v3122_v37 = vpop.f32.mrb[96].mxu1  ;;  %v2858_v6 = vpop.f32.mrb[113].mxu0 }
 0x326   : > { %v3124_v49 = vpop.f32.mrb[97].mxu1  ;;  %v2860_v43 = vpop.f32.mrb[114].mxu0 }
 0x327   : > { %v3126_v33 = vpop.f32.mrb[98].mxu1  ;;  %v21789_v57 = vpack.c.bf16 %v2860_v43, %v2856_v28  ;;  %v2862_v11 = vpop.f32.mrb[115].mxu0 }
 0x328   : > { %v21791_v25 = vpack.c.bf16 %v3126_v33, %v3122_v37  ;;  %v3128_v9 = vpop.f32.mrb[99].mxu1  ;;  %v21793_v14 = vpack.c.bf16 %v2862_v11, %v2858_v6 }
 0x329   : > { %26423 = vst [vmem:[#allocation26_spill] sm:$0xff] %v21789_v57  ;;  %v21795_v7 = vpack.c.bf16 %v3128_v9, %v3124_v49 }
 0x32a   : > { %26424 = vst [vmem:[#allocation58_spill] sm:$0xff] %v21791_v25  ;;  %26425 = vst [vmem:[#allocation59_spill] sm:$0xff] %v21793_v14  ;;  %17455 = vmatprep.subr.bf16.mxu0 %v21791_v25 }
 0x32b   : > { %26426 = vst [vmem:[#allocation89_spill] sm:$0xff] %v21795_v7  ;;  %17414 = vmatpush3.bf16.xpose.msra.mxu1 %v4070_v4  ;;  %17456 = vmatpush3.bf16.msra.mxu0 %v21791_v25 }
 0x32c   : > { %19163 = vmatprep.subr.msk.bf16.mxu1 %vm3958_vm0, %v21621_v23  ;;  %v2866_v43 = vpop.f32.mrb[116].mxu0 }
 0x32d   : > { %v3132_v33 = vpop.f32.mrb[100].mxu1  ;;  %v2868_v28 = vpop.f32.mrb[117].mxu0 }
 0x32e   : > { %v3134_v37 = vpop.f32.mrb[101].mxu1  ;;  %v2870_v62 = vpop.f32.mrb[118].mxu0 }
 0x32f   : > { %v3136_v6 = vpop.f32.mrb[102].mxu1  ;;  %v21803_v11 = vpack.c.bf16 %v2870_v62, %v2866_v43  ;;  %v2872_v9 = vpop.f32.mrb[119].mxu0 }
 0x330   : > { %v21805_v49 = vpack.c.bf16 %v3136_v6, %v3132_v33  ;;  %v3138_v14 = vpop.f32.mrb[103].mxu1  ;;  %v21807_v58 = vpack.c.bf16 %v2872_v9, %v2868_v28 }
 0x331   : > { %26427 = vst [vmem:[#allocation90_spill] sm:$0xff] %v21803_v11  ;;  %v21809_v4 = vpack.c.bf16 %v3138_v14, %v3134_v37  ;;  %v4248_v11 = vsel %vm3958_vm0, %v21647_v44, 0 }
 0x332   : > { %26428 = vst [vmem:[#allocation91_spill] sm:$0xff] %v21805_v49  ;;  %26429 = vst [vmem:[#allocation92_spill] sm:$0xff] %v21807_v58  ;;  %17416 = vmatmul.mubr.msk.bf16.vlgmr.msra.gmra.mrb[200].mxu1 %vm3958_vm0, %v26431_v24  ;;  %17457 = vmatprep.subr.bf16.mxu0 %v21805_v49 }
 0x333   : > { %26430 = vst [vmem:[#allocation93_spill] sm:$0xff] %v21809_v4  ;;  %17419 = vmatprep.mubr.msk.bf16.mxu1 %vm3958_vm0, %v26432_v48  ;;  %17440 = vmatpush3.bf16.xpose.msra.mxu1 %v4239_v16 }
 0x334   : > { %19164 = vmatprep.subr.msk.bf16.mxu1 %vm3958_vm0, %v21631_v41  ;;  %17458 = vmatpush3.bf16.msra.mxu0 %v21805_v49  ;;  %v2876_v62 = vpop.f32.mrb[120].mxu0 }
 0x335   : > { %v3142_v14 = vpop.f32.mrb[104].mxu1  ;;  %v2878_v43 = vpop.f32.mrb[121].mxu0 }
 0x336   : > { %v3144_v33 = vpop.f32.mrb[105].mxu1  ;;  %v2880_v28 = vpop.f32.mrb[122].mxu0 }
 0x337   : > { %v3146_v37 = vpop.f32.mrb[106].mxu1  ;;  %v21821_v6 = vpack.c.bf16 %v2880_v28, %v2876_v62  ;;  %v2882_v58 = vpop.f32.mrb[123].mxu0 }
 0x338   : > { %v21823_v9 = vpack.c.bf16 %v3146_v37, %v3142_v14  ;;  %v3148_v21 = vpop.f32.mrb[107].mxu1  ;;  %v21825_v12 = vpack.c.bf16 %v2882_v58, %v2878_v43 }
 0x339   : > { %26433 = vst [vmem:[#allocation50_spill] sm:$0xff] %v21821_v6  ;;  %v21827_v16 = vpack.c.bf16 %v3148_v21, %v3144_v33 }
 0x33a   : > { %26434 = vst [vmem:[#allocation52_spill] sm:$0xff] %v21823_v9  ;;  %26435 = vst [vmem:[#allocation94_spill] sm:$0xff] %v21825_v12  ;;  %17420 = vmatmul.mubr.msk.bf16.gmra.mrb[204].mxu1 %vm3958_vm0, %v26437_v1  ;;  %17459 = vmatprep.subr.bf16.mxu0 %v21823_v9 }
 0x33b   : > { %26436 = vst [vmem:[#allocation95_spill] sm:$0xff] %v21827_v16  ;;  %17442 = vmatpush3.bf16.xpose.msra.mxu1 %v4242_v61  ;;  %17447 = vmatprep.mubr.msk.bf16.mxu1 %vm3958_vm0, %v26438_v40 }
 0x33c   : > { %19165 = vmatprep.subr.msk.bf16.mxu1 %vm3958_vm0, %v21639_v31  ;;  %17460 = vmatpush3.bf16.msra.mxu0 %v21823_v9  ;;  %v2886_v58 = vpop.f32.mrb[124].mxu0 }
 0x33d   : > { %v3152_v21 = vpop.f32.mrb[108].mxu1  ;;  %v2888_v62 = vpop.f32.mrb[125].mxu0 }
 0x33e   : > { %v3154_v14 = vpop.f32.mrb[109].mxu1  ;;  %v2890_v43 = vpop.f32.mrb[126].mxu0 }
 0x33f   : > { %v3156_v33 = vpop.f32.mrb[110].mxu1  ;;  %v21839_v28 = vpack.c.bf16 %v2890_v43, %v2886_v58  ;;  %v2892_v12 = vpop.f32.mrb[127].mxu0 }
 0x340   : > { %v21841_v37 = vpack.c.bf16 %v3156_v33, %v3152_v21  ;;  %v3158_v61 = vpop.f32.mrb[111].mxu1  ;;  %v21843_v27 = vpack.c.bf16 %v2892_v12, %v2888_v62 }
 0x341   : > { %26439 = vst [vmem:[#allocation96_spill] sm:$0xff] %v21839_v28  ;;  %v21845_v17 = vpack.c.bf16 %v3158_v61, %v3154_v14 }
 0x342   : > { %26440 = vst [vmem:[#allocation97_spill] sm:$0xff] %v21841_v37  ;;  %26441 = vst [vmem:[#allocation98_spill] sm:$0xff] %v21843_v27  ;;  %17461 = vmatprep.subr.bf16.mxu0 %v21841_v37 }
 0x343   : > { %26442 = vst [vmem:[#allocation99_spill] sm:$0xff] %v21845_v17  ;;  %17444 = vmatpush3.bf16.xpose.msra.mxu1 %v4245_v8  ;;  %17462 = vmatpush3.bf16.msra.mxu0 %v21841_v37 }
 0x344   : > { %19166 = vmatprep.subr.msk.bf16.mxu1 %vm3958_vm0, %v21647_v44  ;;  %v16719_v21 = vpop.f32.mrb[128].mxu0 }
 0x345   : > { %v3162_v58 = vpop.f32.mrb[112].mxu1  ;;  %v16720_v33 = vpop.f32.mrb[129].mxu0 }
 0x346   : > { %v3164_v43 = vpop.f32.mrb[113].mxu1  ;;  %v21853_v12 = vadd.f32 %v16720_v33, %v16719_v21  ;;  %v16722_v62 = vpop.f32.mrb[130].mxu0 }
 0x347   : > { %v3166_v28 = vpop.f32.mrb[114].mxu1  ;;  %v16723_v27 = vpop.f32.mrb[131].mxu0 }
 0x348   : > { %v21855_v14 = vpack.c.bf16 %v3166_v28, %v3162_v58  ;;  %v3168_v61 = vpop.f32.mrb[115].mxu1  ;;  %v21859_v8 = vadd.f32 %v16723_v27, %v16722_v62 }
 0x349   : > { %v21857_v6 = vpack.c.bf16 %v3168_v61, %v3164_v43 }
 0x34a   : > { %26443 = vst [vmem:[#allocation100_spill] sm:$0xff] %v21855_v14  ;;  %17471 = vmatprep.subr.bf16.mxu0 %v21855_v14 }
 0x34b   : > { %26444 = vst [vmem:[#allocation101_spill] sm:$0xff] %v21857_v6  ;;  %17446 = vmatpush3.bf16.xpose.msra.mxu1 %v4248_v11  ;;  %v26447_v6 = vld [vmem:[#allocation21_spill] sm:$0xff] }
 0x34c   : > { %v16725_v17 = vpop.f32.mrb[132].mxu0  ;;  %v26448_v11 = vld [vmem:[#allocation41_spill] sm:$0xff] }
 0x34d   : > { %v3172_v57 = vpop.f32.mrb[116].mxu1  ;;  %v16726_v21 = vpop.f32.mrb[133].mxu0 }
 0x34e   : > { %v3174_v16 = vpop.f32.mrb[117].mxu1  ;;  %v21864_v22 = vadd.f32 %v16726_v21, %v16725_v17  ;;  %v16728_v28 = vpop.f32.mrb[134].mxu0 }
 0x34f   : > { %v3176_v33 = vpop.f32.mrb[118].mxu1  ;;  %v16729_v61 = vpop.f32.mrb[135].mxu0 }
 0x350   : > { %v21866_v58 = vpack.c.bf16 %v3176_v33, %v3172_v57  ;;  %v3178_v43 = vpop.f32.mrb[119].mxu1  ;;  %v21870_v62 = vadd.f32 %v16729_v61, %v16728_v28 }
 0x351   : > { %v21868_v27 = vpack.c.bf16 %v3178_v43, %v3174_v16 }
 0x352   : > { %26445 = vst [vmem:[#allocation102_spill] sm:$0xff] %v21866_v58  ;;  %17448 = vmatmul.mubr.msk.bf16.vlgmr.msra.gmra.mrb[208].mxu1 %vm3958_vm0, %v26447_v6 }
 0x353   : > { %26446 = vst [vmem:[#allocation103_spill] sm:$0xff] %v21868_v27  ;;  %17451 = vmatprep.mubr.msk.bf16.mxu1 %vm3958_vm0, %v26448_v11  ;;  %v26451_v27 = vld [vmem:[#allocation23_spill] sm:$0xff] }
 0x354   : > { %v16731_v32 = vpop.f32.mrb[136].mxu0 }
 0x355   : > { %v3182_v4 = vpop.f32.mrb[120].mxu1  ;;  %v16732_v17 = vpop.f32.mrb[137].mxu0 }
 0x356   : > { %v3184_v10 = vpop.f32.mrb[121].mxu1  ;;  %v21876_v29 = vadd.f32 %v16732_v17, %v16731_v32  ;;  %v16734_v57 = vpop.f32.mrb[138].mxu0 }
 0x357   : > { %v3186_v21 = vpop.f32.mrb[122].mxu1  ;;  %v16735_v43 = vpop.f32.mrb[139].mxu0 }
 0x358   : > { %v21878_v33 = vpack.c.bf16 %v3186_v21, %v3182_v4  ;;  %v3188_v16 = vpop.f32.mrb[123].mxu1  ;;  %v21882_v61 = vadd.f32 %v16735_v43, %v16734_v57 }
 0x359   : > { %v21880_v28 = vpack.c.bf16 %v3188_v16, %v3184_v10 }
 0x35a   : > { %26449 = vst [vmem:[#allocation104_spill] sm:$0xff] %v21878_v33  ;;  %17452 = vmatmul.mubr.msk.bf16.gmra.mrb[212].mxu1 %vm3958_vm0, %v26451_v27 }
 0x35b   : > { %26450 = vst [vmem:[#allocation105_spill] sm:$0xff] %v21880_v28 }
 0x35c   : > { %v16737_v20 = vpop.f32.mrb[140].mxu0 }
 0x35d   : > { %v3192_v7 = vpop.f32.mrb[124].mxu1  ;;  %v16738_v13 = vpop.f32.mrb[141].mxu0 }
 0x35e   : > { %v3194_v26 = vpop.f32.mrb[125].mxu1  ;;  %v21886_v52 = vadd.f32 %v16738_v13, %v16737_v20  ;;  %v16740_v32 = vpop.f32.mrb[142].mxu0 }
 0x35f   : > { %v3196_v56 = vpop.f32.mrb[126].mxu1  ;;  %v16741_v21 = vpop.f32.mrb[143].mxu0 }
 0x360   : > { %v21888_v17 = vpack.c.bf16 %v3196_v56, %v3192_v7  ;;  %v3198_v4 = vpop.f32.mrb[127].mxu1  ;;  %v21892_v10 = vadd.f32 %v16741_v21, %v16740_v32 }
 0x361   : > { %v21890_v47 = vpack.c.bf16 %v3198_v4, %v3194_v26 }
 0x362   : > { %26452 = vst [vmem:[#allocation106_spill] sm:$0xff] %v21888_v17 }
 0x363   : > { %26453 = vst [vmem:[#allocation107_spill] sm:$0xff] %v21890_v47 }
 0x364   : > { %v16743_v16 = vpop.f32.mrb[144].mxu0 }
 0x365   : > { %v3202_v57 = vpop.f32.mrb[128].mxu1  ;;  %v16744_v28 = vpop.f32.mrb[145].mxu0 }
 0x366   : > { %v3204_v43 = vpop.f32.mrb[129].mxu1  ;;  %v21894_v55 = vadd.f32 %v16744_v28, %v16743_v16  ;;  %v16746_v15 = vpop.f32.mrb[146].mxu0 }
 0x367   : > { %v3206_v60 = vpop.f32.mrb[130].mxu1  ;;  %v16747_v20 = vpop.f32.mrb[147].mxu0 }
 0x368   : > { %v21896_v33 = vpack.c.bf16 %v3206_v60, %v3202_v57  ;;  %v3208_v13 = vpop.f32.mrb[131].mxu1  ;;  %v21900_v56 = vadd.f32 %v16747_v20, %v16746_v15 }
 0x369   : > { %v21898_v7 = vpack.c.bf16 %v3208_v13, %v3204_v43 }
 0x36a   : > { %26454 = vst [vmem:[#allocation108_spill] sm:$0xff] %v21896_v33 }
 0x36b   : > { %26455 = vst [vmem:[#allocation109_spill] sm:$0xff] %v21898_v7 }
 0x36c   : > { %v16749_v4 = vpop.f32.mrb[148].mxu0 }
 0x36d   : > { %v3212_v26 = vpop.f32.mrb[132].mxu1  ;;  %v16750_v21 = vpop.f32.mrb[149].mxu0 }
 0x36e   : > { %v3214_v32 = vpop.f32.mrb[133].mxu1  ;;  %v21902_v17 = vadd.f32 %v16750_v21, %v16749_v4  ;;  %v16752_v58 = vpop.f32.mrb[150].mxu0 }
 0x36f   : > { %v3216_v47 = vpop.f32.mrb[134].mxu1  ;;  %v16753_v16 = vpop.f32.mrb[151].mxu0 }
 0x370   : > { %v21904_v14 = vpack.c.bf16 %v3216_v47, %v3212_v26  ;;  %v3218_v28 = vpop.f32.mrb[135].mxu1  ;;  %v21908_v57 = vadd.f32 %v16753_v16, %v16752_v58 }
 0x371   : > { %v21906_v60 = vpack.c.bf16 %v3218_v28, %v3214_v32 }
 0x372   : > { %26456 = vst [vmem:[#allocation110_spill] sm:$0xff] %v21904_v14 }
 0x373   : > { %26457 = vst [vmem:[#allocation111_spill] sm:$0xff] %v21906_v60 }
 0x374   : > { %v16755_v13 = vpop.f32.mrb[152].mxu0 }
 0x375   : > { %v3222_v43 = vpop.f32.mrb[136].mxu1  ;;  %v16756_v20 = vpop.f32.mrb[153].mxu0 }
 0x376   : > { %v3224_v15 = vpop.f32.mrb[137].mxu1  ;;  %v21910_v33 = vadd.f32 %v16756_v20, %v16755_v13  ;;  %v16758_v37 = vpop.f32.mrb[154].mxu0 }
 0x377   : > { %v3226_v7 = vpop.f32.mrb[138].mxu1  ;;  %v16759_v21 = vpop.f32.mrb[155].mxu0 }
 0x378   : > { %v21912_v49 = vpack.c.bf16 %v3226_v7, %v3222_v43  ;;  %v3228_v4 = vpop.f32.mrb[139].mxu1  ;;  %v21916_v26 = vadd.f32 %v16759_v21, %v16758_v37 }
 0x379   : > { %v21914_v47 = vpack.c.bf16 %v3228_v4, %v3224_v15 }
 0x37a   : > { %26458 = vst [vmem:[#allocation112_spill] sm:$0xff] %v21912_v49 }
 0x37b   : > { %26459 = vst [vmem:[#allocation113_spill] sm:$0xff] %v21914_v47 }
 0x37c   : > { %v16761_v28 = vpop.f32.mrb[156].mxu0 }
 0x37d   : > { %v3232_v32 = vpop.f32.mrb[140].mxu1  ;;  %v16762_v16 = vpop.f32.mrb[157].mxu0 }
 0x37e   : > { %v3234_v58 = vpop.f32.mrb[141].mxu1  ;;  %v21918_v14 = vadd.f32 %v16762_v16, %v16761_v28  ;;  %v16764_v9 = vpop.f32.mrb[158].mxu0 }
 0x37f   : > { %v3236_v60 = vpop.f32.mrb[142].mxu1  ;;  %v16765_v20 = vpop.f32.mrb[159].mxu0 }
 0x380   : > { %v21920_v27 = vpack.c.bf16 %v3236_v60, %v3232_v32  ;;  %v3238_v13 = vpop.f32.mrb[143].mxu1  ;;  %v21924_v43 = vadd.f32 %v16765_v20, %v16764_v9 }
 0x381   : > { %v21922_v7 = vpack.c.bf16 %v3238_v13, %v3234_v58 }
 0x382   : > { %26460 = vst [vmem:[#allocation114_spill] sm:$0xff] %v21920_v27 }
 0x383   : > { %26461 = vst [vmem:[#allocation115_spill] sm:$0xff] %v21922_v7 }
 0x384   : > { %v16767_v4 = vpop.f32.mrb[160].mxu0 }
 0x385   : > { %v3242_v15 = vpop.f32.mrb[144].mxu1  ;;  %v16768_v21 = vpop.f32.mrb[161].mxu0 }
 0x386   : > { %v3244_v37 = vpop.f32.mrb[145].mxu1  ;;  %v21926_v49 = vadd.f32 %v16768_v21, %v16767_v4  ;;  %v16770_v25 = vpop.f32.mrb[162].mxu0 }
 0x387   : > { %v3246_v47 = vpop.f32.mrb[146].mxu1  ;;  %v16771_v16 = vpop.f32.mrb[163].mxu0 }
 0x388   : > { %v21928_v6 = vpack.c.bf16 %v3246_v47, %v3242_v15  ;;  %v3248_v28 = vpop.f32.mrb[147].mxu1  ;;  %v21932_v32 = vadd.f32 %v16771_v16, %v16770_v25 }
 0x389   : > { %v21930_v60 = vpack.c.bf16 %v3248_v28, %v3244_v37 }
 0x38a   : > { %26462 = vst [vmem:[#allocation116_spill] sm:$0xff] %v21928_v6  ;;  %17503 = vmatprep.subr.bf16.mxu1 %v21928_v6 }
 0x38b   : > { %26463 = vst [vmem:[#allocation117_spill] sm:$0xff] %v21930_v60  ;;  %17504 = vmatpush3.bf16.msra.mxu1 %v21928_v6 }
 0x38c   : > { %v16773_v58 = vpop.f32.mrb[164].mxu0 }
 0x38d   : > { %v3252_v9 = vpop.f32.mrb[148].mxu1  ;;  %v16774_v20 = vpop.f32.mrb[165].mxu0 }
 0x38e   : > { %v3254_v13 = vpop.f32.mrb[149].mxu1  ;;  %v21936_v4 = vadd.f32 %v16774_v20, %v16773_v58  ;;  %v16776_v21 = vpop.f32.mrb[166].mxu0 }
 0x38f   : > { %v3256_v7 = vpop.f32.mrb[150].mxu1  ;;  %v16777_v27 = vpop.f32.mrb[167].mxu0 }
 0x390   : > { %v21938_v47 = vpack.c.bf16 %v3256_v7, %v3252_v9  ;;  %v3258_v15 = vpop.f32.mrb[151].mxu1  ;;  %v21942_v25 = vadd.f32 %v16777_v27, %v16776_v21 }
 0x391   : > { %v21940_v37 = vpack.c.bf16 %v3258_v15, %v3254_v13 }
 0x392   : > { %26464 = vst [vmem:[#allocation118_spill] sm:$0xff] %v21938_v47  ;;  %17505 = vmatprep.subr.bf16.mxu1 %v21938_v47 }
 0x393   : > { %26465 = vst [vmem:[#allocation119_spill] sm:$0xff] %v21940_v37  ;;  %17506 = vmatpush3.bf16.msra.mxu1 %v21938_v47 }
 0x394   : > { %v16779_v16 = vpop.f32.mrb[168].mxu0 }
 0x395   : > { %v3262_v28 = vpop.f32.mrb[152].mxu1  ;;  %v16780_v6 = vpop.f32.mrb[169].mxu0 }
 0x396   : > { %v3264_v60 = vpop.f32.mrb[153].mxu1  ;;  %v21946_v58 = vadd.f32 %v16780_v6, %v16779_v16  ;;  %v16782_v20 = vpop.f32.mrb[170].mxu0 }
 0x397   : > { %v3266_v11 = vpop.f32.mrb[154].mxu1  ;;  %v16783_v44 = vpop.f32.mrb[171].mxu0 }
 0x398   : > { %v21948_v7 = vpack.c.bf16 %v3266_v11, %v3262_v28  ;;  %v3268_v9 = vpop.f32.mrb[155].mxu1  ;;  %v21952_v27 = vadd.f32 %v16783_v44, %v16782_v20 }
 0x399   : > { %v21950_v13 = vpack.c.bf16 %v3268_v9, %v3264_v60 }
 0x39a   : > { %26466 = vst [vmem:[#allocation120_spill] sm:$0xff] %v21948_v7  ;;  %17507 = vmatprep.subr.bf16.mxu1 %v21948_v7 }
 0x39b   : > { %26467 = vst [vmem:[#allocation121_spill] sm:$0xff] %v21950_v13  ;;  %17508 = vmatpush3.bf16.msra.mxu1 %v21948_v7 }
 0x39c   : > { %v16785_v15 = vpop.f32.mrb[172].mxu0 }
 0x39d   : > { %v3272_v21 = vpop.f32.mrb[156].mxu1  ;;  %v16786_v47 = vpop.f32.mrb[173].mxu0 }
 0x39e   : > { %v3274_v37 = vpop.f32.mrb[157].mxu1  ;;  %v21956_v6 = vadd.f32 %v16786_v47, %v16785_v15  ;;  %v16788_v16 = vpop.f32.mrb[174].mxu0 }
 0x39f   : > { %v3276_v40 = vpop.f32.mrb[158].mxu1  ;;  %v16789_v18 = vpop.f32.mrb[175].mxu0 }
 0x3a0   : > { %v21958_v11 = vpack.c.bf16 %v3276_v40, %v3272_v21  ;;  %v3278_v28 = vpop.f32.mrb[159].mxu1  ;;  %v21962_v44 = vadd.f32 %v16789_v18, %v16788_v16 }
 0x3a1   : > { %v21960_v60 = vpack.c.bf16 %v3278_v28, %v3274_v37 }
 0x3a2   : > { %26468 = vst [vmem:[#allocation122_spill] sm:$0xff] %v21958_v11  ;;  %17509 = vmatprep.subr.bf16.mxu1 %v21958_v11 }
 0x3a3   : > { %26469 = vst [vmem:[#allocation123_spill] sm:$0xff] %v21960_v60  ;;  %17510 = vmatpush3.bf16.msra.mxu1 %v21958_v11 }
 0x3a4   : > { %v16791_v9 = vpop.f32.mrb[176].mxu0 }
 0x3a5   : > { %v17361_v20 = vpop.f32.mrb[160].mxu1  ;;  %v16792_v47 = vpop.f32.mrb[177].mxu0 }
 0x3a6   : > { %v3485_v13 = vadd.f32 %v17361_v20, %v21864_v22  ;;  %v3476_v7 = vpop.f32.mrb[161].mxu1  ;;  %v21968_v21 = vadd.f32 %v16792_v47, %v16791_v9  ;;  %v16794_v5 = vpop.f32.mrb[178].mxu0 }
 0x3a7   : > { %v3477_v15 = vadd.f32 %v21853_v12, %v3476_v7  ;;  %v17362_v40 = vpop.f32.mrb[162].mxu1  ;;  %v16795_v16 = vpop.f32.mrb[179].mxu0 }
 0x3a8   : > { %v3488_v37 = vadd.f32 %v17362_v40, %v21870_v62  ;;  %v3479_v18 = vpop.f32.mrb[163].mxu1  ;;  %v21972_v60 = vadd.f32 %v16795_v16, %v16794_v5 }
 0x3a9   : > { %v3480_v28 = vadd.f32 %v21859_v8, %v3479_v18 }
 0x3aa   : > { %v21974_v11 = vpack.c.bf16 %v3488_v37, %v3485_v13 }
 0x3ab   : > { %v21976_v19 = vpack.c.bf16 %v3480_v28, %v3477_v15 }
 0x3ac   : > { %26470 = vst [vmem:[#allocation124_spill] sm:$0xff] %v21974_v11  ;;  %v16797_v20 = vpop.f32.mrb[180].mxu0 }
 0x3ad   : > { %26471 = vst [vmem:[#allocation125_spill] sm:$0xff] %v21976_v19  ;;  %v17365_v22 = vpop.f32.mrb[164].mxu1  ;;  %v16798_v9 = vpop.f32.mrb[181].mxu0 }
 0x3ae   : > { %v3501_v12 = vadd.f32 %v17365_v22, %v21886_v52  ;;  %v3492_v7 = vpop.f32.mrb[165].mxu1  ;;  %v21980_v62 = vadd.f32 %v16798_v9, %v16797_v20  ;;  %v16800_v40 = vpop.f32.mrb[182].mxu0 }
 0x3af   : > { %v3493_v47 = vadd.f32 %v21876_v29, %v3492_v7  ;;  %v17366_v31 = vpop.f32.mrb[166].mxu1  ;;  %v16801_v18 = vpop.f32.mrb[183].mxu0 }
 0x3b0   : > { %v3504_v8 = vadd.f32 %v17366_v31, %v21892_v10  ;;  %v3495_v5 = vpop.f32.mrb[167].mxu1  ;;  %v21984_v15 = vadd.f32 %v16801_v18, %v16800_v40 }
 0x3b1   : > { %v3496_v13 = vadd.f32 %v21882_v61, %v3495_v5 }
 0x3b2   : > { %v21986_v37 = vpack.c.bf16 %v3504_v8, %v3501_v12 }
 0x3b3   : > { %v21988_v16 = vpack.c.bf16 %v3496_v13, %v3493_v47 }
 0x3b4   : > { %26472 = vst [vmem:[#allocation126_spill] sm:$0xff] %v21986_v37  ;;  %v16803_v28 = vpop.f32.mrb[184].mxu0 }
 0x3b5   : > { %26473 = vst [vmem:[#allocation127_spill] sm:$0xff] %v21988_v16  ;;  %v17369_v52 = vpop.f32.mrb[168].mxu1  ;;  %v16804_v20 = vpop.f32.mrb[185].mxu0 }
 0x3b6   : > { %v3517_v29 = vadd.f32 %v17369_v52, %v21902_v17  ;;  %v3508_v22 = vpop.f32.mrb[169].mxu1  ;;  %v21992_v31 = vadd.f32 %v16804_v20, %v16803_v28  ;;  %v16806_v10 = vpop.f32.mrb[186].mxu0 }
 0x3b7   : > { %v3509_v7 = vadd.f32 %v21894_v55, %v3508_v22  ;;  %v17370_v9 = vpop.f32.mrb[170].mxu1  ;;  %v16807_v5 = vpop.f32.mrb[187].mxu0 }
 0x3b8   : > { %v3520_v61 = vadd.f32 %v17370_v9, %v21908_v57  ;;  %v3511_v40 = vpop.f32.mrb[171].mxu1  ;;  %v21996_v47 = vadd.f32 %v16807_v5, %v16806_v10 }
 0x3b9   : > { %v3512_v12 = vadd.f32 %v21900_v56, %v3511_v40 }
 0x3ba   : > { %v21998_v8 = vpack.c.bf16 %v3520_v61, %v3517_v29 }
 0x3bb   : > { %v22000_v18 = vpack.c.bf16 %v3512_v12, %v3509_v7 }
 0x3bc   : > { %26474 = vst [vmem:[#allocation128_spill] sm:$0xff] %v21998_v8  ;;  %v16809_v13 = vpop.f32.mrb[188].mxu0 }
 0x3bd   : > { %26475 = vst [vmem:[#allocation129_spill] sm:$0xff] %v22000_v18  ;;  %v17373_v17 = vpop.f32.mrb[172].mxu1  ;;  %v16810_v28 = vpop.f32.mrb[189].mxu0 }
 0x3be   : > { %v3533_v55 = vadd.f32 %v17373_v17, %v21918_v14  ;;  %v3524_v52 = vpop.f32.mrb[173].mxu1  ;;  %v16811_v57 = vadd.f32 %v16810_v28, %v16809_v13  ;;  %v16812_v9 = vpop.f32.mrb[190].mxu0 }
 0x3bf   : > { %v3525_v22 = vadd.f32 %v21910_v33, %v3524_v52  ;;  %v17374_v20 = vpop.f32.mrb[174].mxu1  ;;  %v16813_v10 = vpop.f32.mrb[191].mxu0 }
 0x3c0   : > { %v3536_v37 = vadd.f32 %v17374_v20, %v21924_v43  ;;  %v3527_v56 = vpop.f32.mrb[175].mxu1  ;;  %v16814_v61 = vadd.f32 %v16813_v10, %v16812_v9 }
 0x3c1   : > { %v3528_v29 = vadd.f32 %v21916_v26, %v3527_v56 }
 0x3c2   : > { %v22006_v7 = vpack.c.bf16 %v3536_v37, %v3533_v55 }
 0x3c3   : > { %v22008_v40 = vpack.c.bf16 %v3528_v29, %v3525_v22 }
 0x3c4   : > { %26476 = vst [vmem:[#allocation130_spill] sm:$0xff] %v22006_v7  ;;  %v22010_v14 = vpop.f32.mrb[192].mxu0 }
 0x3c5   : > { %26477 = vst [vmem:[#allocation131_spill] sm:$0xff] %v22008_v40  ;;  %v17377_v5 = vpop.f32.mrb[176].mxu1  ;;  %v22013_v17 = vpop.f32.mrb[193].mxu0 }
 0x3c6   : > { %v3549_v12 = vadd.f32 %v17377_v5, %v21936_v4  ;;  %v3540_v33 = vpop.f32.mrb[177].mxu1  ;;  %v22016_v52 = vpop.f32.mrb[194].mxu0 }
 0x3c7   : > { %v3541_v13 = vadd.f32 %v21926_v49, %v3540_v33  ;;  %v17378_v43 = vpop.f32.mrb[178].mxu1  ;;  %v22019_v37 = vpop.f32.mrb[195].mxu0 }
 0x3c8   : > { %v3552_v26 = vadd.f32 %v17378_v43, %v21942_v25  ;;  %v3543_v28 = vpop.f32.mrb[179].mxu1 }
 0x3c9   : > { %v3544_v55 = vadd.f32 %v21932_v32, %v3543_v28 }
 0x3ca   : > { %v22022_v22 = vpack.c.bf16 %v3552_v26, %v3549_v12 }
 0x3cb   : > { %v22024_v20 = vpack.c.bf16 %v3544_v55, %v3541_v13 }
 0x3cc   : > { %26478 = vst [vmem:[#allocation132_spill] sm:$0xff] %v22022_v22  ;;  %v22026_v9 = vpop.f32.mrb[196].mxu0 }
 0x3cd   : > { %26479 = vst [vmem:[#allocation133_spill] sm:$0xff] %v22024_v20  ;;  %v17381_v4 = vpop.f32.mrb[180].mxu1  ;;  %v22029_v10 = vpop.f32.mrb[197].mxu0 }
 0x3ce   : > { %v3565_v56 = vadd.f32 %v17381_v4, %v21956_v6  ;;  %v3556_v49 = vpop.f32.mrb[181].mxu1  ;;  %v22032_v5 = vpop.f32.mrb[198].mxu0 }
 0x3cf   : > { %v3557_v29 = vadd.f32 %v21946_v58, %v3556_v49  ;;  %v17382_v25 = vpop.f32.mrb[182].mxu1  ;;  %v22035_v12 = vpop.f32.mrb[199].mxu0 }
 0x3d0   : > { %v3568_v33 = vadd.f32 %v17382_v25, %v21962_v44  ;;  %v3559_v32 = vpop.f32.mrb[183].mxu1  ;;  %v3891_v44 = vlaneseq }
 0x3d1   : > { %v3560_v13 = vadd.f32 %v21952_v27, %v3559_v32 }
 0x3d2   : > { %v22038_v43 = vpack.c.bf16 %v3568_v33, %v3565_v56  ;;  %v22050_v56 = vshrl.u32 %v3891_v44, 7 }
 0x3d3   : > { %v22040_v26 = vpack.c.bf16 %v3560_v13, %v3557_v29 }
 0x3d4   : > { %26480 = vst [vmem:[#allocation134_spill] sm:$0xff] %v22038_v43  ;;  %26484 = vst [vmem:[#allocation138_spill] sm:$0xff] %v22050_v56 }
 0x3d5   : > { %26481 = vst [vmem:[#allocation135_spill] sm:$0xff] %v22040_v26  ;;  %v17385_v6 = vpop.f32.mrb[184].mxu1 }
 0x3d6   : > { %v3581_v28 = vadd.f32 %v17385_v6, %v21980_v62  ;;  %v3572_v55 = vpop.f32.mrb[185].mxu1 }
 0x3d7   : > { %v3573_v58 = vadd.f32 %v21968_v21, %v3572_v55  ;;  %v17386_v4 = vpop.f32.mrb[186].mxu1  ;;  %v3901_v55 = vand.u32 127, %v3891_v44  ;;  %v26493_v44 = vmov 0 }
 0x3d8   : > { %v3584_v49 = vadd.f32 %v17386_v4, %v21984_v15  ;;  %v3575_v22 = vpop.f32.mrb[187].mxu1  ;;  %v3894_v15 = vadd.s32 16, %v22050_v56 }
 0x3d9   : > { %v3576_v25 = vadd.f32 %v21972_v60, %v3575_v22  ;;  %v3895_v22 = vadd.s32 24, %v22050_v56  ;;  %vm22066_vm2 = vcmp.le.s32.totalorder %v3901_v55, %v22050_v56 }
 0x3da   : > { %v22046_v7 = vpack.c.bf16 %v3584_v49, %v3581_v28  ;;  %vm22061_vm1 = vcmp.le.s32.totalorder %v3901_v55, %v3894_v15  ;;  %v3896_v15 = vadd.s32 32, %v22050_v56 }
 0x3db   : > { %v22048_v27 = vpack.c.bf16 %v3576_v25, %v3573_v58  ;;  %v3893_v58 = vadd.s32 8, %v22050_v56  ;;  %vm22074_vm3 = vcmp.le.s32.totalorder %v3901_v55, %v3895_v22  ;;  %v3898_v22 = vadd.s32 48, %v22050_v56 }
 0x3dc   : > { %26482 = vst [vmem:[#allocation136_spill] sm:$0xff] %v22046_v7  ;;  %v26494_v44 = vsel %vm22074_vm3, 4294967295, %v26493_v44  ;;  %vm22105_vm5 = vcmp.le.s32.totalorder %v3901_v55, %v3896_v15 }
 0x3dd   : > { %26483 = vst [vmem:[#allocation137_spill] sm:$0xff] %v22048_v27  ;;  %v17389_v29 = vpop.f32.mrb[188].mxu1  ;;  %26495 = vst [vmem:[#allocation143_spill] sm:$0xff] %v26494_v44  ;;  %vm22084_vm4 = vcmp.le.s32.totalorder %v3901_v55, %v3893_v58  ;;  %v3897_v58 = vadd.s32 40, %v22050_v56  ;;  %vm22114_vm6 = vcmp.le.s32.totalorder %v3901_v55, %v3898_v22  ;;  %v26508_v22 = vmov 0 }
 0x3de   : > { %v3597_v33 = vadd.f32 %v17389_v29, %v16811_v57  ;;  %v3588_v32 = vpop.f32.mrb[189].mxu1  ;;  %v26487_v57 = vmov 0 }
 0x3df   : > { %v3589_v62 = vadd.f32 %v21992_v31, %v3588_v32  ;;  %v17390_v13 = vpop.f32.mrb[190].mxu1  ;;  %v26488_v57 = vsel %vm22061_vm1, 4294967295, %v26487_v57  ;;  %v26496_v32 = vmov 0  ;;  %vm22118_vm7 = vcmp.le.s32.totalorder %v3901_v55, %v3897_v58 }
 0x3e0   : > { %v3600_v21 = vadd.f32 %v17390_v13, %v16814_v61  ;;  %v3591_v6 = vpop.f32.mrb[191].mxu1  ;;  %26489 = vst [vmem:[#allocation141_spill] sm:$0xff] %v26488_v57  ;;  %v26490_v61 = vmov 0  ;;  %v26497_v32 = vsel %vm22084_vm4, 4294967295, %v26496_v32 }
 0x3e1   : > { %v3592_v4 = vadd.f32 %v21996_v47, %v3591_v6  ;;  %v26491_v61 = vsel %vm22066_vm2, 4294967295, %v26490_v61  ;;  %26498 = vst [vmem:[#allocation144_spill] sm:$0xff] %v26497_v32 }
 0x3e2   : > { %v22055_v60 = vpack.c.bf16 %v3600_v21, %v3597_v33  ;;  %26492 = vst [vmem:[#allocation142_spill] sm:$0xff] %v26491_v61 }
 0x3e3   : > { %v22058_v28 = vpack.c.bf16 %v3592_v4, %v3589_v62 }
 0x3e4   : > { %26485 = vst [vmem:[#allocation139_spill] sm:$0xff] %v22055_v60 }
 0x3e5   : > { %26486 = vst [vmem:[#allocation140_spill] sm:$0xff] %v22058_v28  ;;  %v17401_v31 = vpop.f32.mrb[192].mxu1  ;;  %v26502_v28 = vmov 0 }
 0x3e6   : > { %v4017_v49 = vpop.f32.mrb[193].mxu1  ;;  %v22072_v47 = vsel %vm22061_vm1, %v17401_v31, -1e+30  ;;  %v26503_v28 = vsel %vm22114_vm6, 4294967295, %v26502_v28 }
 0x3e7   : > { %v17402_v25 = vpop.f32.mrb[194].mxu1  ;;  %v4369_v29 = vsel %vm3958_vm0, %v22072_v47, -inf  ;;  %v22082_v33 = vsel %vm22066_vm2, %v4017_v49, -1e+30  ;;  %26504 = vst [vmem:[#allocation146_spill] sm:$0xff] %v26503_v28 }
 0x3e8   : > { %4370 = vmax.xlane.f32.xlu1 %v4369_v29  ;;  %v4020_v62 = vpop.f32.mrb[195].mxu1  ;;  %v4363_v13 = vsel %vm3958_vm0, %v22082_v33, -inf  ;;  %v22092_v21 = vsel %vm22074_vm3, %v17402_v25, -1e+30  ;;  %v26499_v25 = vmov 0  ;;  %v3899_v29 = vadd.s32 56, %v22050_v56 }
 0x3e9   : > { %4364 = vmax.xlane.f32.xlu0 %v4363_v13  ;;  %v22096_v6 = vsel %vm22084_vm4, %v4020_v62, -1e+30  ;;  %v4372_v4 = vsel %vm3958_vm0, %v22092_v21, -inf  ;;  %v26500_v25 = vsel %vm22105_vm5, 4294967295, %v26499_v25 }
 0x3ea   : > { %v4366_v31 = vsel %vm3958_vm0, %v22096_v6, -inf  ;;  %26501 = vst [vmem:[#allocation145_spill] sm:$0xff] %v26500_v25  ;;  %vm22132_vm8 = vcmp.le.s32.totalorder %v3901_v55, %v3899_v29 }
 0x3eb   : > { %v26509_v22 = vsel %vm22132_vm8, 4294967295, %v26508_v22 }
 0x3ec   : > { %4373 = vmax.xlane.f32.xlu1 %v4372_v4  ;;  %v26505_v4 = vmov 0  ;;  %26510 = vst [vmem:[#allocation148_spill] sm:$0xff] %v26509_v22 }
 0x3ed   : > { %4367 = vmax.xlane.f32.xlu0 %v4366_v31  ;;  %v17405_v49 = vpop.f32.mrb[196].mxu1  ;;  %v26506_v4 = vsel %vm22118_vm7, 4294967295, %v26505_v4 }
 0x3ee   : > { %v4033_v62 = vpop.f32.mrb[197].mxu1  ;;  %26507 = vst [vmem:[#allocation147_spill] sm:$0xff] %v26506_v4 }
 0x3ef   : > { %v17406_v13 = vpop.f32.mrb[198].mxu1  ;;  %v22112_v60 = vsel %vm22105_vm5, %v4033_v62, -1e+30  ;;  %v22130_v62 = vsel %vm22114_vm6, %v17405_v49, -1e+30 }
 0x3f0   : > { %v4036_v15 = vpop.f32.mrb[199].mxu1  ;;  %v4375_v31 = vsel %vm3958_vm0, %v22112_v60, -inf  ;;  %v22140_v7 = vsel %vm22132_vm8, %v17406_v13, -1e+30 }
 0x3f1   : > { %4376 = vmax.xlane.f32.xlu0 %v4375_v31  ;;  %v22126_v56 = vsel %vm22118_vm7, %v4036_v15, -1e+30  ;;  %v4381_v15 = vsel %vm3958_vm0, %v22130_v62, -inf  ;;  %v4384_v49 = vsel %vm3958_vm0, %v22140_v7, -inf }
 0x3f2   : > { %v4378_v58 = vsel %vm3958_vm0, %v22126_v56, -inf }
 0x3f3   : > { %4379 = vmax.xlane.f32.xlu1 %v4378_v58 }
 0x3f5   : > { %4382 = vmax.xlane.f32.xlu0 %v4381_v15 }
 0x3f7   : > { %4385 = vmax.xlane.f32.xlu1 %v4384_v49 }
 0x405   : > { %v17417_v55 = vpop.f32.mrb[200].mxu1 }
 0x406   : > { %v4106_v29 = vpop.f32.mrb[201].mxu1  ;;  %v22154_v26 = vsel %vm22061_vm1, %v17417_v55, -1e+30 }
 0x407   : > { %v22148_v31 = vsel %vm22066_vm2, %v4106_v29, -1e+30  ;;  %v17418_v43 = vpop.f32.mrb[202].mxu1  ;;  %v4393_v27 = vsel %vm3958_vm0, %v22154_v26, -inf }
 0x408   : > { %v4109_v58 = vpop.f32.mrb[203].mxu1  ;;  %v4387_v13 = vsel %vm3958_vm0, %v22148_v31, -inf  ;;  %v22164_v29 = vsel %vm22074_vm3, %v17418_v43, -1e+30 }
 0x409   : > { %v22158_v15 = vsel %vm22084_vm4, %v4109_v58, -1e+30  ;;  %4388 = vmax.xlane.f32.xlu0 %v4387_v13  ;;  %v4396_v8 = vsel %vm3958_vm0, %v22164_v29, -inf }
 0x40a   : > { %v4390_v49 = vsel %vm3958_vm0, %v22158_v15, -inf }
 0x40b   : > { %4391 = vmax.xlane.f32.xlu1 %v4390_v49 }
 0x40d   : > { %4394 = vmax.xlane.f32.xlu0 %v4393_v27  ;;  %v17421_v40 = vpop.f32.mrb[204].mxu1 }
 0x40e   : > { %v4122_v55 = vpop.f32.mrb[205].mxu1  ;;  %v22178_v49 = vsel %vm22114_vm6, %v17421_v40, -1e+30  ;;  %v22195_v40 = vsel %vm22066_vm2, %v22013_v17, -1e+30 }
 0x40f   : > { %v22172_v58 = vsel %vm22105_vm5, %v4122_v55, -1e+30  ;;  %4397 = vmax.xlane.f32.xlu1 %v4396_v8  ;;  %v17422_v13 = vpop.f32.mrb[206].mxu1  ;;  %v4405_v55 = vsel %vm3958_vm0, %v22178_v49, -inf }
 0x410   : > { %v4125_v18 = vpop.f32.mrb[207].mxu1  ;;  %v4399_v43 = vsel %vm3958_vm0, %v22172_v58, -inf  ;;  %v22188_v8 = vsel %vm22132_vm8, %v17422_v13, -1e+30  ;;  %v22209_v13 = vsel %vm22061_vm1, %v22010_v14, -1e+30 }
 0x411   : > { %v22182_v27 = vsel %vm22118_vm7, %v4125_v18, -1e+30  ;;  %4400 = vmax.xlane.f32.xlu0 %v4399_v43  ;;  %v4408_v18 = vsel %vm3958_vm0, %v22188_v8, -inf  ;;  %v22202_v43 = vsel %vm22084_vm4, %v22019_v37, -1e+30  ;;  %v4417_v37 = vsel %vm3958_vm0, %v22209_v13, -inf }
 0x412   : > { %v4402_v20 = vsel %vm3958_vm0, %v22182_v27, -inf  ;;  %v4414_v17 = vsel %vm3958_vm0, %v22202_v43, -inf }
 0x413   : > { %4403 = vmax.xlane.f32.xlu1 %v4402_v20  ;;  %v4411_v20 = vsel %vm3958_vm0, %v22195_v40, -inf }
 0x415   : > { %4406 = vmax.xlane.f32.xlu0 %v4405_v55  ;;  %v22216_v55 = vsel %vm22074_vm3, %v22016_v52, -1e+30 }
 0x416   : > { %v4420_v14 = vsel %vm3958_vm0, %v22216_v55, -inf }
 0x417   : > { %4409 = vmax.xlane.f32.xlu1 %v4408_v18  ;;  %v22223_v18 = vsel %vm22105_vm5, %v22029_v10, -1e+30 }
 0x418   : > { %v4423_v52 = vsel %vm3958_vm0, %v22223_v18, -inf }
 0x419   : > { %4412 = vmax.xlane.f32.xlu0 %v4411_v20  ;;  %v22230_v20 = vsel %vm22118_vm7, %v22035_v12, -1e+30 }
 0x41a   : > { %v4426_v10 = vsel %vm3958_vm0, %v22230_v20, -inf }
 0x41b   : > { %4415 = vmax.xlane.f32.xlu1 %v4414_v17  ;;  %v22237_v17 = vsel %vm22114_vm6, %v22026_v9, -1e+30 }
 0x41c   : > { %v4429_v12 = vsel %vm3958_vm0, %v22237_v17, -inf }
 0x41d   : > { %4418 = vmax.xlane.f32.xlu0 %v4417_v37  ;;  %v22244_v37 = vsel %vm22132_vm8, %v22032_v5, -1e+30 }
 0x41e   : > { %v4432_v9 = vsel %vm3958_vm0, %v22244_v37, -inf }
 0x41f   : > { %4421 = vmax.xlane.f32.xlu1 %v4420_v14 }
 0x421   : > { %4424 = vmax.xlane.f32.xlu0 %v4423_v52 }
 0x423   : > { %4427 = vmax.xlane.f32.xlu1 %v4426_v10 }
 0x425   : > { %v17449_v14 = vpop.f32.mrb[208].mxu1  ;;  %4430 = vmax.xlane.f32.xlu0 %v4429_v12 }
 0x426   : > { %v4284_v16 = vpop.f32.mrb[209].mxu1  ;;  %v22258_v10 = vsel %vm22061_vm1, %v17449_v14, -1e+30 }
 0x427   : > { %v22252_v52 = vsel %vm22066_vm2, %v4284_v16, -1e+30  ;;  %v17450_v11 = vpop.f32.mrb[210].mxu1  ;;  %4433 = vmax.xlane.f32.xlu1 %v4432_v9  ;;  %v4441_v9 = vsel %vm3958_vm0, %v22258_v10, -inf }
 0x428   : > { %v4287_v19 = vpop.f32.mrb[211].mxu1  ;;  %v4435_v5 = vsel %vm3958_vm0, %v22252_v52, -inf  ;;  %v22268_v16 = vsel %vm22074_vm3, %v17450_v11, -1e+30 }
 0x429   : > { %v22262_v12 = vsel %vm22084_vm4, %v4287_v19, -1e+30  ;;  %4436 = vmax.xlane.f32.xlu0 %v4435_v5  ;;  %v4444_v32 = vsel %vm3958_vm0, %v22268_v16, -inf }
 0x42a   : > { %v4438_v61 = vsel %vm3958_vm0, %v22262_v12, -inf }
 0x42b   : > { %4439 = vmax.xlane.f32.xlu1 %v4438_v61 }
 0x42d   : > { %v17453_v41 = vpop.f32.mrb[212].mxu1  ;;  %4442 = vmax.xlane.f32.xlu0 %v4441_v9 }
 0x42e   : > { %v4300_v14 = vpop.f32.mrb[213].mxu1  ;;  %v22282_v61 = vsel %vm22114_vm6, %v17453_v41, -1e+30 }
 0x42f   : > { %v22276_v19 = vsel %vm22105_vm5, %v4300_v14, -1e+30  ;;  %v17454_v5 = vpop.f32.mrb[214].mxu1  ;;  %4445 = vmax.xlane.f32.xlu1 %v4444_v32  ;;  %v4453_v32 = vsel %vm3958_vm0, %v22282_v61, -inf }
 0x430   : > { %v4303_v57 = vpop.f32.mrb[215].mxu1  ;;  %v4447_v11 = vsel %vm3958_vm0, %v22276_v19, -inf  ;;  %v22292_v14 = vsel %vm22132_vm8, %v17454_v5, -1e+30 }
 0x431   : > { %v22286_v9 = vsel %vm22118_vm7, %v4303_v57, -1e+30  ;;  %4448 = vmax.xlane.f32.xlu0 %v4447_v11  ;;  %v4456_v41 = vsel %vm3958_vm0, %v22292_v14, -inf }
 0x432   : > { %v4450_v25 = vsel %vm3958_vm0, %v22286_v9, -inf }
 0x433   : > { %4451 = vmax.xlane.f32.xlu1 %v4450_v25 }
 0x435   : > { %4454 = vmax.xlane.f32.xlu0 %v4453_v32 }
 0x437   : > { %4457 = vmax.xlane.f32.xlu1 %v4456_v41 }
 0x475   : > { %v4371_v4 = vpop.xlane.xlu1 %4370 }
 0x476   : > { %v4461_v57 = vsub.f32 %v22072_v47, %v4371_v4  ;;  %v4365_v11 = vpop.xlane.xlu0 %4364 }
 0x477   : > { %v4459_v28 = vsub.f32 %v22082_v33, %v4365_v11 }
 0x478   : > { %v4495_v44 = vmul.f32 1.442695, %v4461_v57 }
 0x479   : > { %v4491_v50 = vmul.f32 1.442695, %v4459_v28  ;;  %v4374_v22 = vpop.xlane.xlu1 %4373 }
 0x47a   : > { %v4462_v5 = vsub.f32 %v22092_v21, %v4374_v22  ;;  %v4368_v25 = vpop.xlane.xlu0 %4367 }
 0x47b   : > { %19736 = vpow2.f32 %v4491_v50  ;;  %v4460_v1 = vsub.f32 %v22096_v6, %v4368_v25 }
 0x47c   : > { %19738 = vpow2.f32 %v4495_v44  ;;  %v4497_v32 = vmul.f32 1.442695, %v4462_v5 }
 0x47d   : > { %v4493_v42 = vmul.f32 1.442695, %v4460_v1 }
 0x47e   : > { %v4377_v23 = vpop.xlane.xlu0 %4376 }
 0x47f   : > { %19740 = vpow2.f32 %v4493_v42  ;;  %v4463_v41 = vsub.f32 %v22112_v60, %v4377_v23 }
 0x480   : > { %v4380_v47 = vpop.xlane.xlu1 %4379  ;;  %19742 = vpow2.f32 %v4497_v32 }
 0x481   : > { %v4499_v4 = vmul.f32 1.442695, %v4463_v41  ;;  %v4464_v33 = vsub.f32 %v22126_v56, %v4380_v47 }
 0x482   : > { %v4383_v28 = vpop.xlane.xlu0 %4382 }
 0x483   : > { %19744 = vpow2.f32 %v4499_v4  ;;  %v4501_v57 = vmul.f32 1.442695, %v4464_v33  ;;  %v4465_v21 = vsub.f32 %v22130_v62, %v4383_v28 }
 0x484   : > { %v4386_v50 = vpop.xlane.xlu1 %4385 }
 0x485   : > { %v22305_v22 = vpop.eup %19736  ;;  %19746 = vpow2.f32 %v4501_v57  ;;  %v4503_v44 = vmul.f32 1.442695, %v4465_v21  ;;  %v4466_v1 = vsub.f32 %v22140_v7, %v4386_v50 }
 0x486   : > { %v4555_v42 = vsel %vm3958_vm0, %v22305_v22, 0.0  ;;  %v22310_v23 = vpop.eup %19738 }
 0x487   : > { %19748 = vpow2.f32 %v4503_v44  ;;  %v4505_v60 = vmul.f32 1.442695, %v4466_v1  ;;  %4556 = vadd.xlane.f32.xlu0 %v4555_v42  ;;  %v4561_v6 = vsel %vm3958_vm0, %v22310_v23, 0.0 }
 0x489   : > { %v22312_v56 = vpop.eup %19740  ;;  %19750 = vpow2.f32 %v4505_v60 }
 0x48a   : > { %v4558_v62 = vsel %vm3958_vm0, %v22312_v56, 0.0  ;;  %v22318_v11 = vpop.eup %19742 }
 0x48b   : > { %4562 = vadd.xlane.f32.xlu0 %v4561_v6  ;;  %4559 = vadd.xlane.f32.xlu1 %v4558_v62  ;;  %v4564_v25 = vsel %vm3958_vm0, %v22318_v11, 0.0 }
 0x48d   : > { %v22320_v7 = vpop.eup %19744 }
 0x48e   : > { %v4567_v5 = vsel %vm3958_vm0, %v22320_v7, 0.0 }
 0x48f   : > { %v22326_v32 = vpop.eup %19746  ;;  %4568 = vadd.xlane.f32.xlu0 %v4567_v5  ;;  %4565 = vadd.xlane.f32.xlu1 %v4564_v25 }
 0x490   : > { %v4570_v4 = vsel %vm3958_vm0, %v22326_v32, 0.0 }
 0x491   : > { %v22328_v41 = vpop.eup %19748 }
 0x492   : > { %v4573_v47 = vsel %vm3958_vm0, %v22328_v41, 0.0 }
 0x493   : > { %v22334_v33 = vpop.eup %19750  ;;  %4574 = vadd.xlane.f32.xlu0 %v4573_v47  ;;  %4571 = vadd.xlane.f32.xlu1 %v4570_v4 }
 0x494   : > { %v4576_v57 = vsel %vm3958_vm0, %v22334_v33, 0.0 }
 0x496   : > { %v4389_v28 = vpop.xlane.xlu0 %4388 }
 0x497   : > { %v4467_v21 = vsub.f32 %v22148_v31, %v4389_v28  ;;  %4577 = vadd.xlane.f32.xlu1 %v4576_v57 }
 0x498   : > { %v4392_v50 = vpop.xlane.xlu1 %4391 }
 0x499   : > { %v4507_v44 = vmul.f32 1.442695, %v4467_v21  ;;  %v4468_v1 = vsub.f32 %v22158_v15, %v4392_v50 }
 0x49a   : > { %v4395_v42 = vpop.xlane.xlu0 %4394 }
 0x49b   : > { %19752 = vpow2.f32 %v4507_v44  ;;  %v4509_v60 = vmul.f32 1.442695, %v4468_v1  ;;  %v4469_v6 = vsub.f32 %v22154_v26, %v4395_v42 }
 0x49c   : > { %v4398_v62 = vpop.xlane.xlu1 %4397 }
 0x49d   : > { %19754 = vpow2.f32 %v4509_v60  ;;  %v4511_v5 = vmul.f32 1.442695, %v4469_v6  ;;  %v4470_v25 = vsub.f32 %v22164_v29, %v4398_v62 }
 0x49e   : > { %v4401_v47 = vpop.xlane.xlu0 %4400 }
 0x49f   : > { %19756 = vpow2.f32 %v4511_v5  ;;  %v4513_v4 = vmul.f32 1.442695, %v4470_v25  ;;  %v4471_v31 = vsub.f32 %v22172_v58, %v4401_v47 }
 0x4a0   : > { %v4404_v28 = vpop.xlane.xlu1 %4403 }
 0x4a1   : > { %19758 = vpow2.f32 %v4513_v4  ;;  %v4515_v57 = vmul.f32 1.442695, %v4471_v31  ;;  %v4472_v15 = vsub.f32 %v22182_v27, %v4404_v28 }
 0x4a2   : > { %v4407_v21 = vpop.xlane.xlu0 %4406 }
 0x4a3   : > { %19760 = vpow2.f32 %v4515_v57  ;;  %v4517_v50 = vmul.f32 1.442695, %v4472_v15  ;;  %v4473_v26 = vsub.f32 %v22178_v49, %v4407_v21 }
 0x4a4   : > { %v4410_v44 = vpop.xlane.xlu1 %4409 }
 0x4a5   : > { %v22345_v1 = vpop.eup %19752  ;;  %19762 = vpow2.f32 %v4517_v50  ;;  %v4519_v29 = vmul.f32 1.442695, %v4473_v26  ;;  %v4474_v42 = vsub.f32 %v22188_v8, %v4410_v44 }
 0x4a6   : > { %v4413_v60 = vpop.xlane.xlu0 %4412  ;;  %v4579_v58 = vsel %vm3958_vm0, %v22345_v1, 0.0 }
 0x4a7   : > { %v22350_v6 = vpop.eup %19754  ;;  %19764 = vpow2.f32 %v4519_v29  ;;  %v4521_v27 = vmul.f32 1.442695, %v4474_v42  ;;  %v4475_v62 = vsub.f32 %v22195_v40, %v4413_v60  ;;  %4580 = vadd.xlane.f32.xlu0 %v4579_v58 }
 0x4a8   : > { %v4416_v5 = vpop.xlane.xlu1 %4415  ;;  %v4582_v49 = vsel %vm3958_vm0, %v22350_v6, 0.0 }
 0x4a9   : > { %v22355_v25 = vpop.eup %19756  ;;  %19766 = vpow2.f32 %v4521_v27  ;;  %v4523_v47 = vmul.f32 1.442695, %v4475_v62  ;;  %v4476_v8 = vsub.f32 %v22202_v43, %v4416_v5  ;;  %4583 = vadd.xlane.f32.xlu1 %v4582_v49 }
 0x4aa   : > { %v4419_v4 = vpop.xlane.xlu0 %4418  ;;  %v4585_v31 = vsel %vm3958_vm0, %v22355_v25, 0.0 }
 0x4ab   : > { %v22360_v28 = vpop.eup %19758  ;;  %19768 = vpow2.f32 %v4523_v47  ;;  %v4525_v40 = vmul.f32 1.442695, %v4476_v8  ;;  %v4477_v57 = vsub.f32 %v22209_v13, %v4419_v4  ;;  %4586 = vadd.xlane.f32.xlu0 %v4585_v31 }
 0x4ac   : > { %v4422_v15 = vpop.xlane.xlu1 %4421  ;;  %v4588_v21 = vsel %vm3958_vm0, %v22360_v28, 0.0 }
 0x4ad   : > { %v22365_v50 = vpop.eup %19760  ;;  %19770 = vpow2.f32 %v4525_v40  ;;  %v4527_v43 = vmul.f32 1.442695, %v4477_v57  ;;  %v4478_v26 = vsub.f32 %v22216_v55, %v4422_v15  ;;  %4589 = vadd.xlane.f32.xlu1 %v4588_v21 }
 0x4ae   : > { %v4425_v44 = vpop.xlane.xlu0 %4424  ;;  %v4591_v29 = vsel %vm3958_vm0, %v22365_v50, 0.0 }
 0x4af   : > { %v22370_v42 = vpop.eup %19762  ;;  %19772 = vpow2.f32 %v4527_v43  ;;  %v4529_v13 = vmul.f32 1.442695, %v4478_v26  ;;  %v4479_v60 = vsub.f32 %v22223_v18, %v4425_v44  ;;  %4592 = vadd.xlane.f32.xlu0 %v4591_v29 }
 0x4b0   : > { %v4428_v58 = vpop.xlane.xlu1 %4427  ;;  %v4594_v27 = vsel %vm3958_vm0, %v22370_v42, 0.0 }
 0x4b1   : > { %v22375_v62 = vpop.eup %19764  ;;  %19774 = vpow2.f32 %v4529_v13  ;;  %v4531_v55 = vmul.f32 1.442695, %v4479_v60  ;;  %v4480_v5 = vsub.f32 %v22230_v20, %v4428_v58  ;;  %4595 = vadd.xlane.f32.xlu1 %v4594_v27 }
 0x4b2   : > { %v4431_v49 = vpop.xlane.xlu0 %4430  ;;  %v4597_v47 = vsel %vm3958_vm0, %v22375_v62, 0.0 }
 0x4b3   : > { %v22380_v8 = vpop.eup %19766  ;;  %19776 = vpow2.f32 %v4531_v55  ;;  %v4533_v18 = vmul.f32 1.442695, %v4480_v5  ;;  %v4481_v4 = vsub.f32 %v22237_v17, %v4431_v49  ;;  %4598 = vadd.xlane.f32.xlu0 %v4597_v47 }
 0x4b4   : > { %v4434_v31 = vpop.xlane.xlu1 %4433  ;;  %v4600_v40 = vsel %vm3958_vm0, %v22380_v8, 0.0 }
 0x4b5   : > { %v22385_v57 = vpop.eup %19768  ;;  %19778 = vpow2.f32 %v4533_v18  ;;  %v4535_v20 = vmul.f32 1.442695, %v4481_v4  ;;  %v4482_v15 = vsub.f32 %v22244_v37, %v4434_v31  ;;  %4601 = vadd.xlane.f32.xlu1 %v4600_v40 }
 0x4b6   : > { %v4437_v21 = vpop.xlane.xlu0 %4436  ;;  %v4603_v43 = vsel %vm3958_vm0, %v22385_v57, 0.0 }
 0x4b7   : > { %v22390_v26 = vpop.eup %19770  ;;  %19780 = vpow2.f32 %v4535_v20  ;;  %v4537_v17 = vmul.f32 1.442695, %v4482_v15  ;;  %v4483_v44 = vsub.f32 %v22252_v52, %v4437_v21  ;;  %4604 = vadd.xlane.f32.xlu0 %v4603_v43 }
 0x4b8   : > { %v4440_v29 = vpop.xlane.xlu1 %4439  ;;  %v4606_v13 = vsel %vm3958_vm0, %v22390_v26, 0.0 }
 0x4b9   : > { %v22395_v60 = vpop.eup %19772  ;;  %19782 = vpow2.f32 %v4537_v17  ;;  %v4539_v37 = vmul.f32 1.442695, %v4483_v44  ;;  %v4484_v58 = vsub.f32 %v22262_v12, %v4440_v29  ;;  %4607 = vadd.xlane.f32.xlu1 %v4606_v13 }
 0x4ba   : > { %v4443_v27 = vpop.xlane.xlu0 %4442  ;;  %v4609_v55 = vsel %vm3958_vm0, %v22395_v60, 0.0 }
 0x4bb   : > { %v22400_v5 = vpop.eup %19774  ;;  %19784 = vpow2.f32 %v4539_v37  ;;  %v4541_v52 = vmul.f32 1.442695, %v4484_v58  ;;  %v4485_v49 = vsub.f32 %v22258_v10, %v4443_v27  ;;  %4610 = vadd.xlane.f32.xlu0 %v4609_v55 }
 0x4bc   : > { %v4446_v47 = vpop.xlane.xlu1 %4445  ;;  %v4612_v18 = vsel %vm3958_vm0, %v22400_v5, 0.0 }
 0x4bd   : > { %v22405_v4 = vpop.eup %19776  ;;  %19786 = vpow2.f32 %v4541_v52  ;;  %v4543_v12 = vmul.f32 1.442695, %v4485_v49  ;;  %v4486_v31 = vsub.f32 %v22268_v16, %v4446_v47  ;;  %4613 = vadd.xlane.f32.xlu1 %v4612_v18 }
 0x4be   : > { %v4449_v40 = vpop.xlane.xlu0 %4448  ;;  %v4615_v20 = vsel %vm3958_vm0, %v22405_v4, 0.0 }
 0x4bf   : > { %v22410_v15 = vpop.eup %19778  ;;  %19788 = vpow2.f32 %v4543_v12  ;;  %v4545_v10 = vmul.f32 1.442695, %v4486_v31  ;;  %v4487_v21 = vsub.f32 %v22276_v19, %v4449_v40  ;;  %4616 = vadd.xlane.f32.xlu0 %v4615_v20 }
 0x4c0   : > { %v4452_v43 = vpop.xlane.xlu1 %4451  ;;  %v4618_v17 = vsel %vm3958_vm0, %v22410_v15, 0.0 }
 0x4c1   : > { %v22415_v44 = vpop.eup %19780  ;;  %19790 = vpow2.f32 %v4545_v10  ;;  %v4547_v16 = vmul.f32 1.442695, %v4487_v21  ;;  %v4488_v29 = vsub.f32 %v22286_v9, %v4452_v43  ;;  %4619 = vadd.xlane.f32.xlu1 %v4618_v17 }
 0x4c2   : > { %v4455_v13 = vpop.xlane.xlu0 %4454  ;;  %v4621_v37 = vsel %vm3958_vm0, %v22415_v44, 0.0 }
 0x4c3   : > { %v22420_v58 = vpop.eup %19782  ;;  %19792 = vpow2.f32 %v4547_v16  ;;  %v4549_v19 = vmul.f32 1.442695, %v4488_v29  ;;  %v4489_v27 = vsub.f32 %v22282_v61, %v4455_v13  ;;  %4622 = vadd.xlane.f32.xlu0 %v4621_v37 }
 0x4c4   : > { %v4458_v55 = vpop.xlane.xlu1 %4457  ;;  %v4624_v52 = vsel %vm3958_vm0, %v22420_v58, 0.0 }
 0x4c5   : > { %v22425_v49 = vpop.eup %19784  ;;  %19794 = vpow2.f32 %v4549_v19  ;;  %v4551_v9 = vmul.f32 1.442695, %v4489_v27  ;;  %v4490_v47 = vsub.f32 %v22292_v14, %v4458_v55  ;;  %4625 = vadd.xlane.f32.xlu1 %v4624_v52  ;;  %v22460_v27 = vld [vmem:[#allocation9 + $0x8] ss:$12 sps:$4 sm:$0xff]   ;;  %v26522_v55 = vld [vmem:[#allocation41_spill] sm:$0xff] }
 0x4c6   : > { %v4627_v18 = vsel %vm3958_vm0, %v22425_v49, 0.0  ;;  %17519 = vmatprep.subr.bf16.mxu1 %v22460_v27 }
 0x4c7   : > { %v22430_v12 = vpop.eup %19786  ;;  %19796 = vpow2.f32 %v4551_v9  ;;  %v4553_v31 = vmul.f32 1.442695, %v4490_v47  ;;  %4628 = vadd.xlane.f32.xlu0 %v4627_v18  ;;  %v26523_v9 = vld [vmem:[#allocation21_spill] sm:$0xff] }
 0x4c8   : > { %v4630_v61 = vsel %vm3958_vm0, %v22430_v12, 0.0 }
 0x4c9   : > { %v22434_v40 = vpop.eup %19788  ;;  %19798 = vpow2.f32 %v4553_v31  ;;  %4631 = vadd.xlane.f32.xlu1 %v4630_v61  ;;  %v26524_v31 = vld [vmem:[#allocation58_spill] sm:$0xff] }
 0x4ca   : > { %v4633_v20 = vsel %vm3958_vm0, %v22434_v40, 0.0 }
 0x4cb   : > { %v22438_v14 = vpop.eup %19790  ;;  %4634 = vadd.xlane.f32.xlu0 %v4633_v20 }
 0x4cc   : > { %v4636_v10 = vsel %vm3958_vm0, %v22438_v14, 0.0 }
 0x4cd   : > { %v22442_v21 = vpop.eup %19792  ;;  %4637 = vadd.xlane.f32.xlu1 %v4636_v10 }
 0x4ce   : > { %v4639_v43 = vsel %vm3958_vm0, %v22442_v21, 0.0 }
 0x4cf   : > { %v22446_v17 = vpop.eup %19794  ;;  %4640 = vadd.xlane.f32.xlu0 %v4639_v43  ;;  %v26525_v43 = vld [vmem:[#allocation23_spill] sm:$0xff] }
 0x4d0   : > { %v4642_v16 = vsel %vm3958_vm0, %v22446_v17, 0.0 }
 0x4d1   : > { %v22450_v29 = vpop.eup %19796  ;;  %4643 = vadd.xlane.f32.xlu1 %v4642_v16 }
 0x4d2   : > { %v4645_v13 = vsel %vm3958_vm0, %v22450_v29, 0.0 }
 0x4d3   : > { %v22454_v37 = vpop.eup %19798  ;;  %4646 = vadd.xlane.f32.xlu0 %v4645_v13 }
 0x4d4   : > { %v4648_v19 = vsel %vm3958_vm0, %v22454_v37, 0.0 }
 0x4d5   : > { %4649 = vadd.xlane.f32.xlu1 %v4648_v19 }
 0x4e6   : > { %5699 = vrot.lane.b32.xlu1 %v21508_v30, %s20672_s21  ;;  %v26512_v30 = vld [vmem:[#allocation62_spill] sm:$0xff] }
 0x4e9   : > { %5697 = vrot.lane.b32.xlu0 %v21494_v59, %s20672_s21  ;;  %v26511_v59 = vld [vmem:[#allocation64_spill] sm:$0xff] }
 0x4ea   : > { %5701 = vrot.lane.b32.xlu1 %v21518_v39, %s20672_s21  ;;  %v26513_v39 = vld [vmem:[#allocation15_spill] sm:$0xff] }
 0x4ed   : > { %5685 = vrot.lane.b32.xlu0 %v26409_v0, %s20672_s21  ;;  %v26518_v0 = vld [vmem:[#allocation27_spill] sm:$0xff] }
 0x4ee   : > { %5703 = vrot.lane.b32.xlu1 %v21532_v63, %s20672_s21  ;;  %v26514_v63 = vld [vmem:[#allocation42_spill] sm:$0xff] }
 0x4f1   : > { %5810 = vrot.lane.b32.xlu0 %v26397_v53, %s20672_s21 }
 0x4f2   : > { %5687 = vrot.lane.b32.xlu1 %v26412_v51, %s20672_s21  ;;  %v26519_v51 = vld [vmem:[#allocation46_spill] sm:$0xff] }
 0x4f5   : > { %5689 = vrot.lane.b32.xlu0 %v26413_v34, %s20672_s21 }
 0x4f6   : > { %5812 = vrot.lane.b32.xlu1 %v26414_v38, %s20672_s21 }
 0x4f9   : > { %5814 = vrot.lane.b32.xlu0 %v26419_v46, %s20672_s21 }
 0x4fa   : > { %5691 = vrot.lane.b32.xlu1 %v26417_v3, %s20672_s21  ;;  %v26520_v3 = vld [vmem:[#allocation40_spill] sm:$0xff] }
 0x4fd   : > { %5816 = vrot.lane.b32.xlu0 %v26422_v45, %s20672_s21 }
 0x4fe   : > { %5923 = vrot.lane.b32.xlu1 %v21573_v36, %s20672_s21  ;;  %v26515_v36 = vld [vmem:[#allocation66_spill] sm:$0xff] }
 0x501   : > { %5798 = vrot.lane.b32.xlu0 %v26418_v2, %s20672_s21  ;;  %v26521_v2 = vld [vmem:[#allocation70_spill] sm:$0xff] }
 0x502   : > { %5925 = vrot.lane.b32.xlu1 %v21585_v35, %s20672_s21 }
 0x505   : > { %5927 = vrot.lane.b32.xlu0 %v21597_v54, %s20672_s21  ;;  %v26517_v54 = vld [vmem:[#allocation44_spill] sm:$0xff] }
 0x506   : > { %5800 = vrot.lane.b32.xlu1 %v26431_v24, %s20672_s21  ;;  %v26516_v24 = vld [vmem:[#allocation68_spill] sm:$0xff] }
 0x509   : > { %5802 = vrot.lane.b32.xlu0 %v26432_v48, %s20672_s21 }
 0x50a   : > { %6036 = vrot.lane.b32.xlu1 %v26511_v59, %s20672_s21 }
 0x50d   : > { %5929 = vrot.lane.b32.xlu0 %v26512_v30, %s20672_s21  ;;  %v26526_v30 = vld [vmem:[#allocation52_spill] sm:$0xff] }
 0x50e   : > { %5804 = vrot.lane.b32.xlu1 %v26513_v39, %s20672_s21 }
 0x511   : > { %5911 = vrot.lane.b32.xlu0 %v26514_v63, %s20672_s21 }
 0x512   : > { %6038 = vrot.lane.b32.xlu1 %v26515_v36, %s20672_s21 }
 0x514   : > { %v4557_v35 = vpop.xlane.xlu0 %4556 }
 0x515   : > { %6040 = vrot.lane.b32.xlu0 %v26516_v24, %s20672_s21  ;;  %19800 = vrcp.f32 %v4557_v35  ;;  %v26528_v35 = vld [vmem:[#allocation97_spill] sm:$0xff]  ;;  %v26529_v24 = vld [vmem:[#allocation100_spill] sm:$0xff] }
 0x516   : > { %5913 = vrot.lane.b32.xlu1 %v26517_v54, %s20672_s21  ;;  %v26530_v54 = vld [vmem:[#allocation102_spill] sm:$0xff] }
 0x518   : > { %v4563_v48 = vpop.xlane.xlu0 %4562  ;;  %v4560_v53 = vpop.xlane.xlu1 %4559 }
 0x519   : > { %5917 = vrot.lane.b32.xlu0 %v26518_v0, %s20672_s21  ;;  %19802 = vrcp.f32 %v4560_v53 }
 0x51a   : > { %5915 = vrot.lane.b32.xlu1 %v26519_v51, %s20672_s21  ;;  %19804 = vrcp.f32 %v4563_v48 }
 0x51c   : > { %v4569_v34 = vpop.xlane.xlu0 %4568  ;;  %v4566_v38 = vpop.xlane.xlu1 %4565 }
 0x51d   : > { %6024 = vrot.lane.b32.xlu0 %v26520_v3, %s20672_s21  ;;  %19806 = vrcp.f32 %v4566_v38  ;;  %v26534_v3 = vld [vmem:[#allocation106_spill] sm:$0xff] }
 0x51e   : > { %6042 = vrot.lane.b32.xlu1 %v26521_v2, %s20672_s21  ;;  %19808 = vrcp.f32 %v4569_v34  ;;  %v26532_v34 = vld [vmem:[#allocation104_spill] sm:$0xff] }
 0x51f   : > { %v19801_v52 = vpop.eup %19800 }
 0x520   : > { %v4575_v46 = vpop.xlane.xlu0 %4574  ;;  %v4572_v45 = vpop.xlane.xlu1 %4571  ;;  %v4683_v61 = vmul.f32 %v19801_v52, %v22305_v22  ;;  %v26527_v22 = vld [vmem:[#allocation91_spill] sm:$0xff] }
 0x521   : > { %6028 = vrot.lane.b32.xlu0 %v26522_v55, %s20672_s21  ;;  %19810 = vrcp.f32 %v4572_v45 }
 0x522   : > { %6026 = vrot.lane.b32.xlu1 %v26523_v9, %s20672_s21  ;;  %19812 = vrcp.f32 %v4575_v46 }
 0x523   : > { %v19803_v47 = vpop.eup %19802 }
 0x524   : > { %v4578_v18 = vpop.xlane.xlu1 %4577  ;;  %v4684_v20 = vmul.f32 %v19803_v47, %v22312_v56  ;;  %v19805_v10 = vpop.eup %19804 }
 0x525   : > { %6537 = vrot.lane.b32.xlu0 %v26524_v31, %s20672_s21  ;;  %19814 = vrcp.f32 %v4578_v18  ;;  %v4685_v19 = vmul.f32 %v19805_v10, %v22310_v23 }
 0x526   : > { %6030 = vrot.lane.b32.xlu1 %v26525_v43, %s20672_s21  ;;  %v4715_v16 = vpack.c.bf16 %v4684_v20, %v4683_v61 }
 0x527   : > { %v19807_v13 = vpop.eup %19806 }
 0x528   : > { %v4686_v59 = vmul.f32 %v19807_v13, %v22318_v11  ;;  %17463 = vmatprep.mubr.msk.bf16.mxu0 %vm3958_vm0, %v4715_v16  ;;  %v19809_v39 = vpop.eup %19808 }
 0x529   : > { %6541 = vrot.lane.b32.xlu0 %v26526_v30, %s20672_s21  ;;  %v4687_v23 = vmul.f32 %v19809_v39, %v22320_v7  ;;  %v26531_v7 = vld [vmem:[#allocation108_spill] sm:$0xff] }
 0x52a   : > { %6539 = vrot.lane.b32.xlu1 %v26527_v22, %s20672_s21  ;;  %v4716_v56 = vpack.c.bf16 %v4686_v59, %v4685_v19 }
 0x52b   : > { %v19811_v63 = vpop.eup %19810 }
 0x52c   : > { %v19813_v36 = vpop.eup %19812  ;;  %17464 = vmatmul.mubr.msk.bf16.vlgmr.msra.gmra.mrb[200].mxu0 %vm3958_vm0, %v4716_v56  ;;  %v4688_v11 = vmul.f32 %v19811_v63, %v22326_v32 }
 0x52d   : > { %6543 = vrot.lane.b32.xlu0 %v26528_v35, %s20672_s21  ;;  %17472 = vmatpush3.bf16.msra.mxu0 %v26529_v24  ;;  %v4689_v0 = vmul.f32 %v19813_v36, %v22328_v41  ;;  %v26533_v41 = vld [vmem:[#allocation110_spill] sm:$0xff] }
 0x52e   : > { %6632 = vrot.lane.b32.xlu1 %v26530_v54, %s20672_s21  ;;  %17473 = vmatprep.subr.bf16.mxu0 %v26530_v54  ;;  %v4717_v53 = vpack.c.bf16 %v4688_v11, %v4687_v23 }
 0x52f   : > { %v19815_v48 = vpop.eup %19814 }
 0x530   : > { %v4690_v51 = vmul.f32 %v19815_v48, %v22334_v33  ;;  %17467 = vmatprep.mubr.msk.bf16.mxu0 %vm3958_vm0, %v4717_v53 }
 0x531   : > { %6630 = vrot.lane.b32.xlu0 %v26529_v24, %s20672_s21  ;;  %17474 = vmatpush3.bf16.msra.mxu0 %v26530_v54 }
 0x532   : > { %6723 = vrot.lane.b32.xlu1 %v26531_v7, %s20672_s21  ;;  %v4718_v32 = vpack.c.bf16 %v4690_v51, %v4689_v0  ;;  %17475 = vmatprep.subr.bf16.mxu0 %v26532_v34 }
 0x534   : > { %v4581_v38 = vpop.xlane.xlu0 %4580  ;;  %17468 = vmatmul.mubr.msk.bf16.gmra.mrb[204].mxu0 %vm3958_vm0, %v4718_v32 }
 0x535   : > { %19816 = vrcp.f32 %v4581_v38  ;;  %6634 = vrot.lane.b32.xlu0 %v26532_v34, %s20672_s21  ;;  %17476 = vmatpush3.bf16.msra.mxu0 %v26532_v34  ;;  %v19644_v38 = vld [vmem:[#allocation9 + $0x4] ss:$12 sps:$4 sm:$0xff]  }
 0x536   : > { %6725 = vrot.lane.b32.xlu1 %v26533_v41, %s20672_s21  ;;  %v4584_v33 = vpop.xlane.xlu1 %4583  ;;  %17477 = vmatprep.subr.bf16.mxu0 %v26534_v3 }
 0x537   : > { %19818 = vrcp.f32 %v4584_v33 }
 0x538   : > { %v4587_v2 = vpop.xlane.xlu0 %4586 }
 0x539   : > { %19820 = vrcp.f32 %v4587_v2  ;;  %6636 = vrot.lane.b32.xlu0 %v26534_v3, %s20672_s21  ;;  %17478 = vmatpush3.bf16.msra.mxu0 %v26534_v3 }
 0x53a   : > { %v4590_v46 = vpop.xlane.xlu1 %4589  ;;  %17487 = vmatprep.subr.bf16.mxu0 %v26531_v7 }
 0x53b   : > { %19822 = vrcp.f32 %v4590_v46 }
 0x53c   : > { %v4593_v45 = vpop.xlane.xlu0 %4592 }
 0x53d   : > { %19824 = vrcp.f32 %v4593_v45 }
 0x53e   : > { %v4596_v55 = vpop.xlane.xlu1 %4595 }
 0x53f   : > { %v19817_v52 = vpop.eup %19816  ;;  %19826 = vrcp.f32 %v4596_v55  ;;  %v19648_v55 = vld [vmem:[#allocation9 + $0x1c] ss:$12 sps:$4 sm:$0xff]  }
 0x540   : > { %v4599_v9 = vpop.xlane.xlu0 %4598  ;;  %v4691_v31 = vmul.f32 %v19817_v52, %v22345_v1 }
 0x541   : > { %v19819_v47 = vpop.eup %19818  ;;  %19828 = vrcp.f32 %v4599_v9 }
 0x542   : > { %v4602_v18 = vpop.xlane.xlu1 %4601  ;;  %v4692_v61 = vmul.f32 %v19819_v47, %v22350_v6 }
 0x543   : > { %v19821_v20 = vpop.eup %19820  ;;  %19830 = vrcp.f32 %v4602_v18  ;;  %v19646_v18 = vld [vmem:[#allocation9 + $0x18] ss:$12 sps:$4 sm:$0xff]  }
 0x544   : > { %v4605_v10 = vpop.xlane.xlu0 %4604  ;;  %v4719_v43 = vpack.c.bf16 %v4692_v61, %v4691_v31  ;;  %v4693_v13 = vmul.f32 %v19821_v20, %v22355_v25  ;;  %v19652_v20 = vld [vmem:[#allocation9 + $0x34] ss:$12 sps:$4 sm:$0xff]  }
 0x545   : > { %v19823_v16 = vpop.eup %19822  ;;  %19832 = vrcp.f32 %v4605_v10 }
 0x546   : > { %v4694_v19 = vmul.f32 %v19823_v16, %v22360_v28  ;;  %17479 = vmatprep.mubr.msk.bf16.mxu0 %vm3958_vm0, %v4719_v43  ;;  %v4608_v59 = vpop.xlane.xlu1 %4607 }
 0x547   : > { %v19825_v30 = vpop.eup %19824  ;;  %19834 = vrcp.f32 %v4608_v59 }
 0x548   : > { %v4720_v39 = vpack.c.bf16 %v4694_v19, %v4693_v13  ;;  %v4611_v22 = vpop.xlane.xlu0 %4610  ;;  %v4695_v56 = vmul.f32 %v19825_v30, %v22365_v50  ;;  %v19655_v30 = vld [vmem:[#allocation9 + $0x4c] ss:$12 sps:$4 sm:$0xff]  }
 0x549   : > { %v19827_v1 = vpop.eup %19826  ;;  %19836 = vrcp.f32 %v4611_v22 }
 0x54a   : > { %17480 = vmatmul.mubr.msk.bf16.vlgmr.msra.gmra.mrb[208].mxu0 %vm3958_vm0, %v4720_v39  ;;  %v4614_v6 = vpop.xlane.xlu1 %4613  ;;  %v4696_v63 = vmul.f32 %v19827_v1, %v22370_v42  ;;  %v26535_v42 = vld [vmem:[#allocation112_spill] sm:$0xff] }
 0x54b   : > { %v19829_v36 = vpop.eup %19828  ;;  %17488 = vmatpush3.bf16.msra.mxu0 %v26531_v7  ;;  %19838 = vrcp.f32 %v4614_v6 }
 0x54c   : > { %17489 = vmatprep.subr.bf16.mxu0 %v26533_v41  ;;  %v4617_v25 = vpop.xlane.xlu0 %4616  ;;  %v4721_v28 = vpack.c.bf16 %v4696_v63, %v4695_v56  ;;  %v4697_v11 = vmul.f32 %v19829_v36, %v22375_v62  ;;  %v26537_v56 = vmov 0  }
 0x54d   : > { %v19831_v35 = vpop.eup %19830  ;;  %19840 = vrcp.f32 %v4617_v25 }
 0x54e   : > { %17483 = vmatprep.mubr.msk.bf16.mxu0 %vm3958_vm0, %v4721_v28  ;;  %v4620_v23 = vpop.xlane.xlu1 %4619  ;;  %v4698_v24 = vmul.f32 %v19831_v35, %v22380_v8  ;;  %v26536_v8 = vld [vmem:[#allocation114_spill] sm:$0xff] }
 0x54f   : > { %v19833_v50 = vpop.eup %19832  ;;  %17490 = vmatpush3.bf16.msra.mxu0 %v26533_v41  ;;  %19842 = vrcp.f32 %v4620_v23  ;;  %v19641_v23 = vld [vmem:[#allocation9 + $0x20] ss:$12 sps:$4 sm:$0xff]  }
 0x550   : > { %17491 = vmatprep.subr.bf16.mxu0 %v26535_v42  ;;  %v4623_v54 = vpop.xlane.xlu0 %4622  ;;  %v4722_v48 = vpack.c.bf16 %v4698_v24, %v4697_v11  ;;  %v4699_v51 = vmul.f32 %v19833_v50, %v22385_v57 }
 0x551   : > { %v19835_v53 = vpop.eup %19834  ;;  %19844 = vrcp.f32 %v4623_v54 }
 0x552   : > { %17484 = vmatmul.mubr.msk.bf16.gmra.mrb[212].mxu0 %vm3958_vm0, %v4722_v48  ;;  %v4626_v0 = vpop.xlane.xlu1 %4625  ;;  %v4700_v7 = vmul.f32 %v19835_v53, %v22390_v26  ;;  %v19642_v26 = vld [vmem:[#allocation9] ss:$12 sps:$4 sm:$0xff]   ;;  %v19645_v48 = vld [vmem:[#allocation9 + $0x38] ss:$12 sps:$4 sm:$0xff]  }
 0x553   : > { %v19837_v62 = vpop.eup %19836  ;;  %17492 = vmatpush3.bf16.msra.mxu0 %v26535_v42  ;;  %19846 = vrcp.f32 %v4626_v0 }
 0x554   : > { %17493 = vmatprep.subr.bf16.mxu0 %v26536_v8  ;;  %v4629_v32 = vpop.xlane.xlu0 %4628  ;;  %v4723_v34 = vpack.c.bf16 %v4700_v7, %v4699_v51  ;;  %v4701_v33 = vmul.f32 %v19837_v62, %v22395_v60  ;;  %v19649_v62 = vld [vmem:[#allocation9 + $0x50] ss:$12 sps:$4 sm:$0xff]  }
 0x555   : > { %v19839_v41 = vpop.eup %19838  ;;  %19848 = vrcp.f32 %v4629_v32 }
 0x556   : > { %v4702_v3 = vmul.f32 %v19839_v41, %v22400_v5  ;;  %17495 = vmatprep.mubr.msk.bf16.mxu0 %vm3958_vm0, %v4723_v34  ;;  %v4632_v57 = vpop.xlane.xlu1 %4631 }
 0x557   : > { %v19841_v2 = vpop.eup %19840  ;;  %17494 = vmatpush3.bf16.msra.mxu0 %v26536_v8  ;;  %19850 = vrcp.f32 %v4632_v57 }
 0x558   : > { %v4724_v46 = vpack.c.bf16 %v4702_v3, %v4701_v33  ;;  %v4635_v45 = vpop.xlane.xlu0 %4634  ;;  %5183 = vmatprep.subr.bf16.mxu0 %v19644_v38  ;;  %v4703_v60 = vmul.f32 %v19841_v2, %v22405_v4 }
 0x559   : > { %v19843_v52 = vpop.eup %19842  ;;  %19852 = vrcp.f32 %v4635_v45 }
 0x55a   : > { %17496 = vmatmul.mubr.msk.bf16.vlgmr.msra.gmra.mrb[216].mxu0 %vm3958_vm0, %v4724_v46  ;;  %v4638_v9 = vpop.xlane.xlu1 %4637  ;;  %v4704_v5 = vmul.f32 %v19843_v52, %v22410_v15  ;;  %v19650_v15 = vld [vmem:[#allocation9 + $0x30] ss:$12 sps:$4 sm:$0xff]  }
 0x55b   : > { %v19845_v47 = vpop.eup %19844  ;;  %19854 = vrcp.f32 %v4638_v9  ;;  %5184 = vmatpush1.bf16.msra.mxu0 %v19642_v26 }
 0x55c   : > { %v4641_v31 = vpop.xlane.xlu0 %4640  ;;  %v4725_v61 = vpack.c.bf16 %v4704_v5, %v4703_v60  ;;  %5185 = vmatprep.subr.bf16.mxu0 %v19648_v55  ;;  %v4705_v16 = vmul.f32 %v19845_v47, %v22415_v44 }
 0x55d   : > { %v19847_v10 = vpop.eup %19846  ;;  %19856 = vrcp.f32 %v4641_v31 }
 0x55e   : > { %17499 = vmatprep.mubr.msk.bf16.mxu0 %vm3958_vm0, %v4725_v61  ;;  %v4644_v43 = vpop.xlane.xlu1 %4643  ;;  %v4706_v13 = vmul.f32 %v19847_v10, %v22420_v58  ;;  %v19653_v58 = vld [vmem:[#allocation9 + $0x48] ss:$12 sps:$4 sm:$0xff]  }
 0x55f   : > { %v19849_v4 = vpop.eup %19848  ;;  %19858 = vrcp.f32 %v4644_v43  ;;  %5186 = vmatpush1.bf16.msra.mxu0 %v19646_v18 }
 0x560   : > { %v4647_v19 = vpop.xlane.xlu0 %4646  ;;  %v4726_v59 = vpack.c.bf16 %v4706_v13, %v4705_v16  ;;  %5187 = vmatprep.subr.bf16.mxu0 %v19652_v20  ;;  %v4707_v1 = vmul.f32 %v19849_v4, %v22425_v49 }
 0x561   : > { %v19851_v39 = vpop.eup %19850  ;;  %19860 = vrcp.f32 %v4647_v19 }
 0x562   : > { %17500 = vmatmul.mubr.msk.bf16.gmra.mrb[220].mxu0 %vm3958_vm0, %v4726_v59  ;;  %v4650_v22 = vpop.xlane.xlu1 %4649  ;;  %v4708_v6 = vmul.f32 %v19851_v39, %v22430_v12 }
 0x563   : > { %v19853_v44 = vpop.eup %19852  ;;  %19862 = vrcp.f32 %v4650_v22  ;;  %5188 = vmatpush1.bf16.msra.mxu0 %v19650_v15  ;;  %5215 = vmatprep.mubr.bf16.mxu0 %v26537_v56 }
 0x564   : > { %v4727_v63 = vpack.c.bf16 %v4708_v6, %v4707_v1  ;;  %5189 = vmatprep.subr.bf16.mxu0 %v19655_v30  ;;  %v4709_v25 = vmul.f32 %v19853_v44, %v22434_v40  ;;  %v5698_v32 = vpop.permute.xlu0 %5697 }
 0x565   : > { %v19855_v36 = vpop.eup %19854  ;;  %v5718_v20 = vsel %vm3958_vm0, %v5698_v32, 0 }
 0x566   : > { %v4710_v28 = vmul.f32 %v19855_v36, %v22438_v14  ;;  %17511 = vmatprep.mubr.msk.bf16.mxu1 %vm3958_vm0, %v4727_v63  ;;  %v22602_v35 = vpop.permute.xlu1 %5699 }
 0x567   : > { %v19857_v49 = vpop.eup %19856  ;;  %5190 = vmatpush1.bf16.msra.mxu0 %v19653_v58  ;;  %v5721_v30 = vsel %vm3958_vm0, %v22602_v35, 0 }
 0x568   : > { %v4728_v12 = vpack.c.bf16 %v4710_v28, %v4709_v25  ;;  %v4711_v50 = vmul.f32 %v19857_v49, %v22442_v21 }
 0x569   : > { %v19859_v11 = vpop.eup %19858 }
 0x56a   : > { %17512 = vmatmul.mubr.msk.bf16.vlgmr.msra.gmra.mrb[216].mxu1 %vm3958_vm0, %v4728_v12  ;;  %v22605_v24 = vpop.permute.xlu1 %5701  ;;  %v4712_v54 = vmul.f32 %v19859_v11, %v22446_v17 }
 0x56b   : > { %v19861_v40 = vpop.eup %19860  ;;  %17520 = vmatpush3.bf16.msra.mxu1 %v22460_v27  ;;  %v5724_v1 = vsel %vm3958_vm0, %v22605_v24, 0 }
 0x56c   : > { %17521 = vmatprep.subr.bf16.mxu1 %v19641_v23  ;;  %v4729_v14 = vpack.c.bf16 %v4712_v54, %v4711_v50  ;;  %v4713_v51 = vmul.f32 %v19861_v40, %v22450_v29 }
 0x56d   : > { %v19863_v53 = vpop.eup %19862 }
 0x56e   : > { %17515 = vmatprep.mubr.msk.bf16.mxu1 %vm3958_vm0, %v4729_v14  ;;  %v22611_v0 = vpop.permute.xlu1 %5703  ;;  %v4714_v7 = vmul.f32 %v19863_v53, %v22454_v37  ;;  %v22624_v37 = vpop.permute.xlu0 %5685 }
 0x56f   : > { %17522 = vmatpush3.bf16.msra.mxu1 %v19641_v23  ;;  %v5727_v28 = vsel %vm3958_vm0, %v22611_v0, 0 }
 0x570   : > { %17523 = vmatprep.subr.bf16.mxu1 %v19645_v48  ;;  %v4730_v21 = vpack.c.bf16 %v4714_v7, %v4713_v51 }
 0x572   : > { %17516 = vmatmul.mubr.msk.bf16.gmra.mrb[220].mxu1 %vm3958_vm0, %v4730_v21  ;;  %v22616_v17 = vpop.permute.xlu1 %5687  ;;  %v22626_v38 = vpop.permute.xlu0 %5810 }
 0x573   : > { %17524 = vmatpush3.bf16.msra.mxu1 %v19645_v48 }
 0x574   : > { %17525 = vmatprep.subr.bf16.mxu1 %v19649_v62 }
 0x576   : > { %v22618_v27 = vpop.permute.xlu1 %5812  ;;  %v22628_v41 = vpop.permute.xlu0 %5689 }
 0x577   : > { %17526 = vmatpush3.bf16.msra.mxu1 %v19649_v62 }
 0x578   : > { %19167 = vmatprep.subr.msk.bf16.mxu1 %vm3958_vm0, %v5698_v32 }
 0x57a   : > { %v22621_v34 = vpop.permute.xlu1 %5691  ;;  %v22630_v33 = vpop.permute.xlu0 %5814 }
 0x57e   : > { %v5924_v29 = vpop.permute.xlu1 %5923  ;;  %v22632_v3 = vpop.permute.xlu0 %5816 }
 0x57f   : > { %19175 = vmatprep.subr.msk.bf16.mxu0 %vm3958_vm0, %v5924_v29  ;;  %v5944_v18 = vsel %vm3958_vm0, %v5924_v29, 0 }
 0x582   : > { %v22634_v57 = vpop.permute.xlu0 %5798  ;;  %v5926_v31 = vpop.permute.xlu1 %5925 }
 0x583   : > { %v5947_v59 = vsel %vm3958_vm0, %v5926_v31, 0 }
 0x586   : > { %v5928_v2 = vpop.permute.xlu0 %5927 }
 0x587   : > { %v5950_v22 = vsel %vm3958_vm0, %v5928_v2, 0 }
 0x58a   : > { %v22636_v26 = vpop.permute.xlu0 %5802 }
 0x58e   : > { %v5930_v46 = vpop.permute.xlu0 %5929 }
 0x58f   : > { %v5953_v63 = vsel %vm3958_vm0, %v5930_v46, 0 }
 0x592   : > { %v22638_v55 = vpop.permute.xlu0 %5911 }
 0x596   : > { %v22643_v61 = vpop.permute.xlu0 %6040 }
 0x59a   : > { %v22651_v19 = vpop.permute.xlu0 %5917 }
 0x59e   : > { %v22663_v39 = vpop.permute.xlu0 %6024 }
 0x5a2   : > { %v22671_v6 = vpop.permute.xlu0 %6028 }
 0x5a6   : > { %v22677_v36 = vpop.permute.xlu0 %6537 }
 0x5ff   : > { %v17465_v45 = vpop.f32.mrb[200].mxu0 }
 0x600   : > { %v4777_v52 = vpop.f32.mrb[201].mxu0 }
 0x601   : > { %v17466_v9 = vpop.f32.mrb[202].mxu0 }
 0x602   : > { %v5040_v60 = vpack.c.bf16 %v17466_v9, %v17465_v45  ;;  %v4780_v5 = vpop.f32.mrb[203].mxu0 }
 0x603   : > { %v5039_v47 = vpack.c.bf16 %v4780_v5, %v4777_v52 }
 0x605   : > { %16286 = vmatmul.mubr.msk.bf16.vlgmr.msra.gmra.mrb[224].mxu0 %vm3958_vm0, %v5039_v47  ;;  %17527 = vmatprep.mubr.msk.bf16.mxu1 %vm3958_vm0, %v5039_v47 }
 0x606   : > { %17592 = vmatpush3.bf16.xpose.msra.mxu0 %v5944_v18  ;;  %17528 = vmatmul.mubr.msk.bf16.vlgmr.msra.gmra.mrb[224].mxu1 %vm3958_vm0, %v5040_v60 }
 0x607   : > { %17560 = vmatpush3.bf16.xpose.msra.mxu1 %v5718_v20  ;;  %19176 = vmatprep.subr.msk.bf16.mxu0 %vm3958_vm0, %v5926_v31  ;;  %v17469_v10 = vpop.f32.mrb[204].mxu0 }
 0x608   : > { %19168 = vmatprep.subr.msk.bf16.mxu1 %vm3958_vm0, %v22602_v35  ;;  %v4793_v43 = vpop.f32.mrb[205].mxu0  ;;  %5225 = vmatprep.mubr.bf16.mxu0 %v26537_v56 }
 0x609   : > { %v17470_v16 = vpop.f32.mrb[206].mxu0 }
 0x60a   : > { %v5042_v13 = vpack.c.bf16 %v17470_v16, %v17469_v10  ;;  %v4796_v4 = vpop.f32.mrb[207].mxu0 }
 0x60b   : > { %v5041_v15 = vpack.c.bf16 %v4796_v4, %v4793_v43  ;;  %v5831_v4 = vsel %vm3958_vm0, %v22626_v38, 0 }
 0x60d   : > { %16287 = vmatmul.mubr.msk.bf16.gmra.mrb[228].mxu0 %vm3958_vm0, %v5040_v60  ;;  %17531 = vmatprep.mubr.msk.bf16.mxu1 %vm3958_vm0, %v5041_v15 }
 0x60e   : > { %17594 = vmatpush3.bf16.xpose.msra.mxu0 %v5947_v59  ;;  %17532 = vmatmul.mubr.msk.bf16.gmra.mrb[228].mxu1 %vm3958_vm0, %v5042_v13 }
 0x60f   : > { %17562 = vmatpush3.bf16.xpose.msra.mxu1 %v5721_v30  ;;  %19177 = vmatprep.subr.msk.bf16.mxu0 %vm3958_vm0, %v5928_v2 }
 0x610   : > { %19169 = vmatprep.subr.msk.bf16.mxu1 %vm3958_vm0, %v22605_v24  ;;  %5235 = vmatprep.mubr.bf16.mxu0 %v26537_v56 }
 0x615   : > { %16288 = vmatmul.mubr.msk.bf16.gmra.mrb[232].mxu0 %vm3958_vm0, %v5041_v15 }
 0x616   : > { %17596 = vmatpush3.bf16.xpose.msra.mxu0 %v5950_v22  ;;  %5245 = vmatprep.mubr.bf16.mxu0 %v26537_v56 }
 0x617   : > { %17564 = vmatpush3.bf16.xpose.msra.mxu1 %v5724_v1  ;;  %19178 = vmatprep.subr.msk.bf16.mxu0 %vm3958_vm0, %v5930_v46  ;;  %v6063_v1 = vsel %vm3958_vm0, %v22643_v61, 0 }
 0x618   : > { %19170 = vmatprep.subr.msk.bf16.mxu1 %vm3958_vm0, %v22611_v0 }
 0x61d   : > { %v17481_v44 = vpop.f32.mrb[208].mxu0  ;;  %16289 = vmatmul.mubr.msk.bf16.gmra.mrb[236].mxu0 %vm3958_vm0, %v5042_v13  ;;  %v5801_v13 = vpop.permute.xlu1 %5800 }
 0x61e   : > { %v4854_v58 = vpop.f32.mrb[209].mxu0  ;;  %17598 = vmatpush3.bf16.xpose.msra.mxu0 %v5953_v63  ;;  %5255 = vmatprep.mubr.bf16.mxu0 %v26537_v56 }
 0x61f   : > { %v17482_v25 = vpop.f32.mrb[210].mxu0  ;;  %17566 = vmatpush3.bf16.xpose.msra.mxu1 %v5727_v28  ;;  %17623 = vmatprep.subr.bf16.mxu0 %v22677_v36 }
 0x620   : > { %v5044_v35 = vpack.c.bf16 %v17482_v25, %v17481_v44  ;;  %v4857_v49 = vpop.f32.mrb[211].mxu0  ;;  %19171 = vmatprep.subr.msk.bf16.mxu1 %vm3958_vm0, %v22626_v38 }
 0x621   : > { %v5043_v12 = vpack.c.bf16 %v4857_v49, %v4854_v58 }
 0x623   : > { %17535 = vmatprep.mubr.msk.bf16.mxu1 %vm3958_vm0, %v5043_v12 }
 0x624   : > { %17536 = vmatmul.mubr.msk.bf16.gmra.mrb[232].mxu1 %vm3958_vm0, %v5044_v35 }
 0x625   : > { %v17485_v23 = vpop.f32.mrb[212].mxu0  ;;  %16290 = vmatmul.mubr.msk.bf16.gmra.mrb[240].mxu0 %vm3958_vm0, %v5043_v12 }
 0x626   : > { %v4870_v11 = vpop.f32.mrb[213].mxu0  ;;  %5265 = vmatprep.mubr.bf16.mxu0 %v26537_v56 }
 0x627   : > { %v17486_v24 = vpop.f32.mrb[214].mxu0 }
 0x628   : > { %v5046_v50 = vpack.c.bf16 %v17486_v24, %v17485_v23  ;;  %v4873_v54 = vpop.f32.mrb[215].mxu0 }
 0x629   : > { %v5045_v40 = vpack.c.bf16 %v4873_v54, %v4870_v11 }
 0x62b   : > { %17539 = vmatprep.mubr.msk.bf16.mxu1 %vm3958_vm0, %v5045_v40 }
 0x62c   : > { %17540 = vmatmul.mubr.msk.bf16.gmra.mrb[236].mxu1 %vm3958_vm0, %v5046_v50 }
 0x62d   : > { %v17497_v14 = vpop.f32.mrb[216].mxu0  ;;  %16291 = vmatmul.mubr.msk.bf16.gmra.mrb[244].mxu0 %vm3958_vm0, %v5044_v35 }
 0x62e   : > { %v4931_v48 = vpop.f32.mrb[217].mxu0  ;;  %5275 = vmatprep.mubr.bf16.mxu0 %v26537_v56 }
 0x62f   : > { %v17498_v53 = vpop.f32.mrb[218].mxu0 }
 0x630   : > { %v5048_v0 = vpack.c.bf16 %v17498_v53, %v17497_v14  ;;  %v4934_v51 = vpop.f32.mrb[219].mxu0 }
 0x631   : > { %v5047_v7 = vpack.c.bf16 %v4934_v51, %v4931_v48 }
 0x633   : > { %17543 = vmatprep.mubr.msk.bf16.mxu1 %vm3958_vm0, %v5047_v7 }
 0x634   : > { %17544 = vmatmul.mubr.msk.bf16.gmra.mrb[240].mxu1 %vm3958_vm0, %v5048_v0 }
 0x635   : > { %v17501_v21 = vpop.f32.mrb[220].mxu0  ;;  %16292 = vmatmul.mubr.msk.bf16.gmra.mrb[248].mxu0 %vm3958_vm0, %v5045_v40 }
 0x636   : > { %v4947_v62 = vpop.f32.mrb[221].mxu0  ;;  %5285 = vmatprep.mubr.bf16.mxu0 %v26537_v56 }
 0x637   : > { %v17502_v32 = vpop.f32.mrb[222].mxu0 }
 0x638   : > { %v5050_v29 = vpack.c.bf16 %v17502_v32, %v17501_v21  ;;  %v4950_v2 = vpop.f32.mrb[223].mxu0 }
 0x639   : > { %v5049_v46 = vpack.c.bf16 %v4950_v2, %v4947_v62 }
 0x63b   : > { %17547 = vmatprep.mubr.msk.bf16.mxu1 %vm3958_vm0, %v5049_v46 }
 0x63c   : > { %17548 = vmatmul.mubr.msk.bf16.gmra.mrb[244].mxu1 %vm3958_vm0, %v5050_v29 }
 0x63d   : > { %v17513_v45 = vpop.f32.mrb[216].mxu1  ;;  %16293 = vmatmul.mubr.msk.bf16.gmra.mrb[252].mxu0 %vm3958_vm0, %v5046_v50 }
 0x63e   : > { %v5008_v52 = vpop.f32.mrb[217].mxu1  ;;  %5295 = vmatprep.mubr.bf16.mxu0 %v26537_v56 }
 0x63f   : > { %v17514_v9 = vpop.f32.mrb[218].mxu1 }
 0x640   : > { %v5052_v60 = vpack.c.bf16 %v17514_v9, %v17513_v45  ;;  %v5011_v5 = vpop.f32.mrb[219].mxu1 }
 0x641   : > { %v5051_v47 = vpack.c.bf16 %v5011_v5, %v5008_v52 }
 0x643   : > { %17551 = vmatprep.mubr.msk.bf16.mxu1 %vm3958_vm0, %v5051_v47 }
 0x644   : > { %17552 = vmatmul.mubr.msk.bf16.gmra.mrb[248].mxu1 %vm3958_vm0, %v5052_v60 }
 0x645   : > { %v17517_v18 = vpop.f32.mrb[220].mxu1  ;;  %16294 = vmatmul.mubr.msk.bf16.gmra.mrb[0].mxu0 %vm3958_vm0, %v5047_v7 }
 0x646   : > { %v5024_v31 = vpop.f32.mrb[221].mxu1  ;;  %5305 = vmatprep.mubr.bf16.mxu0 %v26537_v56 }
 0x647   : > { %v17518_v20 = vpop.f32.mrb[222].mxu1 }
 0x648   : > { %v5054_v10 = vpack.c.bf16 %v17518_v20, %v17517_v18  ;;  %v5027_v43 = vpop.f32.mrb[223].mxu1 }
 0x649   : > { %v5053_v16 = vpack.c.bf16 %v5027_v43, %v5024_v31 }
 0x64b   : > { %17555 = vmatprep.mubr.msk.bf16.mxu1 %vm3958_vm0, %v5053_v16 }
 0x64c   : > { %17556 = vmatmul.mubr.msk.bf16.gmra.mrb[252].mxu1 %vm3958_vm0, %v5054_v10 }
 0x64d   : > { %17567 = vmatprep.mubr.msk.bf16.mxu1 %vm3958_vm0, %v22624_v37  ;;  %16295 = vmatmul.mubr.msk.bf16.gmra.mrb[4].mxu0 %vm3958_vm0, %v5048_v0  ;;  %v6037_v37 = vpop.permute.xlu1 %6036 }
 0x64e   : > { %5315 = vmatprep.mubr.bf16.mxu0 %v26537_v56 }
 0x651   : > { %v5805_v15 = vpop.permute.xlu1 %5804 }
 0x654   : > { %17568 = vmatmul.mubr.msk.bf16.vlgmr.msra.gmra.mrb[0].mxu1 %vm3958_vm0, %v22616_v17  ;;  %v5834_v17 = vsel %vm3958_vm0, %v22618_v27, 0 }
 0x655   : > { %17576 = vmatpush3.bf16.xpose.msra.mxu1 %v5831_v4  ;;  %17571 = vmatprep.mubr.msk.bf16.mxu1 %vm3958_vm0, %v22628_v41  ;;  %v6039_v38 = vpop.permute.xlu1 %6038  ;;  %v5837_v41 = vsel %vm3958_vm0, %v22630_v33, 0 }
 0x656   : > { %19172 = vmatprep.subr.msk.bf16.mxu1 %vm3958_vm0, %v22618_v27  ;;  %16296 = vmatmul.mubr.msk.bf16.gmra.mrb[8].mxu0 %vm3958_vm0, %v5049_v46  ;;  %v6060_v30 = vsel %vm3958_vm0, %v6039_v38, 0 }
 0x657   : > { %5325 = vmatprep.mubr.bf16.mxu0 %v26537_v56 }
 0x659   : > { %v5914_v27 = vpop.permute.xlu1 %5913 }
 0x65c   : > { %17572 = vmatmul.mubr.msk.bf16.gmra.mrb[4].mxu1 %vm3958_vm0, %v22621_v34  ;;  %v5840_v34 = vsel %vm3958_vm0, %v22632_v3, 0 }
 0x65d   : > { %17578 = vmatpush3.bf16.xpose.msra.mxu1 %v5834_v17  ;;  %17583 = vmatprep.mubr.msk.bf16.mxu1 %vm3958_vm0, %v22634_v57  ;;  %v5916_v57 = vpop.permute.xlu1 %5915 }
 0x65e   : > { %19173 = vmatprep.subr.msk.bf16.mxu1 %vm3958_vm0, %v22630_v33  ;;  %16297 = vmatmul.mubr.msk.bf16.gmra.mrb[12].mxu0 %vm3958_vm0, %v5050_v29  ;;  %v6057_v33 = vsel %vm3958_vm0, %v6037_v37, 0 }
 0x65f   : > { %5335 = vmatprep.mubr.bf16.mxu0 %v26537_v56 }
 0x661   : > { %v6043_v59 = vpop.permute.xlu1 %6042 }
 0x665   : > { %17580 = vmatpush3.bf16.xpose.msra.mxu1 %v5837_v41 }
 0x666   : > { %19174 = vmatprep.subr.msk.bf16.mxu1 %vm3958_vm0, %v22632_v3  ;;  %16298 = vmatmul.mubr.msk.bf16.gmra.mrb[16].mxu0 %vm3958_vm0, %v5051_v47  ;;  %v6027_v3 = vpop.permute.xlu1 %6026 }
 0x667   : > { %5345 = vmatprep.mubr.bf16.mxu0 %v26537_v56 }
 0x66a   : > { %v6031_v22 = vpop.permute.xlu1 %6030 }
 0x66d   : > { %17582 = vmatpush3.bf16.xpose.msra.mxu1 %v5840_v34 }
 0x66e   : > { %19179 = vmatprep.subr.msk.bf16.mxu1 %vm3958_vm0, %v6037_v37  ;;  %16299 = vmatmul.mubr.msk.bf16.gmra.mrb[20].mxu0 %vm3958_vm0, %v5052_v60 }
 0x66f   : > { %5355 = vmatprep.mubr.bf16.mxu0 %v26537_v56 }
 0x674   : > { %17584 = vmatmul.mubr.msk.bf16.vlgmr.msra.gmra.mrb[8].mxu1 %vm3958_vm0, %v5801_v13 }
 0x675   : > { %17587 = vmatprep.mubr.msk.bf16.mxu1 %vm3958_vm0, %v22636_v26  ;;  %17608 = vmatpush3.bf16.xpose.msra.mxu1 %v6057_v33  ;;  %v6542_v26 = vpop.permute.xlu0 %6541 }
 0x676   : > { %19180 = vmatprep.subr.msk.bf16.mxu1 %vm3958_vm0, %v6039_v38  ;;  %16300 = vmatmul.mubr.msk.bf16.gmra.mrb[24].mxu0 %vm3958_vm0, %v5053_v16 }
 0x677   : > { %5365 = vmatprep.mubr.bf16.mxu0 %v26537_v56 }
 0x679   : > { %v6544_v44 = vpop.permute.xlu0 %6543 }
 0x67c   : > { %17588 = vmatmul.mubr.msk.bf16.gmra.mrb[12].mxu1 %vm3958_vm0, %v5805_v15 }
 0x67d   : > { %17610 = vmatpush3.bf16.xpose.msra.mxu1 %v6060_v30  ;;  %17615 = vmatprep.mubr.msk.bf16.mxu1 %vm3958_vm0, %v22663_v39  ;;  %v6540_v39 = vpop.permute.xlu1 %6539  ;;  %v6631_v58 = vpop.permute.xlu0 %6630 }
 0x67e   : > { %19181 = vmatprep.subr.msk.bf16.mxu1 %vm3958_vm0, %v22643_v61  ;;  %16301 = vmatmul.mubr.msk.bf16.gmra.mrb[32].mxu0 %vm3958_vm0, %v5054_v10 }
 0x67f   : > { %17599 = vmatprep.mubr.msk.bf16.mxu0 %vm3958_vm0, %v22638_v55  ;;  %v6066_v55 = vsel %vm3958_vm0, %v6043_v59, 0 }
 0x681   : > { %v6633_v63 = vpop.permute.xlu1 %6632 }
 0x685   : > { %17612 = vmatpush3.bf16.xpose.msra.mxu1 %v6063_v1  ;;  %v22767_v61 = vpop.permute.xlu1 %6723 }
 0x686   : > { %19182 = vmatprep.subr.msk.bf16.mxu1 %vm3958_vm0, %v6043_v59  ;;  %17600 = vmatmul.mubr.msk.bf16.vlgmr.msra.gmra.mrb[28].mxu0 %vm3958_vm0, %v5914_v27 }
 0x687   : > { %17624 = vmatpush3.bf16.msra.mxu0 %v22677_v36  ;;  %17603 = vmatprep.mubr.msk.bf16.mxu0 %vm3958_vm0, %v5916_v57  ;;  %v6635_v36 = vpop.permute.xlu0 %6634 }
 0x688   : > { %17625 = vmatprep.subr.bf16.mxu0 %v6540_v39 }
 0x68b   : > { %17626 = vmatpush3.bf16.msra.mxu0 %v6540_v39 }
 0x68c   : > { %17627 = vmatprep.subr.bf16.mxu0 %v6542_v26 }
 0x68d   : > { %17614 = vmatpush3.bf16.xpose.msra.mxu1 %v6066_v55 }
 0x68e   : > { %17639 = vmatprep.subr.bf16.mxu1 %v6631_v58  ;;  %17604 = vmatmul.mubr.msk.bf16.gmra.mrb[36].mxu0 %vm3958_vm0, %v22651_v19  ;;  %v6637_v19 = vpop.permute.xlu0 %6636 }
 0x68f   : > { %17628 = vmatpush3.bf16.msra.mxu0 %v6542_v26 }
 0x690   : > { %17629 = vmatprep.subr.bf16.mxu0 %v6544_v44 }
 0x693   : > { %17630 = vmatpush3.bf16.msra.mxu0 %v6544_v44 }
 0x694   : > { %17616 = vmatmul.mubr.msk.bf16.vlgmr.msra.gmra.mrb[16].mxu1 %vm3958_vm0, %v6027_v3  ;;  %17655 = vmatprep.subr.bf16.mxu0 %v22767_v61 }
 0x695   : > { %17619 = vmatprep.mubr.msk.bf16.mxu1 %vm3958_vm0, %v22671_v6  ;;  %17640 = vmatpush3.bf16.msra.mxu1 %v6631_v58 }
 0x696   : > { %17641 = vmatprep.subr.bf16.mxu1 %v6633_v63 }
 0x699   : > { %17642 = vmatpush3.bf16.msra.mxu1 %v6633_v63 }
 0x69a   : > { %17643 = vmatprep.subr.bf16.mxu1 %v6635_v36 }
 0x69c   : > { %17620 = vmatmul.mubr.msk.bf16.gmra.mrb[20].mxu1 %vm3958_vm0, %v6031_v22 }
 0x69d   : > { %17644 = vmatpush3.bf16.msra.mxu1 %v6635_v36 }
 0x69e   : > { %17645 = vmatprep.subr.bf16.mxu1 %v6637_v19 }
 0x6a1   : > { %17646 = vmatpush3.bf16.msra.mxu1 %v6637_v19 }
 0x727   : > { %v17569_v25 = vpop.f32.mrb[0].mxu1 }
 0x728   : > { %v22776_v35 = vsel %vm22061_vm1, %v17569_v25, -1e+30  ;;  %v5763_v49 = vpop.f32.mrb[1].mxu1 }
 0x729   : > { %v6171_v6 = vsel %vm3958_vm0, %v22776_v35, -inf  ;;  %v17570_v12 = vpop.f32.mrb[2].mxu1  ;;  %v22782_v11 = vsel %vm22066_vm2, %v5763_v49, -1e+30 }
 0x72a   : > { %6172 = vmax.xlane.f32.xlu0 %v6171_v6  ;;  %v5766_v24 = vpop.f32.mrb[3].mxu1  ;;  %v6165_v14 = vsel %vm3958_vm0, %v22782_v11, -inf  ;;  %v22794_v53 = vsel %vm22074_vm3, %v17570_v12, -1e+30 }
 0x72b   : > { %v22786_v54 = vsel %vm22084_vm4, %v5766_v24, -1e+30  ;;  %v6174_v7 = vsel %vm3958_vm0, %v22794_v53, -inf }
 0x72c   : > { %v6168_v40 = vsel %vm3958_vm0, %v22786_v54, -inf }
 0x72d   : > { %6169 = vmax.xlane.f32.xlu1 %v6168_v40 }
 0x72e   : > { %6166 = vmax.xlane.f32.xlu0 %v6165_v14 }
 0x72f   : > { %v17573_v0 = vpop.f32.mrb[4].mxu1 }
 0x730   : > { %v5779_v51 = vpop.f32.mrb[5].mxu1  ;;  %v22800_v32 = vsel %vm22114_vm6, %v17573_v0, -1e+30 }
 0x731   : > { %v17574_v21 = vpop.f32.mrb[6].mxu1  ;;  %v6183_v60 = vsel %vm3958_vm0, %v22800_v32, -inf  ;;  %v22816_v47 = vsel %vm22105_vm5, %v5779_v51, -1e+30 }
 0x732   : > { %v22804_v2 = vsel %vm22132_vm8, %v17574_v21, -1e+30  ;;  %6175 = vmax.xlane.f32.xlu0 %v6174_v7  ;;  %v5782_v46 = vpop.f32.mrb[7].mxu1  ;;  %v6177_v31 = vsel %vm3958_vm0, %v22816_v47, -inf }
 0x733   : > { %v6186_v45 = vsel %vm3958_vm0, %v22804_v2, -inf  ;;  %v22810_v9 = vsel %vm22118_vm7, %v5782_v46, -1e+30 }
 0x734   : > { %6187 = vmax.xlane.f32.xlu1 %v6186_v45  ;;  %v6180_v18 = vsel %vm3958_vm0, %v22810_v9, -inf }
 0x736   : > { %6184 = vmax.xlane.f32.xlu0 %v6183_v60 }
 0x738   : > { %6181 = vmax.xlane.f32.xlu1 %v6180_v18 }
 0x73a   : > { %6178 = vmax.xlane.f32.xlu0 %v6177_v31 }
 0x747   : > { %v17585_v20 = vpop.f32.mrb[8].mxu1 }
 0x748   : > { %v22824_v10 = vsel %vm22061_vm1, %v17585_v20, -1e+30  ;;  %v5876_v43 = vpop.f32.mrb[9].mxu1 }
 0x749   : > { %v6195_v16 = vsel %vm3958_vm0, %v22824_v10, -inf  ;;  %v17586_v13 = vpop.f32.mrb[10].mxu1  ;;  %v22830_v4 = vsel %vm22066_vm2, %v5876_v43, -1e+30 }
 0x74a   : > { %v22834_v37 = vsel %vm22074_vm3, %v17586_v13, -1e+30  ;;  %6196 = vmax.xlane.f32.xlu0 %v6195_v16  ;;  %v5879_v17 = vpop.f32.mrb[11].mxu1  ;;  %v6189_v41 = vsel %vm3958_vm0, %v22830_v4, -inf }
 0x74b   : > { %v6198_v15 = vsel %vm3958_vm0, %v22834_v37, -inf  ;;  %v22840_v38 = vsel %vm22084_vm4, %v5879_v17, -1e+30 }
 0x74c   : > { %6199 = vmax.xlane.f32.xlu1 %v6198_v15  ;;  %v6192_v27 = vsel %vm3958_vm0, %v22840_v38, -inf }
 0x74e   : > { %6190 = vmax.xlane.f32.xlu0 %v6189_v41 }
 0x74f   : > { %v17589_v34 = vpop.f32.mrb[12].mxu1 }
 0x750   : > { %v22848_v57 = vsel %vm22114_vm6, %v17589_v34, -1e+30  ;;  %6193 = vmax.xlane.f32.xlu1 %v6192_v27  ;;  %v5892_v33 = vpop.f32.mrb[13].mxu1 }
 0x751   : > { %v6207_v59 = vsel %vm3958_vm0, %v22848_v57, -inf  ;;  %v17590_v3 = vpop.f32.mrb[14].mxu1  ;;  %v22854_v30 = vsel %vm22105_vm5, %v5892_v33, -1e+30 }
 0x752   : > { %v22858_v26 = vsel %vm22132_vm8, %v17590_v3, -1e+30  ;;  %6208 = vmax.xlane.f32.xlu0 %v6207_v59  ;;  %v5895_v22 = vpop.f32.mrb[15].mxu1  ;;  %v6201_v39 = vsel %vm3958_vm0, %v22854_v30, -inf }
 0x753   : > { %v6210_v1 = vsel %vm3958_vm0, %v22858_v26, -inf  ;;  %v22864_v44 = vsel %vm22118_vm7, %v5895_v22, -1e+30 }
 0x754   : > { %6211 = vmax.xlane.f32.xlu1 %v6210_v1  ;;  %v6204_v55 = vsel %vm3958_vm0, %v22864_v44, -inf }
 0x756   : > { %6202 = vmax.xlane.f32.xlu0 %v6201_v39 }
 0x758   : > { %6205 = vmax.xlane.f32.xlu1 %v6204_v55 }
 0x759   : > { %v17601_v58 = vpop.f32.mrb[28].mxu0 }
 0x75a   : > { %v22872_v63 = vsel %vm22061_vm1, %v17601_v58, -1e+30  ;;  %v5989_v36 = vpop.f32.mrb[29].mxu0 }
 0x75b   : > { %v6219_v19 = vsel %vm3958_vm0, %v22872_v63, -inf  ;;  %v17602_v25 = vpop.f32.mrb[30].mxu0  ;;  %v22878_v49 = vsel %vm22066_vm2, %v5989_v36, -1e+30 }
 0x75c   : > { %v22882_v6 = vsel %vm22074_vm3, %v17602_v25, -1e+30  ;;  %6220 = vmax.xlane.f32.xlu0 %v6219_v19  ;;  %v5992_v12 = vpop.f32.mrb[31].mxu0  ;;  %v6213_v14 = vsel %vm3958_vm0, %v22878_v49, -inf }
 0x75d   : > { %v6222_v24 = vsel %vm3958_vm0, %v22882_v6, -inf  ;;  %v22888_v40 = vsel %vm22084_vm4, %v5992_v12, -1e+30 }
 0x75e   : > { %6223 = vmax.xlane.f32.xlu1 %v6222_v24  ;;  %v6216_v0 = vsel %vm3958_vm0, %v22888_v40, -inf }
 0x760   : > { %6214 = vmax.xlane.f32.xlu0 %v6213_v14 }
 0x761   : > { %v17605_v51 = vpop.f32.mrb[36].mxu0 }
 0x762   : > { %v22896_v7 = vsel %vm22114_vm6, %v17605_v51, -1e+30  ;;  %6217 = vmax.xlane.f32.xlu1 %v6216_v0  ;;  %v6005_v21 = vpop.f32.mrb[37].mxu0 }
 0x763   : > { %v6231_v46 = vsel %vm3958_vm0, %v22896_v7, -inf  ;;  %v17606_v45 = vpop.f32.mrb[38].mxu0  ;;  %v22902_v60 = vsel %vm22105_vm5, %v6005_v21, -1e+30 }
 0x764   : > { %v22906_v18 = vsel %vm22132_vm8, %v17606_v45, -1e+30  ;;  %6232 = vmax.xlane.f32.xlu0 %v6231_v46  ;;  %v6008_v31 = vpop.f32.mrb[39].mxu0  ;;  %v6225_v16 = vsel %vm3958_vm0, %v22902_v60, -inf }
 0x765   : > { %v6234_v20 = vsel %vm3958_vm0, %v22906_v18, -inf  ;;  %v22912_v43 = vsel %vm22118_vm7, %v6008_v31, -1e+30 }
 0x766   : > { %6235 = vmax.xlane.f32.xlu1 %v6234_v20  ;;  %v6228_v41 = vsel %vm3958_vm0, %v22912_v43, -inf }
 0x767   : > { %v17617_v13 = vpop.f32.mrb[16].mxu1 }
 0x768   : > { %v22918_v17 = vsel %vm22061_vm1, %v17617_v13, -1e+30  ;;  %v6102_v15 = vpop.f32.mrb[17].mxu1  ;;  %6226 = vmax.xlane.f32.xlu0 %v6225_v16 }
 0x769   : > { %v17618_v27 = vpop.f32.mrb[18].mxu1  ;;  %v6243_v59 = vsel %vm3958_vm0, %v22918_v17, -inf  ;;  %v22930_v3 = vsel %vm22066_vm2, %v6102_v15, -1e+30 }
 0x76a   : > { %v22924_v34 = vsel %vm22074_vm3, %v17618_v27, -1e+30  ;;  %v6105_v33 = vpop.f32.mrb[19].mxu1  ;;  %6229 = vmax.xlane.f32.xlu1 %v6228_v41  ;;  %v6237_v39 = vsel %vm3958_vm0, %v22930_v3, -inf }
 0x76b   : > { %v6246_v22 = vsel %vm3958_vm0, %v22924_v34, -inf  ;;  %v22936_v1 = vsel %vm22084_vm4, %v6105_v33, -1e+30 }
 0x76c   : > { %6244 = vmax.xlane.f32.xlu0 %v6243_v59  ;;  %v6240_v19 = vsel %vm3958_vm0, %v22936_v1, -inf }
 0x76e   : > { %6247 = vmax.xlane.f32.xlu1 %v6246_v22 }
 0x76f   : > { %v17621_v55 = vpop.f32.mrb[20].mxu1 }
 0x770   : > { %v22942_v58 = vsel %vm22114_vm6, %v17621_v55, -1e+30  ;;  %v6118_v36 = vpop.f32.mrb[21].mxu1  ;;  %6238 = vmax.xlane.f32.xlu0 %v6237_v39 }
 0x771   : > { %v17622_v25 = vpop.f32.mrb[22].mxu1  ;;  %v6255_v24 = vsel %vm3958_vm0, %v22942_v58, -inf  ;;  %v22950_v14 = vsel %vm22105_vm5, %v6118_v36, -1e+30 }
 0x772   : > { %v6121_v12 = vpop.f32.mrb[23].mxu1  ;;  %6241 = vmax.xlane.f32.xlu1 %v6240_v19  ;;  %v6249_v0 = vsel %vm3958_vm0, %v22950_v14, -inf  ;;  %v22960_v51 = vsel %vm22132_vm8, %v17622_v25, -1e+30 }
 0x773   : > { %v6258_v21 = vsel %vm3958_vm0, %v22960_v51, -inf  ;;  %v22966_v46 = vsel %vm22118_vm7, %v6121_v12, -1e+30 }
 0x774   : > { %6256 = vmax.xlane.f32.xlu0 %v6255_v24  ;;  %v6252_v45 = vsel %vm3958_vm0, %v22966_v46, -inf }
 0x778   : > { %6250 = vmax.xlane.f32.xlu0 %v6249_v0 }
 0x783   : > { %6729 = vrot.lane.b32.xlu1 %v26536_v8, %s20672_s21  ;;  %v22970_v8 = vpop.permute.xlu1 %6725 }
 0x78e   : > { %6727 = vrot.lane.b32.xlu0 %v26535_v42, %s20672_s21 }
 0x7a7   : > { %6259 = vmax.xlane.f32.xlu1 %v6258_v21 }
 0x7ab   : > { %6253 = vmax.xlane.f32.xlu1 %v6252_v45 }
 0x7b7   : > { %v6173_v31 = vpop.xlane.xlu0 %6172 }
 0x7b8   : > { %v6263_v42 = vsub.f32 %v22776_v35, %v6173_v31 }
 0x7ba   : > { %v6297_v20 = vmul.f32 1.442695, %v6263_v42  ;;  %v6170_v16 = vpop.xlane.xlu1 %6169 }
 0x7bb   : > { %v6167_v13 = vpop.xlane.xlu0 %6166  ;;  %v6262_v41 = vsub.f32 %v22786_v54, %v6170_v16 }
 0x7bc   : > { %19864 = vpow2.f32 %v6297_v20  ;;  %v6261_v15 = vsub.f32 %v22782_v11, %v6167_v13 }
 0x7bd   : > { %v6295_v22 = vmul.f32 1.442695, %v6262_v41 }
 0x7be   : > { %v6293_v27 = vmul.f32 1.442695, %v6261_v15 }
 0x7bf   : > { %v6176_v33 = vpop.xlane.xlu0 %6175 }
 0x7c0   : > { %19866 = vpow2.f32 %v6293_v27  ;;  %v6264_v59 = vsub.f32 %v22794_v53, %v6176_v33 }
 0x7c1   : > { %v6188_v35 = vpop.xlane.xlu1 %6187 }
 0x7c2   : > { %v6299_v39 = vmul.f32 1.442695, %v6264_v59  ;;  %v6268_v53 = vsub.f32 %v22804_v2, %v6188_v35 }
 0x7c3   : > { %v6185_v55 = vpop.xlane.xlu0 %6184 }
 0x7c4   : > { %19868 = vpow2.f32 %v6299_v39  ;;  %v6267_v36 = vsub.f32 %v22800_v32, %v6185_v55  ;;  %v6307_v31 = vmul.f32 1.442695, %v6268_v53 }
 0x7c5   : > { %19870 = vpow2.f32 %v6295_v22  ;;  %v6182_v21 = vpop.xlane.xlu1 %6181 }
 0x7c6   : > { %v22977_v19 = vpop.eup %19864  ;;  %v6305_v25 = vmul.f32 1.442695, %v6267_v36  ;;  %v6266_v42 = vsub.f32 %v22810_v9, %v6182_v21 }
 0x7c7   : > { %v6179_v12 = vpop.xlane.xlu0 %6178  ;;  %v6363_v11 = vsel %vm3958_vm0, %v22977_v19, 0.0 }
 0x7c8   : > { %v6265_v54 = vsub.f32 %v22816_v47, %v6179_v12  ;;  %6364 = vadd.xlane.f32.xlu0 %v6363_v11  ;;  %19872 = vpow2.f32 %v6305_v25  ;;  %v6303_v2 = vmul.f32 1.442695, %v6266_v42 }
 0x7ca   : > { %v22982_v24 = vpop.eup %19866  ;;  %v6301_v0 = vmul.f32 1.442695, %v6265_v54 }
 0x7cb   : > { %v6357_v32 = vsel %vm3958_vm0, %v22982_v24, 0.0 }
 0x7cc   : > { %6358 = vadd.xlane.f32.xlu0 %v6357_v32  ;;  %19874 = vpow2.f32 %v6301_v0 }
 0x7cd   : > { %19876 = vpow2.f32 %v6307_v31 }
 0x7ce   : > { %v22987_v45 = vpop.eup %19868  ;;  %19878 = vpow2.f32 %v6303_v2 }
 0x7cf   : > { %v6366_v47 = vsel %vm3958_vm0, %v22987_v45, 0.0  ;;  %v22992_v20 = vpop.eup %19870 }
 0x7d0   : > { %6367 = vadd.xlane.f32.xlu1 %v6366_v47  ;;  %v6360_v16 = vsel %vm3958_vm0, %v22992_v20, 0.0 }
 0x7d2   : > { %v22996_v13 = vpop.eup %19872 }
 0x7d3   : > { %v6375_v9 = vsel %vm3958_vm0, %v22996_v13, 0.0 }
 0x7d4   : > { %6361 = vadd.xlane.f32.xlu1 %v6360_v16 }
 0x7d6   : > { %v23000_v41 = vpop.eup %19874 }
 0x7d7   : > { %v6197_v15 = vpop.xlane.xlu0 %6196  ;;  %v6369_v55 = vsel %vm3958_vm0, %v23000_v41, 0.0  ;;  %v23006_v36 = vpop.eup %19876 }
 0x7d8   : > { %v6271_v27 = vsub.f32 %v22824_v10, %v6197_v15  ;;  %6376 = vadd.xlane.f32.xlu1 %v6375_v9  ;;  %v6378_v53 = vsel %vm3958_vm0, %v23006_v36, 0.0 }
 0x7d9   : > { %v6200_v33 = vpop.xlane.xlu1 %6199 }
 0x7da   : > { %v6313_v59 = vmul.f32 1.442695, %v6271_v27  ;;  %v6272_v22 = vsub.f32 %v22834_v37, %v6200_v33  ;;  %v23012_v37 = vpop.eup %19878 }
 0x7db   : > { %v6191_v39 = vpop.xlane.xlu0 %6190 }
 0x7dc   : > { %19880 = vpow2.f32 %v6313_v59  ;;  %v6269_v35 = vsub.f32 %v22830_v4, %v6191_v39  ;;  %6370 = vadd.xlane.f32.xlu1 %v6369_v55  ;;  %v6315_v25 = vmul.f32 1.442695, %v6272_v22 }
 0x7dd   : > { %v6194_v12 = vpop.xlane.xlu1 %6193 }
 0x7de   : > { %v6309_v11 = vmul.f32 1.442695, %v6269_v35  ;;  %v6270_v10 = vsub.f32 %v22840_v38, %v6194_v12  ;;  %v6372_v38 = vsel %vm3958_vm0, %v23012_v37, 0.0 }
 0x7df   : > { %v6209_v54 = vpop.xlane.xlu0 %6208 }
 0x7e0   : > { %19882 = vpow2.f32 %v6309_v11  ;;  %v6311_v0 = vmul.f32 1.442695, %v6270_v10  ;;  %v6275_v21 = vsub.f32 %v22848_v57, %v6209_v54  ;;  %6379 = vadd.xlane.f32.xlu1 %v6378_v53 }
 0x7e1   : > { %19884 = vpow2.f32 %v6315_v25  ;;  %v6212_v32 = vpop.xlane.xlu1 %6211 }
 0x7e2   : > { %19886 = vpow2.f32 %v6311_v0  ;;  %v6321_v4 = vmul.f32 1.442695, %v6275_v21  ;;  %v6276_v31 = vsub.f32 %v22858_v26, %v6212_v32 }
 0x7e3   : > { %v6203_v42 = vpop.xlane.xlu0 %6202 }
 0x7e4   : > { %v6323_v47 = vmul.f32 1.442695, %v6276_v31  ;;  %v6273_v2 = vsub.f32 %v22854_v30, %v6203_v42  ;;  %6373 = vadd.xlane.f32.xlu1 %v6372_v38  ;;  %19888 = vpow2.f32 %v6321_v4 }
 0x7e5   : > { %v6206_v16 = vpop.xlane.xlu1 %6205 }
 0x7e6   : > { %v23019_v15 = vpop.eup %19880  ;;  %19890 = vpow2.f32 %v6323_v47  ;;  %v6317_v57 = vmul.f32 1.442695, %v6273_v2  ;;  %v6274_v9 = vsub.f32 %v22864_v44, %v6206_v16 }
 0x7e7   : > { %v6387_v27 = vsel %vm3958_vm0, %v23019_v15, 0.0 }
 0x7e8   : > { %v6319_v26 = vmul.f32 1.442695, %v6274_v9  ;;  %6388 = vadd.xlane.f32.xlu0 %v6387_v27  ;;  %19892 = vpow2.f32 %v6317_v57 }
 0x7e9   : > { %v6221_v33 = vpop.xlane.xlu0 %6220 }
 0x7ea   : > { %v23024_v59 = vpop.eup %19882  ;;  %19894 = vpow2.f32 %v6319_v26  ;;  %v6279_v30 = vsub.f32 %v22872_v63, %v6221_v33 }
 0x7eb   : > { %v23027_v22 = vpop.eup %19884  ;;  %v6381_v39 = vsel %vm3958_vm0, %v23024_v59, 0.0  ;;  %v6224_v55 = vpop.xlane.xlu1 %6223 }
 0x7ec   : > { %v23031_v35 = vpop.eup %19886  ;;  %v6329_v44 = vmul.f32 1.442695, %v6279_v30  ;;  %6382 = vadd.xlane.f32.xlu0 %v6381_v39  ;;  %v6280_v25 = vsub.f32 %v22882_v6, %v6224_v55  ;;  %v6390_v54 = vsel %vm3958_vm0, %v23027_v22, 0.0 }
 0x7ed   : > { %v6215_v12 = vpop.xlane.xlu0 %6214  ;;  %v6384_v11 = vsel %vm3958_vm0, %v23031_v35, 0.0 }
 0x7ee   : > { %19896 = vpow2.f32 %v6329_v44  ;;  %v6277_v10 = vsub.f32 %v22878_v49, %v6215_v12  ;;  %6385 = vadd.xlane.f32.xlu1 %v6384_v11  ;;  %v23037_v63 = vpop.eup %19888  ;;  %v6331_v21 = vmul.f32 1.442695, %v6280_v25 }
 0x7ef   : > { %v6218_v53 = vpop.xlane.xlu1 %6217  ;;  %v6399_v38 = vsel %vm3958_vm0, %v23037_v63, 0.0 }
 0x7f0   : > { %v23041_v0 = vpop.eup %19890  ;;  %v6325_v32 = vmul.f32 1.442695, %v6277_v10  ;;  %6391 = vadd.xlane.f32.xlu0 %v6390_v54  ;;  %v6278_v6 = vsub.f32 %v22888_v40, %v6218_v53 }
 0x7f1   : > { %v6233_v4 = vpop.xlane.xlu0 %6232  ;;  %v6402_v31 = vsel %vm3958_vm0, %v23041_v0, 0.0 }
 0x7f2   : > { %19898 = vpow2.f32 %v6325_v32  ;;  %v6283_v49 = vsub.f32 %v22896_v7, %v6233_v4  ;;  %6403 = vadd.xlane.f32.xlu1 %v6402_v31  ;;  %v23047_v42 = vpop.eup %19892  ;;  %v6327_v16 = vmul.f32 1.442695, %v6278_v6 }
 0x7f3   : > { %v6236_v47 = vpop.xlane.xlu1 %6235  ;;  %19900 = vpow2.f32 %v6331_v21  ;;  %v6393_v33 = vsel %vm3958_vm0, %v23047_v42, 0.0 }
 0x7f4   : > { %v23051_v2 = vpop.eup %19894  ;;  %v6337_v57 = vmul.f32 1.442695, %v6283_v49  ;;  %6400 = vadd.xlane.f32.xlu0 %v6399_v38  ;;  %v6284_v40 = vsub.f32 %v22906_v18, %v6236_v47 }
 0x7f5   : > { %v6227_v9 = vpop.xlane.xlu0 %6226  ;;  %v6396_v27 = vsel %vm3958_vm0, %v23051_v2, 0.0 }
 0x7f6   : > { %19902 = vpow2.f32 %v6337_v57  ;;  %v6281_v7 = vsub.f32 %v22902_v60, %v6227_v9  ;;  %6397 = vadd.xlane.f32.xlu1 %v6396_v27  ;;  %v6339_v26 = vmul.f32 1.442695, %v6284_v40 }
 0x7f7   : > { %v6230_v30 = vpop.xlane.xlu1 %6229  ;;  %19904 = vpow2.f32 %v6327_v16 }
 0x7f8   : > { %v23059_v39 = vpop.eup %19896  ;;  %v6333_v55 = vmul.f32 1.442695, %v6281_v7  ;;  %6394 = vadd.xlane.f32.xlu0 %v6393_v33  ;;  %v6282_v18 = vsub.f32 %v22912_v43, %v6230_v30 }
 0x7f9   : > { %v6245_v44 = vpop.xlane.xlu0 %6244  ;;  %v6411_v25 = vsel %vm3958_vm0, %v23059_v39, 0.0 }
 0x7fa   : > { %19906 = vpow2.f32 %v6333_v55  ;;  %v6335_v12 = vmul.f32 1.442695, %v6282_v18  ;;  %v6287_v60 = vsub.f32 %v22918_v17, %v6245_v44  ;;  %6412 = vadd.xlane.f32.xlu1 %v6411_v25 }
 0x7fb   : > { %19908 = vpow2.f32 %v6339_v26  ;;  %v6248_v11 = vpop.xlane.xlu1 %6247 }
 0x7fc   : > { %v23065_v10 = vpop.eup %19898  ;;  %19910 = vpow2.f32 %v6335_v12  ;;  %v6345_v54 = vmul.f32 1.442695, %v6287_v60  ;;  %v6288_v53 = vsub.f32 %v22924_v34, %v6248_v11 }
 0x7fd   : > { %v6239_v21 = vpop.xlane.xlu0 %6238  ;;  %v6405_v43 = vsel %vm3958_vm0, %v23065_v10, 0.0  ;;  %v23070_v32 = vpop.eup %19900 }
 0x7fe   : > { %v6285_v6 = vsub.f32 %v22930_v3, %v6239_v21  ;;  %6406 = vadd.xlane.f32.xlu1 %v6405_v43  ;;  %19912 = vpow2.f32 %v6345_v54  ;;  %v6347_v31 = vmul.f32 1.442695, %v6288_v53  ;;  %v6414_v16 = vsel %vm3958_vm0, %v23070_v32, 0.0 }
 0x7ff   : > { %v6242_v4 = vpop.xlane.xlu1 %6241 }
 0x800   : > { %v23073_v17 = vpop.eup %19902  ;;  %v6341_v49 = vmul.f32 1.442695, %v6285_v6  ;;  %v6286_v38 = vsub.f32 %v22936_v1, %v6242_v4 }
 0x801   : > { %v6257_v47 = vpop.xlane.xlu0 %6256  ;;  %v6423_v34 = vsel %vm3958_vm0, %v23073_v17, 0.0  ;;  %v23080_v57 = vpop.eup %19904 }
 0x802   : > { %19914 = vpow2.f32 %v6341_v49  ;;  %v6291_v3 = vsub.f32 %v22942_v58, %v6257_v47  ;;  %6424 = vadd.xlane.f32.xlu0 %v6423_v34  ;;  %6415 = vadd.xlane.f32.xlu1 %v6414_v16  ;;  %v6343_v9 = vmul.f32 1.442695, %v6286_v38  ;;  %v6408_v33 = vsel %vm3958_vm0, %v23080_v57, 0.0  ;;  %v26546_v49 = vld [vmem:[#allocation118_spill] sm:$0xff]  ;;  %v26547_v38 = vld [vmem:[#allocation120_spill] sm:$0xff] }
 0x803   : > { %19916 = vpow2.f32 %v6347_v31  ;;  %v26548_v47 = vld [vmem:[#allocation122_spill] sm:$0xff]  ;;  %v23128_v34 = vpop.permute.xlu1 %6729 }
 0x804   : > { %v23083_v40 = vpop.eup %19906  ;;  %v6353_v27 = vmul.f32 1.442695, %v6291_v3 }
 0x805   : > { %v23085_v1 = vpop.eup %19908  ;;  %v6251_v7 = vpop.xlane.xlu0 %6250  ;;  %v6417_v26 = vsel %vm3958_vm0, %v23083_v40, 0.0 }
 0x806   : > { %v23091_v30 = vpop.eup %19910  ;;  %19918 = vpow2.f32 %v6353_v27  ;;  %v6289_v58 = vsub.f32 %v22950_v14, %v6251_v7  ;;  %6418 = vadd.xlane.f32.xlu0 %v6417_v26  ;;  %6409 = vadd.xlane.f32.xlu1 %v6408_v33  ;;  %v6426_v18 = vsel %vm3958_vm0, %v23085_v1, 0.0 }
 0x807   : > { %19920 = vpow2.f32 %v6343_v9  ;;  %v6420_v44 = vsel %vm3958_vm0, %v23091_v30, 0.0 }
 0x808   : > { %v6349_v55 = vmul.f32 1.442695, %v6289_v58  ;;  %v23098_v25 = vpop.eup %19912 }
 0x809   : > { %v6435_v14 = vsel %vm3958_vm0, %v23098_v25, 0.0 }
 0x80a   : > { %19922 = vpow2.f32 %v6349_v55  ;;  %6427 = vadd.xlane.f32.xlu0 %v6426_v18  ;;  %6421 = vadd.xlane.f32.xlu1 %v6420_v44 }
 0x80c   : > { %v23100_v12 = vpop.eup %19914 }
 0x80d   : > { %v6429_v60 = vsel %vm3958_vm0, %v23100_v12, 0.0  ;;  %v23106_v11 = vpop.eup %19916 }
 0x80e   : > { %6436 = vadd.xlane.f32.xlu0 %v6435_v14  ;;  %6430 = vadd.xlane.f32.xlu1 %v6429_v60  ;;  %v6438_v21 = vsel %vm3958_vm0, %v23106_v11, 0.0 }
 0x810   : > { %v23108_v54 = vpop.eup %19918 }
 0x811   : > { %v6447_v53 = vsel %vm3958_vm0, %v23108_v54, 0.0  ;;  %v23114_v43 = vpop.eup %19920 }
 0x812   : > { %6448 = vadd.xlane.f32.xlu1 %v6447_v53  ;;  %6439 = vadd.xlane.f32.xlu0 %v6438_v21  ;;  %v6432_v31 = vsel %vm3958_vm0, %v23114_v43, 0.0 }
 0x814   : > { %v23116_v6 = vpop.eup %19922 }
 0x815   : > { %v6441_v4 = vsel %vm3958_vm0, %v23116_v6, 0.0 }
 0x816   : > { %6442 = vadd.xlane.f32.xlu1 %v6441_v4  ;;  %6433 = vadd.xlane.f32.xlu0 %v6432_v31 }
 0x827   : > { %6818 = vrot.lane.b32.xlu1 %v26546_v49, %s20672_s21 }
 0x82b   : > { %6820 = vrot.lane.b32.xlu1 %v26547_v38, %s20672_s21 }
 0x82f   : > { %6822 = vrot.lane.b32.xlu1 %v26548_v47, %s20672_s21 }
 0x834   : > { %v6260_v16 = vpop.xlane.xlu1 %6259 }
 0x835   : > { %v6292_v3 = vsub.f32 %v22960_v51, %v6260_v16  ;;  %v6728_v51 = vpop.permute.xlu0 %6727 }
 0x837   : > { %v6355_v9 = vmul.f32 1.442695, %v6292_v3 }
 0x838   : > { %v6254_v27 = vpop.xlane.xlu1 %6253 }
 0x839   : > { %19924 = vpow2.f32 %v6355_v9  ;;  %v6290_v7 = vsub.f32 %v22966_v46, %v6254_v27  ;;  %v26549_v46 = vld [vmem:[#allocation116_spill] sm:$0xff] }
 0x83b   : > { %v6351_v26 = vmul.f32 1.442695, %v6290_v7 }
 0x83d   : > { %19926 = vpow2.f32 %v6351_v26 }
 0x843   : > { %v23132_v33 = vpop.eup %19924 }
 0x844   : > { %v6450_v58 = vsel %vm3958_vm0, %v23132_v33, 0.0 }
 0x845   : > { %6451 = vadd.xlane.f32.xlu0 %v6450_v58 }
 0x847   : > { %v23136_v55 = vpop.eup %19926 }
 0x848   : > { %v6444_v18 = vsel %vm3958_vm0, %v23136_v55, 0.0 }
 0x849   : > { %6445 = vadd.xlane.f32.xlu0 %v6444_v18 }
 0x855   : > { %v6365_v44 = vpop.xlane.xlu0 %6364 }
 0x859   : > { %v6359_v14 = vpop.xlane.xlu0 %6358 }
 0x85d   : > { %v6368_v60 = vpop.xlane.xlu1 %6367 }
 0x85e   : > { %19928 = vrcp.f32 %v6368_v60 }
 0x85f   : > { %6816 = vrot.lane.b32.xlu0 %v26549_v46, %s20672_s21  ;;  %19930 = vrcp.f32 %v6359_v14 }
 0x860   : > { %19932 = vrcp.f32 %v6365_v44 }
 0x861   : > { %v6362_v53 = vpop.xlane.xlu1 %6361 }
 0x862   : > { %19934 = vrcp.f32 %v6362_v53 }
 0x865   : > { %v6377_v21 = vpop.xlane.xlu1 %6376 }
 0x868   : > { %v19929_v4 = vpop.eup %19928 }
 0x869   : > { %v6371_v31 = vpop.xlane.xlu1 %6370  ;;  %v19931_v49 = vpop.eup %19930  ;;  %v6488_v16 = vmul.f32 %v19929_v4, %v22987_v45 }
 0x86a   : > { %v19933_v38 = vpop.eup %19932  ;;  %v6485_v9 = vmul.f32 %v19931_v49, %v22982_v24 }
 0x86b   : > { %v6487_v7 = vmul.f32 %v19933_v38, %v22977_v19 }
 0x86c   : > { %v19935_v47 = vpop.eup %19934 }
 0x86d   : > { %v6380_v3 = vpop.xlane.xlu1 %6379  ;;  %v6486_v27 = vmul.f32 %v19935_v47, %v22992_v20  ;;  %v6518_v58 = vpack.c.bf16 %v6488_v16, %v6487_v7 }
 0x86e   : > { %19936 = vrcp.f32 %v6380_v3 }
 0x86f   : > { %v6517_v26 = vpack.c.bf16 %v6486_v27, %v6485_v9  ;;  %19938 = vrcp.f32 %v6371_v31 }
 0x870   : > { %19940 = vrcp.f32 %v6377_v21 }
 0x871   : > { %17631 = vmatprep.mubr.msk.bf16.mxu0 %vm3958_vm0, %v6517_v26  ;;  %v6374_v18 = vpop.xlane.xlu1 %6373 }
 0x872   : > { %19942 = vrcp.f32 %v6374_v18  ;;  %17632 = vmatmul.mubr.msk.bf16.vlgmr.msra.gmra.mrb[40].mxu0 %vm3958_vm0, %v6518_v58 }
 0x873   : > { %17656 = vmatpush3.bf16.msra.mxu0 %v22767_v61  ;;  %v19658_v61 = vld [vmem:[#allocation9 + $0x64] ss:$12 sps:$4 sm:$0xff]  }
 0x874   : > { %17657 = vmatprep.subr.bf16.mxu0 %v22970_v8 }
 0x875   : > { %v6389_v24 = vpop.xlane.xlu0 %6388 }
 0x877   : > { %17658 = vmatpush3.bf16.msra.mxu0 %v22970_v8 }
 0x878   : > { %17659 = vmatprep.subr.bf16.mxu0 %v6728_v51  ;;  %v19937_v19 = vpop.eup %19936 }
 0x879   : > { %v6383_v45 = vpop.xlane.xlu0 %6382  ;;  %v19939_v20 = vpop.eup %19938  ;;  %v6492_v46 = vmul.f32 %v19937_v19, %v23006_v36 }
 0x87a   : > { %19944 = vrcp.f32 %v6383_v45  ;;  %v19941_v44 = vpop.eup %19940  ;;  %v6489_v21 = vmul.f32 %v19939_v20, %v23000_v41 }
 0x87b   : > { %19946 = vrcp.f32 %v6389_v24  ;;  %17660 = vmatpush3.bf16.msra.mxu0 %v6728_v51  ;;  %v6386_v14 = vpop.xlane.xlu1 %6385  ;;  %v6491_v4 = vmul.f32 %v19941_v44, %v22996_v13 }
 0x87c   : > { %v19943_v60 = vpop.eup %19942  ;;  %19948 = vrcp.f32 %v6386_v14  ;;  %17661 = vmatprep.subr.bf16.mxu0 %v23128_v34 }
 0x87d   : > { %v6392_v53 = vpop.xlane.xlu0 %6391  ;;  %v6490_v8 = vmul.f32 %v19943_v60, %v23012_v37  ;;  %v6520_v49 = vpack.c.bf16 %v6492_v46, %v6491_v4 }
 0x87e   : > { %19950 = vrcp.f32 %v6392_v53 }
 0x87f   : > { %17662 = vmatpush3.bf16.msra.mxu0 %v23128_v34  ;;  %v6404_v31 = vpop.xlane.xlu1 %6403  ;;  %v6519_v51 = vpack.c.bf16 %v6490_v8, %v6489_v21 }
 0x880   : > { %7049 = vmatprep.subr.bf16.mxu0 %v19658_v61 }
 0x881   : > { %v6401_v38 = vpop.xlane.xlu0 %6400  ;;  %17635 = vmatprep.mubr.msk.bf16.mxu0 %vm3958_vm0, %v6519_v51 }
 0x882   : > { %17636 = vmatmul.mubr.msk.bf16.gmra.mrb[44].mxu0 %vm3958_vm0, %v6520_v49  ;;  %19952 = vrcp.f32 %v6401_v38 }
 0x883   : > { %v6398_v36 = vpop.xlane.xlu1 %6397 }
 0x884   : > { %v19945_v47 = vpop.eup %19944  ;;  %19954 = vrcp.f32 %v6398_v36 }
 0x885   : > { %v19947_v41 = vpop.eup %19946  ;;  %19956 = vrcp.f32 %v6404_v31  ;;  %v6395_v37 = vpop.xlane.xlu0 %6394  ;;  %v6493_v34 = vmul.f32 %v19945_v47, %v23024_v59 }
 0x886   : > { %v19949_v13 = vpop.eup %19948  ;;  %19958 = vrcp.f32 %v6395_v37  ;;  %v6495_v27 = vmul.f32 %v19947_v41, %v23019_v15 }
 0x887   : > { %v6413_v16 = vpop.xlane.xlu1 %6412  ;;  %v6494_v3 = vmul.f32 %v19949_v13, %v23031_v35  ;;  %v19656_v13 = vld [vmem:[#allocation9 + $0x60] ss:$12 sps:$4 sm:$0xff]  }
 0x888   : > { %v19951_v9 = vpop.eup %19950 }
 0x889   : > { %v6496_v7 = vmul.f32 %v19951_v9, %v23027_v22  ;;  %v6521_v26 = vpack.c.bf16 %v6494_v3, %v6493_v34  ;;  %v19661_v9 = vld [vmem:[#allocation9 + $0x7c] ss:$12 sps:$4 sm:$0xff]  }
 0x88b   : > { %v6522_v58 = vpack.c.bf16 %v6496_v7, %v6495_v27  ;;  %17647 = vmatprep.mubr.msk.bf16.mxu1 %vm3958_vm0, %v6521_v26  ;;  %v6407_v18 = vpop.xlane.xlu1 %6406  ;;  %v19659_v7 = vld [vmem:[#allocation9 + $0x78] ss:$12 sps:$4 sm:$0xff]  }
 0x88c   : > { %v19953_v24 = vpop.eup %19952 }
 0x88d   : > { %17648 = vmatmul.mubr.msk.bf16.vlgmr.msra.gmra.mrb[24].mxu1 %vm3958_vm0, %v6522_v58  ;;  %v6499_v35 = vmul.f32 %v19953_v24, %v23037_v63  ;;  %v19664_v58 = vld [vmem:[#allocation9 + $0x94] ss:$12 sps:$4 sm:$0xff]   ;;  %v19662_v24 = vld [vmem:[#allocation9 + $0x90] ss:$12 sps:$4 sm:$0xff]  }
 0x88e   : > { %v19955_v19 = vpop.eup %19954 }
 0x88f   : > { %v19957_v45 = vpop.eup %19956  ;;  %v6425_v20 = vpop.xlane.xlu0 %6424  ;;  %v6498_v15 = vmul.f32 %v19955_v19, %v23051_v2 }
 0x890   : > { %v6416_v44 = vpop.xlane.xlu1 %6415  ;;  %v19959_v59 = vpop.eup %19958  ;;  %v6500_v22 = vmul.f32 %v19957_v45, %v23041_v0 }
 0x891   : > { %v6497_v14 = vmul.f32 %v19959_v59, %v23047_v42  ;;  %19960 = vrcp.f32 %v6416_v44 }
 0x892   : > { %19962 = vrcp.f32 %v6407_v18  ;;  %v6524_v53 = vpack.c.bf16 %v6500_v22, %v6499_v35 }
 0x893   : > { %v6419_v60 = vpop.xlane.xlu0 %6418  ;;  %v6523_v61 = vpack.c.bf16 %v6498_v15, %v6497_v14  ;;  %19964 = vrcp.f32 %v6413_v16 }
 0x894   : > { %v6410_v46 = vpop.xlane.xlu1 %6409 }
 0x895   : > { %19966 = vrcp.f32 %v6410_v46  ;;  %17651 = vmatprep.mubr.msk.bf16.mxu1 %vm3958_vm0, %v6523_v61 }
 0x896   : > { %17652 = vmatmul.mubr.msk.bf16.gmra.mrb[28].mxu1 %vm3958_vm0, %v6524_v53  ;;  %19968 = vrcp.f32 %v6419_v60 }
 0x897   : > { %v6428_v63 = vpop.xlane.xlu0 %6427 }
 0x898   : > { %v6422_v21 = vpop.xlane.xlu1 %6421 }
 0x899   : > { %19970 = vrcp.f32 %v6422_v21 }
 0x89a   : > { %19972 = vrcp.f32 %v6428_v63 }
 0x89b   : > { %v6437_v42 = vpop.xlane.xlu0 %6436  ;;  %v19961_v2 = vpop.eup %19960  ;;  %19974 = vrcp.f32 %v6425_v20  ;;  %v19665_v20 = vld [vmem:[#allocation9 + $0xa8] ss:$12 sps:$4 sm:$0xff]  }
 0x89c   : > { %v19963_v0 = vpop.eup %19962  ;;  %v6504_v31 = vmul.f32 %v19961_v2, %v23070_v32  ;;  %v6431_v51 = vpop.xlane.xlu1 %6430 }
 0x89d   : > { %v19965_v8 = vpop.eup %19964  ;;  %v6501_v38 = vmul.f32 %v19963_v0, %v23065_v10  ;;  %19976 = vrcp.f32 %v6431_v51  ;;  %v19669_v51 = vld [vmem:[#allocation9 + $0x80] ss:$12 sps:$4 sm:$0xff]  }
 0x89e   : > { %v6503_v41 = vmul.f32 %v19965_v8, %v23059_v39 }
 0x89f   : > { %v19967_v4 = vpop.eup %19966  ;;  %v6440_v49 = vpop.xlane.xlu0 %6439 }
 0x8a0   : > { %v6502_v36 = vmul.f32 %v19967_v4, %v23080_v57  ;;  %v19969_v47 = vpop.eup %19968  ;;  %v6526_v34 = vpack.c.bf16 %v6504_v31, %v6503_v41  ;;  %v6449_v35 = vpop.xlane.xlu1 %6448  ;;  %v26551_v41 = vld [vmem:[#allocation71_spill] sm:$0xff] }
 0x8a1   : > { %v6505_v32 = vmul.f32 %v19969_v47, %v23083_v40  ;;  %v19667_v40 = vld [vmem:[#allocation9 + $0xac] ss:$12 sps:$4 sm:$0xff]  }
 0x8a2   : > { %v6525_v37 = vpack.c.bf16 %v6502_v36, %v6501_v38 }
 0x8a3   : > { %v19971_v16 = vpop.eup %19970  ;;  %v6434_v3 = vpop.xlane.xlu0 %6433 }
 0x8a4   : > { %v19973_v27 = vpop.eup %19972  ;;  %19978 = vrcp.f32 %v6434_v3  ;;  %17663 = vmatprep.mubr.msk.bf16.mxu0 %vm3958_vm0, %v6525_v37  ;;  %v6506_v10 = vmul.f32 %v19971_v16, %v23091_v30  ;;  %v6443_v14 = vpop.xlane.xlu1 %6442 }
 0x8a5   : > { %17664 = vmatmul.mubr.msk.bf16.vlgmr.msra.gmra.mrb[48].mxu0 %vm3958_vm0, %v6526_v34  ;;  %v19975_v57 = vpop.eup %19974  ;;  %v6508_v26 = vmul.f32 %v19973_v27, %v23085_v1  ;;  %19980 = vrcp.f32 %v6440_v49  ;;  %v26552_v27 = vld [vmem:[#allocation32_spill] sm:$0xff] }
 0x8a6   : > { %7050 = vmatpush1.bf16.msra.mxu0 %v19656_v13  ;;  %v6527_v39 = vpack.c.bf16 %v6506_v10, %v6505_v32  ;;  %v6507_v18 = vmul.f32 %v19975_v57, %v23073_v17  ;;  %v26550_v17 = vld [vmem:[#allocation86_spill] sm:$0xff]  ;;  %v26553_v32 = vld [vmem:[#allocation73_spill] sm:$0xff]  ;;  %v7933_v10 = vsel %vm3958_vm0, %v26552_v27, 0 }
 0x8a7   : > { %7051 = vmatprep.subr.bf16.mxu0 %v19661_v9  ;;  %v19977_v30 = vpop.eup %19976  ;;  %v7752_v9 = vsel %vm3958_vm0, %v26551_v41, 0  ;;  %v7755_v57 = vsel %vm3958_vm0, %v26553_v32, 0 }
 0x8a8   : > { %17667 = vmatprep.mubr.msk.bf16.mxu0 %vm3958_vm0, %v6527_v39  ;;  %v6528_v19 = vpack.c.bf16 %v6508_v26, %v6507_v18  ;;  %v6509_v1 = vmul.f32 %v19977_v30, %v23100_v12  ;;  %v6819_v60 = vpop.permute.xlu1 %6818  ;;  %v26554_v39 = vld [vmem:[#allocation34_spill] sm:$0xff]  ;;  %v26555_v26 = vld [vmem:[#allocation75_spill] sm:$0xff] }
 0x8a9   : > { %v7936_v30 = vsel %vm3958_vm0, %v26554_v39, 0 }
 0x8aa   : > { %7052 = vmatpush1.bf16.msra.mxu0 %v19659_v7 }
 0x8ab   : > { %7053 = vmatprep.subr.bf16.mxu0 %v19664_v58 }
 0x8ac   : > { %v6821_v12 = vpop.permute.xlu1 %6820 }
 0x8ad   : > { %17668 = vmatmul.mubr.msk.bf16.gmra.mrb[52].mxu0 %vm3958_vm0, %v6528_v19 }
 0x8ae   : > { %v19979_v45 = vpop.eup %19978  ;;  %7054 = vmatpush1.bf16.msra.mxu0 %v19662_v24  ;;  %7081 = vmatprep.mubr.bf16.mxu0 %v26537_v56 }
 0x8af   : > { %7055 = vmatprep.subr.bf16.mxu0 %v19667_v40  ;;  %v6510_v44 = vmul.f32 %v19979_v45, %v23114_v43  ;;  %v19981_v43 = vpop.eup %19980  ;;  %v7758_v45 = vsel %vm3958_vm0, %v26555_v26, 0 }
 0x8b0   : > { %v6823_v63 = vpop.permute.xlu1 %6822  ;;  %v6512_v2 = vmul.f32 %v19981_v43, %v23106_v11  ;;  %v26559_v43 = vld [vmem:[#allocation79_spill] sm:$0xff] }
 0x8b1   : > { %v6529_v59 = vpack.c.bf16 %v6510_v44, %v6509_v1  ;;  %v26557_v1 = vld [vmem:[#allocation77_spill] sm:$0xff] }
 0x8b2   : > { %7056 = vmatpush1.bf16.msra.mxu0 %v19665_v20  ;;  %v26556_v20 = vld [vmem:[#allocation57_spill] sm:$0xff] }
 0x8b3   : > { %19191 = vmatprep.subr.msk.bf16.mxu0 %vm3958_vm0, %v26550_v17  ;;  %17679 = vmatprep.mubr.msk.bf16.mxu1 %vm3958_vm0, %v6529_v59 }
 0x8d2   : > { %v6452_v15 = vpop.xlane.xlu0 %6451 }
 0x8d6   : > { %v6446_v22 = vpop.xlane.xlu0 %6445 }
 0x8d7   : > { %19982 = vrcp.f32 %v6446_v22  ;;  %v7939_v22 = vsel %vm3958_vm0, %v26556_v20, 0 }
 0x8d8   : > { %19984 = vrcp.f32 %v6437_v42  ;;  %v19668_v42 = vld [vmem:[#allocation9 + $0x68] ss:$12 sps:$4 sm:$0xff]  }
 0x8d9   : > { %19986 = vrcp.f32 %v6443_v14 }
 0x8da   : > { %v6817_v46 = vpop.permute.xlu0 %6816  ;;  %19988 = vrcp.f32 %v6452_v15 }
 0x8db   : > { %17671 = vmatprep.subr.bf16.mxu1 %v6817_v46  ;;  %19990 = vrcp.f32 %v6449_v35 }
 0x8dc   : > { %17672 = vmatpush3.bf16.msra.mxu1 %v6817_v46  ;;  %v7761_v46 = vsel %vm3958_vm0, %v26557_v1, 0 }
 0x8dd   : > { %17673 = vmatprep.subr.bf16.mxu1 %v6819_v60 }
 0x8e0   : > { %17674 = vmatpush3.bf16.msra.mxu1 %v6819_v60 }
 0x8e1   : > { %17675 = vmatprep.subr.bf16.mxu1 %v6821_v12  ;;  %v19983_v61 = vpop.eup %19982 }
 0x8e2   : > { %v19985_v53 = vpop.eup %19984  ;;  %v6514_v0 = vmul.f32 %v19983_v61, %v23136_v55  ;;  %v19670_v55 = vld [vmem:[#allocation9 + $0x98] ss:$12 sps:$4 sm:$0xff]  }
 0x8e3   : > { %v19987_v21 = vpop.eup %19986  ;;  %v6511_v8 = vmul.f32 %v19985_v53, %v23098_v25 }
 0x8e4   : > { %17676 = vmatpush3.bf16.msra.mxu1 %v6821_v12  ;;  %v6513_v4 = vmul.f32 %v19987_v21, %v23116_v6  ;;  %v19989_v49 = vpop.eup %19988  ;;  %v19671_v6 = vld [vmem:[#allocation9 + $0xb0] ss:$12 sps:$4 sm:$0xff]  }
 0x8e5   : > { %17677 = vmatprep.subr.bf16.mxu1 %v6823_v63  ;;  %v6530_v31 = vpack.c.bf16 %v6512_v2, %v6511_v8  ;;  %v19991_v36 = vpop.eup %19990  ;;  %v6516_v11 = vmul.f32 %v19989_v49, %v23132_v33  ;;  %v26558_v12 = vld [vmem:[#allocation89_spill] sm:$0xff] }
 0x8e6   : > { %v6531_v38 = vpack.c.bf16 %v6514_v0, %v6513_v4  ;;  %v6515_v25 = vmul.f32 %v19991_v36, %v23108_v54  ;;  %v7930_v54 = vsel %vm3958_vm0, %v26550_v17, 0 }
 0x8e8   : > { %17678 = vmatpush3.bf16.msra.mxu1 %v6823_v63  ;;  %v6532_v47 = vpack.c.bf16 %v6516_v11, %v6515_v25 }
 0x8e9   : > { %17687 = vmatprep.subr.bf16.mxu1 %v19668_v42 }
 0x8eb   : > { %17680 = vmatmul.mubr.msk.bf16.vlgmr.msra.gmra.mrb[32].mxu1 %vm3958_vm0, %v6530_v31 }
 0x8ec   : > { %17683 = vmatprep.mubr.msk.bf16.mxu1 %vm3958_vm0, %v6531_v38  ;;  %17688 = vmatpush3.bf16.msra.mxu1 %v19668_v42 }
 0x8ed   : > { %17689 = vmatprep.subr.bf16.mxu1 %v19669_v51 }
 0x8f0   : > { %17690 = vmatpush3.bf16.msra.mxu1 %v19669_v51 }
 0x8f1   : > { %17691 = vmatprep.subr.bf16.mxu1 %v19670_v55 }
 0x8f3   : > { %17684 = vmatmul.mubr.msk.bf16.gmra.mrb[36].mxu1 %vm3958_vm0, %v6532_v47 }
 0x8f4   : > { %17692 = vmatpush3.bf16.msra.mxu1 %v19670_v55 }
 0x8f5   : > { %17693 = vmatprep.subr.bf16.mxu1 %v19671_v6 }
 0x8f8   : > { %17694 = vmatpush3.bf16.msra.mxu1 %v19671_v6 }
 0x8f9   : > { %19183 = vmatprep.subr.msk.bf16.mxu1 %vm3958_vm0, %v26551_v41 }
 0x945   : > { %v17633_v37 = vpop.f32.mrb[40].mxu0 }
 0x946   : > { %v6595_v13 = vpop.f32.mrb[41].mxu0 }
 0x947   : > { %v17634_v16 = vpop.f32.mrb[42].mxu0 }
 0x948   : > { %v6906_v33 = vpack.c.bf16 %v17634_v16, %v17633_v37  ;;  %v6598_v34 = vpop.f32.mrb[43].mxu0 }
 0x949   : > { %v6905_v3 = vpack.c.bf16 %v6598_v34, %v6595_v13 }
 0x94b   : > { %16362 = vmatmul.mubr.msk.bf16.vlgmr.msra.gmra.mrb[224].mxu0 %vm3958_vm0, %v6905_v3  ;;  %17695 = vmatprep.mubr.msk.bf16.mxu1 %vm3958_vm0, %v6905_v3 }
 0x94c   : > { %17760 = vmatpush3.bf16.xpose.msra.mxu0 %v7930_v54  ;;  %17696 = vmatmul.mubr.msk.bf16.vlgmr.msra.gmra.mrb[224].mxu1 %vm3958_vm0, %v6906_v33 }
 0x94d   : > { %17728 = vmatpush3.bf16.xpose.msra.mxu1 %v7752_v9  ;;  %19192 = vmatprep.subr.msk.bf16.mxu0 %vm3958_vm0, %v26552_v27 }
 0x94e   : > { %19184 = vmatprep.subr.msk.bf16.mxu1 %vm3958_vm0, %v26553_v32  ;;  %7091 = vmatprep.mubr.bf16.mxu0 %v26537_v56 }
 0x953   : > { %16363 = vmatmul.mubr.msk.bf16.gmra.mrb[228].mxu0 %vm3958_vm0, %v6906_v33 }
 0x954   : > { %17762 = vmatpush3.bf16.xpose.msra.mxu0 %v7933_v10  ;;  %7101 = vmatprep.mubr.bf16.mxu0 %v26537_v56 }
 0x955   : > { %17730 = vmatpush3.bf16.xpose.msra.mxu1 %v7755_v57  ;;  %19193 = vmatprep.subr.msk.bf16.mxu0 %vm3958_vm0, %v26554_v39  ;;  %v17637_v7 = vpop.f32.mrb[44].mxu0 }
 0x956   : > { %19185 = vmatprep.subr.msk.bf16.mxu1 %vm3958_vm0, %v26555_v26  ;;  %v6611_v58 = vpop.f32.mrb[45].mxu0 }
 0x957   : > { %v17638_v18 = vpop.f32.mrb[46].mxu0 }
 0x958   : > { %v6908_v24 = vpack.c.bf16 %v17638_v18, %v17637_v7  ;;  %v6614_v19 = vpop.f32.mrb[47].mxu0  ;;  %v26561_v18 = vld [vmem:[#allocation47_spill] sm:$0xff] }
 0x959   : > { %v6907_v40 = vpack.c.bf16 %v6614_v19, %v6611_v58  ;;  %v26560_v58 = vld [vmem:[#allocation33_spill] sm:$0xff]  ;;  %v26562_v19 = vld [vmem:[#allocation48_spill] sm:$0xff] }
 0x95b   : > { %16364 = vmatmul.mubr.msk.bf16.gmra.mrb[232].mxu0 %vm3958_vm0, %v6907_v40  ;;  %17699 = vmatprep.mubr.msk.bf16.mxu1 %vm3958_vm0, %v6907_v40  ;;  %v26563_v40 = vld [vmem:[#allocation56_spill] sm:$0xff] }
 0x95c   : > { %17764 = vmatpush3.bf16.xpose.msra.mxu0 %v7936_v30  ;;  %17700 = vmatmul.mubr.msk.bf16.gmra.mrb[228].mxu1 %vm3958_vm0, %v6908_v24  ;;  %v26564_v30 = vld [vmem:[#allocation25_spill] sm:$0xff] }
 0x95d   : > { %17732 = vmatpush3.bf16.xpose.msra.mxu1 %v7758_v45  ;;  %19194 = vmatprep.subr.msk.bf16.mxu0 %vm3958_vm0, %v26556_v20  ;;  %v7844_v45 = vsel %vm3958_vm0, %v26563_v40, 0 }
 0x95e   : > { %19186 = vmatprep.subr.msk.bf16.mxu1 %vm3958_vm0, %v26557_v1  ;;  %7111 = vmatprep.mubr.bf16.mxu0 %v26537_v56 }
 0x960   : > { %v17649_v44 = vpop.f32.mrb[24].mxu1 }
 0x961   : > { %v6688_v59 = vpop.f32.mrb[25].mxu1 }
 0x962   : > { %v17650_v35 = vpop.f32.mrb[26].mxu1 }
 0x963   : > { %v6910_v14 = vpack.c.bf16 %v17650_v35, %v17649_v44  ;;  %v6691_v15 = vpop.f32.mrb[27].mxu1  ;;  %16365 = vmatmul.mubr.msk.bf16.gmra.mrb[236].mxu0 %vm3958_vm0, %v6908_v24  ;;  %v7841_v24 = vsel %vm3958_vm0, %v26559_v43, 0  ;;  %v26565_v44 = vld [vmem:[#allocation43_spill] sm:$0xff]  ;;  %v26567_v35 = vld [vmem:[#allocation82_spill] sm:$0xff] }
 0x964   : > { %v6909_v60 = vpack.c.bf16 %v6691_v15, %v6688_v59  ;;  %17766 = vmatpush3.bf16.xpose.msra.mxu0 %v7939_v22  ;;  %7121 = vmatprep.mubr.bf16.mxu0 %v26537_v56  ;;  %v26566_v59 = vld [vmem:[#allocation49_spill] sm:$0xff]  ;;  %v7847_v15 = vsel %vm3958_vm0, %v26567_v35, 0  ;;  %v26569_v22 = vld [vmem:[#allocation19_spill] sm:$0xff] }
 0x965   : > { %17734 = vmatpush3.bf16.xpose.msra.mxu1 %v7761_v46  ;;  %17791 = vmatprep.subr.bf16.mxu0 %v26558_v12  ;;  %v26571_v46 = vld [vmem:[#allocation84_spill] sm:$0xff] }
 0x966   : > { %17703 = vmatprep.mubr.msk.bf16.mxu1 %vm3958_vm0, %v6909_v60  ;;  %19187 = vmatprep.subr.msk.bf16.mxu1 %vm3958_vm0, %v26559_v43 }
 0x967   : > { %17704 = vmatmul.mubr.msk.bf16.gmra.mrb[232].mxu1 %vm3958_vm0, %v6910_v14 }
 0x969   : > { %v17653_v61 = vpop.f32.mrb[28].mxu1 }
 0x96a   : > { %v6704_v53 = vpop.f32.mrb[29].mxu1 }
 0x96b   : > { %v17654_v63 = vpop.f32.mrb[30].mxu1  ;;  %16366 = vmatmul.mubr.msk.bf16.gmra.mrb[240].mxu0 %vm3958_vm0, %v6909_v60  ;;  %v26570_v60 = vld [vmem:[#allocation93_spill] sm:$0xff] }
 0x96c   : > { %v6912_v21 = vpack.c.bf16 %v17654_v63, %v17653_v61  ;;  %v6707_v2 = vpop.f32.mrb[31].mxu1  ;;  %7131 = vmatprep.mubr.bf16.mxu0 %v26537_v56  ;;  %v26572_v61 = vld [vmem:[#allocation95_spill] sm:$0xff]  ;;  %v7850_v63 = vsel %vm3958_vm0, %v26571_v46, 0 }
 0x96d   : > { %v6911_v42 = vpack.c.bf16 %v6707_v2, %v6704_v53  ;;  %v26573_v53 = vld [vmem:[#allocation39_spill] sm:$0xff]  ;;  %v26575_v2 = vld [vmem:[#allocation26_spill] sm:$0xff] }
 0x96f   : > { %17707 = vmatprep.mubr.msk.bf16.mxu1 %vm3958_vm0, %v6911_v42 }
 0x970   : > { %17708 = vmatmul.mubr.msk.bf16.gmra.mrb[236].mxu1 %vm3958_vm0, %v6912_v21 }
 0x973   : > { %16367 = vmatmul.mubr.msk.bf16.gmra.mrb[244].mxu0 %vm3958_vm0, %v6910_v14  ;;  %v26568_v14 = vld [vmem:[#allocation45_spill] sm:$0xff] }
 0x974   : > { %7141 = vmatprep.mubr.bf16.mxu0 %v26537_v56 }
 0x978   : > { %v17665_v0 = vpop.f32.mrb[48].mxu0 }
 0x979   : > { %v6781_v8 = vpop.f32.mrb[49].mxu0 }
 0x97a   : > { %v17666_v4 = vpop.f32.mrb[50].mxu0 }
 0x97b   : > { %v6914_v31 = vpack.c.bf16 %v17666_v4, %v17665_v0  ;;  %v6784_v51 = vpop.f32.mrb[51].mxu0  ;;  %16368 = vmatmul.mubr.msk.bf16.gmra.mrb[248].mxu0 %vm3958_vm0, %v6911_v42  ;;  %v26576_v42 = vld [vmem:[#allocation109_spill] sm:$0xff]  ;;  %v26577_v0 = vld [vmem:[#allocation51_spill] sm:$0xff] }
 0x97c   : > { %v6913_v49 = vpack.c.bf16 %v6784_v51, %v6781_v8  ;;  %7151 = vmatprep.mubr.bf16.mxu0 %v26537_v56  ;;  %v8019_v8 = vsel %vm3958_vm0, %v26575_v2, 0  ;;  %v26578_v4 = vld [vmem:[#allocation53_spill] sm:$0xff]  ;;  %v26580_v51 = vld [vmem:[#allocation55_spill] sm:$0xff] }
 0x97e   : > { %17711 = vmatprep.mubr.msk.bf16.mxu1 %vm3958_vm0, %v6913_v49 }
 0x97f   : > { %17712 = vmatmul.mubr.msk.bf16.gmra.mrb[240].mxu1 %vm3958_vm0, %v6914_v31 }
 0x980   : > { %v17669_v38 = vpop.f32.mrb[52].mxu0 }
 0x981   : > { %v6797_v36 = vpop.f32.mrb[53].mxu0 }
 0x982   : > { %v17670_v11 = vpop.f32.mrb[54].mxu0 }
 0x983   : > { %v6916_v55 = vpack.c.bf16 %v17670_v11, %v17669_v38  ;;  %v6800_v25 = vpop.f32.mrb[55].mxu0  ;;  %16369 = vmatmul.mubr.msk.bf16.gmra.mrb[252].mxu0 %vm3958_vm0, %v6912_v21  ;;  %v26574_v21 = vld [vmem:[#allocation99_spill] sm:$0xff]  ;;  %v26581_v38 = vld [vmem:[#allocation28_spill] sm:$0xff] }
 0x984   : > { %v6915_v47 = vpack.c.bf16 %v6800_v25, %v6797_v36  ;;  %7161 = vmatprep.mubr.bf16.mxu0 %v26537_v56  ;;  %v26582_v36 = vld [vmem:[#allocation50_spill] sm:$0xff] }
 0x985   : > { %v8025_v11 = vsel %vm3958_vm0, %v26582_v36, 0 }
 0x986   : > { %17715 = vmatprep.mubr.msk.bf16.mxu1 %vm3958_vm0, %v6915_v47 }
 0x987   : > { %17716 = vmatmul.mubr.msk.bf16.gmra.mrb[244].mxu1 %vm3958_vm0, %v6916_v55 }
 0x98b   : > { %16370 = vmatmul.mubr.msk.bf16.gmra.mrb[0].mxu0 %vm3958_vm0, %v6913_v49 }
 0x98c   : > { %7171 = vmatprep.mubr.bf16.mxu0 %v26537_v56 }
 0x993   : > { %16371 = vmatmul.mubr.msk.bf16.gmra.mrb[4].mxu0 %vm3958_vm0, %v6914_v31  ;;  %v26579_v31 = vld [vmem:[#allocation90_spill] sm:$0xff] }
 0x994   : > { %7181 = vmatprep.mubr.bf16.mxu0 %v26537_v56  ;;  %v8022_v49 = vsel %vm3958_vm0, %v26579_v31, 0 }
 0x99b   : > { %16372 = vmatmul.mubr.msk.bf16.gmra.mrb[8].mxu0 %vm3958_vm0, %v6915_v47  ;;  %v26584_v47 = vld [vmem:[#allocation101_spill] sm:$0xff] }
 0x99c   : > { %7191 = vmatprep.mubr.bf16.mxu0 %v26537_v56 }
 0x9a3   : > { %16373 = vmatmul.mubr.msk.bf16.gmra.mrb[12].mxu0 %vm3958_vm0, %v6916_v55  ;;  %v26583_v55 = vld [vmem:[#allocation96_spill] sm:$0xff] }
 0x9a4   : > { %7201 = vmatprep.mubr.bf16.mxu0 %v26537_v56  ;;  %v8028_v25 = vsel %vm3958_vm0, %v26583_v55, 0 }
 0x9be   : > { %v17681_v6 = vpop.f32.mrb[32].mxu1 }
 0x9bf   : > { %v6874_v37 = vpop.f32.mrb[33].mxu1 }
 0x9c0   : > { %v17682_v13 = vpop.f32.mrb[34].mxu1 }
 0x9c1   : > { %v6918_v16 = vpack.c.bf16 %v17682_v13, %v17681_v6  ;;  %v6877_v33 = vpop.f32.mrb[35].mxu1  ;;  %v26585_v6 = vld [vmem:[#allocation29_spill] sm:$0xff]  ;;  %v26587_v13 = vld [vmem:[#allocation103_spill] sm:$0xff] }
 0x9c2   : > { %v6917_v34 = vpack.c.bf16 %v6877_v33, %v6874_v37  ;;  %v26586_v37 = vld [vmem:[#allocation30_spill] sm:$0xff]  ;;  %v26589_v33 = vld [vmem:[#allocation31_spill] sm:$0xff] }
 0x9c4   : > { %16374 = vmatmul.mubr.msk.bf16.gmra.mrb[16].mxu0 %vm3958_vm0, %v6917_v34  ;;  %17719 = vmatprep.mubr.msk.bf16.mxu1 %vm3958_vm0, %v6917_v34  ;;  %v26590_v34 = vld [vmem:[#allocation107_spill] sm:$0xff] }
 0x9c5   : > { %17720 = vmatmul.mubr.msk.bf16.gmra.mrb[248].mxu1 %vm3958_vm0, %v6918_v16  ;;  %7211 = vmatprep.mubr.bf16.mxu0 %v26537_v56 }
 0x9c6   : > { %v17685_v3 = vpop.f32.mrb[36].mxu1 }
 0x9c7   : > { %v6890_v54 = vpop.f32.mrb[37].mxu1 }
 0x9c8   : > { %v17686_v9 = vpop.f32.mrb[38].mxu1 }
 0x9c9   : > { %v6920_v10 = vpack.c.bf16 %v17686_v9, %v17685_v3  ;;  %v6893_v57 = vpop.f32.mrb[39].mxu1  ;;  %v26591_v3 = vld [vmem:[#allocation117_spill] sm:$0xff] }
 0x9ca   : > { %v6919_v7 = vpack.c.bf16 %v6893_v57, %v6890_v54 }
 0x9cc   : > { %16375 = vmatmul.mubr.msk.bf16.gmra.mrb[20].mxu0 %vm3958_vm0, %v6918_v16  ;;  %17723 = vmatprep.mubr.msk.bf16.mxu1 %vm3958_vm0, %v6919_v7  ;;  %v26588_v16 = vld [vmem:[#allocation105_spill] sm:$0xff] }
 0x9cd   : > { %17724 = vmatmul.mubr.msk.bf16.gmra.mrb[252].mxu1 %vm3958_vm0, %v6920_v10  ;;  %7221 = vmatprep.mubr.bf16.mxu0 %v26537_v56 }
 0x9ce   : > { %17735 = vmatprep.mubr.msk.bf16.mxu1 %vm3958_vm0, %v26560_v58 }
 0x9d4   : > { %16376 = vmatmul.mubr.msk.bf16.gmra.mrb[24].mxu0 %vm3958_vm0, %v6919_v7 }
 0x9d5   : > { %17736 = vmatmul.mubr.msk.bf16.vlgmr.msra.gmra.mrb[40].mxu1 %vm3958_vm0, %v26561_v18  ;;  %7231 = vmatprep.mubr.bf16.mxu0 %v26537_v56 }
 0x9d6   : > { %17744 = vmatpush3.bf16.xpose.msra.mxu1 %v7841_v24  ;;  %17739 = vmatprep.mubr.msk.bf16.mxu1 %vm3958_vm0, %v26562_v19 }
 0x9d7   : > { %19188 = vmatprep.subr.msk.bf16.mxu1 %vm3958_vm0, %v26563_v40 }
 0x9dc   : > { %16377 = vmatmul.mubr.msk.bf16.gmra.mrb[32].mxu0 %vm3958_vm0, %v6920_v10 }
 0x9dd   : > { %17740 = vmatmul.mubr.msk.bf16.gmra.mrb[44].mxu1 %vm3958_vm0, %v26564_v30  ;;  %17767 = vmatprep.mubr.msk.bf16.mxu0 %vm3958_vm0, %v26565_v44 }
 0x9de   : > { %17746 = vmatpush3.bf16.xpose.msra.mxu1 %v7844_v45  ;;  %17751 = vmatprep.mubr.msk.bf16.mxu1 %vm3958_vm0, %v26566_v59 }
 0x9df   : > { %19189 = vmatprep.subr.msk.bf16.mxu1 %vm3958_vm0, %v26567_v35 }
 0x9e4   : > { %17768 = vmatmul.mubr.msk.bf16.vlgmr.msra.gmra.mrb[56].mxu0 %vm3958_vm0, %v26568_v14 }
 0x9e5   : > { %17792 = vmatpush3.bf16.msra.mxu0 %v26558_v12  ;;  %17771 = vmatprep.mubr.msk.bf16.mxu0 %vm3958_vm0, %v26569_v22 }
 0x9e6   : > { %17748 = vmatpush3.bf16.xpose.msra.mxu1 %v7847_v15  ;;  %17793 = vmatprep.subr.bf16.mxu0 %v26570_v60 }
 0x9e7   : > { %19190 = vmatprep.subr.msk.bf16.mxu1 %vm3958_vm0, %v26571_v46 }
 0x9e9   : > { %17794 = vmatpush3.bf16.msra.mxu0 %v26570_v60 }
 0x9ea   : > { %17795 = vmatprep.subr.bf16.mxu0 %v26572_v61 }
 0x9ec   : > { %17772 = vmatmul.mubr.msk.bf16.gmra.mrb[60].mxu0 %vm3958_vm0, %v26573_v53 }
 0x9ed   : > { %17796 = vmatpush3.bf16.msra.mxu0 %v26572_v61 }
 0x9ee   : > { %17750 = vmatpush3.bf16.xpose.msra.mxu1 %v7850_v63  ;;  %17797 = vmatprep.subr.bf16.mxu0 %v26574_v21 }
 0x9ef   : > { %19195 = vmatprep.subr.msk.bf16.mxu1 %vm3958_vm0, %v26575_v2 }
 0x9f1   : > { %17798 = vmatpush3.bf16.msra.mxu0 %v26574_v21 }
 0x9f2   : > { %17823 = vmatprep.subr.bf16.mxu0 %v26576_v42 }
 0x9f5   : > { %17752 = vmatmul.mubr.msk.bf16.vlgmr.msra.gmra.mrb[48].mxu1 %vm3958_vm0, %v26577_v0 }
 0x9f6   : > { %17755 = vmatprep.mubr.msk.bf16.mxu1 %vm3958_vm0, %v26578_v4  ;;  %17776 = vmatpush3.bf16.xpose.msra.mxu1 %v8019_v8 }
 0x9f7   : > { %19196 = vmatprep.subr.msk.bf16.mxu1 %vm3958_vm0, %v26579_v31 }
 0x9fd   : > { %17756 = vmatmul.mubr.msk.bf16.gmra.mrb[52].mxu1 %vm3958_vm0, %v26580_v51 }
 0x9fe   : > { %17778 = vmatpush3.bf16.xpose.msra.mxu1 %v8022_v49  ;;  %17783 = vmatprep.mubr.msk.bf16.mxu1 %vm3958_vm0, %v26581_v38 }
 0x9ff   : > { %19197 = vmatprep.subr.msk.bf16.mxu1 %vm3958_vm0, %v26582_v36 }
 0xa06   : > { %17780 = vmatpush3.bf16.xpose.msra.mxu1 %v8025_v11 }
 0xa07   : > { %19198 = vmatprep.subr.msk.bf16.mxu1 %vm3958_vm0, %v26583_v55 }
 0xa0e   : > { %17782 = vmatpush3.bf16.xpose.msra.mxu1 %v8028_v25 }
 0xa0f   : > { %17807 = vmatprep.subr.bf16.mxu1 %v26584_v47 }
 0xa15   : > { %17784 = vmatmul.mubr.msk.bf16.vlgmr.msra.gmra.mrb[56].mxu1 %vm3958_vm0, %v26585_v6 }
 0xa16   : > { %17787 = vmatprep.mubr.msk.bf16.mxu1 %vm3958_vm0, %v26586_v37  ;;  %17808 = vmatpush3.bf16.msra.mxu1 %v26584_v47 }
 0xa17   : > { %17809 = vmatprep.subr.bf16.mxu1 %v26587_v13 }
 0xa1a   : > { %17810 = vmatpush3.bf16.msra.mxu1 %v26587_v13 }
 0xa1b   : > { %17811 = vmatprep.subr.bf16.mxu1 %v26588_v16 }
 0xa1d   : > { %17788 = vmatmul.mubr.msk.bf16.gmra.mrb[60].mxu1 %vm3958_vm0, %v26589_v33 }
 0xa1e   : > { %17812 = vmatpush3.bf16.msra.mxu1 %v26588_v16 }
 0xa1f   : > { %17813 = vmatprep.subr.bf16.mxu1 %v26590_v34 }
 0xa22   : > { %17814 = vmatpush3.bf16.msra.mxu1 %v26590_v34 }
 0xa23   : > { %17839 = vmatprep.subr.bf16.mxu1 %v26591_v3 }
 0xaa8   : > { %v17737_v54 = vpop.f32.mrb[40].mxu1 }
 0xaa9   : > { %v7797_v9 = vpop.f32.mrb[41].mxu1  ;;  %v23365_v45 = vsel %vm22061_vm1, %v17737_v54, -1e+30 }
 0xaaa   : > { %v23359_v10 = vsel %vm22066_vm2, %v7797_v9, -1e+30  ;;  %v17738_v57 = vpop.f32.mrb[42].mxu1  ;;  %v8133_v8 = vsel %vm3958_vm0, %v23365_v45, -inf }
 0xaab   : > { %v8127_v7 = vsel %vm3958_vm0, %v23359_v10, -inf  ;;  %v7800_v24 = vpop.f32.mrb[43].mxu1  ;;  %v23377_v49 = vsel %vm22074_vm3, %v17738_v57, -1e+30 }
 0xaac   : > { %v23369_v15 = vsel %vm22084_vm4, %v7800_v24, -1e+30  ;;  %8128 = vmax.xlane.f32.xlu0 %v8127_v7  ;;  %v8136_v9 = vsel %vm3958_vm0, %v23377_v49, -inf }
 0xaad   : > { %v8130_v63 = vsel %vm3958_vm0, %v23369_v15, -inf }
 0xaae   : > { %8131 = vmax.xlane.f32.xlu1 %v8130_v63 }
 0xab0   : > { %8134 = vmax.xlane.f32.xlu0 %v8133_v8  ;;  %v17741_v11 = vpop.f32.mrb[44].mxu1 }
 0xab1   : > { %v7813_v25 = vpop.f32.mrb[45].mxu1 }
 0xab2   : > { %v17742_v54 = vpop.f32.mrb[46].mxu1  ;;  %v23383_v7 = vsel %vm22105_vm5, %v7813_v25, -1e+30  ;;  %v23399_v25 = vsel %vm22114_vm6, %v17741_v11, -1e+30 }
 0xab3   : > { %v7816_v24 = vpop.f32.mrb[47].mxu1  ;;  %v23393_v8 = vsel %vm22132_vm8, %v17742_v54, -1e+30  ;;  %v8139_v56 = vsel %vm3958_vm0, %v23383_v7, -inf  ;;  %v8145_v54 = vsel %vm3958_vm0, %v23399_v25, -inf }
 0xab4   : > { %v23387_v63 = vsel %vm22118_vm7, %v7816_v24, -1e+30  ;;  %8137 = vmax.xlane.f32.xlu0 %v8136_v9  ;;  %v8148_v9 = vsel %vm3958_vm0, %v23393_v8, -inf }
 0xab5   : > { %v8142_v57 = vsel %vm3958_vm0, %v23387_v63, -inf }
 0xab6   : > { %8143 = vmax.xlane.f32.xlu1 %v8142_v57 }
 0xab7   : > { %v17769_v3 = vpop.f32.mrb[56].mxu0 }
 0xab8   : > { %8140 = vmax.xlane.f32.xlu0 %v8139_v56  ;;  %v7975_v24 = vpop.f32.mrb[57].mxu0 }
 0xab9   : > { %v17770_v34 = vpop.f32.mrb[58].mxu0 }
 0xaba   : > { %8149 = vmax.xlane.f32.xlu1 %v8148_v9  ;;  %v7978_v16 = vpop.f32.mrb[59].mxu0 }
 0xabc   : > { %8146 = vmax.xlane.f32.xlu0 %v8145_v54 }
 0xabf   : > { %v17773_v57 = vpop.f32.mrb[60].mxu0 }
 0xac0   : > { %v7991_v47 = vpop.f32.mrb[61].mxu0 }
 0xac1   : > { %v17774_v13 = vpop.f32.mrb[62].mxu0 }
 0xac2   : > { %v7994_v42 = vpop.f32.mrb[63].mxu0 }
 0xac8   : > { %v17753_v21 = vpop.f32.mrb[48].mxu1 }
 0xac9   : > { %v7886_v60 = vpop.f32.mrb[49].mxu1  ;;  %v23413_v33 = vsel %vm22061_vm1, %v17753_v21, -1e+30 }
 0xaca   : > { %v23407_v56 = vsel %vm22066_vm2, %v7886_v60, -1e+30  ;;  %v17754_v11 = vpop.f32.mrb[50].mxu1  ;;  %v8157_v6 = vsel %vm3958_vm0, %v23413_v33, -inf }
 0xacb   : > { %v8151_v61 = vsel %vm3958_vm0, %v23407_v56, -inf  ;;  %v7889_v9 = vpop.f32.mrb[51].mxu1  ;;  %v23423_v60 = vsel %vm22074_vm3, %v17754_v11, -1e+30 }
 0xacc   : > { %v23417_v54 = vsel %vm22084_vm4, %v7889_v9, -1e+30  ;;  %8152 = vmax.xlane.f32.xlu0 %v8151_v61  ;;  %v8160_v21 = vsel %vm3958_vm0, %v23423_v60, -inf }
 0xacd   : > { %v8154_v12 = vsel %vm3958_vm0, %v23417_v54, -inf }
 0xace   : > { %8155 = vmax.xlane.f32.xlu1 %v8154_v12 }
 0xad0   : > { %8158 = vmax.xlane.f32.xlu0 %v8157_v6  ;;  %v17757_v37 = vpop.f32.mrb[52].mxu1 }
 0xad1   : > { %v7902_v55 = vpop.f32.mrb[53].mxu1  ;;  %v23437_v12 = vsel %vm22114_vm6, %v17757_v37, -1e+30  ;;  %v23453_v37 = vsel %vm22066_vm2, %v7975_v24, -1e+30 }
 0xad2   : > { %v23431_v61 = vsel %vm22105_vm5, %v7902_v55, -1e+30  ;;  %8161 = vmax.xlane.f32.xlu1 %v8160_v21  ;;  %v17758_v9 = vpop.f32.mrb[54].mxu1  ;;  %v8169_v21 = vsel %vm3958_vm0, %v23437_v12, -inf }
 0xad3   : > { %v8163_v11 = vsel %vm3958_vm0, %v23431_v61, -inf  ;;  %v7905_v38 = vpop.f32.mrb[55].mxu1  ;;  %v23447_v55 = vsel %vm22132_vm8, %v17758_v9, -1e+30  ;;  %v8175_v9 = vsel %vm3958_vm0, %v23453_v37, -inf }
 0xad4   : > { %v23441_v6 = vsel %vm22118_vm7, %v7905_v38, -1e+30  ;;  %8164 = vmax.xlane.f32.xlu0 %v8163_v11  ;;  %v8172_v38 = vsel %vm3958_vm0, %v23447_v55, -inf  ;;  %v23459_v11 = vsel %vm22084_vm4, %v7978_v16, -1e+30 }
 0xad5   : > { %v8166_v22 = vsel %vm3958_vm0, %v23441_v6, -inf  ;;  %v8178_v24 = vsel %vm3958_vm0, %v23459_v11, -inf }
 0xad6   : > { %8167 = vmax.xlane.f32.xlu1 %v8166_v22  ;;  %v23465_v22 = vsel %vm22061_vm1, %v17769_v3, -1e+30 }
 0xad7   : > { %v8181_v16 = vsel %vm3958_vm0, %v23465_v22, -inf }
 0xad8   : > { %8170 = vmax.xlane.f32.xlu0 %v8169_v21  ;;  %v23471_v21 = vsel %vm22074_vm3, %v17770_v34, -1e+30 }
 0xad9   : > { %v8184_v3 = vsel %vm3958_vm0, %v23471_v21, -inf }
 0xada   : > { %8173 = vmax.xlane.f32.xlu1 %v8172_v38  ;;  %v23477_v38 = vsel %vm22105_vm5, %v7991_v47, -1e+30 }
 0xadb   : > { %v8187_v34 = vsel %vm3958_vm0, %v23477_v38, -inf }
 0xadc   : > { %8176 = vmax.xlane.f32.xlu0 %v8175_v9  ;;  %v23483_v9 = vsel %vm22118_vm7, %v7994_v42, -1e+30 }
 0xadd   : > { %v8190_v47 = vsel %vm3958_vm0, %v23483_v9, -inf }
 0xade   : > { %8179 = vmax.xlane.f32.xlu1 %v8178_v24  ;;  %v23489_v24 = vsel %vm22114_vm6, %v17773_v57, -1e+30 }
 0xadf   : > { %v8193_v42 = vsel %vm3958_vm0, %v23489_v24, -inf }
 0xae0   : > { %8182 = vmax.xlane.f32.xlu0 %v8181_v16  ;;  %v23495_v16 = vsel %vm22132_vm8, %v17774_v13, -1e+30 }
 0xae1   : > { %v8196_v53 = vsel %vm3958_vm0, %v23495_v16, -inf }
 0xae2   : > { %8185 = vmax.xlane.f32.xlu1 %v8184_v3 }
 0xae4   : > { %8188 = vmax.xlane.f32.xlu0 %v8187_v34 }
 0xae6   : > { %8191 = vmax.xlane.f32.xlu1 %v8190_v47 }
 0xae8   : > { %v17785_v3 = vpop.f32.mrb[56].mxu1  ;;  %8194 = vmax.xlane.f32.xlu0 %v8193_v42 }
 0xae9   : > { %v8064_v14 = vpop.f32.mrb[57].mxu1  ;;  %v23509_v47 = vsel %vm22061_vm1, %v17785_v3, -1e+30 }
 0xaea   : > { %v23503_v57 = vsel %vm22066_vm2, %v8064_v14, -1e+30  ;;  %v17786_v34 = vpop.f32.mrb[58].mxu1  ;;  %8197 = vmax.xlane.f32.xlu1 %v8196_v53  ;;  %v8205_v53 = vsel %vm3958_vm0, %v23509_v47, -inf }
 0xaeb   : > { %v8199_v13 = vsel %vm3958_vm0, %v23503_v57, -inf  ;;  %v8067_v36 = vpop.f32.mrb[59].mxu1  ;;  %v23519_v14 = vsel %vm22074_vm3, %v17786_v34, -1e+30 }
 0xaec   : > { %v23513_v42 = vsel %vm22084_vm4, %v8067_v36, -1e+30  ;;  %8200 = vmax.xlane.f32.xlu0 %v8199_v13  ;;  %v8208_v3 = vsel %vm3958_vm0, %v23519_v14, -inf }
 0xaed   : > { %v8202_v23 = vsel %vm3958_vm0, %v23513_v42, -inf }
 0xaee   : > { %8203 = vmax.xlane.f32.xlu1 %v8202_v23 }
 0xaf0   : > { %v17789_v31 = vpop.f32.mrb[60].mxu1  ;;  %8206 = vmax.xlane.f32.xlu0 %v8205_v53 }
 0xaf1   : > { %v8080_v50 = vpop.f32.mrb[61].mxu1  ;;  %v23533_v23 = vsel %vm22114_vm6, %v17789_v31, -1e+30 }
 0xaf2   : > { %v23527_v36 = vsel %vm22105_vm5, %v8080_v50, -1e+30  ;;  %v17790_v13 = vpop.f32.mrb[62].mxu1  ;;  %8209 = vmax.xlane.f32.xlu1 %v8208_v3  ;;  %v8217_v3 = vsel %vm3958_vm0, %v23533_v23, -inf }
 0xaf3   : > { %v8211_v34 = vsel %vm3958_vm0, %v23527_v36, -inf  ;;  %v8083_v48 = vpop.f32.mrb[63].mxu1  ;;  %v23543_v50 = vsel %vm22132_vm8, %v17790_v13, -1e+30 }
 0xaf4   : > { %v23537_v53 = vsel %vm22118_vm7, %v8083_v48, -1e+30  ;;  %8212 = vmax.xlane.f32.xlu0 %v8211_v34  ;;  %v8220_v31 = vsel %vm3958_vm0, %v23543_v50, -inf }
 0xaf5   : > { %v8214_v5 = vsel %vm3958_vm0, %v23537_v53, -inf }
 0xaf6   : > { %8215 = vmax.xlane.f32.xlu1 %v8214_v5 }
 0xaf8   : > { %8218 = vmax.xlane.f32.xlu0 %v8217_v3 }
 0xafa   : > { %8221 = vmax.xlane.f32.xlu1 %v8220_v31 }
 0xb39   : > { %v8129_v52 = vpop.xlane.xlu0 %8128 }
 0xb3a   : > { %v8223_v48 = vsub.f32 %v23359_v10, %v8129_v52 }
 0xb3b   : > { %v8132_v34 = vpop.xlane.xlu1 %8131 }
 0xb3c   : > { %v8255_v62 = vmul.f32 1.442695, %v8223_v48  ;;  %v8224_v28 = vsub.f32 %v23369_v15, %v8132_v34 }
 0xb3d   : > { %v8135_v44 = vpop.xlane.xlu0 %8134 }
 0xb3e   : > { %19992 = vpow2.f32 %v8255_v62  ;;  %v8257_v13 = vmul.f32 1.442695, %v8224_v28  ;;  %v8225_v5 = vsub.f32 %v23365_v45, %v8135_v44 }
 0xb40   : > { %19994 = vpow2.f32 %v8257_v13  ;;  %v8259_v29 = vmul.f32 1.442695, %v8225_v5 }
 0xb41   : > { %v8138_v51 = vpop.xlane.xlu0 %8137 }
 0xb42   : > { %19996 = vpow2.f32 %v8259_v29  ;;  %v8226_v3 = vsub.f32 %v23377_v49, %v8138_v51 }
 0xb43   : > { %v8144_v20 = vpop.xlane.xlu1 %8143 }
 0xb44   : > { %v8261_v31 = vmul.f32 1.442695, %v8226_v3  ;;  %v8228_v2 = vsub.f32 %v23387_v63, %v8144_v20 }
 0xb45   : > { %v8141_v52 = vpop.xlane.xlu0 %8140 }
 0xb46   : > { %19998 = vpow2.f32 %v8261_v31  ;;  %v8265_v10 = vmul.f32 1.442695, %v8228_v2  ;;  %v8227_v15 = vsub.f32 %v23383_v7, %v8141_v52 }
 0xb47   : > { %v8150_v48 = vpop.xlane.xlu1 %8149 }
 0xb48   : > { %v23555_v62 = vpop.eup %19992  ;;  %20000 = vpow2.f32 %v8265_v10  ;;  %v8263_v28 = vmul.f32 1.442695, %v8227_v15  ;;  %v8230_v44 = vsub.f32 %v23393_v8, %v8150_v48 }
 0xb49   : > { %v8147_v45 = vpop.xlane.xlu0 %8146  ;;  %v8319_v29 = vsel %vm3958_vm0, %v23555_v62, 0.0 }
 0xb4a   : > { %v23560_v51 = vpop.eup %19994  ;;  %20002 = vpow2.f32 %v8263_v28  ;;  %v8269_v20 = vmul.f32 1.442695, %v8230_v44  ;;  %v8229_v49 = vsub.f32 %v23399_v25, %v8147_v45  ;;  %8320 = vadd.xlane.f32.xlu0 %v8319_v29 }
 0xb4b   : > { %v8322_v2 = vsel %vm3958_vm0, %v23560_v51, 0.0 }
 0xb4c   : > { %v23565_v7 = vpop.eup %19996  ;;  %20004 = vpow2.f32 %v8269_v20  ;;  %v8267_v63 = vmul.f32 1.442695, %v8229_v49  ;;  %8323 = vadd.xlane.f32.xlu1 %v8322_v2 }
 0xb4d   : > { %v8325_v8 = vsel %vm3958_vm0, %v23565_v7, 0.0 }
 0xb4e   : > { %20006 = vpow2.f32 %v8267_v63  ;;  %8326 = vadd.xlane.f32.xlu0 %v8325_v8 }
 0xb50   : > { %v23569_v34 = vpop.eup %19998 }
 0xb51   : > { %v8328_v13 = vsel %vm3958_vm0, %v23569_v34, 0.0 }
 0xb52   : > { %v23573_v25 = vpop.eup %20000  ;;  %8329 = vadd.xlane.f32.xlu1 %v8328_v13 }
 0xb53   : > { %v8334_v31 = vsel %vm3958_vm0, %v23573_v25, 0.0 }
 0xb54   : > { %v23575_v5 = vpop.eup %20002 }
 0xb55   : > { %v8331_v3 = vsel %vm3958_vm0, %v23575_v5, 0.0 }
 0xb56   : > { %v23581_v52 = vpop.eup %20004  ;;  %8332 = vadd.xlane.f32.xlu0 %v8331_v3  ;;  %8335 = vadd.xlane.f32.xlu1 %v8334_v31 }
 0xb57   : > { %26592 = vst [vmem:[#allocation64_spill] sm:$0xff] %v23581_v52  ;;  %v8340_v28 = vsel %vm3958_vm0, %v23581_v52, 0.0 }
 0xb58   : > { %v23583_v10 = vpop.eup %20006 }
 0xb59   : > { %v8153_v15 = vpop.xlane.xlu0 %8152  ;;  %v8337_v48 = vsel %vm3958_vm0, %v23583_v10, 0.0 }
 0xb5a   : > { %v8231_v44 = vsub.f32 %v23407_v56, %v8153_v15  ;;  %8338 = vadd.xlane.f32.xlu0 %v8337_v48  ;;  %8341 = vadd.xlane.f32.xlu1 %v8340_v28 }
 0xb5b   : > { %v8156_v45 = vpop.xlane.xlu1 %8155 }
 0xb5c   : > { %v8271_v29 = vmul.f32 1.442695, %v8231_v44  ;;  %v8232_v20 = vsub.f32 %v23417_v54, %v8156_v45 }
 0xb5d   : > { %v8159_v49 = vpop.xlane.xlu0 %8158 }
 0xb5e   : > { %20008 = vpow2.f32 %v8271_v29  ;;  %v8273_v2 = vmul.f32 1.442695, %v8232_v20  ;;  %v8233_v63 = vsub.f32 %v23413_v33, %v8159_v49 }
 0xb5f   : > { %v8162_v8 = vpop.xlane.xlu1 %8161 }
 0xb60   : > { %20010 = vpow2.f32 %v8273_v2  ;;  %v8275_v13 = vmul.f32 1.442695, %v8233_v63  ;;  %v8234_v3 = vsub.f32 %v23423_v60, %v8162_v8 }
 0xb61   : > { %v8165_v31 = vpop.xlane.xlu0 %8164 }
 0xb62   : > { %20012 = vpow2.f32 %v8275_v13  ;;  %v8277_v52 = vmul.f32 1.442695, %v8234_v3  ;;  %v8235_v56 = vsub.f32 %v23431_v61, %v8165_v31 }
 0xb63   : > { %v8168_v15 = vpop.xlane.xlu1 %8167 }
 0xb64   : > { %20014 = vpow2.f32 %v8277_v52  ;;  %v8279_v48 = vmul.f32 1.442695, %v8235_v56  ;;  %v8236_v54 = vsub.f32 %v23441_v6, %v8168_v15 }
 0xb65   : > { %v8171_v28 = vpop.xlane.xlu0 %8170 }
 0xb66   : > { %20016 = vpow2.f32 %v8279_v48  ;;  %v8281_v44 = vmul.f32 1.442695, %v8236_v54  ;;  %v8237_v33 = vsub.f32 %v23437_v12, %v8171_v28 }
 0xb67   : > { %v8174_v45 = vpop.xlane.xlu1 %8173 }
 0xb68   : > { %v23596_v29 = vpop.eup %20008  ;;  %20018 = vpow2.f32 %v8281_v44  ;;  %v8283_v60 = vmul.f32 1.442695, %v8237_v33  ;;  %v8238_v20 = vsub.f32 %v23447_v55, %v8174_v45 }
 0xb69   : > { %v8177_v49 = vpop.xlane.xlu0 %8176  ;;  %v8343_v61 = vsel %vm3958_vm0, %v23596_v29, 0.0 }
 0xb6a   : > { %v23601_v52 = vpop.eup %20010  ;;  %20020 = vpow2.f32 %v8283_v60  ;;  %v8285_v6 = vmul.f32 1.442695, %v8238_v20  ;;  %v8239_v2 = vsub.f32 %v23453_v37, %v8177_v49  ;;  %8344 = vadd.xlane.f32.xlu0 %v8343_v61 }
 0xb6b   : > { %v8180_v63 = vpop.xlane.xlu1 %8179  ;;  %v8346_v12 = vsel %vm3958_vm0, %v23601_v52, 0.0 }
 0xb6c   : > { %v23606_v8 = vpop.eup %20012  ;;  %20022 = vpow2.f32 %v8285_v6  ;;  %v8287_v13 = vmul.f32 1.442695, %v8239_v2  ;;  %v8240_v55 = vsub.f32 %v23459_v11, %v8180_v63  ;;  %8347 = vadd.xlane.f32.xlu1 %v8346_v12 }
 0xb6d   : > { %v8183_v3 = vpop.xlane.xlu0 %8182  ;;  %v8349_v31 = vsel %vm3958_vm0, %v23606_v8, 0.0 }
 0xb6e   : > { %v23611_v56 = vpop.eup %20014  ;;  %20024 = vpow2.f32 %v8287_v13  ;;  %v8289_v37 = vmul.f32 1.442695, %v8240_v55  ;;  %v8241_v15 = vsub.f32 %v23465_v22, %v8183_v3  ;;  %8350 = vadd.xlane.f32.xlu0 %v8349_v31 }
 0xb6f   : > { %v8186_v48 = vpop.xlane.xlu1 %8185  ;;  %v8352_v54 = vsel %vm3958_vm0, %v23611_v56, 0.0 }
 0xb70   : > { %v23616_v28 = vpop.eup %20016  ;;  %20026 = vpow2.f32 %v8289_v37  ;;  %v8291_v11 = vmul.f32 1.442695, %v8241_v15  ;;  %v8242_v44 = vsub.f32 %v23471_v21, %v8186_v48  ;;  %8353 = vadd.xlane.f32.xlu1 %v8352_v54 }
 0xb71   : > { %v8189_v33 = vpop.xlane.xlu0 %8188  ;;  %v8355_v45 = vsel %vm3958_vm0, %v23616_v28, 0.0 }
 0xb72   : > { %v23621_v60 = vpop.eup %20018  ;;  %20028 = vpow2.f32 %v8291_v11  ;;  %v8293_v22 = vmul.f32 1.442695, %v8242_v44  ;;  %v8243_v20 = vsub.f32 %v23477_v38, %v8189_v33  ;;  %8356 = vadd.xlane.f32.xlu0 %v8355_v45 }
 0xb73   : > { %v8192_v49 = vpop.xlane.xlu1 %8191  ;;  %v8358_v61 = vsel %vm3958_vm0, %v23621_v60, 0.0 }
 0xb74   : > { %v23626_v6 = vpop.eup %20020  ;;  %20030 = vpow2.f32 %v8293_v22  ;;  %v8295_v21 = vmul.f32 1.442695, %v8243_v20  ;;  %v8244_v2 = vsub.f32 %v23483_v9, %v8192_v49  ;;  %8359 = vadd.xlane.f32.xlu1 %v8358_v61 }
 0xb75   : > { %v8195_v63 = vpop.xlane.xlu0 %8194  ;;  %v8361_v12 = vsel %vm3958_vm0, %v23626_v6, 0.0 }
 0xb76   : > { %v23631_v13 = vpop.eup %20022  ;;  %20032 = vpow2.f32 %v8295_v21  ;;  %v8297_v38 = vmul.f32 1.442695, %v8244_v2  ;;  %v8245_v55 = vsub.f32 %v23489_v24, %v8195_v63  ;;  %8362 = vadd.xlane.f32.xlu0 %v8361_v12 }
 0xb77   : > { %v8198_v3 = vpop.xlane.xlu1 %8197  ;;  %v8364_v31 = vsel %vm3958_vm0, %v23631_v13, 0.0 }
 0xb78   : > { %v23636_v37 = vpop.eup %20024  ;;  %20034 = vpow2.f32 %v8297_v38  ;;  %v8299_v9 = vmul.f32 1.442695, %v8245_v55  ;;  %v8246_v15 = vsub.f32 %v23495_v16, %v8198_v3  ;;  %8365 = vadd.xlane.f32.xlu1 %v8364_v31 }
 0xb79   : > { %v8201_v48 = vpop.xlane.xlu0 %8200  ;;  %v8367_v54 = vsel %vm3958_vm0, %v23636_v37, 0.0 }
 0xb7a   : > { %v23641_v11 = vpop.eup %20026  ;;  %20036 = vpow2.f32 %v8299_v9  ;;  %v8301_v24 = vmul.f32 1.442695, %v8246_v15  ;;  %v8247_v44 = vsub.f32 %v23503_v57, %v8201_v48  ;;  %8368 = vadd.xlane.f32.xlu0 %v8367_v54 }
 0xb7b   : > { %v8204_v33 = vpop.xlane.xlu1 %8203  ;;  %v8370_v45 = vsel %vm3958_vm0, %v23641_v11, 0.0 }
 0xb7c   : > { %v23646_v22 = vpop.eup %20028  ;;  %20038 = vpow2.f32 %v8301_v24  ;;  %v8303_v16 = vmul.f32 1.442695, %v8247_v44  ;;  %v8248_v20 = vsub.f32 %v23513_v42, %v8204_v33  ;;  %8371 = vadd.xlane.f32.xlu1 %v8370_v45 }
 0xb7d   : > { %v8207_v49 = vpop.xlane.xlu0 %8206  ;;  %v8373_v61 = vsel %vm3958_vm0, %v23646_v22, 0.0 }
 0xb7e   : > { %v23651_v21 = vpop.eup %20030  ;;  %20040 = vpow2.f32 %v8303_v16  ;;  %v8305_v57 = vmul.f32 1.442695, %v8248_v20  ;;  %v8249_v2 = vsub.f32 %v23509_v47, %v8207_v49  ;;  %8374 = vadd.xlane.f32.xlu0 %v8373_v61 }
 0xb7f   : > { %v8210_v63 = vpop.xlane.xlu1 %8209  ;;  %v8376_v12 = vsel %vm3958_vm0, %v23651_v21, 0.0 }
 0xb80   : > { %v23656_v38 = vpop.eup %20032  ;;  %20042 = vpow2.f32 %v8305_v57  ;;  %v8307_v42 = vmul.f32 1.442695, %v8249_v2  ;;  %v8250_v55 = vsub.f32 %v23519_v14, %v8210_v63  ;;  %8377 = vadd.xlane.f32.xlu1 %v8376_v12 }
 0xb81   : > { %v8213_v3 = vpop.xlane.xlu0 %8212  ;;  %v8379_v31 = vsel %vm3958_vm0, %v23656_v38, 0.0 }
 0xb82   : > { %v23661_v9 = vpop.eup %20034  ;;  %20044 = vpow2.f32 %v8307_v42  ;;  %v8309_v47 = vmul.f32 1.442695, %v8250_v55  ;;  %v8251_v15 = vsub.f32 %v23527_v36, %v8213_v3  ;;  %8380 = vadd.xlane.f32.xlu0 %v8379_v31 }
 0xb83   : > { %v8216_v48 = vpop.xlane.xlu1 %8215  ;;  %v8382_v54 = vsel %vm3958_vm0, %v23661_v9, 0.0 }
 0xb84   : > { %v23666_v24 = vpop.eup %20036  ;;  %20046 = vpow2.f32 %v8309_v47  ;;  %v8311_v14 = vmul.f32 1.442695, %v8251_v15  ;;  %v8252_v44 = vsub.f32 %v23537_v53, %v8216_v48  ;;  %8383 = vadd.xlane.f32.xlu1 %v8382_v54 }
 0xb85   : > { %v8219_v33 = vpop.xlane.xlu0 %8218  ;;  %v8385_v45 = vsel %vm3958_vm0, %v23666_v24, 0.0 }
 0xb86   : > { %v23671_v16 = vpop.eup %20038  ;;  %20048 = vpow2.f32 %v8311_v14  ;;  %v8313_v36 = vmul.f32 1.442695, %v8252_v44  ;;  %v8253_v20 = vsub.f32 %v23533_v23, %v8219_v33  ;;  %8386 = vadd.xlane.f32.xlu0 %v8385_v45 }
 0xb87   : > { %v8222_v49 = vpop.xlane.xlu1 %8221  ;;  %v8388_v61 = vsel %vm3958_vm0, %v23671_v16, 0.0 }
 0xb88   : > { %v23676_v57 = vpop.eup %20040  ;;  %20050 = vpow2.f32 %v8313_v36  ;;  %v8315_v53 = vmul.f32 1.442695, %v8253_v20  ;;  %v8254_v2 = vsub.f32 %v23543_v50, %v8222_v49  ;;  %8389 = vadd.xlane.f32.xlu1 %v8388_v61  ;;  %v26604_v20 = vld [vmem:[#allocation30_spill] sm:$0xff]  ;;  %v26605_v49 = vld [vmem:[#allocation29_spill] sm:$0xff] }
 0xb89   : > { %v8391_v63 = vsel %vm3958_vm0, %v23676_v57, 0.0 }
 0xb8a   : > { %v23681_v12 = vpop.eup %20042  ;;  %20052 = vpow2.f32 %v8315_v53  ;;  %v8317_v42 = vmul.f32 1.442695, %v8254_v2  ;;  %8392 = vadd.xlane.f32.xlu0 %v8391_v63 }
 0xb8b   : > { %v8394_v23 = vsel %vm3958_vm0, %v23681_v12, 0.0 }
 0xb8c   : > { %v23685_v55 = vpop.eup %20044  ;;  %20054 = vpow2.f32 %v8317_v42  ;;  %8395 = vadd.xlane.f32.xlu1 %v8394_v23 }
 0xb8d   : > { %v8397_v3 = vsel %vm3958_vm0, %v23685_v55, 0.0 }
 0xb8e   : > { %v23689_v50 = vpop.eup %20046  ;;  %8398 = vadd.xlane.f32.xlu0 %v8397_v3  ;;  %v26606_v3 = vld [vmem:[#allocation89_spill] sm:$0xff] }
 0xb8f   : > { %v8400_v31 = vsel %vm3958_vm0, %v23689_v50, 0.0 }
 0xb90   : > { %v23693_v47 = vpop.eup %20048  ;;  %8401 = vadd.xlane.f32.xlu1 %v8400_v31  ;;  %v26607_v31 = vld [vmem:[#allocation31_spill] sm:$0xff] }
 0xb91   : > { %v8403_v15 = vsel %vm3958_vm0, %v23693_v47, 0.0 }
 0xb92   : > { %v23697_v48 = vpop.eup %20050  ;;  %8404 = vadd.xlane.f32.xlu0 %v8403_v15 }
 0xb93   : > { %v8406_v54 = vsel %vm3958_vm0, %v23697_v48, 0.0 }
 0xb94   : > { %v23701_v14 = vpop.eup %20052  ;;  %8407 = vadd.xlane.f32.xlu1 %v8406_v54 }
 0xb95   : > { %v8409_v44 = vsel %vm3958_vm0, %v23701_v14, 0.0 }
 0xb96   : > { %v23705_v33 = vpop.eup %20054  ;;  %8410 = vadd.xlane.f32.xlu0 %v8409_v44 }
 0xb97   : > { %v8412_v45 = vsel %vm3958_vm0, %v23705_v33, 0.0 }
 0xb98   : > { %8413 = vadd.xlane.f32.xlu1 %v8412_v45  ;;  %v26609_v45 = vld [vmem:[#allocation93_spill] sm:$0xff] }
 0xba9   : > { %9655 = vrot.lane.b32.xlu1 %v26553_v32, %s20672_s21  ;;  %v26595_v32 = vld [vmem:[#allocation55_spill] sm:$0xff] }
 0xbac   : > { %9653 = vrot.lane.b32.xlu0 %v26551_v41, %s20672_s21  ;;  %v26593_v41 = vld [vmem:[#allocation26_spill] sm:$0xff] }
 0xbad   : > { %9657 = vrot.lane.b32.xlu1 %v26555_v26, %s20672_s21 }
 0xbb0   : > { %9641 = vrot.lane.b32.xlu0 %v26560_v58, %s20672_s21 }
 0xbb1   : > { %9659 = vrot.lane.b32.xlu1 %v26557_v1, %s20672_s21  ;;  %v26598_v1 = vld [vmem:[#allocation50_spill] sm:$0xff] }
 0xbb4   : > { %9766 = vrot.lane.b32.xlu0 %v26559_v43, %s20672_s21  ;;  %v26599_v43 = vld [vmem:[#allocation45_spill] sm:$0xff] }
 0xbb5   : > { %9643 = vrot.lane.b32.xlu1 %v26561_v18, %s20672_s21 }
 0xbb8   : > { %9645 = vrot.lane.b32.xlu0 %v26562_v19, %s20672_s21  ;;  %v26600_v19 = vld [vmem:[#allocation39_spill] sm:$0xff] }
 0xbb9   : > { %9768 = vrot.lane.b32.xlu1 %v26563_v40, %s20672_s21  ;;  %v26601_v40 = vld [vmem:[#allocation19_spill] sm:$0xff] }
 0xbbc   : > { %9770 = vrot.lane.b32.xlu0 %v26567_v35, %s20672_s21  ;;  %v26603_v35 = vld [vmem:[#allocation96_spill] sm:$0xff] }
 0xbbd   : > { %9647 = vrot.lane.b32.xlu1 %v26564_v30, %s20672_s21 }
 0xbc0   : > { %9772 = vrot.lane.b32.xlu0 %v26571_v46, %s20672_s21 }
 0xbc1   : > { %9879 = vrot.lane.b32.xlu1 %v26550_v17, %s20672_s21  ;;  %v26594_v17 = vld [vmem:[#allocation57_spill] sm:$0xff] }
 0xbc4   : > { %9754 = vrot.lane.b32.xlu0 %v26566_v59, %s20672_s21  ;;  %v26602_v59 = vld [vmem:[#allocation28_spill] sm:$0xff] }
 0xbc5   : > { %9881 = vrot.lane.b32.xlu1 %v26552_v27, %s20672_s21  ;;  %v26596_v27 = vld [vmem:[#allocation43_spill] sm:$0xff] }
 0xbc8   : > { %9883 = vrot.lane.b32.xlu0 %v26554_v39, %s20672_s21  ;;  %v26597_v39 = vld [vmem:[#allocation90_spill] sm:$0xff] }
 0xbc9   : > { %9756 = vrot.lane.b32.xlu1 %v26577_v0, %s20672_s21 }
 0xbcc   : > { %9758 = vrot.lane.b32.xlu0 %v26578_v4, %s20672_s21 }
 0xbcd   : > { %9992 = vrot.lane.b32.xlu1 %v26593_v41, %s20672_s21 }
 0xbd0   : > { %9885 = vrot.lane.b32.xlu0 %v26594_v17, %s20672_s21 }
 0xbd1   : > { %9760 = vrot.lane.b32.xlu1 %v26595_v32, %s20672_s21 }
 0xbd4   : > { %9867 = vrot.lane.b32.xlu0 %v26596_v27, %s20672_s21  ;;  %v26610_v27 = vld [vmem:[#allocation99_spill] sm:$0xff] }
 0xbd5   : > { %9994 = vrot.lane.b32.xlu1 %v26597_v39, %s20672_s21  ;;  %v26611_v39 = vld [vmem:[#allocation109_spill] sm:$0xff] }
 0xbd7   : > { %v8321_v26 = vpop.xlane.xlu0 %8320 }
 0xbd8   : > { %9996 = vrot.lane.b32.xlu0 %v26598_v1, %s20672_s21  ;;  %20056 = vrcp.f32 %v8321_v26  ;;  %v26613_v26 = vld [vmem:[#allocation111_spill] sm:$0xff] }
 0xbd9   : > { %9869 = vrot.lane.b32.xlu1 %v26599_v43, %s20672_s21  ;;  %v8324_v58 = vpop.xlane.xlu1 %8323 }
 0xbda   : > { %20058 = vrcp.f32 %v8324_v58 }
 0xbdb   : > { %v8327_v18 = vpop.xlane.xlu0 %8326 }
 0xbdc   : > { %9873 = vrot.lane.b32.xlu0 %v26600_v19, %s20672_s21  ;;  %20060 = vrcp.f32 %v8327_v18  ;;  %v26614_v19 = vld [vmem:[#allocation64_spill] sm:$0xff] }
 0xbdd   : > { %9871 = vrot.lane.b32.xlu1 %v26601_v40, %s20672_s21 }
 0xbdf   : > { %v8330_v30 = vpop.xlane.xlu1 %8329 }
 0xbe0   : > { %9980 = vrot.lane.b32.xlu0 %v26602_v59, %s20672_s21  ;;  %20062 = vrcp.f32 %v8330_v30  ;;  %v26616_v30 = vld [vmem:[#allocation113_spill] sm:$0xff] }
 0xbe1   : > { %9998 = vrot.lane.b32.xlu1 %v26603_v35, %s20672_s21  ;;  %v26617_v35 = vld [vmem:[#allocation105_spill] sm:$0xff] }
 0xbe2   : > { %v20057_v46 = vpop.eup %20056 }
 0xbe3   : > { %v8333_v0 = vpop.xlane.xlu0 %8332  ;;  %v8336_v4 = vpop.xlane.xlu1 %8335  ;;  %v8447_v61 = vmul.f32 %v20057_v46, %v23555_v62  ;;  %v26618_v46 = vld [vmem:[#allocation115_spill] sm:$0xff] }
 0xbe4   : > { %v20059_v36 = vpop.eup %20058  ;;  %9984 = vrot.lane.b32.xlu0 %v26604_v20, %s20672_s21  ;;  %20064 = vrcp.f32 %v8333_v0  ;;  %v19676_v0 = vld [vmem:[#allocation9 + $0xc4] ss:$12 sps:$4 sm:$0xff]  }
 0xbe5   : > { %20066 = vrcp.f32 %v8336_v4  ;;  %9982 = vrot.lane.b32.xlu1 %v26605_v49, %s20672_s21  ;;  %v8448_v53 = vmul.f32 %v20059_v36, %v23560_v51  ;;  %v26608_v51 = vld [vmem:[#allocation95_spill] sm:$0xff] }
 0xbe6   : > { %v20061_v23 = vpop.eup %20060  ;;  %v26619_v36 = vld [vmem:[#allocation107_spill] sm:$0xff] }
 0xbe7   : > { %v8339_v2 = vpop.xlane.xlu0 %8338  ;;  %v8342_v63 = vpop.xlane.xlu1 %8341  ;;  %v8479_v42 = vpack.c.bf16 %v8448_v53, %v8447_v61  ;;  %v8449_v54 = vmul.f32 %v20061_v23, %v23565_v7 }
 0xbe8   : > { %10493 = vrot.lane.b32.xlu0 %v26606_v3, %s20672_s21  ;;  %20068 = vrcp.f32 %v8339_v2 }
 0xbe9   : > { %20070 = vrcp.f32 %v8342_v63  ;;  %9986 = vrot.lane.b32.xlu1 %v26607_v31, %s20672_s21  ;;  %17799 = vmatprep.mubr.msk.bf16.mxu0 %vm3958_vm0, %v8479_v42 }
 0xbea   : > { %v20063_v15 = vpop.eup %20062 }
 0xbeb   : > { %v8450_v62 = vmul.f32 %v20063_v15, %v23569_v34  ;;  %v26612_v34 = vld [vmem:[#allocation103_spill] sm:$0xff] }
 0xbec   : > { %10497 = vrot.lane.b32.xlu0 %v26608_v51, %s20672_s21 }
 0xbed   : > { %v8480_v44 = vpack.c.bf16 %v8450_v62, %v8449_v54  ;;  %10495 = vrot.lane.b32.xlu1 %v26609_v45, %s20672_s21 }
 0xbee   : > { %v20065_v41 = vpop.eup %20064 }
 0xbef   : > { %v20067_v17 = vpop.eup %20066  ;;  %17800 = vmatmul.mubr.msk.bf16.vlgmr.msra.gmra.mrb[64].mxu0 %vm3958_vm0, %v8480_v44  ;;  %v8451_v32 = vmul.f32 %v20065_v41, %v23575_v5  ;;  %v26615_v5 = vld [vmem:[#allocation101_spill] sm:$0xff] }
 0xbf0   : > { %10499 = vrot.lane.b32.xlu0 %v26610_v27, %s20672_s21  ;;  %17824 = vmatpush3.bf16.msra.mxu0 %v26611_v39  ;;  %v8452_v7 = vmul.f32 %v20067_v17, %v23573_v25 }
 0xbf1   : > { %10588 = vrot.lane.b32.xlu1 %v26612_v34, %s20672_s21  ;;  %17825 = vmatprep.subr.bf16.mxu0 %v26613_v26 }
 0xbf2   : > { %v20069_v1 = vpop.eup %20068  ;;  %v8481_v43 = vpack.c.bf16 %v8452_v7, %v8451_v32 }
 0xbf3   : > { %v20071_v58 = vpop.eup %20070  ;;  %v8453_v18 = vmul.f32 %v20069_v1, %v23583_v10 }
 0xbf4   : > { %v8454_v40 = vmul.f32 %v20071_v58, %v26614_v19  ;;  %10586 = vrot.lane.b32.xlu0 %v26615_v5, %s20672_s21  ;;  %17803 = vmatprep.mubr.msk.bf16.mxu0 %vm3958_vm0, %v8481_v43  ;;  %v26622_v19 = vld [vmem:[#allocation121_spill] sm:$0xff] }
 0xbf5   : > { %17826 = vmatpush3.bf16.msra.mxu0 %v26613_v26  ;;  %10679 = vrot.lane.b32.xlu1 %v26611_v39, %s20672_s21 }
 0xbf6   : > { %v8482_v25 = vpack.c.bf16 %v8454_v40, %v8453_v18  ;;  %17827 = vmatprep.subr.bf16.mxu0 %v26616_v30 }
 0xbf7   : > { %v8345_v59 = vpop.xlane.xlu0 %8344 }
 0xbf8   : > { %20072 = vrcp.f32 %v8345_v59  ;;  %10590 = vrot.lane.b32.xlu0 %v26617_v35, %s20672_s21  ;;  %17804 = vmatmul.mubr.msk.bf16.gmra.mrb[68].mxu0 %vm3958_vm0, %v8482_v25  ;;  %v26623_v35 = vld [vmem:[#allocation123_spill] sm:$0xff] }
 0xbf9   : > { %17828 = vmatpush3.bf16.msra.mxu0 %v26616_v30  ;;  %10681 = vrot.lane.b32.xlu1 %v26613_v26, %s20672_s21  ;;  %v8348_v10 = vpop.xlane.xlu1 %8347 }
 0xbfa   : > { %17829 = vmatprep.subr.bf16.mxu0 %v26618_v46  ;;  %20074 = vrcp.f32 %v8348_v10 }
 0xbfb   : > { %v8351_v4 = vpop.xlane.xlu0 %8350 }
 0xbfc   : > { %20076 = vrcp.f32 %v8351_v4  ;;  %10592 = vrot.lane.b32.xlu0 %v26619_v36, %s20672_s21  ;;  %v23832_v4 = vld [vmem:[#allocation9 + $0xc8] ss:$12 sps:$4 sm:$0xff]  }
 0xbfd   : > { %17830 = vmatpush3.bf16.msra.mxu0 %v26618_v46  ;;  %v8354_v20 = vpop.xlane.xlu1 %8353 }
 0xbfe   : > { %20078 = vrcp.f32 %v8354_v20  ;;  %8947 = vmatprep.subr.bf16.mxu0 %v19676_v0 }
 0xbff   : > { %v8357_v49 = vpop.xlane.xlu0 %8356 }
 0xc00   : > { %20080 = vrcp.f32 %v8357_v49 }
 0xc01   : > { %v8360_v61 = vpop.xlane.xlu1 %8359 }
 0xc02   : > { %v20073_v53 = vpop.eup %20072  ;;  %20082 = vrcp.f32 %v8360_v61  ;;  %v19674_v61 = vld [vmem:[#allocation9 + $0xc0] ss:$12 sps:$4 sm:$0xff]  }
 0xc03   : > { %v8363_v2 = vpop.xlane.xlu0 %8362  ;;  %v8455_v23 = vmul.f32 %v20073_v53, %v23596_v29 }
 0xc04   : > { %v20075_v63 = vpop.eup %20074  ;;  %20084 = vrcp.f32 %v8363_v2 }
 0xc05   : > { %v8366_v42 = vpop.xlane.xlu1 %8365  ;;  %v8456_v3 = vmul.f32 %v20075_v63, %v23601_v52  ;;  %v19680_v63 = vld [vmem:[#allocation9 + $0xdc] ss:$12 sps:$4 sm:$0xff]  }
 0xc06   : > { %v20077_v31 = vpop.eup %20076  ;;  %20086 = vrcp.f32 %v8366_v42 }
 0xc07   : > { %v8369_v15 = vpop.xlane.xlu0 %8368  ;;  %v8483_v54 = vpack.c.bf16 %v8456_v3, %v8455_v23  ;;  %v8457_v51 = vmul.f32 %v20077_v31, %v23606_v8  ;;  %v26620_v8 = vld [vmem:[#allocation117_spill] sm:$0xff] }
 0xc08   : > { %v20079_v62 = vpop.eup %20078  ;;  %20088 = vrcp.f32 %v8369_v15  ;;  %v19678_v31 = vld [vmem:[#allocation9 + $0xd8] ss:$12 sps:$4 sm:$0xff]  }
 0xc09   : > { %v8458_v44 = vmul.f32 %v20079_v62, %v23611_v56  ;;  %17815 = vmatprep.mubr.msk.bf16.mxu1 %vm3958_vm0, %v8483_v54  ;;  %v8372_v45 = vpop.xlane.xlu1 %8371  ;;  %v26621_v56 = vld [vmem:[#allocation119_spill] sm:$0xff]  ;;  %v19684_v62 = vld [vmem:[#allocation9 + $0xf4] ss:$12 sps:$4 sm:$0xff]  }
 0xc0a   : > { %v20081_v41 = vpop.eup %20080  ;;  %20090 = vrcp.f32 %v8372_v45 }
 0xc0b   : > { %v8484_v17 = vpack.c.bf16 %v8458_v44, %v8457_v51  ;;  %v8375_v32 = vpop.xlane.xlu0 %8374  ;;  %v8459_v27 = vmul.f32 %v20081_v41, %v23616_v28 }
 0xc0c   : > { %v20083_v29 = vpop.eup %20082  ;;  %20092 = vrcp.f32 %v8375_v32 }
 0xc0d   : > { %17816 = vmatmul.mubr.msk.bf16.vlgmr.msra.gmra.mrb[64].mxu1 %vm3958_vm0, %v8484_v17  ;;  %v8378_v52 = vpop.xlane.xlu1 %8377  ;;  %v8460_v39 = vmul.f32 %v20083_v29, %v23621_v60  ;;  %v19687_v29 = vld [vmem:[#allocation9 + $0x10c] ss:$12 sps:$4 sm:$0xff]  }
 0xc0e   : > { %v20085_v7 = vpop.eup %20084  ;;  %17840 = vmatpush3.bf16.msra.mxu1 %v26620_v8  ;;  %20094 = vrcp.f32 %v8378_v52 }
 0xc0f   : > { %17841 = vmatprep.subr.bf16.mxu1 %v26621_v56  ;;  %v8381_v34 = vpop.xlane.xlu0 %8380  ;;  %v8485_v26 = vpack.c.bf16 %v8460_v39, %v8459_v27  ;;  %v8461_v43 = vmul.f32 %v20085_v7, %v23626_v6  ;;  %v19685_v7 = vld [vmem:[#allocation9 + $0x108] ss:$12 sps:$4 sm:$0xff]  }
 0xc10   : > { %v20087_v1 = vpop.eup %20086  ;;  %20096 = vrcp.f32 %v8381_v34  ;;  %v26624_v34 = vmov 0  }
 0xc11   : > { %v8462_v58 = vmul.f32 %v20087_v1, %v23631_v13  ;;  %17819 = vmatprep.mubr.msk.bf16.mxu1 %vm3958_vm0, %v8485_v26  ;;  %v8384_v18 = vpop.xlane.xlu1 %8383 }
 0xc12   : > { %v20089_v28 = vpop.eup %20088  ;;  %17842 = vmatpush3.bf16.msra.mxu1 %v26621_v56  ;;  %20098 = vrcp.f32 %v8384_v18 }
 0xc13   : > { %v8486_v60 = vpack.c.bf16 %v8462_v58, %v8461_v43  ;;  %17843 = vmatprep.subr.bf16.mxu1 %v26622_v19  ;;  %v8387_v40 = vpop.xlane.xlu0 %8386  ;;  %v8463_v6 = vmul.f32 %v20089_v28, %v23636_v37  ;;  %v19673_v28 = vld [vmem:[#allocation9 + $0xe0] ss:$12 sps:$4 sm:$0xff]  }
 0xc14   : > { %v20091_v5 = vpop.eup %20090  ;;  %20100 = vrcp.f32 %v8387_v40 }
 0xc15   : > { %17820 = vmatmul.mubr.msk.bf16.gmra.mrb[68].mxu1 %vm3958_vm0, %v8486_v60  ;;  %v8390_v25 = vpop.xlane.xlu1 %8389  ;;  %v8464_v13 = vmul.f32 %v20091_v5, %v23641_v11 }
 0xc16   : > { %v20093_v59 = vpop.eup %20092  ;;  %17844 = vmatpush3.bf16.msra.mxu1 %v26622_v19  ;;  %20102 = vrcp.f32 %v8390_v25 }
 0xc17   : > { %17845 = vmatprep.subr.bf16.mxu1 %v26623_v35  ;;  %v8393_v10 = vpop.xlane.xlu0 %8392  ;;  %v8487_v0 = vpack.c.bf16 %v8464_v13, %v8463_v6  ;;  %v8465_v20 = vmul.f32 %v20093_v59, %v23646_v22  ;;  %v19677_v6 = vld [vmem:[#allocation9 + $0xf8] ss:$12 sps:$4 sm:$0xff]  }
 0xc18   : > { %v20095_v36 = vpop.eup %20094  ;;  %20104 = vrcp.f32 %v8393_v10 }
 0xc19   : > { %v8466_v49 = vmul.f32 %v20095_v36, %v23651_v21  ;;  %17831 = vmatprep.mubr.msk.bf16.mxu0 %vm3958_vm0, %v8487_v0  ;;  %v8396_v37 = vpop.xlane.xlu1 %8395 }
 0xc1a   : > { %v20097_v11 = vpop.eup %20096  ;;  %17846 = vmatpush3.bf16.msra.mxu1 %v26623_v35  ;;  %20106 = vrcp.f32 %v8396_v37 }
 0xc1b   : > { %v8488_v53 = vpack.c.bf16 %v8466_v49, %v8465_v20  ;;  %v8399_v2 = vpop.xlane.xlu0 %8398  ;;  %17855 = vmatprep.subr.bf16.mxu1 %v23832_v4  ;;  %v8467_v21 = vmul.f32 %v20097_v11, %v23656_v38 }
 0xc1c   : > { %v20099_v42 = vpop.eup %20098  ;;  %20108 = vrcp.f32 %v8399_v2 }
 0xc1d   : > { %17832 = vmatmul.mubr.msk.bf16.vlgmr.msra.gmra.mrb[72].mxu0 %vm3958_vm0, %v8488_v53  ;;  %v8402_v22 = vpop.xlane.xlu1 %8401  ;;  %v8468_v23 = vmul.f32 %v20099_v42, %v23661_v9  ;;  %v19682_v9 = vld [vmem:[#allocation9 + $0xf0] ss:$12 sps:$4 sm:$0xff]  }
 0xc1e   : > { %v20101_v3 = vpop.eup %20100  ;;  %20110 = vrcp.f32 %v8402_v22  ;;  %8948 = vmatpush1.bf16.msra.mxu0 %v19674_v61 }
 0xc1f   : > { %v8405_v15 = vpop.xlane.xlu0 %8404  ;;  %v8489_v54 = vpack.c.bf16 %v8468_v23, %v8467_v21  ;;  %8949 = vmatprep.subr.bf16.mxu0 %v19680_v63  ;;  %v8469_v44 = vmul.f32 %v20101_v3, %v23666_v24 }
 0xc20   : > { %v20103_v51 = vpop.eup %20102  ;;  %20112 = vrcp.f32 %v8405_v15 }
 0xc21   : > { %v8470_v45 = vmul.f32 %v20103_v51, %v23671_v16  ;;  %17835 = vmatprep.mubr.msk.bf16.mxu0 %vm3958_vm0, %v8489_v54  ;;  %v8408_v41 = vpop.xlane.xlu1 %8407 }
 0xc22   : > { %v20105_v38 = vpop.eup %20104  ;;  %20114 = vrcp.f32 %v8408_v41  ;;  %8950 = vmatpush1.bf16.msra.mxu0 %v19678_v31 }
 0xc23   : > { %v8490_v17 = vpack.c.bf16 %v8470_v45, %v8469_v44  ;;  %v8411_v32 = vpop.xlane.xlu0 %8410  ;;  %8951 = vmatprep.subr.bf16.mxu0 %v19684_v62  ;;  %v8471_v24 = vmul.f32 %v20105_v38, %v23676_v57 }
 0xc24   : > { %v20107_v52 = vpop.eup %20106  ;;  %20116 = vrcp.f32 %v8411_v32 }
 0xc25   : > { %17836 = vmatmul.mubr.msk.bf16.gmra.mrb[76].mxu0 %vm3958_vm0, %v8490_v17  ;;  %v8414_v27 = vpop.xlane.xlu1 %8413  ;;  %v8472_v16 = vmul.f32 %v20107_v52, %v23681_v12 }
 0xc26   : > { %v20109_v39 = vpop.eup %20108  ;;  %20118 = vrcp.f32 %v8414_v27  ;;  %8952 = vmatpush1.bf16.msra.mxu0 %v19682_v9  ;;  %8979 = vmatprep.mubr.bf16.mxu0 %v26624_v34 }
 0xc27   : > { %v8491_v26 = vpack.c.bf16 %v8472_v16, %v8471_v24  ;;  %8953 = vmatprep.subr.bf16.mxu0 %v19687_v29  ;;  %v8473_v43 = vmul.f32 %v20109_v39, %v23685_v55  ;;  %v9654_v20 = vpop.permute.xlu0 %9653 }
 0xc28   : > { %v20111_v1 = vpop.eup %20110  ;;  %v9674_v41 = vsel %vm3958_vm0, %v9654_v20, 0 }
 0xc29   : > { %v8474_v58 = vmul.f32 %v20111_v1, %v23689_v50  ;;  %17847 = vmatprep.mubr.msk.bf16.mxu1 %vm3958_vm0, %v8491_v26  ;;  %v23852_v18 = vpop.permute.xlu1 %9655 }
 0xc2a   : > { %v20113_v57 = vpop.eup %20112  ;;  %8954 = vmatpush1.bf16.msra.mxu0 %v19685_v7  ;;  %v9677_v16 = vsel %vm3958_vm0, %v23852_v18, 0 }
 0xc2b   : > { %v8492_v12 = vpack.c.bf16 %v8474_v58, %v8473_v43  ;;  %v8475_v5 = vmul.f32 %v20113_v57, %v23693_v47  ;;  %v19681_v47 = vld [vmem:[#allocation9 + $0x110] ss:$12 sps:$4 sm:$0xff]   ;;  %v23874_v49 = vpop.permute.xlu0 %9641 }
 0xc2c   : > { %v20115_v60 = vpop.eup %20114 }
 0xc2d   : > { %17848 = vmatmul.mubr.msk.bf16.vlgmr.msra.gmra.mrb[72].mxu1 %vm3958_vm0, %v8492_v12  ;;  %v23855_v40 = vpop.permute.xlu1 %9657  ;;  %v8476_v25 = vmul.f32 %v20115_v60, %v23697_v48 }
 0xc2e   : > { %v20117_v55 = vpop.eup %20116  ;;  %17856 = vmatpush3.bf16.msra.mxu1 %v23832_v4  ;;  %v9680_v26 = vsel %vm3958_vm0, %v23855_v40, 0 }
 0xc2f   : > { %17857 = vmatprep.subr.bf16.mxu1 %v19673_v28  ;;  %v8493_v50 = vpack.c.bf16 %v8476_v25, %v8475_v5  ;;  %v8477_v59 = vmul.f32 %v20117_v55, %v23701_v14  ;;  %v23876_v37 = vpop.permute.xlu0 %9766 }
 0xc30   : > { %v20119_v13 = vpop.eup %20118 }
 0xc31   : > { %v8478_v10 = vmul.f32 %v20119_v13, %v23705_v33  ;;  %17851 = vmatprep.mubr.msk.bf16.mxu1 %vm3958_vm0, %v8493_v50  ;;  %v23863_v0 = vpop.permute.xlu1 %9659 }
 0xc32   : > { %17858 = vmatpush3.bf16.msra.mxu1 %v19673_v28  ;;  %v9683_v28 = vsel %vm3958_vm0, %v23863_v0, 0 }
 0xc33   : > { %v8494_v36 = vpack.c.bf16 %v8478_v10, %v8477_v59  ;;  %17859 = vmatprep.subr.bf16.mxu1 %v19677_v6  ;;  %v23878_v11 = vpop.permute.xlu0 %9645 }
 0xc35   : > { %17852 = vmatmul.mubr.msk.bf16.gmra.mrb[76].mxu1 %vm3958_vm0, %v8494_v36  ;;  %v23866_v48 = vpop.permute.xlu1 %9643 }
 0xc36   : > { %17860 = vmatpush3.bf16.msra.mxu1 %v19677_v6 }
 0xc37   : > { %17861 = vmatprep.subr.bf16.mxu1 %v19681_v47  ;;  %v23880_v61 = vpop.permute.xlu0 %9770 }
 0xc39   : > { %v23868_v4 = vpop.permute.xlu1 %9768 }
 0xc3a   : > { %17862 = vmatpush3.bf16.msra.mxu1 %v19681_v47 }
 0xc3b   : > { %19199 = vmatprep.subr.msk.bf16.mxu1 %vm3958_vm0, %v9654_v20  ;;  %v23882_v53 = vpop.permute.xlu0 %9772 }
 0xc3d   : > { %v23871_v14 = vpop.permute.xlu1 %9647 }
 0xc3f   : > { %v23884_v2 = vpop.permute.xlu0 %9754 }
 0xc41   : > { %v9880_v33 = vpop.permute.xlu1 %9879 }
 0xc42   : > { %19207 = vmatprep.subr.msk.bf16.mxu0 %vm3958_vm0, %v9880_v33  ;;  %v9900_v51 = vsel %vm3958_vm0, %v9880_v33, 0 }
 0xc43   : > { %v9884_v63 = vpop.permute.xlu0 %9883 }
 0xc44   : > { %v9906_v7 = vsel %vm3958_vm0, %v9884_v63, 0 }
 0xc45   : > { %v9882_v44 = vpop.permute.xlu1 %9881 }
 0xc46   : > { %v9903_v24 = vsel %vm3958_vm0, %v9882_v44, 0 }
 0xc47   : > { %v23886_v42 = vpop.permute.xlu0 %9758 }
 0xc4b   : > { %v9886_v22 = vpop.permute.xlu0 %9885 }
 0xc4c   : > { %v9909_v58 = vsel %vm3958_vm0, %v9886_v22, 0 }
 0xc4f   : > { %v23888_v23 = vpop.permute.xlu0 %9867 }
 0xc53   : > { %v23893_v45 = vpop.permute.xlu0 %9996 }
 0xc57   : > { %v23901_v52 = vpop.permute.xlu0 %9873 }
 0xc5b   : > { %v23913_v39 = vpop.permute.xlu0 %9980 }
 0xc5f   : > { %v23921_v1 = vpop.permute.xlu0 %9984 }
 0xcc2   : > { %v17801_v21 = vpop.f32.mrb[64].mxu0 }
 0xcc3   : > { %v8541_v3 = vpop.f32.mrb[65].mxu0 }
 0xcc4   : > { %v17802_v31 = vpop.f32.mrb[66].mxu0 }
 0xcc5   : > { %v8804_v15 = vpack.c.bf16 %v17802_v31, %v17801_v21  ;;  %v8544_v54 = vpop.f32.mrb[67].mxu0 }
 0xcc6   : > { %v8803_v62 = vpack.c.bf16 %v8544_v54, %v8541_v3 }
 0xcc8   : > { %16438 = vmatmul.mubr.msk.bf16.vlgmr.msra.gmra.mrb[224].mxu0 %vm3958_vm0, %v8803_v62  ;;  %17863 = vmatprep.mubr.msk.bf16.mxu1 %vm3958_vm0, %v8803_v62 }
 0xcc9   : > { %17928 = vmatpush3.bf16.xpose.msra.mxu0 %v9900_v51  ;;  %17864 = vmatmul.mubr.msk.bf16.vlgmr.msra.gmra.mrb[224].mxu1 %vm3958_vm0, %v8804_v15 }
 0xcca   : > { %17896 = vmatpush3.bf16.xpose.msra.mxu1 %v9674_v41  ;;  %19208 = vmatprep.subr.msk.bf16.mxu0 %vm3958_vm0, %v9882_v44 }
 0xccb   : > { %v17805_v38 = vpop.f32.mrb[68].mxu0  ;;  %19200 = vmatprep.subr.msk.bf16.mxu1 %vm3958_vm0, %v23852_v18  ;;  %8989 = vmatprep.mubr.bf16.mxu0 %v26624_v34  ;;  %v23927_v18 = vpop.permute.xlu0 %10493 }
 0xccc   : > { %v8557_v9 = vpop.f32.mrb[69].mxu0 }
 0xccd   : > { %v17806_v17 = vpop.f32.mrb[70].mxu0 }
 0xcce   : > { %v8806_v32 = vpack.c.bf16 %v17806_v17, %v17805_v38  ;;  %v8560_v29 = vpop.f32.mrb[71].mxu0 }
 0xccf   : > { %v8805_v27 = vpack.c.bf16 %v8560_v29, %v8557_v9 }
 0xcd0   : > { %16439 = vmatmul.mubr.msk.bf16.gmra.mrb[228].mxu0 %vm3958_vm0, %v8804_v15 }
 0xcd1   : > { %17867 = vmatprep.mubr.msk.bf16.mxu1 %vm3958_vm0, %v8805_v27  ;;  %17930 = vmatpush3.bf16.xpose.msra.mxu0 %v9903_v24 }
 0xcd2   : > { %17868 = vmatmul.mubr.msk.bf16.gmra.mrb[228].mxu1 %vm3958_vm0, %v8806_v32  ;;  %19209 = vmatprep.subr.msk.bf16.mxu0 %vm3958_vm0, %v9884_v63 }
 0xcd3   : > { %17898 = vmatpush3.bf16.xpose.msra.mxu1 %v9677_v16  ;;  %8999 = vmatprep.mubr.bf16.mxu0 %v26624_v34  ;;  %v9757_v16 = vpop.permute.xlu1 %9756 }
 0xcd4   : > { %19201 = vmatprep.subr.msk.bf16.mxu1 %vm3958_vm0, %v23855_v40 }
 0xcd8   : > { %16440 = vmatmul.mubr.msk.bf16.gmra.mrb[232].mxu0 %vm3958_vm0, %v8805_v27 }
 0xcd9   : > { %17932 = vmatpush3.bf16.xpose.msra.mxu0 %v9906_v7  ;;  %9009 = vmatprep.mubr.bf16.mxu0 %v26624_v34  ;;  %v9787_v7 = vsel %vm3958_vm0, %v23876_v37, 0 }
 0xcda   : > { %19210 = vmatprep.subr.msk.bf16.mxu0 %vm3958_vm0, %v9886_v22 }
 0xcdb   : > { %17900 = vmatpush3.bf16.xpose.msra.mxu1 %v9680_v26 }
 0xcdc   : > { %19202 = vmatprep.subr.msk.bf16.mxu1 %vm3958_vm0, %v23863_v0 }
 0xce0   : > { %v17817_v43 = vpop.f32.mrb[64].mxu1  ;;  %16441 = vmatmul.mubr.msk.bf16.gmra.mrb[236].mxu0 %vm3958_vm0, %v8806_v32 }
 0xce1   : > { %v8618_v57 = vpop.f32.mrb[65].mxu1  ;;  %17934 = vmatpush3.bf16.xpose.msra.mxu0 %v9909_v58  ;;  %9019 = vmatprep.mubr.bf16.mxu0 %v26624_v34 }
 0xce2   : > { %v17818_v12 = vpop.f32.mrb[66].mxu1  ;;  %17959 = vmatprep.subr.bf16.mxu0 %v23927_v18 }
 0xce3   : > { %v8808_v60 = vpack.c.bf16 %v17818_v12, %v17817_v43  ;;  %17902 = vmatpush3.bf16.xpose.msra.mxu1 %v9683_v28  ;;  %v8621_v40 = vpop.f32.mrb[67].mxu1  ;;  %v10019_v12 = vsel %vm3958_vm0, %v23893_v45, 0 }
 0xce4   : > { %v8807_v5 = vpack.c.bf16 %v8621_v40, %v8618_v57  ;;  %19203 = vmatprep.subr.msk.bf16.mxu1 %vm3958_vm0, %v23876_v37 }
 0xce6   : > { %17871 = vmatprep.mubr.msk.bf16.mxu1 %vm3958_vm0, %v8807_v5 }
 0xce7   : > { %17872 = vmatmul.mubr.msk.bf16.gmra.mrb[232].mxu1 %vm3958_vm0, %v8808_v60 }
 0xce8   : > { %v17821_v25 = vpop.f32.mrb[68].mxu1  ;;  %16442 = vmatmul.mubr.msk.bf16.gmra.mrb[240].mxu0 %vm3958_vm0, %v8807_v5 }
 0xce9   : > { %v8634_v55 = vpop.f32.mrb[69].mxu1  ;;  %9029 = vmatprep.mubr.bf16.mxu0 %v26624_v34 }
 0xcea   : > { %v17822_v50 = vpop.f32.mrb[70].mxu1 }
 0xceb   : > { %v8810_v6 = vpack.c.bf16 %v17822_v50, %v17821_v25  ;;  %v8637_v13 = vpop.f32.mrb[71].mxu1 }
 0xcec   : > { %v8809_v59 = vpack.c.bf16 %v8637_v13, %v8634_v55 }
 0xcee   : > { %17875 = vmatprep.mubr.msk.bf16.mxu1 %vm3958_vm0, %v8809_v59 }
 0xcef   : > { %17876 = vmatmul.mubr.msk.bf16.gmra.mrb[236].mxu1 %vm3958_vm0, %v8810_v6 }
 0xcf0   : > { %v17833_v10 = vpop.f32.mrb[72].mxu0  ;;  %16443 = vmatmul.mubr.msk.bf16.gmra.mrb[244].mxu0 %vm3958_vm0, %v8808_v60 }
 0xcf1   : > { %v8695_v0 = vpop.f32.mrb[73].mxu0  ;;  %9039 = vmatprep.mubr.bf16.mxu0 %v26624_v34 }
 0xcf2   : > { %v17834_v36 = vpop.f32.mrb[74].mxu0 }
 0xcf3   : > { %v8812_v47 = vpack.c.bf16 %v17834_v36, %v17833_v10  ;;  %v8698_v20 = vpop.f32.mrb[75].mxu0 }
 0xcf4   : > { %v8811_v33 = vpack.c.bf16 %v8698_v20, %v8695_v0 }
 0xcf6   : > { %17879 = vmatprep.mubr.msk.bf16.mxu1 %vm3958_vm0, %v8811_v33 }
 0xcf7   : > { %17880 = vmatmul.mubr.msk.bf16.gmra.mrb[240].mxu1 %vm3958_vm0, %v8812_v47 }
 0xcf8   : > { %v17837_v63 = vpop.f32.mrb[76].mxu0  ;;  %16444 = vmatmul.mubr.msk.bf16.gmra.mrb[248].mxu0 %vm3958_vm0, %v8809_v59 }
 0xcf9   : > { %v8711_v22 = vpop.f32.mrb[77].mxu0  ;;  %9049 = vmatprep.mubr.bf16.mxu0 %v26624_v34 }
 0xcfa   : > { %v17838_v21 = vpop.f32.mrb[78].mxu0 }
 0xcfb   : > { %v8814_v3 = vpack.c.bf16 %v17838_v21, %v17837_v63  ;;  %v8714_v31 = vpop.f32.mrb[79].mxu0 }
 0xcfc   : > { %v8813_v15 = vpack.c.bf16 %v8714_v31, %v8711_v22 }
 0xcfe   : > { %17883 = vmatprep.mubr.msk.bf16.mxu1 %vm3958_vm0, %v8813_v15 }
 0xcff   : > { %17884 = vmatmul.mubr.msk.bf16.gmra.mrb[244].mxu1 %vm3958_vm0, %v8814_v3 }
 0xd00   : > { %v17849_v54 = vpop.f32.mrb[72].mxu1  ;;  %16445 = vmatmul.mubr.msk.bf16.gmra.mrb[252].mxu0 %vm3958_vm0, %v8810_v6 }
 0xd01   : > { %v8772_v62 = vpop.f32.mrb[73].mxu1  ;;  %9059 = vmatprep.mubr.bf16.mxu0 %v26624_v34 }
 0xd02   : > { %v17850_v51 = vpop.f32.mrb[74].mxu1 }
 0xd03   : > { %v8816_v44 = vpack.c.bf16 %v17850_v51, %v17849_v54  ;;  %v8775_v41 = vpop.f32.mrb[75].mxu1 }
 0xd04   : > { %v8815_v38 = vpack.c.bf16 %v8775_v41, %v8772_v62 }
 0xd06   : > { %17887 = vmatprep.mubr.msk.bf16.mxu1 %vm3958_vm0, %v8815_v38 }
 0xd07   : > { %17888 = vmatmul.mubr.msk.bf16.gmra.mrb[248].mxu1 %vm3958_vm0, %v8816_v44 }
 0xd08   : > { %v17853_v9 = vpop.f32.mrb[76].mxu1  ;;  %16446 = vmatmul.mubr.msk.bf16.gmra.mrb[0].mxu0 %vm3958_vm0, %v8811_v33 }
 0xd09   : > { %v8788_v17 = vpop.f32.mrb[77].mxu1  ;;  %9069 = vmatprep.mubr.bf16.mxu0 %v26624_v34 }
 0xd0a   : > { %v17854_v32 = vpop.f32.mrb[78].mxu1 }
 0xd0b   : > { %v8818_v29 = vpack.c.bf16 %v17854_v32, %v17853_v9  ;;  %v8791_v27 = vpop.f32.mrb[79].mxu1 }
 0xd0c   : > { %v8817_v24 = vpack.c.bf16 %v8791_v27, %v8788_v17 }
 0xd0e   : > { %17891 = vmatprep.mubr.msk.bf16.mxu1 %vm3958_vm0, %v8817_v24 }
 0xd0f   : > { %17892 = vmatmul.mubr.msk.bf16.gmra.mrb[252].mxu1 %vm3958_vm0, %v8818_v29 }
 0xd10   : > { %17903 = vmatprep.mubr.msk.bf16.mxu1 %vm3958_vm0, %v23874_v49  ;;  %16447 = vmatmul.mubr.msk.bf16.gmra.mrb[4].mxu0 %vm3958_vm0, %v8812_v47  ;;  %v9993_v49 = vpop.permute.xlu1 %9992 }
 0xd11   : > { %9079 = vmatprep.mubr.bf16.mxu0 %v26624_v34 }
 0xd14   : > { %v9761_v26 = vpop.permute.xlu1 %9760 }
 0xd17   : > { %17904 = vmatmul.mubr.msk.bf16.vlgmr.msra.gmra.mrb[80].mxu1 %vm3958_vm0, %v23866_v48  ;;  %v9790_v48 = vsel %vm3958_vm0, %v23868_v4, 0 }
 0xd18   : > { %17912 = vmatpush3.bf16.xpose.msra.mxu1 %v9787_v7  ;;  %17907 = vmatprep.mubr.msk.bf16.mxu1 %vm3958_vm0, %v23878_v11  ;;  %v9995_v37 = vpop.permute.xlu1 %9994  ;;  %v9793_v11 = vsel %vm3958_vm0, %v23880_v61, 0 }
 0xd19   : > { %19204 = vmatprep.subr.msk.bf16.mxu1 %vm3958_vm0, %v23868_v4  ;;  %16448 = vmatmul.mubr.msk.bf16.gmra.mrb[8].mxu0 %vm3958_vm0, %v8813_v15  ;;  %v10016_v58 = vsel %vm3958_vm0, %v9995_v37, 0 }
 0xd1a   : > { %9089 = vmatprep.mubr.bf16.mxu0 %v26624_v34 }
 0xd1c   : > { %v9870_v4 = vpop.permute.xlu1 %9869 }
 0xd1f   : > { %17908 = vmatmul.mubr.msk.bf16.gmra.mrb[84].mxu1 %vm3958_vm0, %v23871_v14  ;;  %v9796_v14 = vsel %vm3958_vm0, %v23882_v53, 0 }
 0xd20   : > { %17914 = vmatpush3.bf16.xpose.msra.mxu1 %v9790_v48  ;;  %17919 = vmatprep.mubr.msk.bf16.mxu1 %vm3958_vm0, %v23884_v2  ;;  %v9872_v2 = vpop.permute.xlu1 %9871 }
 0xd21   : > { %19205 = vmatprep.subr.msk.bf16.mxu1 %vm3958_vm0, %v23880_v61  ;;  %16449 = vmatmul.mubr.msk.bf16.gmra.mrb[12].mxu0 %vm3958_vm0, %v8814_v3  ;;  %v10013_v61 = vsel %vm3958_vm0, %v9993_v49, 0 }
 0xd22   : > { %9099 = vmatprep.mubr.bf16.mxu0 %v26624_v34 }
 0xd24   : > { %v9999_v43 = vpop.permute.xlu1 %9998 }
 0xd28   : > { %17916 = vmatpush3.bf16.xpose.msra.mxu1 %v9793_v11 }
 0xd29   : > { %19206 = vmatprep.subr.msk.bf16.mxu1 %vm3958_vm0, %v23882_v53  ;;  %16450 = vmatmul.mubr.msk.bf16.gmra.mrb[16].mxu0 %vm3958_vm0, %v8815_v38  ;;  %v9983_v53 = vpop.permute.xlu1 %9982 }
 0xd2a   : > { %9109 = vmatprep.mubr.bf16.mxu0 %v26624_v34 }
 0xd2d   : > { %v9987_v57 = vpop.permute.xlu1 %9986 }
 0xd30   : > { %17918 = vmatpush3.bf16.xpose.msra.mxu1 %v9796_v14 }
 0xd31   : > { %19211 = vmatprep.subr.msk.bf16.mxu1 %vm3958_vm0, %v9993_v49  ;;  %16451 = vmatmul.mubr.msk.bf16.gmra.mrb[20].mxu0 %vm3958_vm0, %v8816_v44 }
 0xd32   : > { %9119 = vmatprep.mubr.bf16.mxu0 %v26624_v34 }
 0xd37   : > { %17920 = vmatmul.mubr.msk.bf16.vlgmr.msra.gmra.mrb[88].mxu1 %vm3958_vm0, %v9757_v16 }
 0xd38   : > { %17923 = vmatprep.mubr.msk.bf16.mxu1 %vm3958_vm0, %v23886_v42  ;;  %17944 = vmatpush3.bf16.xpose.msra.mxu1 %v10013_v61  ;;  %v10498_v42 = vpop.permute.xlu0 %10497 }
 0xd39   : > { %19212 = vmatprep.subr.msk.bf16.mxu1 %vm3958_vm0, %v9995_v37  ;;  %16452 = vmatmul.mubr.msk.bf16.gmra.mrb[24].mxu0 %vm3958_vm0, %v8817_v24 }
 0xd3a   : > { %9129 = vmatprep.mubr.bf16.mxu0 %v26624_v34 }
 0xd3c   : > { %v10500_v28 = vpop.permute.xlu0 %10499 }
 0xd3f   : > { %17924 = vmatmul.mubr.msk.bf16.gmra.mrb[92].mxu1 %vm3958_vm0, %v9761_v26 }
 0xd40   : > { %17946 = vmatpush3.bf16.xpose.msra.mxu1 %v10016_v58  ;;  %17951 = vmatprep.mubr.msk.bf16.mxu1 %vm3958_vm0, %v23913_v39  ;;  %v10496_v39 = vpop.permute.xlu1 %10495  ;;  %v10587_v60 = vpop.permute.xlu0 %10586 }
 0xd41   : > { %19213 = vmatprep.subr.msk.bf16.mxu1 %vm3958_vm0, %v23893_v45  ;;  %16453 = vmatmul.mubr.msk.bf16.gmra.mrb[32].mxu0 %vm3958_vm0, %v8818_v29 }
 0xd42   : > { %17935 = vmatprep.mubr.msk.bf16.mxu0 %vm3958_vm0, %v23888_v23  ;;  %v10022_v23 = vsel %vm3958_vm0, %v9999_v43, 0 }
 0xd44   : > { %v10589_v40 = vpop.permute.xlu1 %10588 }
 0xd48   : > { %17948 = vmatpush3.bf16.xpose.msra.mxu1 %v10019_v12  ;;  %v24017_v45 = vpop.permute.xlu1 %10679 }
 0xd49   : > { %19214 = vmatprep.subr.msk.bf16.mxu1 %vm3958_vm0, %v9999_v43  ;;  %17936 = vmatmul.mubr.msk.bf16.vlgmr.msra.gmra.mrb[80].mxu0 %vm3958_vm0, %v9870_v4 }
 0xd4a   : > { %17960 = vmatpush3.bf16.msra.mxu0 %v23927_v18  ;;  %17939 = vmatprep.mubr.msk.bf16.mxu0 %vm3958_vm0, %v9872_v2  ;;  %v10591_v18 = vpop.permute.xlu0 %10590 }
 0xd4b   : > { %17961 = vmatprep.subr.bf16.mxu0 %v10496_v39 }
 0xd4e   : > { %17962 = vmatpush3.bf16.msra.mxu0 %v10496_v39 }
 0xd4f   : > { %17963 = vmatprep.subr.bf16.mxu0 %v10498_v42 }
 0xd50   : > { %17950 = vmatpush3.bf16.xpose.msra.mxu1 %v10022_v23 }
 0xd51   : > { %17975 = vmatprep.subr.bf16.mxu1 %v10587_v60  ;;  %17940 = vmatmul.mubr.msk.bf16.gmra.mrb[84].mxu0 %vm3958_vm0, %v23901_v52  ;;  %v10593_v52 = vpop.permute.xlu0 %10592 }
 0xd52   : > { %17964 = vmatpush3.bf16.msra.mxu0 %v10498_v42 }
 0xd53   : > { %17965 = vmatprep.subr.bf16.mxu0 %v10500_v28 }
 0xd56   : > { %17966 = vmatpush3.bf16.msra.mxu0 %v10500_v28 }
 0xd57   : > { %17952 = vmatmul.mubr.msk.bf16.vlgmr.msra.gmra.mrb[96].mxu1 %vm3958_vm0, %v9983_v53  ;;  %17991 = vmatprep.subr.bf16.mxu0 %v24017_v45 }
 0xd58   : > { %17955 = vmatprep.mubr.msk.bf16.mxu1 %vm3958_vm0, %v23921_v1  ;;  %17976 = vmatpush3.bf16.msra.mxu1 %v10587_v60 }
 0xd59   : > { %17977 = vmatprep.subr.bf16.mxu1 %v10589_v40 }
 0xd5c   : > { %17978 = vmatpush3.bf16.msra.mxu1 %v10589_v40 }
 0xd5d   : > { %17979 = vmatprep.subr.bf16.mxu1 %v10591_v18 }
 0xd5f   : > { %17956 = vmatmul.mubr.msk.bf16.gmra.mrb[100].mxu1 %vm3958_vm0, %v9987_v57 }
 0xd60   : > { %17980 = vmatpush3.bf16.msra.mxu1 %v10591_v18 }
 0xd61   : > { %17981 = vmatprep.subr.bf16.mxu1 %v10593_v52 }
 0xd64   : > { %17982 = vmatpush3.bf16.msra.mxu1 %v10593_v52 }
 0xdea   : > { %v17905_v5 = vpop.f32.mrb[80].mxu1 }
 0xdeb   : > { %v24026_v55 = vsel %vm22061_vm1, %v17905_v5, -1e+30  ;;  %v9719_v50 = vpop.f32.mrb[81].mxu1 }
 0xdec   : > { %v10127_v1 = vsel %vm3958_vm0, %v24026_v55, -inf  ;;  %v17906_v6 = vpop.f32.mrb[82].mxu1  ;;  %v24032_v59 = vsel %vm22066_vm2, %v9719_v50, -1e+30 }
 0xded   : > { %10128 = vmax.xlane.f32.xlu0 %v10127_v1  ;;  %v9722_v10 = vpop.f32.mrb[83].mxu1  ;;  %v10121_v20 = vsel %vm3958_vm0, %v24032_v59, -inf  ;;  %v24044_v63 = vsel %vm22074_vm3, %v17906_v6, -1e+30 }
 0xdee   : > { %v24036_v36 = vsel %vm22084_vm4, %v9722_v10, -1e+30  ;;  %v10130_v3 = vsel %vm3958_vm0, %v24044_v63, -inf }
 0xdef   : > { %v10124_v47 = vsel %vm3958_vm0, %v24036_v36, -inf }
 0xdf0   : > { %10125 = vmax.xlane.f32.xlu1 %v10124_v47 }
 0xdf1   : > { %10122 = vmax.xlane.f32.xlu0 %v10121_v20 }
 0xdf2   : > { %v17909_v22 = vpop.f32.mrb[84].mxu1 }
 0xdf3   : > { %v9735_v21 = vpop.f32.mrb[85].mxu1  ;;  %v24050_v54 = vsel %vm22114_vm6, %v17909_v22, -1e+30 }
 0xdf4   : > { %v17910_v31 = vpop.f32.mrb[86].mxu1  ;;  %v10139_v17 = vsel %vm3958_vm0, %v24050_v54, -inf  ;;  %v24066_v29 = vsel %vm22105_vm5, %v9735_v21, -1e+30 }
 0xdf5   : > { %v24054_v51 = vsel %vm22132_vm8, %v17910_v31, -1e+30  ;;  %10131 = vmax.xlane.f32.xlu0 %v10130_v3  ;;  %v9738_v44 = vpop.f32.mrb[87].mxu1  ;;  %v10133_v24 = vsel %vm3958_vm0, %v24066_v29, -inf }
 0xdf6   : > { %v10142_v41 = vsel %vm3958_vm0, %v24054_v51, -inf  ;;  %v24060_v9 = vsel %vm22118_vm7, %v9738_v44, -1e+30 }
 0xdf7   : > { %10143 = vmax.xlane.f32.xlu1 %v10142_v41  ;;  %v10136_v27 = vsel %vm3958_vm0, %v24060_v9, -inf }
 0xdf9   : > { %10140 = vmax.xlane.f32.xlu0 %v10139_v17 }
 0xdfb   : > { %10137 = vmax.xlane.f32.xlu1 %v10136_v27 }
 0xdfd   : > { %10134 = vmax.xlane.f32.xlu0 %v10133_v24 }
 0xe0a   : > { %v17921_v16 = vpop.f32.mrb[88].mxu1 }
 0xe0b   : > { %v24074_v7 = vsel %vm22061_vm1, %v17921_v16, -1e+30  ;;  %v9832_v49 = vpop.f32.mrb[89].mxu1 }
 0xe0c   : > { %v10151_v48 = vsel %vm3958_vm0, %v24074_v7, -inf  ;;  %v17922_v26 = vpop.f32.mrb[90].mxu1  ;;  %v24080_v37 = vsel %vm22066_vm2, %v9832_v49, -1e+30 }
 0xe0d   : > { %v24084_v11 = vsel %vm22074_vm3, %v17922_v26, -1e+30  ;;  %10152 = vmax.xlane.f32.xlu0 %v10151_v48  ;;  %v9835_v4 = vpop.f32.mrb[91].mxu1  ;;  %v10145_v61 = vsel %vm3958_vm0, %v24080_v37, -inf }
 0xe0e   : > { %v10154_v14 = vsel %vm3958_vm0, %v24084_v11, -inf  ;;  %v24090_v2 = vsel %vm22084_vm4, %v9835_v4, -1e+30 }
 0xe0f   : > { %10155 = vmax.xlane.f32.xlu1 %v10154_v14  ;;  %v10148_v43 = vsel %vm3958_vm0, %v24090_v2, -inf }
 0xe11   : > { %10146 = vmax.xlane.f32.xlu0 %v10145_v61 }
 0xe12   : > { %v17925_v53 = vpop.f32.mrb[92].mxu1 }
 0xe13   : > { %v24098_v58 = vsel %vm22114_vm6, %v17925_v53, -1e+30  ;;  %10149 = vmax.xlane.f32.xlu1 %v10148_v43  ;;  %v9848_v42 = vpop.f32.mrb[93].mxu1 }
 0xe14   : > { %v10163_v57 = vsel %vm3958_vm0, %v24098_v58, -inf  ;;  %v17926_v12 = vpop.f32.mrb[94].mxu1  ;;  %v24104_v28 = vsel %vm22105_vm5, %v9848_v42, -1e+30 }
 0xe15   : > { %v24108_v39 = vsel %vm22132_vm8, %v17926_v12, -1e+30  ;;  %10164 = vmax.xlane.f32.xlu0 %v10163_v57  ;;  %v9851_v23 = vpop.f32.mrb[95].mxu1  ;;  %v10157_v18 = vsel %vm3958_vm0, %v24104_v28, -inf }
 0xe16   : > { %v10166_v60 = vsel %vm3958_vm0, %v24108_v39, -inf  ;;  %v24114_v40 = vsel %vm22118_vm7, %v9851_v23, -1e+30 }
 0xe17   : > { %10167 = vmax.xlane.f32.xlu1 %v10166_v60  ;;  %v10160_v52 = vsel %vm3958_vm0, %v24114_v40, -inf }
 0xe19   : > { %10158 = vmax.xlane.f32.xlu0 %v10157_v18 }
 0xe1b   : > { %10161 = vmax.xlane.f32.xlu1 %v10160_v52 }
 0xe1c   : > { %v17937_v5 = vpop.f32.mrb[80].mxu0 }
 0xe1d   : > { %v24122_v50 = vsel %vm22061_vm1, %v17937_v5, -1e+30  ;;  %v9945_v1 = vpop.f32.mrb[81].mxu0 }
 0xe1e   : > { %v10175_v6 = vsel %vm3958_vm0, %v24122_v50, -inf  ;;  %v17938_v10 = vpop.f32.mrb[82].mxu0  ;;  %v24128_v47 = vsel %vm22066_vm2, %v9945_v1, -1e+30 }
 0xe1f   : > { %v24132_v20 = vsel %vm22074_vm3, %v17938_v10, -1e+30  ;;  %10176 = vmax.xlane.f32.xlu0 %v10175_v6  ;;  %v9948_v22 = vpop.f32.mrb[83].mxu0  ;;  %v10169_v31 = vsel %vm3958_vm0, %v24128_v47, -inf }
 0xe20   : > { %v10178_v21 = vsel %vm3958_vm0, %v24132_v20, -inf  ;;  %v24138_v3 = vsel %vm22084_vm4, %v9948_v22, -1e+30 }
 0xe21   : > { %10179 = vmax.xlane.f32.xlu1 %v10178_v21  ;;  %v10172_v44 = vsel %vm3958_vm0, %v24138_v3, -inf }
 0xe23   : > { %10170 = vmax.xlane.f32.xlu0 %v10169_v31 }
 0xe24   : > { %v17941_v41 = vpop.f32.mrb[84].mxu0 }
 0xe25   : > { %v24146_v17 = vsel %vm22114_vm6, %v17941_v41, -1e+30  ;;  %10173 = vmax.xlane.f32.xlu1 %v10172_v44  ;;  %v9961_v27 = vpop.f32.mrb[85].mxu0 }
 0xe26   : > { %v10187_v24 = vsel %vm3958_vm0, %v24146_v17, -inf  ;;  %v17942_v16 = vpop.f32.mrb[86].mxu0  ;;  %v24152_v49 = vsel %vm22105_vm5, %v9961_v27, -1e+30 }
 0xe27   : > { %v24156_v48 = vsel %vm22132_vm8, %v17942_v16, -1e+30  ;;  %10188 = vmax.xlane.f32.xlu0 %v10187_v24  ;;  %v9964_v26 = vpop.f32.mrb[87].mxu0  ;;  %v10181_v61 = vsel %vm3958_vm0, %v24152_v49, -inf }
 0xe28   : > { %v10190_v4 = vsel %vm3958_vm0, %v24156_v48, -inf  ;;  %v24162_v14 = vsel %vm22118_vm7, %v9964_v26, -1e+30 }
 0xe29   : > { %10191 = vmax.xlane.f32.xlu1 %v10190_v4  ;;  %v10184_v57 = vsel %vm3958_vm0, %v24162_v14, -inf }
 0xe2a   : > { %v17953_v43 = vpop.f32.mrb[96].mxu1 }
 0xe2b   : > { %v24168_v53 = vsel %vm22061_vm1, %v17953_v43, -1e+30  ;;  %v10058_v42 = vpop.f32.mrb[97].mxu1  ;;  %10182 = vmax.xlane.f32.xlu0 %v10181_v61 }
 0xe2c   : > { %v17954_v12 = vpop.f32.mrb[98].mxu1  ;;  %v10199_v18 = vsel %vm3958_vm0, %v24168_v53, -inf  ;;  %v24180_v52 = vsel %vm22066_vm2, %v10058_v42, -1e+30 }
 0xe2d   : > { %v24174_v23 = vsel %vm22074_vm3, %v17954_v12, -1e+30  ;;  %v10061_v60 = vpop.f32.mrb[99].mxu1  ;;  %10185 = vmax.xlane.f32.xlu1 %v10184_v57  ;;  %v10193_v6 = vsel %vm3958_vm0, %v24180_v52, -inf }
 0xe2e   : > { %v10202_v5 = vsel %vm3958_vm0, %v24174_v23, -inf  ;;  %v24186_v1 = vsel %vm22084_vm4, %v10061_v60, -1e+30 }
 0xe2f   : > { %10200 = vmax.xlane.f32.xlu0 %v10199_v18  ;;  %v10196_v31 = vsel %vm3958_vm0, %v24186_v1, -inf }
 0xe31   : > { %10203 = vmax.xlane.f32.xlu1 %v10202_v5 }
 0xe32   : > { %v17957_v10 = vpop.f32.mrb[100].mxu1 }
 0xe33   : > { %v24192_v22 = vsel %vm22114_vm6, %v17957_v10, -1e+30  ;;  %v10074_v21 = vpop.f32.mrb[101].mxu1  ;;  %10194 = vmax.xlane.f32.xlu0 %v10193_v6 }
 0xe34   : > { %v17958_v44 = vpop.f32.mrb[102].mxu1  ;;  %v10211_v27 = vsel %vm3958_vm0, %v24192_v22, -inf  ;;  %v24200_v24 = vsel %vm22105_vm5, %v10074_v21, -1e+30 }
 0xe35   : > { %v10077_v41 = vpop.f32.mrb[103].mxu1  ;;  %10197 = vmax.xlane.f32.xlu1 %v10196_v31  ;;  %v10205_v16 = vsel %vm3958_vm0, %v24200_v24, -inf  ;;  %v24210_v26 = vsel %vm22132_vm8, %v17958_v44, -1e+30 }
 0xe36   : > { %v10214_v4 = vsel %vm3958_vm0, %v24210_v26, -inf  ;;  %v24216_v61 = vsel %vm22118_vm7, %v10077_v41, -1e+30 }
 0xe37   : > { %10212 = vmax.xlane.f32.xlu0 %v10211_v27  ;;  %v10208_v43 = vsel %vm3958_vm0, %v24216_v61, -inf }
 0xe3b   : > { %10206 = vmax.xlane.f32.xlu0 %v10205_v16 }
 0xe46   : > { %10685 = vrot.lane.b32.xlu1 %v26618_v46, %s20672_s21  ;;  %v24220_v46 = vpop.permute.xlu1 %10681 }
 0xe51   : > { %10683 = vrot.lane.b32.xlu0 %v26616_v30, %s20672_s21 }
 0xe6a   : > { %10215 = vmax.xlane.f32.xlu1 %v10214_v4 }
 0xe6e   : > { %10209 = vmax.xlane.f32.xlu1 %v10208_v43 }
 0xe7a   : > { %v10129_v42 = vpop.xlane.xlu0 %10128 }
 0xe7b   : > { %v10219_v30 = vsub.f32 %v24026_v55, %v10129_v42 }
 0xe7d   : > { %v10253_v57 = vmul.f32 1.442695, %v10219_v30  ;;  %v10126_v12 = vpop.xlane.xlu1 %10125 }
 0xe7e   : > { %v10123_v60 = vpop.xlane.xlu0 %10122  ;;  %v10218_v5 = vsub.f32 %v24036_v36, %v10126_v12 }
 0xe7f   : > { %20120 = vpow2.f32 %v10253_v57  ;;  %v10217_v18 = vsub.f32 %v24032_v59, %v10123_v60 }
 0xe80   : > { %v10251_v31 = vmul.f32 1.442695, %v10218_v5 }
 0xe81   : > { %v10249_v6 = vmul.f32 1.442695, %v10217_v18 }
 0xe82   : > { %v10132_v10 = vpop.xlane.xlu0 %10131 }
 0xe83   : > { %20122 = vpow2.f32 %v10249_v6  ;;  %v10220_v21 = vsub.f32 %v24044_v63, %v10132_v10 }
 0xe84   : > { %v10144_v55 = vpop.xlane.xlu1 %10143 }
 0xe85   : > { %v10255_v44 = vmul.f32 1.442695, %v10220_v21  ;;  %v10224_v63 = vsub.f32 %v24054_v51, %v10144_v55 }
 0xe86   : > { %v10141_v41 = vpop.xlane.xlu0 %10140 }
 0xe87   : > { %20124 = vpow2.f32 %v10255_v44  ;;  %v10223_v27 = vsub.f32 %v24050_v54, %v10141_v41  ;;  %v10263_v60 = vmul.f32 1.442695, %v10224_v63 }
 0xe88   : > { %20126 = vpow2.f32 %v10251_v31  ;;  %v10138_v57 = vpop.xlane.xlu1 %10137 }
 0xe89   : > { %v24227_v16 = vpop.eup %20120  ;;  %v10261_v4 = vmul.f32 1.442695, %v10223_v27  ;;  %v10222_v18 = vsub.f32 %v24060_v9, %v10138_v57 }
 0xe8a   : > { %v10135_v43 = vpop.xlane.xlu0 %10134  ;;  %v10319_v59 = vsel %vm3958_vm0, %v24227_v16, 0.0 }
 0xe8b   : > { %v10221_v36 = vsub.f32 %v24066_v29, %v10135_v43  ;;  %10320 = vadd.xlane.f32.xlu0 %v10319_v59  ;;  %20128 = vpow2.f32 %v10261_v4  ;;  %v10259_v51 = vmul.f32 1.442695, %v10222_v18 }
 0xe8d   : > { %v24232_v42 = vpop.eup %20122  ;;  %v10257_v30 = vmul.f32 1.442695, %v10221_v36 }
 0xe8e   : > { %v10313_v54 = vsel %vm3958_vm0, %v24232_v42, 0.0 }
 0xe8f   : > { %10314 = vadd.xlane.f32.xlu0 %v10313_v54  ;;  %20130 = vpow2.f32 %v10257_v30 }
 0xe90   : > { %20132 = vpow2.f32 %v10263_v60 }
 0xe91   : > { %v24237_v12 = vpop.eup %20124  ;;  %20134 = vpow2.f32 %v10259_v51 }
 0xe92   : > { %v10322_v29 = vsel %vm3958_vm0, %v24237_v12, 0.0  ;;  %v24242_v5 = vpop.eup %20126 }
 0xe93   : > { %10323 = vadd.xlane.f32.xlu1 %v10322_v29  ;;  %v10316_v6 = vsel %vm3958_vm0, %v24242_v5, 0.0 }
 0xe95   : > { %v24246_v10 = vpop.eup %20128 }
 0xe96   : > { %v10331_v9 = vsel %vm3958_vm0, %v24246_v10, 0.0 }
 0xe97   : > { %10317 = vadd.xlane.f32.xlu1 %v10316_v6 }
 0xe99   : > { %v24250_v31 = vpop.eup %20130 }
 0xe9a   : > { %v10153_v21 = vpop.xlane.xlu0 %10152  ;;  %v10325_v43 = vsel %vm3958_vm0, %v24250_v31, 0.0  ;;  %v24256_v59 = vpop.eup %20132 }
 0xe9b   : > { %v10227_v44 = vsub.f32 %v24074_v7, %v10153_v21  ;;  %10332 = vadd.xlane.f32.xlu1 %v10331_v9  ;;  %v10334_v60 = vsel %vm3958_vm0, %v24256_v59, 0.0 }
 0xe9c   : > { %v10156_v41 = vpop.xlane.xlu1 %10155 }
 0xe9d   : > { %v10269_v27 = vmul.f32 1.442695, %v10227_v44  ;;  %v10228_v55 = vsub.f32 %v24084_v11, %v10156_v41  ;;  %v24262_v11 = vpop.eup %20134 }
 0xe9e   : > { %v10147_v4 = vpop.xlane.xlu0 %10146 }
 0xe9f   : > { %20136 = vpow2.f32 %v10269_v27  ;;  %v10225_v36 = vsub.f32 %v24080_v37, %v10147_v4  ;;  %10326 = vadd.xlane.f32.xlu1 %v10325_v43  ;;  %v10271_v63 = vmul.f32 1.442695, %v10228_v55 }
 0xea0   : > { %v10150_v30 = vpop.xlane.xlu1 %10149 }
 0xea1   : > { %v10265_v57 = vmul.f32 1.442695, %v10225_v36  ;;  %v10226_v7 = vsub.f32 %v24090_v2, %v10150_v30  ;;  %v10328_v2 = vsel %vm3958_vm0, %v24262_v11, 0.0 }
 0xea2   : > { %v10165_v54 = vpop.xlane.xlu0 %10164 }
 0xea3   : > { %20138 = vpow2.f32 %v10265_v57  ;;  %v10267_v18 = vmul.f32 1.442695, %v10226_v7  ;;  %v10231_v29 = vsub.f32 %v24098_v58, %v10165_v54  ;;  %10335 = vadd.xlane.f32.xlu1 %v10334_v60 }
 0xea4   : > { %20140 = vpow2.f32 %v10271_v63  ;;  %v10168_v51 = vpop.xlane.xlu1 %10167 }
 0xea5   : > { %20142 = vpow2.f32 %v10267_v18  ;;  %v10277_v37 = vmul.f32 1.442695, %v10231_v29  ;;  %v10232_v6 = vsub.f32 %v24108_v39, %v10168_v51 }
 0xea6   : > { %v10159_v21 = vpop.xlane.xlu0 %10158 }
 0xea7   : > { %v10279_v9 = vmul.f32 1.442695, %v10232_v6  ;;  %v10229_v44 = vsub.f32 %v24104_v28, %v10159_v21  ;;  %10329 = vadd.xlane.f32.xlu1 %v10328_v2  ;;  %20144 = vpow2.f32 %v10277_v37 }
 0xea8   : > { %v10162_v41 = vpop.xlane.xlu1 %10161 }
 0xea9   : > { %v24269_v27 = vpop.eup %20136  ;;  %20146 = vpow2.f32 %v10279_v9  ;;  %v10273_v58 = vmul.f32 1.442695, %v10229_v44  ;;  %v10230_v55 = vsub.f32 %v24114_v40, %v10162_v41 }
 0xeaa   : > { %v10343_v4 = vsel %vm3958_vm0, %v24269_v27, 0.0 }
 0xeab   : > { %v10275_v39 = vmul.f32 1.442695, %v10230_v55  ;;  %10344 = vadd.xlane.f32.xlu0 %v10343_v4  ;;  %20148 = vpow2.f32 %v10273_v58 }
 0xeac   : > { %v10177_v43 = vpop.xlane.xlu0 %10176 }
 0xead   : > { %v24274_v36 = vpop.eup %20138  ;;  %20150 = vpow2.f32 %v10275_v39  ;;  %v10235_v28 = vsub.f32 %v24122_v50, %v10177_v43 }
 0xeae   : > { %v24277_v63 = vpop.eup %20140  ;;  %v10337_v30 = vsel %vm3958_vm0, %v24274_v36, 0.0  ;;  %v10180_v57 = vpop.xlane.xlu1 %10179 }
 0xeaf   : > { %v24281_v7 = vpop.eup %20142  ;;  %v10285_v40 = vmul.f32 1.442695, %v10235_v28  ;;  %10338 = vadd.xlane.f32.xlu0 %v10337_v30  ;;  %v10236_v54 = vsub.f32 %v24132_v20, %v10180_v57  ;;  %v10346_v51 = vsel %vm3958_vm0, %v24277_v63, 0.0 }
 0xeb0   : > { %v10171_v60 = vpop.xlane.xlu0 %10170  ;;  %v10340_v18 = vsel %vm3958_vm0, %v24281_v7, 0.0 }
 0xeb1   : > { %20152 = vpow2.f32 %v10285_v40  ;;  %v10233_v29 = vsub.f32 %v24128_v47, %v10171_v60  ;;  %10341 = vadd.xlane.f32.xlu1 %v10340_v18  ;;  %v24287_v50 = vpop.eup %20144  ;;  %v10287_v21 = vmul.f32 1.442695, %v10236_v54 }
 0xeb2   : > { %v10174_v37 = vpop.xlane.xlu1 %10173  ;;  %v10355_v58 = vsel %vm3958_vm0, %v24287_v50, 0.0 }
 0xeb3   : > { %v24291_v6 = vpop.eup %20146  ;;  %v10281_v2 = vmul.f32 1.442695, %v10233_v29  ;;  %10347 = vadd.xlane.f32.xlu0 %v10346_v51  ;;  %v10234_v20 = vsub.f32 %v24138_v3, %v10174_v37 }
 0xeb4   : > { %v10189_v9 = vpop.xlane.xlu0 %10188  ;;  %v10358_v44 = vsel %vm3958_vm0, %v24291_v6, 0.0 }
 0xeb5   : > { %20154 = vpow2.f32 %v10281_v2  ;;  %v10239_v47 = vsub.f32 %v24146_v17, %v10189_v9  ;;  %10359 = vadd.xlane.f32.xlu1 %v10358_v44  ;;  %v24297_v41 = vpop.eup %20148  ;;  %v10283_v39 = vmul.f32 1.442695, %v10234_v20 }
 0xeb6   : > { %v10192_v55 = vpop.xlane.xlu1 %10191  ;;  %20156 = vpow2.f32 %v10287_v21  ;;  %v10349_v40 = vsel %vm3958_vm0, %v24297_v41, 0.0 }
 0xeb7   : > { %v24301_v4 = vpop.eup %20150  ;;  %v10293_v43 = vmul.f32 1.442695, %v10239_v47  ;;  %10356 = vadd.xlane.f32.xlu0 %v10355_v58  ;;  %v10240_v3 = vsub.f32 %v24156_v48, %v10192_v55 }
 0xeb8   : > { %v10183_v28 = vpop.xlane.xlu0 %10182  ;;  %v10352_v30 = vsel %vm3958_vm0, %v24301_v4, 0.0 }
 0xeb9   : > { %20158 = vpow2.f32 %v10293_v43  ;;  %v10237_v17 = vsub.f32 %v24152_v49, %v10183_v28  ;;  %10353 = vadd.xlane.f32.xlu1 %v10352_v30  ;;  %v10295_v57 = vmul.f32 1.442695, %v10240_v3 }
 0xeba   : > { %v10186_v54 = vpop.xlane.xlu1 %10185  ;;  %20160 = vpow2.f32 %v10283_v39 }
 0xebb   : > { %v24309_v60 = vpop.eup %20152  ;;  %v10289_v18 = vmul.f32 1.442695, %v10237_v17  ;;  %10350 = vadd.xlane.f32.xlu0 %v10349_v40  ;;  %v10238_v48 = vsub.f32 %v24162_v14, %v10186_v54 }
 0xebc   : > { %v10201_v29 = vpop.xlane.xlu0 %10200  ;;  %v10367_v51 = vsel %vm3958_vm0, %v24309_v60, 0.0 }
 0xebd   : > { %20162 = vpow2.f32 %v10289_v18  ;;  %v10291_v37 = vmul.f32 1.442695, %v10238_v48  ;;  %v10243_v49 = vsub.f32 %v24168_v53, %v10201_v29  ;;  %10368 = vadd.xlane.f32.xlu1 %v10367_v51 }
 0xebe   : > { %20164 = vpow2.f32 %v10295_v57  ;;  %v10204_v21 = vpop.xlane.xlu1 %10203 }
 0xebf   : > { %v24315_v2 = vpop.eup %20154  ;;  %20166 = vpow2.f32 %v10291_v37  ;;  %v10301_v20 = vmul.f32 1.442695, %v10243_v49  ;;  %v10244_v9 = vsub.f32 %v24174_v23, %v10204_v21 }
 0xec0   : > { %v10195_v44 = vpop.xlane.xlu0 %10194  ;;  %v10361_v14 = vsel %vm3958_vm0, %v24315_v2, 0.0  ;;  %v24320_v47 = vpop.eup %20156 }
 0xec1   : > { %v10241_v58 = vsub.f32 %v24180_v52, %v10195_v44  ;;  %10362 = vadd.xlane.f32.xlu1 %v10361_v14  ;;  %20168 = vpow2.f32 %v10301_v20  ;;  %v10303_v39 = vmul.f32 1.442695, %v10244_v9  ;;  %v10370_v30 = vsel %vm3958_vm0, %v24320_v47, 0.0 }
 0xec2   : > { %v10198_v55 = vpop.xlane.xlu1 %10197 }
 0xec3   : > { %v24323_v53 = vpop.eup %20158  ;;  %v10297_v43 = vmul.f32 1.442695, %v10241_v58  ;;  %v10242_v3 = vsub.f32 %v24186_v1, %v10198_v55 }
 0xec4   : > { %v10213_v28 = vpop.xlane.xlu0 %10212  ;;  %v10379_v23 = vsel %vm3958_vm0, %v24323_v53, 0.0  ;;  %v24330_v17 = vpop.eup %20160 }
 0xec5   : > { %20170 = vpow2.f32 %v10297_v43  ;;  %v10247_v52 = vsub.f32 %v24192_v22, %v10213_v28  ;;  %10380 = vadd.xlane.f32.xlu0 %v10379_v23  ;;  %10371 = vadd.xlane.f32.xlu1 %v10370_v30  ;;  %v10299_v40 = vmul.f32 1.442695, %v10242_v3  ;;  %v10364_v29 = vsel %vm3958_vm0, %v24330_v17, 0.0 }
 0xec6   : > { %20172 = vpow2.f32 %v10303_v39  ;;  %v24378_v30 = vpop.permute.xlu1 %10685 }
 0xec7   : > { %v24333_v57 = vpop.eup %20162  ;;  %v10309_v54 = vmul.f32 1.442695, %v10247_v52 }
 0xec8   : > { %v24335_v1 = vpop.eup %20164  ;;  %v10207_v18 = vpop.xlane.xlu0 %10206  ;;  %v10373_v48 = vsel %vm3958_vm0, %v24333_v57, 0.0 }
 0xec9   : > { %v24341_v51 = vpop.eup %20166  ;;  %20174 = vpow2.f32 %v10309_v54  ;;  %v10245_v22 = vsub.f32 %v24200_v24, %v10207_v18  ;;  %10374 = vadd.xlane.f32.xlu0 %v10373_v48  ;;  %10365 = vadd.xlane.f32.xlu1 %v10364_v29  ;;  %v10382_v49 = vsel %vm3958_vm0, %v24335_v1, 0.0 }
 0xeca   : > { %20176 = vpow2.f32 %v10299_v40  ;;  %v10376_v21 = vsel %vm3958_vm0, %v24341_v51, 0.0 }
 0xecb   : > { %v10305_v37 = vmul.f32 1.442695, %v10245_v22  ;;  %v24348_v20 = vpop.eup %20168 }
 0xecc   : > { %v10391_v24 = vsel %vm3958_vm0, %v24348_v20, 0.0 }
 0xecd   : > { %20178 = vpow2.f32 %v10305_v37  ;;  %10383 = vadd.xlane.f32.xlu0 %v10382_v49  ;;  %10377 = vadd.xlane.f32.xlu1 %v10376_v21 }
 0xecf   : > { %v24350_v9 = vpop.eup %20170 }
 0xed0   : > { %v10385_v44 = vsel %vm3958_vm0, %v24350_v9, 0.0  ;;  %v24356_v14 = vpop.eup %20172 }
 0xed1   : > { %10392 = vadd.xlane.f32.xlu0 %v10391_v24  ;;  %10386 = vadd.xlane.f32.xlu1 %v10385_v44  ;;  %v10394_v39 = vsel %vm3958_vm0, %v24356_v14, 0.0 }
 0xed3   : > { %v24358_v58 = vpop.eup %20174 }
 0xed4   : > { %v10403_v55 = vsel %vm3958_vm0, %v24358_v58, 0.0  ;;  %v24364_v43 = vpop.eup %20176 }
 0xed5   : > { %10404 = vadd.xlane.f32.xlu1 %v10403_v55  ;;  %10395 = vadd.xlane.f32.xlu0 %v10394_v39  ;;  %v10388_v23 = vsel %vm3958_vm0, %v24364_v43, 0.0 }
 0xed7   : > { %v24366_v3 = vpop.eup %20178 }
 0xed8   : > { %v10397_v28 = vsel %vm3958_vm0, %v24366_v3, 0.0 }
 0xed9   : > { %10398 = vadd.xlane.f32.xlu1 %v10397_v28  ;;  %10389 = vadd.xlane.f32.xlu0 %v10388_v23 }
 0xeea   : > { %10774 = vrot.lane.b32.xlu1 %v26621_v56, %s20672_s21 }
 0xeee   : > { %10776 = vrot.lane.b32.xlu1 %v26622_v19, %s20672_s21 }
 0xef2   : > { %10778 = vrot.lane.b32.xlu1 %v26623_v35, %s20672_s21 }
 0xef7   : > { %v10216_v52 = vpop.xlane.xlu1 %10215 }
 0xef8   : > { %v10248_v40 = vsub.f32 %v24210_v26, %v10216_v52  ;;  %v10684_v26 = vpop.permute.xlu0 %10683 }
 0xefa   : > { %v10311_v54 = vmul.f32 1.442695, %v10248_v40 }
 0xefb   : > { %v10210_v18 = vpop.xlane.xlu1 %10209 }
 0xefc   : > { %20180 = vpow2.f32 %v10311_v54  ;;  %v10246_v48 = vsub.f32 %v24216_v61, %v10210_v18 }
 0xefe   : > { %v10307_v29 = vmul.f32 1.442695, %v10246_v48 }
 0xf00   : > { %20182 = vpow2.f32 %v10307_v29 }
 0xf06   : > { %v24382_v22 = vpop.eup %20180 }
 0xf07   : > { %v10406_v56 = vsel %vm3958_vm0, %v24382_v22, 0.0 }
 0xf08   : > { %10407 = vadd.xlane.f32.xlu0 %v10406_v56 }
 0xf0a   : > { %v24386_v19 = vpop.eup %20182 }
 0xf0b   : > { %v10400_v35 = vsel %vm3958_vm0, %v24386_v19, 0.0 }
 0xf0c   : > { %10401 = vadd.xlane.f32.xlu0 %v10400_v35 }
 0xf18   : > { %v10321_v37 = vpop.xlane.xlu0 %10320 }
 0xf1c   : > { %v10315_v49 = vpop.xlane.xlu0 %10314 }
 0xf20   : > { %v10324_v21 = vpop.xlane.xlu1 %10323 }
 0xf21   : > { %20184 = vrcp.f32 %v10324_v21 }
 0xf22   : > { %10772 = vrot.lane.b32.xlu0 %v26620_v8, %s20672_s21  ;;  %20186 = vrcp.f32 %v10315_v49 }
 0xf23   : > { %20188 = vrcp.f32 %v10321_v37 }
 0xf24   : > { %v10318_v61 = vpop.xlane.xlu1 %10317 }
 0xf25   : > { %20190 = vrcp.f32 %v10318_v61 }
 0xf28   : > { %v10333_v24 = vpop.xlane.xlu1 %10332 }
 0xf2b   : > { %v20185_v44 = vpop.eup %20184 }
 0xf2c   : > { %v10327_v55 = vpop.xlane.xlu1 %10326  ;;  %v20187_v39 = vpop.eup %20186  ;;  %v10444_v52 = vmul.f32 %v20185_v44, %v24237_v12 }
 0xf2d   : > { %v20189_v28 = vpop.eup %20188  ;;  %v10441_v54 = vmul.f32 %v20187_v39, %v24232_v42 }
 0xf2e   : > { %v10443_v48 = vmul.f32 %v20189_v28, %v24227_v16 }
 0xf2f   : > { %v20191_v23 = vpop.eup %20190 }
 0xf30   : > { %v10336_v40 = vpop.xlane.xlu1 %10335  ;;  %v10442_v18 = vmul.f32 %v20191_v23, %v24242_v5  ;;  %v10474_v29 = vpack.c.bf16 %v10444_v52, %v10443_v48 }
 0xf31   : > { %20192 = vrcp.f32 %v10336_v40 }
 0xf32   : > { %v10473_v8 = vpack.c.bf16 %v10442_v18, %v10441_v54  ;;  %20194 = vrcp.f32 %v10327_v55 }
 0xf33   : > { %20196 = vrcp.f32 %v10333_v24 }
 0xf34   : > { %17967 = vmatprep.mubr.msk.bf16.mxu0 %vm3958_vm0, %v10473_v8  ;;  %v10330_v56 = vpop.xlane.xlu1 %10329 }
 0xf35   : > { %20198 = vrcp.f32 %v10330_v56  ;;  %17968 = vmatmul.mubr.msk.bf16.vlgmr.msra.gmra.mrb[88].mxu0 %vm3958_vm0, %v10474_v29 }
 0xf36   : > { %17992 = vmatpush3.bf16.msra.mxu0 %v24017_v45  ;;  %v19690_v45 = vld [vmem:[#allocation9 + $0x124] ss:$12 sps:$4 sm:$0xff]  }
 0xf37   : > { %17993 = vmatprep.subr.bf16.mxu0 %v24220_v46 }
 0xf38   : > { %v10345_v42 = vpop.xlane.xlu0 %10344 }
 0xf3a   : > { %17994 = vmatpush3.bf16.msra.mxu0 %v24220_v46 }
 0xf3b   : > { %17995 = vmatprep.subr.bf16.mxu0 %v10684_v26  ;;  %v20193_v16 = vpop.eup %20192 }
 0xf3c   : > { %v10339_v12 = vpop.xlane.xlu0 %10338  ;;  %v20195_v5 = vpop.eup %20194  ;;  %v10448_v21 = vmul.f32 %v20193_v16, %v24256_v59 }
 0xf3d   : > { %20200 = vrcp.f32 %v10339_v12  ;;  %v20197_v35 = vpop.eup %20196  ;;  %v10445_v24 = vmul.f32 %v20195_v5, %v24250_v31 }
 0xf3e   : > { %20202 = vrcp.f32 %v10345_v42  ;;  %17996 = vmatpush3.bf16.msra.mxu0 %v10684_v26  ;;  %v10342_v37 = vpop.xlane.xlu1 %10341  ;;  %v10447_v44 = vmul.f32 %v20197_v35, %v24246_v10 }
 0xf3f   : > { %v20199_v49 = vpop.eup %20198  ;;  %20204 = vrcp.f32 %v10342_v37  ;;  %17997 = vmatprep.subr.bf16.mxu0 %v24378_v30 }
 0xf40   : > { %v10348_v61 = vpop.xlane.xlu0 %10347  ;;  %v10446_v46 = vmul.f32 %v20199_v49, %v24262_v11  ;;  %v10476_v39 = vpack.c.bf16 %v10448_v21, %v10447_v44 }
 0xf41   : > { %20206 = vrcp.f32 %v10348_v61 }
 0xf42   : > { %17998 = vmatpush3.bf16.msra.mxu0 %v24378_v30  ;;  %v10360_v55 = vpop.xlane.xlu1 %10359  ;;  %v10475_v26 = vpack.c.bf16 %v10446_v46, %v10445_v24 }
 0xf43   : > { %11005 = vmatprep.subr.bf16.mxu0 %v19690_v45 }
 0xf44   : > { %v10357_v28 = vpop.xlane.xlu0 %10356  ;;  %17971 = vmatprep.mubr.msk.bf16.mxu0 %vm3958_vm0, %v10475_v26 }
 0xf45   : > { %17972 = vmatmul.mubr.msk.bf16.gmra.mrb[92].mxu0 %vm3958_vm0, %v10476_v39  ;;  %20208 = vrcp.f32 %v10357_v28 }
 0xf46   : > { %v10354_v59 = vpop.xlane.xlu1 %10353 }
 0xf47   : > { %v20201_v23 = vpop.eup %20200  ;;  %20210 = vrcp.f32 %v10354_v59 }
 0xf48   : > { %v20203_v31 = vpop.eup %20202  ;;  %20212 = vrcp.f32 %v10360_v55  ;;  %v10351_v11 = vpop.xlane.xlu0 %10350  ;;  %v10449_v30 = vmul.f32 %v20201_v23, %v24274_v36 }
 0xf49   : > { %v20205_v10 = vpop.eup %20204  ;;  %20214 = vrcp.f32 %v10351_v11  ;;  %v10451_v18 = vmul.f32 %v20203_v31, %v24269_v27 }
 0xf4a   : > { %v10369_v52 = vpop.xlane.xlu1 %10368  ;;  %v10450_v40 = vmul.f32 %v20205_v10, %v24281_v7  ;;  %v19688_v10 = vld [vmem:[#allocation9 + $0x120] ss:$12 sps:$4 sm:$0xff]  }
 0xf4b   : > { %v20207_v54 = vpop.eup %20206 }
 0xf4c   : > { %v10452_v48 = vmul.f32 %v20207_v54, %v24277_v63  ;;  %v10477_v8 = vpack.c.bf16 %v10450_v40, %v10449_v30  ;;  %v19693_v54 = vld [vmem:[#allocation9 + $0x13c] ss:$12 sps:$4 sm:$0xff]  }
 0xf4e   : > { %v10478_v29 = vpack.c.bf16 %v10452_v48, %v10451_v18  ;;  %17983 = vmatprep.mubr.msk.bf16.mxu1 %vm3958_vm0, %v10477_v8  ;;  %v10363_v56 = vpop.xlane.xlu1 %10362  ;;  %v19691_v48 = vld [vmem:[#allocation9 + $0x138] ss:$12 sps:$4 sm:$0xff]  }
 0xf4f   : > { %v20209_v42 = vpop.eup %20208 }
 0xf50   : > { %17984 = vmatmul.mubr.msk.bf16.vlgmr.msra.gmra.mrb[104].mxu1 %vm3958_vm0, %v10478_v29  ;;  %v10455_v7 = vmul.f32 %v20209_v42, %v24287_v50  ;;  %v19696_v29 = vld [vmem:[#allocation9 + $0x154] ss:$12 sps:$4 sm:$0xff]   ;;  %v19694_v42 = vld [vmem:[#allocation9 + $0x150] ss:$12 sps:$4 sm:$0xff]  }
 0xf51   : > { %v20211_v16 = vpop.eup %20210 }
 0xf52   : > { %v20213_v12 = vpop.eup %20212  ;;  %v10381_v5 = vpop.xlane.xlu0 %10380  ;;  %v10454_v27 = vmul.f32 %v20211_v16, %v24301_v4 }
 0xf53   : > { %v10372_v35 = vpop.xlane.xlu1 %10371  ;;  %v20215_v36 = vpop.eup %20214  ;;  %v10456_v63 = vmul.f32 %v20213_v12, %v24291_v6 }
 0xf54   : > { %v10453_v37 = vmul.f32 %v20215_v36, %v24297_v41  ;;  %20216 = vrcp.f32 %v10372_v35 }
 0xf55   : > { %20218 = vrcp.f32 %v10363_v56  ;;  %v10480_v61 = vpack.c.bf16 %v10456_v63, %v10455_v7 }
 0xf56   : > { %v10375_v49 = vpop.xlane.xlu0 %10374  ;;  %v10479_v45 = vpack.c.bf16 %v10454_v27, %v10453_v37  ;;  %20220 = vrcp.f32 %v10369_v52 }
 0xf57   : > { %v10366_v21 = vpop.xlane.xlu1 %10365 }
 0xf58   : > { %20222 = vrcp.f32 %v10366_v21  ;;  %17987 = vmatprep.mubr.msk.bf16.mxu1 %vm3958_vm0, %v10479_v45 }
 0xf59   : > { %17988 = vmatmul.mubr.msk.bf16.gmra.mrb[108].mxu1 %vm3958_vm0, %v10480_v61  ;;  %20224 = vrcp.f32 %v10375_v49 }
 0xf5a   : > { %v10384_v50 = vpop.xlane.xlu0 %10383 }
 0xf5b   : > { %v10378_v24 = vpop.xlane.xlu1 %10377 }
 0xf5c   : > { %20226 = vrcp.f32 %v10378_v24 }
 0xf5d   : > { %20228 = vrcp.f32 %v10384_v50 }
 0xf5e   : > { %v10393_v41 = vpop.xlane.xlu0 %10392  ;;  %v20217_v4 = vpop.eup %20216  ;;  %20230 = vrcp.f32 %v10381_v5  ;;  %v19697_v5 = vld [vmem:[#allocation9 + $0x168] ss:$12 sps:$4 sm:$0xff]  }
 0xf5f   : > { %v20219_v6 = vpop.eup %20218  ;;  %v10460_v55 = vmul.f32 %v20217_v4, %v24320_v47  ;;  %v10387_v26 = vpop.xlane.xlu1 %10386 }
 0xf60   : > { %v20221_v46 = vpop.eup %20220  ;;  %v10457_v28 = vmul.f32 %v20219_v6, %v24315_v2  ;;  %20232 = vrcp.f32 %v10387_v26  ;;  %v19701_v26 = vld [vmem:[#allocation9 + $0x140] ss:$12 sps:$4 sm:$0xff]  }
 0xf61   : > { %v10459_v31 = vmul.f32 %v20221_v46, %v24309_v60 }
 0xf62   : > { %v20223_v44 = vpop.eup %20222  ;;  %v10396_v39 = vpop.xlane.xlu0 %10395 }
 0xf63   : > { %v10458_v59 = vmul.f32 %v20223_v44, %v24330_v17  ;;  %v20225_v23 = vpop.eup %20224  ;;  %v10482_v30 = vpack.c.bf16 %v10460_v55, %v10459_v31  ;;  %v10405_v7 = vpop.xlane.xlu1 %10404  ;;  %v26634_v31 = vld [vmem:[#allocation72_spill] sm:$0xff] }
 0xf64   : > { %v10461_v47 = vmul.f32 %v20225_v23, %v24333_v57  ;;  %v19699_v57 = vld [vmem:[#allocation9 + $0x16c] ss:$12 sps:$4 sm:$0xff]  }
 0xf65   : > { %v10481_v11 = vpack.c.bf16 %v10458_v59, %v10457_v28 }
 0xf66   : > { %v20227_v52 = vpop.eup %20226  ;;  %v10390_v40 = vpop.xlane.xlu0 %10389 }
 0xf67   : > { %v20229_v18 = vpop.eup %20228  ;;  %20234 = vrcp.f32 %v10390_v40  ;;  %17999 = vmatprep.mubr.msk.bf16.mxu0 %vm3958_vm0, %v10481_v11  ;;  %v10462_v2 = vmul.f32 %v20227_v52, %v24341_v51  ;;  %v10399_v37 = vpop.xlane.xlu1 %10398 }
 0xf68   : > { %18000 = vmatmul.mubr.msk.bf16.vlgmr.msra.gmra.mrb[96].mxu0 %vm3958_vm0, %v10482_v30  ;;  %v20231_v17 = vpop.eup %20230  ;;  %v10464_v8 = vmul.f32 %v20229_v18, %v24335_v1  ;;  %20236 = vrcp.f32 %v10396_v39  ;;  %v26635_v18 = vld [vmem:[#allocation88_spill] sm:$0xff] }
 0xf69   : > { %11006 = vmatpush1.bf16.msra.mxu0 %v19688_v10  ;;  %v10483_v60 = vpack.c.bf16 %v10462_v2, %v10461_v47  ;;  %v10463_v56 = vmul.f32 %v20231_v17, %v24323_v53  ;;  %v26633_v53 = vld [vmem:[#allocation87_spill] sm:$0xff]  ;;  %v26636_v47 = vld [vmem:[#allocation74_spill] sm:$0xff]  ;;  %v11889_v2 = vsel %vm3958_vm0, %v26635_v18, 0 }
 0xf6a   : > { %11007 = vmatprep.subr.bf16.mxu0 %v19693_v54  ;;  %v20233_v51 = vpop.eup %20232  ;;  %v11708_v54 = vsel %vm3958_vm0, %v26634_v31, 0  ;;  %v11711_v17 = vsel %vm3958_vm0, %v26636_v47, 0 }
 0xf6b   : > { %18003 = vmatprep.mubr.msk.bf16.mxu0 %vm3958_vm0, %v10483_v60  ;;  %v10484_v16 = vpack.c.bf16 %v10464_v8, %v10463_v56  ;;  %v10465_v1 = vmul.f32 %v20233_v51, %v24350_v9  ;;  %v10775_v49 = vpop.permute.xlu1 %10774  ;;  %v26637_v60 = vld [vmem:[#allocation35_spill] sm:$0xff]  ;;  %v26638_v8 = vld [vmem:[#allocation76_spill] sm:$0xff] }
 0xf6c   : > { %v11892_v51 = vsel %vm3958_vm0, %v26637_v60, 0 }
 0xf6d   : > { %11008 = vmatpush1.bf16.msra.mxu0 %v19691_v48 }
 0xf6e   : > { %11009 = vmatprep.subr.bf16.mxu0 %v19696_v29 }
 0xf6f   : > { %v10777_v9 = vpop.permute.xlu1 %10776 }
 0xf70   : > { %18004 = vmatmul.mubr.msk.bf16.gmra.mrb[100].mxu0 %vm3958_vm0, %v10484_v16 }
 0xf71   : > { %v20235_v12 = vpop.eup %20234  ;;  %11010 = vmatpush1.bf16.msra.mxu0 %v19694_v42  ;;  %11037 = vmatprep.mubr.bf16.mxu0 %v26624_v34 }
 0xf72   : > { %11011 = vmatprep.subr.bf16.mxu0 %v19699_v57  ;;  %v10466_v35 = vmul.f32 %v20235_v12, %v24364_v43  ;;  %v20237_v43 = vpop.eup %20236  ;;  %v11714_v12 = vsel %vm3958_vm0, %v26638_v8, 0 }
 0xf73   : > { %v10779_v50 = vpop.permute.xlu1 %10778  ;;  %v10468_v4 = vmul.f32 %v20237_v43, %v24356_v14  ;;  %v26642_v43 = vld [vmem:[#allocation80_spill] sm:$0xff] }
 0xf74   : > { %v10485_v36 = vpack.c.bf16 %v10466_v35, %v10465_v1  ;;  %v26640_v1 = vld [vmem:[#allocation78_spill] sm:$0xff] }
 0xf75   : > { %11012 = vmatpush1.bf16.msra.mxu0 %v19697_v5  ;;  %v26639_v5 = vld [vmem:[#allocation36_spill] sm:$0xff] }
 0xf76   : > { %19223 = vmatprep.subr.msk.bf16.mxu0 %vm3958_vm0, %v26633_v53  ;;  %18015 = vmatprep.mubr.msk.bf16.mxu1 %vm3958_vm0, %v10485_v36 }
 0xf95   : > { %v10408_v27 = vpop.xlane.xlu0 %10407 }
 0xf99   : > { %v10402_v63 = vpop.xlane.xlu0 %10401 }
 0xf9a   : > { %20238 = vrcp.f32 %v10402_v63  ;;  %v11895_v63 = vsel %vm3958_vm0, %v26639_v5, 0 }
 0xf9b   : > { %20240 = vrcp.f32 %v10393_v41  ;;  %v19700_v41 = vld [vmem:[#allocation9 + $0x128] ss:$12 sps:$4 sm:$0xff]  }
 0xf9c   : > { %20242 = vrcp.f32 %v10399_v37 }
 0xf9d   : > { %v10773_v21 = vpop.permute.xlu0 %10772  ;;  %20244 = vrcp.f32 %v10408_v27 }
 0xf9e   : > { %18007 = vmatprep.subr.bf16.mxu1 %v10773_v21  ;;  %20246 = vrcp.f32 %v10405_v7 }
 0xf9f   : > { %18008 = vmatpush3.bf16.msra.mxu1 %v10773_v21  ;;  %v11717_v21 = vsel %vm3958_vm0, %v26640_v1, 0 }
 0xfa0   : > { %18009 = vmatprep.subr.bf16.mxu1 %v10775_v49 }
 0xfa3   : > { %18010 = vmatpush3.bf16.msra.mxu1 %v10775_v49 }
 0xfa4   : > { %18011 = vmatprep.subr.bf16.mxu1 %v10777_v9  ;;  %v20239_v45 = vpop.eup %20238 }
 0xfa5   : > { %v20241_v61 = vpop.eup %20240  ;;  %v10470_v6 = vmul.f32 %v20239_v45, %v24386_v19  ;;  %v19702_v19 = vld [vmem:[#allocation9 + $0x158] ss:$12 sps:$4 sm:$0xff]  }
 0xfa6   : > { %v20243_v24 = vpop.eup %20242  ;;  %v10467_v46 = vmul.f32 %v20241_v61, %v24348_v20 }
 0xfa7   : > { %18012 = vmatpush3.bf16.msra.mxu1 %v10777_v9  ;;  %v10469_v44 = vmul.f32 %v20243_v24, %v24366_v3  ;;  %v20245_v39 = vpop.eup %20244  ;;  %v19703_v3 = vld [vmem:[#allocation9 + $0x170] ss:$12 sps:$4 sm:$0xff]  }
 0xfa8   : > { %18013 = vmatprep.subr.bf16.mxu1 %v10779_v50  ;;  %v10486_v55 = vpack.c.bf16 %v10468_v4, %v10467_v46  ;;  %v20247_v59 = vpop.eup %20246  ;;  %v10472_v14 = vmul.f32 %v20245_v39, %v24382_v22  ;;  %v26641_v9 = vld [vmem:[#allocation125_spill] sm:$0xff] }
 0xfa9   : > { %v10487_v28 = vpack.c.bf16 %v10470_v6, %v10469_v44  ;;  %v10471_v20 = vmul.f32 %v20247_v59, %v24358_v58  ;;  %v11886_v58 = vsel %vm3958_vm0, %v26633_v53, 0 }
 0xfab   : > { %18014 = vmatpush3.bf16.msra.mxu1 %v10779_v50  ;;  %v10488_v23 = vpack.c.bf16 %v10472_v14, %v10471_v20 }
 0xfac   : > { %18023 = vmatprep.subr.bf16.mxu1 %v19700_v41 }
 0xfae   : > { %18016 = vmatmul.mubr.msk.bf16.vlgmr.msra.gmra.mrb[112].mxu1 %vm3958_vm0, %v10486_v55 }
 0xfaf   : > { %18019 = vmatprep.mubr.msk.bf16.mxu1 %vm3958_vm0, %v10487_v28  ;;  %18024 = vmatpush3.bf16.msra.mxu1 %v19700_v41 }
 0xfb0   : > { %18025 = vmatprep.subr.bf16.mxu1 %v19701_v26 }
 0xfb3   : > { %18026 = vmatpush3.bf16.msra.mxu1 %v19701_v26 }
 0xfb4   : > { %18027 = vmatprep.subr.bf16.mxu1 %v19702_v19 }
 0xfb6   : > { %18020 = vmatmul.mubr.msk.bf16.gmra.mrb[116].mxu1 %vm3958_vm0, %v10488_v23 }
 0xfb7   : > { %18028 = vmatpush3.bf16.msra.mxu1 %v19702_v19 }
 0xfb8   : > { %18029 = vmatprep.subr.bf16.mxu1 %v19703_v3 }
 0xfbb   : > { %18030 = vmatpush3.bf16.msra.mxu1 %v19703_v3 }
 0xfbc   : > { %19215 = vmatprep.subr.msk.bf16.mxu1 %vm3958_vm0, %v26634_v31 }
0x1008   : > { %v17969_v11 = vpop.f32.mrb[88].mxu0 }
0x1009   : > { %v10551_v10 = vpop.f32.mrb[89].mxu0 }
0x100a   : > { %v17970_v52 = vpop.f32.mrb[90].mxu0 }
0x100b   : > { %v10862_v22 = vpack.c.bf16 %v17970_v52, %v17969_v11  ;;  %v10554_v30 = vpop.f32.mrb[91].mxu0 }
0x100c   : > { %v10861_v40 = vpack.c.bf16 %v10554_v30, %v10551_v10 }
0x100e   : > { %16514 = vmatmul.mubr.msk.bf16.vlgmr.msra.gmra.mrb[224].mxu0 %vm3958_vm0, %v10861_v40  ;;  %18031 = vmatprep.mubr.msk.bf16.mxu1 %vm3958_vm0, %v10861_v40 }
0x100f   : > { %18096 = vmatpush3.bf16.xpose.msra.mxu0 %v11886_v58  ;;  %18032 = vmatmul.mubr.msk.bf16.vlgmr.msra.gmra.mrb[224].mxu1 %vm3958_vm0, %v10862_v22 }
0x1010   : > { %18064 = vmatpush3.bf16.xpose.msra.mxu1 %v11708_v54  ;;  %19224 = vmatprep.subr.msk.bf16.mxu0 %vm3958_vm0, %v26635_v18 }
0x1011   : > { %19216 = vmatprep.subr.msk.bf16.mxu1 %vm3958_vm0, %v26636_v47  ;;  %11047 = vmatprep.mubr.bf16.mxu0 %v26624_v34 }
0x1016   : > { %16515 = vmatmul.mubr.msk.bf16.gmra.mrb[228].mxu0 %vm3958_vm0, %v10862_v22 }
0x1017   : > { %18098 = vmatpush3.bf16.xpose.msra.mxu0 %v11889_v2  ;;  %11057 = vmatprep.mubr.bf16.mxu0 %v26624_v34 }
0x1018   : > { %18066 = vmatpush3.bf16.xpose.msra.mxu1 %v11711_v17  ;;  %19225 = vmatprep.subr.msk.bf16.mxu0 %vm3958_vm0, %v26637_v60  ;;  %v17973_v48 = vpop.f32.mrb[92].mxu0 }
0x1019   : > { %19217 = vmatprep.subr.msk.bf16.mxu1 %vm3958_vm0, %v26638_v8  ;;  %v10567_v29 = vpop.f32.mrb[93].mxu0 }
0x101a   : > { %v17974_v56 = vpop.f32.mrb[94].mxu0 }
0x101b   : > { %v10864_v42 = vpack.c.bf16 %v17974_v56, %v17973_v48  ;;  %v10570_v16 = vpop.f32.mrb[95].mxu0  ;;  %v26644_v56 = vld [vmem:[#allocation38_spill] sm:$0xff] }
0x101c   : > { %v10863_v57 = vpack.c.bf16 %v10570_v16, %v10567_v29  ;;  %v26643_v29 = vld [vmem:[#allocation37_spill] sm:$0xff]  ;;  %v26645_v16 = vld [vmem:[#allocation14_spill] sm:$0xff] }
0x101e   : > { %16516 = vmatmul.mubr.msk.bf16.gmra.mrb[232].mxu0 %vm3958_vm0, %v10863_v57  ;;  %18035 = vmatprep.mubr.msk.bf16.mxu1 %vm3958_vm0, %v10863_v57  ;;  %v26646_v57 = vld [vmem:[#allocation81_spill] sm:$0xff] }
0x101f   : > { %18100 = vmatpush3.bf16.xpose.msra.mxu0 %v11892_v51  ;;  %18036 = vmatmul.mubr.msk.bf16.gmra.mrb[228].mxu1 %vm3958_vm0, %v10864_v42  ;;  %v26647_v51 = vld [vmem:[#allocation54_spill] sm:$0xff] }
0x1020   : > { %18068 = vmatpush3.bf16.xpose.msra.mxu1 %v11714_v12  ;;  %19226 = vmatprep.subr.msk.bf16.mxu0 %vm3958_vm0, %v26639_v5  ;;  %v11800_v12 = vsel %vm3958_vm0, %v26646_v57, 0 }
0x1021   : > { %19218 = vmatprep.subr.msk.bf16.mxu1 %vm3958_vm0, %v26640_v1  ;;  %11067 = vmatprep.mubr.bf16.mxu0 %v26624_v34 }
0x1023   : > { %v17985_v35 = vpop.f32.mrb[104].mxu1 }
0x1024   : > { %v10644_v36 = vpop.f32.mrb[105].mxu1 }
0x1025   : > { %v17986_v7 = vpop.f32.mrb[106].mxu1 }
0x1026   : > { %v10866_v37 = vpack.c.bf16 %v17986_v7, %v17985_v35  ;;  %v10647_v27 = vpop.f32.mrb[107].mxu1  ;;  %16517 = vmatmul.mubr.msk.bf16.gmra.mrb[236].mxu0 %vm3958_vm0, %v10864_v42  ;;  %v11797_v42 = vsel %vm3958_vm0, %v26642_v43, 0  ;;  %v26648_v35 = vld [vmem:[#allocation22_spill] sm:$0xff]  ;;  %v26650_v7 = vld [vmem:[#allocation83_spill] sm:$0xff] }
0x1027   : > { %v10865_v49 = vpack.c.bf16 %v10647_v27, %v10644_v36  ;;  %18102 = vmatpush3.bf16.xpose.msra.mxu0 %v11895_v63  ;;  %11077 = vmatprep.mubr.bf16.mxu0 %v26624_v34  ;;  %v26649_v36 = vld [vmem:[#allocation16_spill] sm:$0xff]  ;;  %v11803_v27 = vsel %vm3958_vm0, %v26650_v7, 0 }
0x1028   : > { %18070 = vmatpush3.bf16.xpose.msra.mxu1 %v11717_v21  ;;  %18127 = vmatprep.subr.bf16.mxu0 %v26641_v9  ;;  %v26652_v63 = vld [vmem:[#allocation60_spill] sm:$0xff]  ;;  %v26654_v21 = vld [vmem:[#allocation85_spill] sm:$0xff] }
0x1029   : > { %18039 = vmatprep.mubr.msk.bf16.mxu1 %vm3958_vm0, %v10865_v49  ;;  %19219 = vmatprep.subr.msk.bf16.mxu1 %vm3958_vm0, %v26642_v43 }
0x102a   : > { %18040 = vmatmul.mubr.msk.bf16.gmra.mrb[232].mxu1 %vm3958_vm0, %v10866_v37 }
0x102c   : > { %v17989_v45 = vpop.f32.mrb[108].mxu1 }
0x102d   : > { %v10660_v61 = vpop.f32.mrb[109].mxu1 }
0x102e   : > { %v17990_v50 = vpop.f32.mrb[110].mxu1  ;;  %16518 = vmatmul.mubr.msk.bf16.gmra.mrb[240].mxu0 %vm3958_vm0, %v10865_v49  ;;  %v26653_v49 = vld [vmem:[#allocation124_spill] sm:$0xff] }
0x102f   : > { %v10868_v24 = vpack.c.bf16 %v17990_v50, %v17989_v45  ;;  %v10663_v4 = vpop.f32.mrb[111].mxu1  ;;  %11087 = vmatprep.mubr.bf16.mxu0 %v26624_v34  ;;  %v26655_v45 = vld [vmem:[#allocation127_spill] sm:$0xff]  ;;  %v11806_v50 = vsel %vm3958_vm0, %v26654_v21, 0 }
0x1030   : > { %v10867_v41 = vpack.c.bf16 %v10663_v4, %v10660_v61  ;;  %v26656_v61 = vld [vmem:[#allocation61_spill] sm:$0xff]  ;;  %v26658_v4 = vld [vmem:[#allocation59_spill] sm:$0xff] }
0x1032   : > { %18043 = vmatprep.mubr.msk.bf16.mxu1 %vm3958_vm0, %v10867_v41 }
0x1033   : > { %18044 = vmatmul.mubr.msk.bf16.gmra.mrb[236].mxu1 %vm3958_vm0, %v10868_v24 }
0x1036   : > { %16519 = vmatmul.mubr.msk.bf16.gmra.mrb[244].mxu0 %vm3958_vm0, %v10866_v37  ;;  %v26651_v37 = vld [vmem:[#allocation24_spill] sm:$0xff] }
0x1037   : > { %11097 = vmatprep.mubr.bf16.mxu0 %v26624_v34 }
0x103b   : > { %v18001_v6 = vpop.f32.mrb[96].mxu0 }
0x103c   : > { %v10737_v46 = vpop.f32.mrb[97].mxu0 }
0x103d   : > { %v18002_v44 = vpop.f32.mrb[98].mxu0 }
0x103e   : > { %v10870_v55 = vpack.c.bf16 %v18002_v44, %v18001_v6  ;;  %v10740_v26 = vpop.f32.mrb[99].mxu0  ;;  %16520 = vmatmul.mubr.msk.bf16.gmra.mrb[248].mxu0 %vm3958_vm0, %v10867_v41  ;;  %v26659_v41 = vld [vmem:[#allocation133_spill] sm:$0xff]  ;;  %v26661_v44 = vld [vmem:[#allocation18_spill] sm:$0xff] }
0x103f   : > { %v10869_v39 = vpack.c.bf16 %v10740_v26, %v10737_v46  ;;  %11107 = vmatprep.mubr.bf16.mxu0 %v26624_v34  ;;  %v26660_v6 = vld [vmem:[#allocation17_spill] sm:$0xff]  ;;  %v11975_v46 = vsel %vm3958_vm0, %v26658_v4, 0  ;;  %v26663_v26 = vld [vmem:[#allocation20_spill] sm:$0xff] }
0x1041   : > { %18047 = vmatprep.mubr.msk.bf16.mxu1 %vm3958_vm0, %v10869_v39 }
0x1042   : > { %18048 = vmatmul.mubr.msk.bf16.gmra.mrb[240].mxu1 %vm3958_vm0, %v10870_v55 }
0x1043   : > { %v18005_v28 = vpop.f32.mrb[100].mxu0 }
0x1044   : > { %v10753_v59 = vpop.f32.mrb[101].mxu0 }
0x1045   : > { %v18006_v14 = vpop.f32.mrb[102].mxu0 }
0x1046   : > { %v10872_v19 = vpack.c.bf16 %v18006_v14, %v18005_v28  ;;  %v10756_v20 = vpop.f32.mrb[103].mxu0  ;;  %16521 = vmatmul.mubr.msk.bf16.gmra.mrb[252].mxu0 %vm3958_vm0, %v10868_v24  ;;  %v26657_v24 = vld [vmem:[#allocation126_spill] sm:$0xff]  ;;  %v26664_v28 = vld [vmem:[#allocation63_spill] sm:$0xff] }
0x1047   : > { %v10871_v23 = vpack.c.bf16 %v10756_v20, %v10753_v59  ;;  %11117 = vmatprep.mubr.bf16.mxu0 %v26624_v34  ;;  %v26665_v59 = vld [vmem:[#allocation94_spill] sm:$0xff] }
0x1048   : > { %v11981_v14 = vsel %vm3958_vm0, %v26665_v59, 0 }
0x1049   : > { %18051 = vmatprep.mubr.msk.bf16.mxu1 %vm3958_vm0, %v10871_v23 }
0x104a   : > { %18052 = vmatmul.mubr.msk.bf16.gmra.mrb[244].mxu1 %vm3958_vm0, %v10872_v19 }
0x104e   : > { %16522 = vmatmul.mubr.msk.bf16.gmra.mrb[0].mxu0 %vm3958_vm0, %v10869_v39 }
0x104f   : > { %11127 = vmatprep.mubr.bf16.mxu0 %v26624_v34 }
0x1056   : > { %16523 = vmatmul.mubr.msk.bf16.gmra.mrb[4].mxu0 %vm3958_vm0, %v10870_v55  ;;  %v26662_v55 = vld [vmem:[#allocation92_spill] sm:$0xff] }
0x1057   : > { %11137 = vmatprep.mubr.bf16.mxu0 %v26624_v34  ;;  %v11978_v39 = vsel %vm3958_vm0, %v26662_v55, 0 }
0x105e   : > { %16524 = vmatmul.mubr.msk.bf16.gmra.mrb[8].mxu0 %vm3958_vm0, %v10871_v23  ;;  %v26667_v23 = vld [vmem:[#allocation129_spill] sm:$0xff] }
0x105f   : > { %11147 = vmatprep.mubr.bf16.mxu0 %v26624_v34 }
0x1066   : > { %16525 = vmatmul.mubr.msk.bf16.gmra.mrb[12].mxu0 %vm3958_vm0, %v10872_v19  ;;  %v26666_v19 = vld [vmem:[#allocation98_spill] sm:$0xff] }
0x1067   : > { %11157 = vmatprep.mubr.bf16.mxu0 %v26624_v34  ;;  %v11984_v20 = vsel %vm3958_vm0, %v26666_v19, 0 }
0x1081   : > { %v18017_v3 = vpop.f32.mrb[112].mxu1 }
0x1082   : > { %v10830_v11 = vpop.f32.mrb[113].mxu1 }
0x1083   : > { %v18018_v10 = vpop.f32.mrb[114].mxu1 }
0x1084   : > { %v10874_v52 = vpack.c.bf16 %v18018_v10, %v18017_v3  ;;  %v10833_v22 = vpop.f32.mrb[115].mxu1  ;;  %v26668_v3 = vld [vmem:[#allocation65_spill] sm:$0xff]  ;;  %v26670_v10 = vld [vmem:[#allocation128_spill] sm:$0xff] }
0x1085   : > { %v10873_v30 = vpack.c.bf16 %v10833_v22, %v10830_v11  ;;  %v26669_v11 = vld [vmem:[#allocation67_spill] sm:$0xff]  ;;  %v26672_v22 = vld [vmem:[#allocation69_spill] sm:$0xff] }
0x1087   : > { %16526 = vmatmul.mubr.msk.bf16.gmra.mrb[16].mxu0 %vm3958_vm0, %v10873_v30  ;;  %18055 = vmatprep.mubr.msk.bf16.mxu1 %vm3958_vm0, %v10873_v30  ;;  %v26673_v30 = vld [vmem:[#allocation130_spill] sm:$0xff] }
0x1088   : > { %18056 = vmatmul.mubr.msk.bf16.gmra.mrb[248].mxu1 %vm3958_vm0, %v10874_v52  ;;  %11167 = vmatprep.mubr.bf16.mxu0 %v26624_v34 }
0x1089   : > { %v18021_v40 = vpop.f32.mrb[116].mxu1 }
0x108a   : > { %v10846_v58 = vpop.f32.mrb[117].mxu1 }
0x108b   : > { %v18022_v54 = vpop.f32.mrb[118].mxu1 }
0x108c   : > { %v10876_v2 = vpack.c.bf16 %v18022_v54, %v18021_v40  ;;  %v10849_v17 = vpop.f32.mrb[119].mxu1  ;;  %v26674_v40 = vld [vmem:[#allocation137_spill] sm:$0xff] }
0x108d   : > { %v10875_v48 = vpack.c.bf16 %v10849_v17, %v10846_v58 }
0x108f   : > { %16527 = vmatmul.mubr.msk.bf16.gmra.mrb[20].mxu0 %vm3958_vm0, %v10874_v52  ;;  %18059 = vmatprep.mubr.msk.bf16.mxu1 %vm3958_vm0, %v10875_v48  ;;  %v26671_v52 = vld [vmem:[#allocation131_spill] sm:$0xff] }
0x1090   : > { %18060 = vmatmul.mubr.msk.bf16.gmra.mrb[252].mxu1 %vm3958_vm0, %v10876_v2  ;;  %11177 = vmatprep.mubr.bf16.mxu0 %v26624_v34 }
0x1091   : > { %18071 = vmatprep.mubr.msk.bf16.mxu1 %vm3958_vm0, %v26643_v29 }
0x1097   : > { %16528 = vmatmul.mubr.msk.bf16.gmra.mrb[24].mxu0 %vm3958_vm0, %v10875_v48 }
0x1098   : > { %18072 = vmatmul.mubr.msk.bf16.vlgmr.msra.gmra.mrb[120].mxu1 %vm3958_vm0, %v26644_v56  ;;  %11187 = vmatprep.mubr.bf16.mxu0 %v26624_v34 }
0x1099   : > { %18080 = vmatpush3.bf16.xpose.msra.mxu1 %v11797_v42  ;;  %18075 = vmatprep.mubr.msk.bf16.mxu1 %vm3958_vm0, %v26645_v16 }
0x109a   : > { %19220 = vmatprep.subr.msk.bf16.mxu1 %vm3958_vm0, %v26646_v57 }
0x109f   : > { %16529 = vmatmul.mubr.msk.bf16.gmra.mrb[32].mxu0 %vm3958_vm0, %v10876_v2 }
0x10a0   : > { %18076 = vmatmul.mubr.msk.bf16.gmra.mrb[124].mxu1 %vm3958_vm0, %v26647_v51  ;;  %18103 = vmatprep.mubr.msk.bf16.mxu0 %vm3958_vm0, %v26648_v35 }
0x10a1   : > { %18082 = vmatpush3.bf16.xpose.msra.mxu1 %v11800_v12  ;;  %18087 = vmatprep.mubr.msk.bf16.mxu1 %vm3958_vm0, %v26649_v36 }
0x10a2   : > { %19221 = vmatprep.subr.msk.bf16.mxu1 %vm3958_vm0, %v26650_v7 }
0x10a7   : > { %18104 = vmatmul.mubr.msk.bf16.vlgmr.msra.gmra.mrb[104].mxu0 %vm3958_vm0, %v26651_v37 }
0x10a8   : > { %18128 = vmatpush3.bf16.msra.mxu0 %v26641_v9  ;;  %18107 = vmatprep.mubr.msk.bf16.mxu0 %vm3958_vm0, %v26652_v63 }
0x10a9   : > { %18084 = vmatpush3.bf16.xpose.msra.mxu1 %v11803_v27  ;;  %18129 = vmatprep.subr.bf16.mxu0 %v26653_v49 }
0x10aa   : > { %19222 = vmatprep.subr.msk.bf16.mxu1 %vm3958_vm0, %v26654_v21 }
0x10ac   : > { %18130 = vmatpush3.bf16.msra.mxu0 %v26653_v49 }
0x10ad   : > { %18131 = vmatprep.subr.bf16.mxu0 %v26655_v45 }
0x10af   : > { %18108 = vmatmul.mubr.msk.bf16.gmra.mrb[108].mxu0 %vm3958_vm0, %v26656_v61 }
0x10b0   : > { %18132 = vmatpush3.bf16.msra.mxu0 %v26655_v45 }
0x10b1   : > { %18086 = vmatpush3.bf16.xpose.msra.mxu1 %v11806_v50  ;;  %18133 = vmatprep.subr.bf16.mxu0 %v26657_v24 }
0x10b2   : > { %19227 = vmatprep.subr.msk.bf16.mxu1 %vm3958_vm0, %v26658_v4 }
0x10b4   : > { %18134 = vmatpush3.bf16.msra.mxu0 %v26657_v24 }
0x10b5   : > { %18159 = vmatprep.subr.bf16.mxu0 %v26659_v41 }
0x10b8   : > { %18088 = vmatmul.mubr.msk.bf16.vlgmr.msra.gmra.mrb[128].mxu1 %vm3958_vm0, %v26660_v6 }
0x10b9   : > { %18091 = vmatprep.mubr.msk.bf16.mxu1 %vm3958_vm0, %v26661_v44  ;;  %18112 = vmatpush3.bf16.xpose.msra.mxu1 %v11975_v46 }
0x10ba   : > { %19228 = vmatprep.subr.msk.bf16.mxu1 %vm3958_vm0, %v26662_v55 }
0x10c0   : > { %18092 = vmatmul.mubr.msk.bf16.gmra.mrb[132].mxu1 %vm3958_vm0, %v26663_v26 }
0x10c1   : > { %18114 = vmatpush3.bf16.xpose.msra.mxu1 %v11978_v39  ;;  %18119 = vmatprep.mubr.msk.bf16.mxu1 %vm3958_vm0, %v26664_v28 }
0x10c2   : > { %19229 = vmatprep.subr.msk.bf16.mxu1 %vm3958_vm0, %v26665_v59 }
0x10c9   : > { %18116 = vmatpush3.bf16.xpose.msra.mxu1 %v11981_v14 }
0x10ca   : > { %19230 = vmatprep.subr.msk.bf16.mxu1 %vm3958_vm0, %v26666_v19 }
0x10d1   : > { %18118 = vmatpush3.bf16.xpose.msra.mxu1 %v11984_v20 }
0x10d2   : > { %18143 = vmatprep.subr.bf16.mxu1 %v26667_v23 }
0x10d8   : > { %18120 = vmatmul.mubr.msk.bf16.vlgmr.msra.gmra.mrb[136].mxu1 %vm3958_vm0, %v26668_v3 }
0x10d9   : > { %18123 = vmatprep.mubr.msk.bf16.mxu1 %vm3958_vm0, %v26669_v11  ;;  %18144 = vmatpush3.bf16.msra.mxu1 %v26667_v23 }
0x10da   : > { %18145 = vmatprep.subr.bf16.mxu1 %v26670_v10 }
0x10dd   : > { %18146 = vmatpush3.bf16.msra.mxu1 %v26670_v10 }
0x10de   : > { %18147 = vmatprep.subr.bf16.mxu1 %v26671_v52 }
0x10e0   : > { %18124 = vmatmul.mubr.msk.bf16.gmra.mrb[140].mxu1 %vm3958_vm0, %v26672_v22 }
0x10e1   : > { %18148 = vmatpush3.bf16.msra.mxu1 %v26671_v52 }
0x10e2   : > { %18149 = vmatprep.subr.bf16.mxu1 %v26673_v30 }
0x10e5   : > { %18150 = vmatpush3.bf16.msra.mxu1 %v26673_v30 }
0x10e6   : > { %18175 = vmatprep.subr.bf16.mxu1 %v26674_v40 }
0x116b   : > { %v18073_v58 = vpop.f32.mrb[120].mxu1 }
0x116c   : > { %v11753_v54 = vpop.f32.mrb[121].mxu1  ;;  %v24615_v12 = vsel %vm22061_vm1, %v18073_v58, -1e+30 }
0x116d   : > { %v24609_v2 = vsel %vm22066_vm2, %v11753_v54, -1e+30  ;;  %v18074_v17 = vpop.f32.mrb[122].mxu1  ;;  %v12089_v46 = vsel %vm3958_vm0, %v24615_v12, -inf }
0x116e   : > { %v12083_v48 = vsel %vm3958_vm0, %v24609_v2, -inf  ;;  %v11756_v42 = vpop.f32.mrb[123].mxu1  ;;  %v24627_v39 = vsel %vm22074_vm3, %v18074_v17, -1e+30 }
0x116f   : > { %v24619_v27 = vsel %vm22084_vm4, %v11756_v42, -1e+30  ;;  %12084 = vmax.xlane.f32.xlu0 %v12083_v48  ;;  %v12092_v54 = vsel %vm3958_vm0, %v24627_v39, -inf }
0x1170   : > { %v12086_v50 = vsel %vm3958_vm0, %v24619_v27, -inf }
0x1171   : > { %12087 = vmax.xlane.f32.xlu1 %v12086_v50 }
0x1173   : > { %12090 = vmax.xlane.f32.xlu0 %v12089_v46  ;;  %v18077_v14 = vpop.f32.mrb[124].mxu1 }
0x1174   : > { %v11769_v20 = vpop.f32.mrb[125].mxu1 }
0x1175   : > { %v18078_v58 = vpop.f32.mrb[126].mxu1  ;;  %v24633_v48 = vsel %vm22105_vm5, %v11769_v20, -1e+30  ;;  %v24649_v20 = vsel %vm22114_vm6, %v18077_v14, -1e+30 }
0x1176   : > { %v11772_v42 = vpop.f32.mrb[127].mxu1  ;;  %v24643_v46 = vsel %vm22132_vm8, %v18078_v58, -1e+30  ;;  %v12095_v34 = vsel %vm3958_vm0, %v24633_v48, -inf  ;;  %v12101_v58 = vsel %vm3958_vm0, %v24649_v20, -inf }
0x1177   : > { %v24637_v50 = vsel %vm22118_vm7, %v11772_v42, -1e+30  ;;  %12093 = vmax.xlane.f32.xlu0 %v12092_v54  ;;  %v12104_v54 = vsel %vm3958_vm0, %v24643_v46, -inf }
0x1178   : > { %v12098_v17 = vsel %vm3958_vm0, %v24637_v50, -inf }
0x1179   : > { %12099 = vmax.xlane.f32.xlu1 %v12098_v17 }
0x117a   : > { %v18105_v40 = vpop.f32.mrb[104].mxu0 }
0x117b   : > { %12096 = vmax.xlane.f32.xlu0 %v12095_v34  ;;  %v11931_v42 = vpop.f32.mrb[105].mxu0 }
0x117c   : > { %v18106_v30 = vpop.f32.mrb[106].mxu0 }
0x117d   : > { %12105 = vmax.xlane.f32.xlu1 %v12104_v54  ;;  %v11934_v52 = vpop.f32.mrb[107].mxu0 }
0x117f   : > { %12102 = vmax.xlane.f32.xlu0 %v12101_v58 }
0x1182   : > { %v18109_v17 = vpop.f32.mrb[108].mxu0 }
0x1183   : > { %v11947_v10 = vpop.f32.mrb[109].mxu0 }
0x1184   : > { %v18110_v23 = vpop.f32.mrb[110].mxu0 }
0x1185   : > { %v11950_v41 = vpop.f32.mrb[111].mxu0 }
0x118b   : > { %v18089_v24 = vpop.f32.mrb[128].mxu1 }
0x118c   : > { %v11842_v49 = vpop.f32.mrb[129].mxu1  ;;  %v24663_v22 = vsel %vm22061_vm1, %v18089_v24, -1e+30 }
0x118d   : > { %v24657_v34 = vsel %vm22066_vm2, %v11842_v49, -1e+30  ;;  %v18090_v14 = vpop.f32.mrb[130].mxu1  ;;  %v12113_v3 = vsel %vm3958_vm0, %v24663_v22, -inf }
0x118e   : > { %v12107_v45 = vsel %vm3958_vm0, %v24657_v34, -inf  ;;  %v11845_v54 = vpop.f32.mrb[131].mxu1  ;;  %v24673_v49 = vsel %vm22074_vm3, %v18090_v14, -1e+30 }
0x118f   : > { %v24667_v58 = vsel %vm22084_vm4, %v11845_v54, -1e+30  ;;  %12108 = vmax.xlane.f32.xlu0 %v12107_v45  ;;  %v12116_v24 = vsel %vm3958_vm0, %v24673_v49, -inf }
0x1190   : > { %v12110_v9 = vsel %vm3958_vm0, %v24667_v58, -inf }
0x1191   : > { %12111 = vmax.xlane.f32.xlu1 %v12110_v9 }
0x1193   : > { %12114 = vmax.xlane.f32.xlu0 %v12113_v3  ;;  %v18093_v11 = vpop.f32.mrb[132].mxu1 }
0x1194   : > { %v11858_v19 = vpop.f32.mrb[133].mxu1  ;;  %v24687_v9 = vsel %vm22114_vm6, %v18093_v11, -1e+30  ;;  %v24703_v11 = vsel %vm22066_vm2, %v11931_v42, -1e+30 }
0x1195   : > { %v24681_v45 = vsel %vm22105_vm5, %v11858_v19, -1e+30  ;;  %12117 = vmax.xlane.f32.xlu1 %v12116_v24  ;;  %v18094_v54 = vpop.f32.mrb[134].mxu1  ;;  %v12125_v24 = vsel %vm3958_vm0, %v24687_v9, -inf }
0x1196   : > { %v12119_v14 = vsel %vm3958_vm0, %v24681_v45, -inf  ;;  %v11861_v28 = vpop.f32.mrb[135].mxu1  ;;  %v24697_v19 = vsel %vm22132_vm8, %v18094_v54, -1e+30  ;;  %v12131_v54 = vsel %vm3958_vm0, %v24703_v11, -inf }
0x1197   : > { %v24691_v3 = vsel %vm22118_vm7, %v11861_v28, -1e+30  ;;  %12120 = vmax.xlane.f32.xlu0 %v12119_v14  ;;  %v12128_v28 = vsel %vm3958_vm0, %v24697_v19, -inf  ;;  %v24709_v14 = vsel %vm22084_vm4, %v11934_v52, -1e+30 }
0x1198   : > { %v12122_v61 = vsel %vm3958_vm0, %v24691_v3, -inf  ;;  %v12134_v42 = vsel %vm3958_vm0, %v24709_v14, -inf }
0x1199   : > { %12123 = vmax.xlane.f32.xlu1 %v12122_v61  ;;  %v24715_v61 = vsel %vm22061_vm1, %v18105_v40, -1e+30 }
0x119a   : > { %v12137_v52 = vsel %vm3958_vm0, %v24715_v61, -inf }
0x119b   : > { %12126 = vmax.xlane.f32.xlu0 %v12125_v24  ;;  %v24721_v24 = vsel %vm22074_vm3, %v18106_v30, -1e+30 }
0x119c   : > { %v12140_v40 = vsel %vm3958_vm0, %v24721_v24, -inf }
0x119d   : > { %12129 = vmax.xlane.f32.xlu1 %v12128_v28  ;;  %v24727_v28 = vsel %vm22105_vm5, %v11947_v10, -1e+30 }
0x119e   : > { %v12143_v30 = vsel %vm3958_vm0, %v24727_v28, -inf }
0x119f   : > { %12132 = vmax.xlane.f32.xlu0 %v12131_v54  ;;  %v24733_v54 = vsel %vm22118_vm7, %v11950_v41, -1e+30 }
0x11a0   : > { %v12146_v10 = vsel %vm3958_vm0, %v24733_v54, -inf }
0x11a1   : > { %12135 = vmax.xlane.f32.xlu1 %v12134_v42  ;;  %v24739_v42 = vsel %vm22114_vm6, %v18109_v17, -1e+30 }
0x11a2   : > { %v12149_v41 = vsel %vm3958_vm0, %v24739_v42, -inf }
0x11a3   : > { %12138 = vmax.xlane.f32.xlu0 %v12137_v52  ;;  %v24745_v52 = vsel %vm22132_vm8, %v18110_v23, -1e+30 }
0x11a4   : > { %v12152_v59 = vsel %vm3958_vm0, %v24745_v52, -inf }
0x11a5   : > { %12141 = vmax.xlane.f32.xlu1 %v12140_v40 }
0x11a7   : > { %12144 = vmax.xlane.f32.xlu0 %v12143_v30 }
0x11a9   : > { %12147 = vmax.xlane.f32.xlu1 %v12146_v10 }
0x11ab   : > { %v18121_v40 = vpop.f32.mrb[136].mxu1  ;;  %12150 = vmax.xlane.f32.xlu0 %v12149_v41 }
0x11ac   : > { %v12020_v55 = vpop.f32.mrb[137].mxu1  ;;  %v24759_v10 = vsel %vm22061_vm1, %v18121_v40, -1e+30 }
0x11ad   : > { %v24753_v17 = vsel %vm22066_vm2, %v12020_v55, -1e+30  ;;  %v18122_v30 = vpop.f32.mrb[138].mxu1  ;;  %12153 = vmax.xlane.f32.xlu1 %v12152_v59  ;;  %v12161_v59 = vsel %vm3958_vm0, %v24759_v10, -inf }
0x11ae   : > { %v12155_v23 = vsel %vm3958_vm0, %v24753_v17, -inf  ;;  %v12023_v63 = vpop.f32.mrb[139].mxu1  ;;  %v24769_v55 = vsel %vm22074_vm3, %v18122_v30, -1e+30 }
0x11af   : > { %v24763_v41 = vsel %vm22084_vm4, %v12023_v63, -1e+30  ;;  %12156 = vmax.xlane.f32.xlu0 %v12155_v23  ;;  %v12164_v40 = vsel %vm3958_vm0, %v24769_v55, -inf }
0x11b0   : > { %v12158_v13 = vsel %vm3958_vm0, %v24763_v41, -inf }
0x11b1   : > { %12159 = vmax.xlane.f32.xlu1 %v12158_v13 }
0x11b3   : > { %v18125_v37 = vpop.f32.mrb[140].mxu1  ;;  %12162 = vmax.xlane.f32.xlu0 %v12161_v59 }
0x11b4   : > { %v12036_v0 = vpop.f32.mrb[141].mxu1  ;;  %v24783_v13 = vsel %vm22114_vm6, %v18125_v37, -1e+30 }
0x11b5   : > { %v24777_v63 = vsel %vm22105_vm5, %v12036_v0, -1e+30  ;;  %v18126_v23 = vpop.f32.mrb[142].mxu1  ;;  %12165 = vmax.xlane.f32.xlu1 %v12164_v40  ;;  %v12173_v40 = vsel %vm3958_vm0, %v24783_v13, -inf }
0x11b6   : > { %v12167_v30 = vsel %vm3958_vm0, %v24777_v63, -inf  ;;  %v12039_v33 = vpop.f32.mrb[143].mxu1  ;;  %v24793_v0 = vsel %vm22132_vm8, %v18126_v23, -1e+30 }
0x11b7   : > { %v24787_v59 = vsel %vm22118_vm7, %v12039_v33, -1e+30  ;;  %12168 = vmax.xlane.f32.xlu0 %v12167_v30  ;;  %v12176_v37 = vsel %vm3958_vm0, %v24793_v0, -inf }
0x11b8   : > { %v12170_v32 = vsel %vm3958_vm0, %v24787_v59, -inf }
0x11b9   : > { %12171 = vmax.xlane.f32.xlu1 %v12170_v32 }
0x11bb   : > { %12174 = vmax.xlane.f32.xlu0 %v12173_v40 }
0x11bd   : > { %12177 = vmax.xlane.f32.xlu1 %v12176_v37 }
0x11fc   : > { %v12085_v38 = vpop.xlane.xlu0 %12084 }
0x11fd   : > { %v12179_v33 = vsub.f32 %v24609_v2, %v12085_v38 }
0x11fe   : > { %v12088_v30 = vpop.xlane.xlu1 %12087 }
0x11ff   : > { %v12211_v15 = vmul.f32 1.442695, %v12179_v33  ;;  %v12180_v25 = vsub.f32 %v24619_v27, %v12088_v30 }
0x1200   : > { %v12091_v4 = vpop.xlane.xlu0 %12090 }
0x1201   : > { %20248 = vpow2.f32 %v12211_v15  ;;  %v12213_v23 = vmul.f32 1.442695, %v12180_v25  ;;  %v12181_v32 = vsub.f32 %v24615_v12, %v12091_v4 }
0x1203   : > { %20250 = vpow2.f32 %v12213_v23  ;;  %v12215_v62 = vmul.f32 1.442695, %v12181_v32 }
0x1204   : > { %v12094_v5 = vpop.xlane.xlu0 %12093 }
0x1205   : > { %20252 = vpow2.f32 %v12215_v62  ;;  %v12182_v40 = vsub.f32 %v24627_v39, %v12094_v5 }
0x1206   : > { %v12100_v35 = vpop.xlane.xlu1 %12099 }
0x1207   : > { %v12217_v37 = vmul.f32 1.442695, %v12182_v40  ;;  %v12184_v26 = vsub.f32 %v24637_v50, %v12100_v35 }
0x1208   : > { %v12097_v38 = vpop.xlane.xlu0 %12096 }
0x1209   : > { %20254 = vpow2.f32 %v12217_v37  ;;  %v12221_v2 = vmul.f32 1.442695, %v12184_v26  ;;  %v12183_v27 = vsub.f32 %v24633_v48, %v12097_v38 }
0x120a   : > { %v12106_v33 = vpop.xlane.xlu1 %12105 }
0x120b   : > { %v24805_v15 = vpop.eup %20248  ;;  %20256 = vpow2.f32 %v12221_v2  ;;  %v12219_v25 = vmul.f32 1.442695, %v12183_v27  ;;  %v12186_v4 = vsub.f32 %v24643_v46, %v12106_v33 }
0x120c   : > { %v12103_v12 = vpop.xlane.xlu0 %12102  ;;  %v12275_v62 = vsel %vm3958_vm0, %v24805_v15, 0.0 }
0x120d   : > { %v24810_v5 = vpop.eup %20250  ;;  %20258 = vpow2.f32 %v12219_v25  ;;  %v12225_v35 = vmul.f32 1.442695, %v12186_v4  ;;  %v12185_v39 = vsub.f32 %v24649_v20, %v12103_v12  ;;  %12276 = vadd.xlane.f32.xlu0 %v12275_v62 }
0x120e   : > { %v12278_v26 = vsel %vm3958_vm0, %v24810_v5, 0.0 }
0x120f   : > { %v24815_v48 = vpop.eup %20252  ;;  %20260 = vpow2.f32 %v12225_v35  ;;  %v12223_v50 = vmul.f32 1.442695, %v12185_v39  ;;  %12279 = vadd.xlane.f32.xlu1 %v12278_v26 }
0x1210   : > { %v12281_v46 = vsel %vm3958_vm0, %v24815_v48, 0.0 }
0x1211   : > { %20262 = vpow2.f32 %v12223_v50  ;;  %12282 = vadd.xlane.f32.xlu0 %v12281_v46 }
0x1213   : > { %v24819_v30 = vpop.eup %20254 }
0x1214   : > { %v12284_v23 = vsel %vm3958_vm0, %v24819_v30, 0.0 }
0x1215   : > { %v24823_v20 = vpop.eup %20256  ;;  %12285 = vadd.xlane.f32.xlu1 %v12284_v23 }
0x1216   : > { %v12290_v37 = vsel %vm3958_vm0, %v24823_v20, 0.0 }
0x1217   : > { %v24825_v32 = vpop.eup %20258 }
0x1218   : > { %v12287_v40 = vsel %vm3958_vm0, %v24825_v32, 0.0 }
0x1219   : > { %v24831_v38 = vpop.eup %20260  ;;  %12288 = vadd.xlane.f32.xlu0 %v12287_v40  ;;  %12291 = vadd.xlane.f32.xlu1 %v12290_v37 }
0x121a   : > { %26675 = vst [vmem:[#allocation62_spill] sm:$0xff] %v24831_v38  ;;  %v12296_v25 = vsel %vm3958_vm0, %v24831_v38, 0.0 }
0x121b   : > { %v24833_v2 = vpop.eup %20262 }
0x121c   : > { %v12109_v27 = vpop.xlane.xlu0 %12108  ;;  %v12293_v33 = vsel %vm3958_vm0, %v24833_v2, 0.0 }
0x121d   : > { %v12187_v4 = vsub.f32 %v24657_v34, %v12109_v27  ;;  %12294 = vadd.xlane.f32.xlu0 %v12293_v33  ;;  %12297 = vadd.xlane.f32.xlu1 %v12296_v25 }
0x121e   : > { %v12112_v12 = vpop.xlane.xlu1 %12111 }
0x121f   : > { %v12227_v62 = vmul.f32 1.442695, %v12187_v4  ;;  %v12188_v35 = vsub.f32 %v24667_v58, %v12112_v12 }
0x1220   : > { %v12115_v39 = vpop.xlane.xlu0 %12114 }
0x1221   : > { %20264 = vpow2.f32 %v12227_v62  ;;  %v12229_v26 = vmul.f32 1.442695, %v12188_v35  ;;  %v12189_v50 = vsub.f32 %v24663_v22, %v12115_v39 }
0x1222   : > { %v12118_v46 = vpop.xlane.xlu1 %12117 }
0x1223   : > { %20266 = vpow2.f32 %v12229_v26  ;;  %v12231_v23 = vmul.f32 1.442695, %v12189_v50  ;;  %v12190_v40 = vsub.f32 %v24673_v49, %v12118_v46 }
0x1224   : > { %v12121_v37 = vpop.xlane.xlu0 %12120 }
0x1225   : > { %20268 = vpow2.f32 %v12231_v23  ;;  %v12233_v38 = vmul.f32 1.442695, %v12190_v40  ;;  %v12191_v34 = vsub.f32 %v24681_v45, %v12121_v37 }
0x1226   : > { %v12124_v27 = vpop.xlane.xlu1 %12123 }
0x1227   : > { %20270 = vpow2.f32 %v12233_v38  ;;  %v12235_v33 = vmul.f32 1.442695, %v12191_v34  ;;  %v12192_v58 = vsub.f32 %v24691_v3, %v12124_v27 }
0x1228   : > { %v12127_v25 = vpop.xlane.xlu0 %12126 }
0x1229   : > { %20272 = vpow2.f32 %v12235_v33  ;;  %v12237_v4 = vmul.f32 1.442695, %v12192_v58  ;;  %v12193_v22 = vsub.f32 %v24687_v9, %v12127_v25 }
0x122a   : > { %v12130_v12 = vpop.xlane.xlu1 %12129 }
0x122b   : > { %v24846_v62 = vpop.eup %20264  ;;  %20274 = vpow2.f32 %v12237_v4  ;;  %v12239_v49 = vmul.f32 1.442695, %v12193_v22  ;;  %v12194_v35 = vsub.f32 %v24697_v19, %v12130_v12 }
0x122c   : > { %v12133_v39 = vpop.xlane.xlu0 %12132  ;;  %v12299_v45 = vsel %vm3958_vm0, %v24846_v62, 0.0 }
0x122d   : > { %v24851_v38 = vpop.eup %20266  ;;  %20276 = vpow2.f32 %v12239_v49  ;;  %v12241_v3 = vmul.f32 1.442695, %v12194_v35  ;;  %v12195_v26 = vsub.f32 %v24703_v11, %v12133_v39  ;;  %12300 = vadd.xlane.f32.xlu0 %v12299_v45 }
0x122e   : > { %v12136_v50 = vpop.xlane.xlu1 %12135  ;;  %v12302_v9 = vsel %vm3958_vm0, %v24851_v38, 0.0 }
0x122f   : > { %v24856_v46 = vpop.eup %20268  ;;  %20278 = vpow2.f32 %v12241_v3  ;;  %v12243_v23 = vmul.f32 1.442695, %v12195_v26  ;;  %v12196_v19 = vsub.f32 %v24709_v14, %v12136_v50  ;;  %12303 = vadd.xlane.f32.xlu1 %v12302_v9 }
0x1230   : > { %v12139_v40 = vpop.xlane.xlu0 %12138  ;;  %v12305_v37 = vsel %vm3958_vm0, %v24856_v46, 0.0 }
0x1231   : > { %v24861_v34 = vpop.eup %20270  ;;  %20280 = vpow2.f32 %v12243_v23  ;;  %v12245_v11 = vmul.f32 1.442695, %v12196_v19  ;;  %v12197_v27 = vsub.f32 %v24715_v61, %v12139_v40  ;;  %12306 = vadd.xlane.f32.xlu0 %v12305_v37 }
0x1232   : > { %v12142_v33 = vpop.xlane.xlu1 %12141  ;;  %v12308_v58 = vsel %vm3958_vm0, %v24861_v34, 0.0 }
0x1233   : > { %v24866_v25 = vpop.eup %20272  ;;  %20282 = vpow2.f32 %v12245_v11  ;;  %v12247_v14 = vmul.f32 1.442695, %v12197_v27  ;;  %v12198_v4 = vsub.f32 %v24721_v24, %v12142_v33  ;;  %12309 = vadd.xlane.f32.xlu1 %v12308_v58 }
0x1234   : > { %v12145_v22 = vpop.xlane.xlu0 %12144  ;;  %v12311_v12 = vsel %vm3958_vm0, %v24866_v25, 0.0 }
0x1235   : > { %v24871_v49 = vpop.eup %20274  ;;  %20284 = vpow2.f32 %v12247_v14  ;;  %v12249_v61 = vmul.f32 1.442695, %v12198_v4  ;;  %v12199_v35 = vsub.f32 %v24727_v28, %v12145_v22  ;;  %12312 = vadd.xlane.f32.xlu0 %v12311_v12 }
0x1236   : > { %v12148_v39 = vpop.xlane.xlu1 %12147  ;;  %v12314_v45 = vsel %vm3958_vm0, %v24871_v49, 0.0 }
0x1237   : > { %v24876_v3 = vpop.eup %20276  ;;  %20286 = vpow2.f32 %v12249_v61  ;;  %v12251_v24 = vmul.f32 1.442695, %v12199_v35  ;;  %v12200_v26 = vsub.f32 %v24733_v54, %v12148_v39  ;;  %12315 = vadd.xlane.f32.xlu1 %v12314_v45 }
0x1238   : > { %v12151_v50 = vpop.xlane.xlu0 %12150  ;;  %v12317_v9 = vsel %vm3958_vm0, %v24876_v3, 0.0 }
0x1239   : > { %v24881_v23 = vpop.eup %20278  ;;  %20288 = vpow2.f32 %v12251_v24  ;;  %v12253_v28 = vmul.f32 1.442695, %v12200_v26  ;;  %v12201_v19 = vsub.f32 %v24739_v42, %v12151_v50  ;;  %12318 = vadd.xlane.f32.xlu0 %v12317_v9 }
0x123a   : > { %v12154_v40 = vpop.xlane.xlu1 %12153  ;;  %v12320_v37 = vsel %vm3958_vm0, %v24881_v23, 0.0 }
0x123b   : > { %v24886_v11 = vpop.eup %20280  ;;  %20290 = vpow2.f32 %v12253_v28  ;;  %v12255_v54 = vmul.f32 1.442695, %v12201_v19  ;;  %v12202_v27 = vsub.f32 %v24745_v52, %v12154_v40  ;;  %12321 = vadd.xlane.f32.xlu1 %v12320_v37 }
0x123c   : > { %v12157_v33 = vpop.xlane.xlu0 %12156  ;;  %v12323_v58 = vsel %vm3958_vm0, %v24886_v11, 0.0 }
0x123d   : > { %v24891_v14 = vpop.eup %20282  ;;  %20292 = vpow2.f32 %v12255_v54  ;;  %v12257_v42 = vmul.f32 1.442695, %v12202_v27  ;;  %v12203_v4 = vsub.f32 %v24753_v17, %v12157_v33  ;;  %12324 = vadd.xlane.f32.xlu0 %v12323_v58 }
0x123e   : > { %v12160_v22 = vpop.xlane.xlu1 %12159  ;;  %v12326_v12 = vsel %vm3958_vm0, %v24891_v14, 0.0 }
0x123f   : > { %v24896_v61 = vpop.eup %20284  ;;  %20294 = vpow2.f32 %v12257_v42  ;;  %v12259_v52 = vmul.f32 1.442695, %v12203_v4  ;;  %v12204_v35 = vsub.f32 %v24763_v41, %v12160_v22  ;;  %12327 = vadd.xlane.f32.xlu1 %v12326_v12 }
0x1240   : > { %v12163_v39 = vpop.xlane.xlu0 %12162  ;;  %v12329_v45 = vsel %vm3958_vm0, %v24896_v61, 0.0 }
0x1241   : > { %v24901_v24 = vpop.eup %20286  ;;  %20296 = vpow2.f32 %v12259_v52  ;;  %v12261_v17 = vmul.f32 1.442695, %v12204_v35  ;;  %v12205_v26 = vsub.f32 %v24759_v10, %v12163_v39  ;;  %12330 = vadd.xlane.f32.xlu0 %v12329_v45 }
0x1242   : > { %v12166_v50 = vpop.xlane.xlu1 %12165  ;;  %v12332_v9 = vsel %vm3958_vm0, %v24901_v24, 0.0 }
0x1243   : > { %v24906_v28 = vpop.eup %20288  ;;  %20298 = vpow2.f32 %v12261_v17  ;;  %v12263_v41 = vmul.f32 1.442695, %v12205_v26  ;;  %v12206_v19 = vsub.f32 %v24769_v55, %v12166_v50  ;;  %12333 = vadd.xlane.f32.xlu1 %v12332_v9 }
0x1244   : > { %v12169_v40 = vpop.xlane.xlu0 %12168  ;;  %v12335_v37 = vsel %vm3958_vm0, %v24906_v28, 0.0 }
0x1245   : > { %v24911_v54 = vpop.eup %20290  ;;  %20300 = vpow2.f32 %v12263_v41  ;;  %v12265_v10 = vmul.f32 1.442695, %v12206_v19  ;;  %v12207_v27 = vsub.f32 %v24777_v63, %v12169_v40  ;;  %12336 = vadd.xlane.f32.xlu0 %v12335_v37 }
0x1246   : > { %v12172_v33 = vpop.xlane.xlu1 %12171  ;;  %v12338_v58 = vsel %vm3958_vm0, %v24911_v54, 0.0 }
0x1247   : > { %v24916_v42 = vpop.eup %20292  ;;  %20302 = vpow2.f32 %v12265_v10  ;;  %v12267_v55 = vmul.f32 1.442695, %v12207_v27  ;;  %v12208_v4 = vsub.f32 %v24787_v59, %v12172_v33  ;;  %12339 = vadd.xlane.f32.xlu1 %v12338_v58 }
0x1248   : > { %v12175_v22 = vpop.xlane.xlu0 %12174  ;;  %v12341_v12 = vsel %vm3958_vm0, %v24916_v42, 0.0 }
0x1249   : > { %v24921_v52 = vpop.eup %20294  ;;  %20304 = vpow2.f32 %v12267_v55  ;;  %v12269_v63 = vmul.f32 1.442695, %v12208_v4  ;;  %v12209_v35 = vsub.f32 %v24783_v13, %v12175_v22  ;;  %12342 = vadd.xlane.f32.xlu0 %v12341_v12 }
0x124a   : > { %v12178_v39 = vpop.xlane.xlu1 %12177  ;;  %v12344_v45 = vsel %vm3958_vm0, %v24921_v52, 0.0 }
0x124b   : > { %v24926_v17 = vpop.eup %20296  ;;  %20306 = vpow2.f32 %v12269_v63  ;;  %v12271_v59 = vmul.f32 1.442695, %v12209_v35  ;;  %v12210_v26 = vsub.f32 %v24793_v0, %v12178_v39  ;;  %12345 = vadd.xlane.f32.xlu1 %v12344_v45  ;;  %v26687_v35 = vld [vmem:[#allocation67_spill] sm:$0xff]  ;;  %v26688_v39 = vld [vmem:[#allocation65_spill] sm:$0xff] }
0x124c   : > { %v12347_v50 = vsel %vm3958_vm0, %v24926_v17, 0.0 }
0x124d   : > { %v24931_v9 = vpop.eup %20298  ;;  %20308 = vpow2.f32 %v12271_v59  ;;  %v12273_v41 = vmul.f32 1.442695, %v12210_v26  ;;  %12348 = vadd.xlane.f32.xlu0 %v12347_v50 }
0x124e   : > { %v12350_v13 = vsel %vm3958_vm0, %v24931_v9, 0.0 }
0x124f   : > { %v24935_v19 = vpop.eup %20300  ;;  %20310 = vpow2.f32 %v12273_v41  ;;  %12351 = vadd.xlane.f32.xlu1 %v12350_v13 }
0x1250   : > { %v12353_v40 = vsel %vm3958_vm0, %v24935_v19, 0.0 }
0x1251   : > { %v24939_v0 = vpop.eup %20302  ;;  %12354 = vadd.xlane.f32.xlu0 %v12353_v40  ;;  %v26689_v40 = vld [vmem:[#allocation125_spill] sm:$0xff] }
0x1252   : > { %v12356_v37 = vsel %vm3958_vm0, %v24939_v0, 0.0 }
0x1253   : > { %v24943_v10 = vpop.eup %20304  ;;  %12357 = vadd.xlane.f32.xlu1 %v12356_v37  ;;  %v26690_v37 = vld [vmem:[#allocation69_spill] sm:$0xff] }
0x1254   : > { %v12359_v27 = vsel %vm3958_vm0, %v24943_v10, 0.0 }
0x1255   : > { %v24947_v33 = vpop.eup %20306  ;;  %12360 = vadd.xlane.f32.xlu0 %v12359_v27 }
0x1256   : > { %v12362_v58 = vsel %vm3958_vm0, %v24947_v33, 0.0 }
0x1257   : > { %v24951_v55 = vpop.eup %20308  ;;  %12363 = vadd.xlane.f32.xlu1 %v12362_v58 }
0x1258   : > { %v12365_v4 = vsel %vm3958_vm0, %v24951_v55, 0.0 }
0x1259   : > { %v24955_v22 = vpop.eup %20310  ;;  %12366 = vadd.xlane.f32.xlu0 %v12365_v4 }
0x125a   : > { %v12368_v12 = vsel %vm3958_vm0, %v24955_v22, 0.0 }
0x125b   : > { %12369 = vadd.xlane.f32.xlu1 %v12368_v12  ;;  %v26692_v12 = vld [vmem:[#allocation124_spill] sm:$0xff] }
0x126c   : > { %13611 = vrot.lane.b32.xlu1 %v26636_v47, %s20672_s21  ;;  %v26677_v47 = vld [vmem:[#allocation22_spill] sm:$0xff] }
0x126f   : > { %13609 = vrot.lane.b32.xlu0 %v26634_v31, %s20672_s21  ;;  %v26676_v31 = vld [vmem:[#allocation20_spill] sm:$0xff] }
0x1270   : > { %13613 = vrot.lane.b32.xlu1 %v26638_v8, %s20672_s21  ;;  %v26679_v8 = vld [vmem:[#allocation59_spill] sm:$0xff] }
0x1273   : > { %13597 = vrot.lane.b32.xlu0 %v26643_v29, %s20672_s21 }
0x1274   : > { %13615 = vrot.lane.b32.xlu1 %v26640_v1, %s20672_s21  ;;  %v26680_v1 = vld [vmem:[#allocation24_spill] sm:$0xff] }
0x1277   : > { %13722 = vrot.lane.b32.xlu0 %v26642_v43, %s20672_s21 }
0x1278   : > { %13599 = vrot.lane.b32.xlu1 %v26644_v56, %s20672_s21 }
0x127b   : > { %13601 = vrot.lane.b32.xlu0 %v26645_v16, %s20672_s21  ;;  %v26683_v16 = vld [vmem:[#allocation94_spill] sm:$0xff] }
0x127c   : > { %13724 = vrot.lane.b32.xlu1 %v26646_v57, %s20672_s21  ;;  %v26684_v57 = vld [vmem:[#allocation61_spill] sm:$0xff] }
0x127f   : > { %13726 = vrot.lane.b32.xlu0 %v26650_v7, %s20672_s21  ;;  %v26686_v7 = vld [vmem:[#allocation98_spill] sm:$0xff] }
0x1280   : > { %13603 = vrot.lane.b32.xlu1 %v26647_v51, %s20672_s21 }
0x1283   : > { %13710 = vrot.lane.b32.xlu0 %v26649_v36, %s20672_s21  ;;  %v26685_v36 = vld [vmem:[#allocation63_spill] sm:$0xff] }
0x1284   : > { %13728 = vrot.lane.b32.xlu1 %v26654_v21, %s20672_s21 }
0x1287   : > { %13835 = vrot.lane.b32.xlu0 %v26633_v53, %s20672_s21  ;;  %v26678_v53 = vld [vmem:[#allocation36_spill] sm:$0xff] }
0x1288   : > { %13712 = vrot.lane.b32.xlu1 %v26660_v6, %s20672_s21 }
0x128b   : > { %13714 = vrot.lane.b32.xlu0 %v26661_v44, %s20672_s21 }
0x128c   : > { %13837 = vrot.lane.b32.xlu1 %v26635_v18, %s20672_s21  ;;  %v26681_v18 = vld [vmem:[#allocation60_spill] sm:$0xff] }
0x128f   : > { %13839 = vrot.lane.b32.xlu0 %v26637_v60, %s20672_s21  ;;  %v26682_v60 = vld [vmem:[#allocation92_spill] sm:$0xff] }
0x1290   : > { %13716 = vrot.lane.b32.xlu1 %v26676_v31, %s20672_s21 }
0x1293   : > { %13823 = vrot.lane.b32.xlu0 %v26677_v47, %s20672_s21 }
0x1294   : > { %13841 = vrot.lane.b32.xlu1 %v26678_v53, %s20672_s21 }
0x1297   : > { %13948 = vrot.lane.b32.xlu0 %v26679_v8, %s20672_s21  ;;  %v26693_v8 = vld [vmem:[#allocation126_spill] sm:$0xff] }
0x1298   : > { %13825 = vrot.lane.b32.xlu1 %v26680_v1, %s20672_s21  ;;  %v26694_v1 = vld [vmem:[#allocation133_spill] sm:$0xff] }
0x129a   : > { %v12277_v43 = vpop.xlane.xlu0 %12276 }
0x129b   : > { %13827 = vrot.lane.b32.xlu0 %v26681_v18, %s20672_s21  ;;  %20312 = vrcp.f32 %v12277_v43  ;;  %v26696_v43 = vld [vmem:[#allocation132_spill] sm:$0xff] }
0x129c   : > { %13950 = vrot.lane.b32.xlu1 %v26682_v60, %s20672_s21  ;;  %v12280_v29 = vpop.xlane.xlu1 %12279 }
0x129d   : > { %20314 = vrcp.f32 %v12280_v29 }
0x129e   : > { %v12283_v56 = vpop.xlane.xlu0 %12282 }
0x129f   : > { %13952 = vrot.lane.b32.xlu0 %v26683_v16, %s20672_s21  ;;  %20316 = vrcp.f32 %v12283_v56  ;;  %v26697_v16 = vld [vmem:[#allocation62_spill] sm:$0xff] }
0x12a0   : > { %13829 = vrot.lane.b32.xlu1 %v26684_v57, %s20672_s21 }
0x12a2   : > { %v12286_v51 = vpop.xlane.xlu1 %12285 }
0x12a3   : > { %13936 = vrot.lane.b32.xlu0 %v26685_v36, %s20672_s21  ;;  %20318 = vrcp.f32 %v12286_v51  ;;  %v26700_v36 = vld [vmem:[#allocation135_spill] sm:$0xff] }
0x12a4   : > { %13954 = vrot.lane.b32.xlu1 %v26686_v7, %s20672_s21 }
0x12a5   : > { %v20313_v21 = vpop.eup %20312 }
0x12a6   : > { %v12289_v6 = vpop.xlane.xlu0 %12288  ;;  %v12292_v44 = vpop.xlane.xlu1 %12291  ;;  %v12403_v45 = vmul.f32 %v20313_v21, %v24805_v15  ;;  %v26701_v21 = vld [vmem:[#allocation130_spill] sm:$0xff] }
0x12a7   : > { %v20315_v63 = vpop.eup %20314  ;;  %13940 = vrot.lane.b32.xlu0 %v26687_v35, %s20672_s21  ;;  %20320 = vrcp.f32 %v12289_v6  ;;  %v26702_v6 = vld [vmem:[#allocation134_spill] sm:$0xff] }
0x12a8   : > { %20322 = vrcp.f32 %v12292_v44  ;;  %13938 = vrot.lane.b32.xlu1 %v26688_v39, %s20672_s21  ;;  %v12404_v59 = vmul.f32 %v20315_v63, %v24810_v5  ;;  %v26691_v5 = vld [vmem:[#allocation127_spill] sm:$0xff]  ;;  %v19708_v44 = vld [vmem:[#allocation9 + $0x184] ss:$12 sps:$4 sm:$0xff]  }
0x12a9   : > { %v20317_v13 = vpop.eup %20316 }
0x12aa   : > { %v12295_v26 = vpop.xlane.xlu0 %12294  ;;  %v12298_v50 = vpop.xlane.xlu1 %12297  ;;  %v12435_v41 = vpack.c.bf16 %v12404_v59, %v12403_v45  ;;  %v12405_v58 = vmul.f32 %v20317_v13, %v24815_v48 }
0x12ab   : > { %20324 = vrcp.f32 %v12295_v26  ;;  %14449 = vrot.lane.b32.xlu0 %v26689_v40, %s20672_s21 }
0x12ac   : > { %20326 = vrcp.f32 %v12298_v50  ;;  %13942 = vrot.lane.b32.xlu1 %v26690_v37, %s20672_s21  ;;  %18135 = vmatprep.mubr.msk.bf16.mxu0 %vm3958_vm0, %v12435_v41 }
0x12ad   : > { %v20319_v27 = vpop.eup %20318 }
0x12ae   : > { %v12406_v15 = vmul.f32 %v20319_v27, %v24819_v30  ;;  %v26695_v30 = vld [vmem:[#allocation129_spill] sm:$0xff] }
0x12af   : > { %14453 = vrot.lane.b32.xlu0 %v26691_v5, %s20672_s21 }
0x12b0   : > { %v12436_v4 = vpack.c.bf16 %v12406_v15, %v12405_v58  ;;  %14451 = vrot.lane.b32.xlu1 %v26692_v12, %s20672_s21 }
0x12b1   : > { %v20321_v31 = vpop.eup %20320 }
0x12b2   : > { %v20323_v47 = vpop.eup %20322  ;;  %18136 = vmatmul.mubr.msk.bf16.vlgmr.msra.gmra.mrb[112].mxu0 %vm3958_vm0, %v12436_v4  ;;  %v12407_v53 = vmul.f32 %v20321_v31, %v24825_v32  ;;  %v26698_v32 = vld [vmem:[#allocation128_spill] sm:$0xff] }
0x12b3   : > { %14455 = vrot.lane.b32.xlu0 %v26693_v8, %s20672_s21  ;;  %18160 = vmatpush3.bf16.msra.mxu0 %v26694_v1  ;;  %v12408_v48 = vmul.f32 %v20323_v47, %v24823_v20  ;;  %v26699_v20 = vld [vmem:[#allocation131_spill] sm:$0xff] }
0x12b4   : > { %14542 = vrot.lane.b32.xlu1 %v26695_v30, %s20672_s21  ;;  %18161 = vmatprep.subr.bf16.mxu0 %v26696_v43 }
0x12b5   : > { %v20325_v18 = vpop.eup %20324  ;;  %v12437_v60 = vpack.c.bf16 %v12408_v48, %v12407_v53 }
0x12b6   : > { %v20327_v29 = vpop.eup %20326  ;;  %v12409_v56 = vmul.f32 %v20325_v18, %v24833_v2 }
0x12b7   : > { %v12410_v57 = vmul.f32 %v20327_v29, %v26697_v16  ;;  %14544 = vrot.lane.b32.xlu0 %v26698_v32, %s20672_s21  ;;  %18139 = vmatprep.mubr.msk.bf16.mxu0 %vm3958_vm0, %v12437_v60 }
0x12b8   : > { %18162 = vmatpush3.bf16.msra.mxu0 %v26696_v43  ;;  %14546 = vrot.lane.b32.xlu1 %v26699_v20, %s20672_s21 }
0x12b9   : > { %v12438_v51 = vpack.c.bf16 %v12410_v57, %v12409_v56  ;;  %18163 = vmatprep.subr.bf16.mxu0 %v26700_v36  ;;  %v26705_v57 = vld [vmem:[#allocation140_spill] sm:$0xff] }
0x12ba   : > { %v12301_v7 = vpop.xlane.xlu0 %12300 }
0x12bb   : > { %20328 = vrcp.f32 %v12301_v7  ;;  %14548 = vrot.lane.b32.xlu0 %v26701_v21, %s20672_s21  ;;  %18140 = vmatmul.mubr.msk.bf16.gmra.mrb[116].mxu0 %vm3958_vm0, %v12438_v51  ;;  %v26706_v21 = vld [vmem:[#allocation139_spill] sm:$0xff] }
0x12bc   : > { %18164 = vmatpush3.bf16.msra.mxu0 %v26700_v36  ;;  %v12304_v2 = vpop.xlane.xlu1 %12303 }
0x12bd   : > { %20330 = vrcp.f32 %v12304_v2  ;;  %18165 = vmatprep.subr.bf16.mxu0 %v26702_v6 }
0x12be   : > { %v12307_v63 = vpop.xlane.xlu0 %12306 }
0x12bf   : > { %20332 = vrcp.f32 %v12307_v63  ;;  %14635 = vrot.lane.b32.xlu0 %v26694_v1, %s20672_s21  ;;  %v25080_v63 = vld [vmem:[#allocation9 + $0x188] ss:$12 sps:$4 sm:$0xff]  }
0x12c0   : > { %18166 = vmatpush3.bf16.msra.mxu0 %v26702_v6  ;;  %v12310_v35 = vpop.xlane.xlu1 %12309 }
0x12c1   : > { %20334 = vrcp.f32 %v12310_v35  ;;  %12903 = vmatprep.subr.bf16.mxu0 %v19708_v44 }
0x12c2   : > { %v12313_v39 = vpop.xlane.xlu0 %12312 }
0x12c3   : > { %20336 = vrcp.f32 %v12313_v39 }
0x12c4   : > { %v12316_v45 = vpop.xlane.xlu1 %12315 }
0x12c5   : > { %v20329_v59 = vpop.eup %20328  ;;  %20338 = vrcp.f32 %v12316_v45 }
0x12c6   : > { %v12319_v26 = vpop.xlane.xlu0 %12318  ;;  %v12411_v13 = vmul.f32 %v20329_v59, %v24846_v62 }
0x12c7   : > { %v20331_v50 = vpop.eup %20330  ;;  %20340 = vrcp.f32 %v12319_v26 }
0x12c8   : > { %v12322_v41 = vpop.xlane.xlu1 %12321  ;;  %v12412_v40 = vmul.f32 %v20331_v50, %v24851_v38 }
0x12c9   : > { %v20333_v37 = vpop.eup %20332  ;;  %20342 = vrcp.f32 %v12322_v41  ;;  %v19712_v41 = vld [vmem:[#allocation9 + $0x19c] ss:$12 sps:$4 sm:$0xff]  }
0x12ca   : > { %v12325_v27 = vpop.xlane.xlu0 %12324  ;;  %v12439_v58 = vpack.c.bf16 %v12412_v40, %v12411_v13  ;;  %v12413_v5 = vmul.f32 %v20333_v37, %v24856_v46  ;;  %v26703_v46 = vld [vmem:[#allocation137_spill] sm:$0xff] }
0x12cb   : > { %v20335_v15 = vpop.eup %20334  ;;  %20344 = vrcp.f32 %v12325_v27  ;;  %v19710_v27 = vld [vmem:[#allocation9 + $0x198] ss:$12 sps:$4 sm:$0xff]  }
0x12cc   : > { %v12414_v4 = vmul.f32 %v20335_v15, %v24861_v34  ;;  %18151 = vmatprep.mubr.msk.bf16.mxu1 %vm3958_vm0, %v12439_v58  ;;  %v12328_v12 = vpop.xlane.xlu1 %12327  ;;  %v26704_v34 = vld [vmem:[#allocation136_spill] sm:$0xff] }
0x12cd   : > { %v20337_v31 = vpop.eup %20336  ;;  %20346 = vrcp.f32 %v12328_v12 }
0x12ce   : > { %v12440_v47 = vpack.c.bf16 %v12414_v4, %v12413_v5  ;;  %v12331_v53 = vpop.xlane.xlu0 %12330  ;;  %v12415_v8 = vmul.f32 %v20337_v31, %v24866_v25  ;;  %v19716_v5 = vld [vmem:[#allocation9 + $0x1b4] ss:$12 sps:$4 sm:$0xff]  }
0x12cf   : > { %v20339_v62 = vpop.eup %20338  ;;  %20348 = vrcp.f32 %v12331_v53 }
0x12d0   : > { %v12334_v38 = vpop.xlane.xlu1 %12333  ;;  %18152 = vmatmul.mubr.msk.bf16.vlgmr.msra.gmra.mrb[144].mxu1 %vm3958_vm0, %v12440_v47  ;;  %v12416_v1 = vmul.f32 %v20339_v62, %v24871_v49 }
0x12d1   : > { %v20341_v48 = vpop.eup %20340  ;;  %20350 = vrcp.f32 %v12334_v38  ;;  %18176 = vmatpush3.bf16.msra.mxu1 %v26703_v46  ;;  %v19719_v38 = vld [vmem:[#allocation9 + $0x1cc] ss:$12 sps:$4 sm:$0xff]  }
0x12d2   : > { %18177 = vmatprep.subr.bf16.mxu1 %v26704_v34  ;;  %v12337_v30 = vpop.xlane.xlu0 %12336  ;;  %v12441_v18 = vpack.c.bf16 %v12416_v1, %v12415_v8  ;;  %v12417_v29 = vmul.f32 %v20341_v48, %v24876_v3 }
0x12d3   : > { %v20343_v60 = vpop.eup %20342  ;;  %20352 = vrcp.f32 %v12337_v30  ;;  %v19717_v30 = vld [vmem:[#allocation9 + $0x1c8] ss:$12 sps:$4 sm:$0xff]  }
0x12d4   : > { %v12418_v56 = vmul.f32 %v20343_v60, %v24881_v23  ;;  %v12340_v16 = vpop.xlane.xlu1 %12339  ;;  %18155 = vmatprep.mubr.msk.bf16.mxu1 %vm3958_vm0, %v12441_v18  ;;  %v26707_v18 = vmov 0  }
0x12d5   : > { %v20345_v25 = vpop.eup %20344  ;;  %20354 = vrcp.f32 %v12340_v16  ;;  %18178 = vmatpush3.bf16.msra.mxu1 %v26704_v34 }
0x12d6   : > { %v12442_v49 = vpack.c.bf16 %v12418_v56, %v12417_v29  ;;  %18179 = vmatprep.subr.bf16.mxu1 %v26705_v57  ;;  %v12343_v32 = vpop.xlane.xlu0 %12342  ;;  %v12419_v3 = vmul.f32 %v20345_v25, %v24886_v11 }
0x12d7   : > { %v20347_v20 = vpop.eup %20346  ;;  %20356 = vrcp.f32 %v12343_v32  ;;  %v19705_v32 = vld [vmem:[#allocation9 + $0x1a0] ss:$12 sps:$4 sm:$0xff]  }
0x12d8   : > { %v12346_v51 = vpop.xlane.xlu1 %12345  ;;  %18156 = vmatmul.mubr.msk.bf16.gmra.mrb[148].mxu1 %vm3958_vm0, %v12442_v49  ;;  %v12420_v23 = vmul.f32 %v20347_v20, %v24891_v14  ;;  %v19706_v14 = vld [vmem:[#allocation9 + $0x180] ss:$12 sps:$4 sm:$0xff]  }
0x12d9   : > { %v20349_v7 = vpop.eup %20348  ;;  %20358 = vrcp.f32 %v12346_v51  ;;  %18180 = vmatpush3.bf16.msra.mxu1 %v26705_v57 }
0x12da   : > { %18181 = vmatprep.subr.bf16.mxu1 %v26706_v21  ;;  %v12349_v2 = vpop.xlane.xlu0 %12348  ;;  %v12443_v44 = vpack.c.bf16 %v12420_v23, %v12419_v3  ;;  %v12421_v39 = vmul.f32 %v20349_v7, %v24896_v61  ;;  %v19709_v7 = vld [vmem:[#allocation9 + $0x1b8] ss:$12 sps:$4 sm:$0xff]  }
0x12db   : > { %v20351_v35 = vpop.eup %20350  ;;  %20360 = vrcp.f32 %v12349_v2 }
0x12dc   : > { %v12422_v45 = vmul.f32 %v20351_v35, %v24901_v24  ;;  %v12352_v59 = vpop.xlane.xlu1 %12351  ;;  %18167 = vmatprep.mubr.msk.bf16.mxu0 %vm3958_vm0, %v12443_v44 }
0x12dd   : > { %v20353_v11 = vpop.eup %20352  ;;  %20362 = vrcp.f32 %v12352_v59  ;;  %18182 = vmatpush3.bf16.msra.mxu1 %v26706_v21 }
0x12de   : > { %v12444_v26 = vpack.c.bf16 %v12422_v45, %v12421_v39  ;;  %v12355_v50 = vpop.xlane.xlu0 %12354  ;;  %18191 = vmatprep.subr.bf16.mxu1 %v25080_v63  ;;  %v12423_v61 = vmul.f32 %v20353_v11, %v24906_v28 }
0x12df   : > { %v20355_v13 = vpop.eup %20354  ;;  %20364 = vrcp.f32 %v12355_v50 }
0x12e0   : > { %v12358_v40 = vpop.xlane.xlu1 %12357  ;;  %18168 = vmatmul.mubr.msk.bf16.vlgmr.msra.gmra.mrb[120].mxu0 %vm3958_vm0, %v12444_v26  ;;  %v12424_v24 = vmul.f32 %v20355_v13, %v24911_v54  ;;  %v19714_v54 = vld [vmem:[#allocation9 + $0x1b0] ss:$12 sps:$4 sm:$0xff]  }
0x12e1   : > { %v20357_v37 = vpop.eup %20356  ;;  %20366 = vrcp.f32 %v12358_v40  ;;  %12904 = vmatpush1.bf16.msra.mxu0 %v19706_v14 }
0x12e2   : > { %v12361_v58 = vpop.xlane.xlu0 %12360  ;;  %v12445_v15 = vpack.c.bf16 %v12424_v24, %v12423_v61  ;;  %12905 = vmatprep.subr.bf16.mxu0 %v19712_v41  ;;  %v12425_v12 = vmul.f32 %v20357_v37, %v24916_v42 }
0x12e3   : > { %v20359_v4 = vpop.eup %20358  ;;  %20368 = vrcp.f32 %v12361_v58 }
0x12e4   : > { %v12426_v31 = vmul.f32 %v20359_v4, %v24921_v52  ;;  %v12364_v47 = vpop.xlane.xlu1 %12363  ;;  %18171 = vmatprep.mubr.msk.bf16.mxu0 %vm3958_vm0, %v12445_v15 }
0x12e5   : > { %v20361_v28 = vpop.eup %20360  ;;  %20370 = vrcp.f32 %v12364_v47  ;;  %12906 = vmatpush1.bf16.msra.mxu0 %v19710_v27 }
0x12e6   : > { %v12446_v53 = vpack.c.bf16 %v12426_v31, %v12425_v12  ;;  %v12367_v62 = vpop.xlane.xlu0 %12366  ;;  %12907 = vmatprep.subr.bf16.mxu0 %v19716_v5  ;;  %v12427_v42 = vmul.f32 %v20361_v28, %v24926_v17 }
0x12e7   : > { %v20363_v8 = vpop.eup %20362  ;;  %20372 = vrcp.f32 %v12367_v62 }
0x12e8   : > { %v12370_v1 = vpop.xlane.xlu1 %12369  ;;  %18172 = vmatmul.mubr.msk.bf16.gmra.mrb[124].mxu0 %vm3958_vm0, %v12446_v53  ;;  %v12428_v52 = vmul.f32 %v20363_v8, %v24931_v9 }
0x12e9   : > { %v20365_v48 = vpop.eup %20364  ;;  %20374 = vrcp.f32 %v12370_v1  ;;  %12908 = vmatpush1.bf16.msra.mxu0 %v19714_v54  ;;  %12935 = vmatprep.mubr.bf16.mxu0 %v26707_v18 }
0x12ea   : > { %v25097_v60 = vpop.permute.xlu0 %13609  ;;  %v12447_v29 = vpack.c.bf16 %v12428_v52, %v12427_v42  ;;  %12909 = vmatprep.subr.bf16.mxu0 %v19719_v38  ;;  %v12429_v16 = vmul.f32 %v20365_v48, %v24935_v19 }
0x12eb   : > { %v20367_v56 = vpop.eup %20366  ;;  %v13630_v54 = vsel %vm3958_vm0, %v25097_v60, 0 }
0x12ec   : > { %v12430_v25 = vmul.f32 %v20367_v56, %v24939_v0  ;;  %18183 = vmatprep.mubr.msk.bf16.mxu1 %vm3958_vm0, %v12447_v29  ;;  %v13612_v45 = vpop.permute.xlu1 %13611 }
0x12ed   : > { %v20369_v17 = vpop.eup %20368  ;;  %12910 = vmatpush1.bf16.msra.mxu0 %v19717_v30  ;;  %v13633_v30 = vsel %vm3958_vm0, %v13612_v45, 0 }
0x12ee   : > { %v12448_v9 = vpack.c.bf16 %v12430_v25, %v12429_v16  ;;  %v25102_v49 = vpop.permute.xlu0 %13597  ;;  %v12431_v51 = vmul.f32 %v20369_v17, %v24943_v10 }
0x12ef   : > { %v20371_v20 = vpop.eup %20370 }
0x12f0   : > { %18184 = vmatmul.mubr.msk.bf16.vlgmr.msra.gmra.mrb[152].mxu1 %vm3958_vm0, %v12448_v9  ;;  %v12432_v3 = vmul.f32 %v20371_v20, %v24947_v33  ;;  %v19713_v33 = vld [vmem:[#allocation9 + $0x1d0] ss:$12 sps:$4 sm:$0xff]   ;;  %v13614_v59 = vpop.permute.xlu1 %13613 }
0x12f1   : > { %v20373_v23 = vpop.eup %20372  ;;  %18192 = vmatpush3.bf16.msra.mxu1 %v25080_v63  ;;  %v13636_v25 = vsel %vm3958_vm0, %v13614_v59, 0 }
0x12f2   : > { %v25108_v19 = vpop.permute.xlu0 %13722  ;;  %18193 = vmatprep.subr.bf16.mxu1 %v19705_v32  ;;  %v12449_v0 = vpack.c.bf16 %v12432_v3, %v12431_v51  ;;  %v12433_v44 = vmul.f32 %v20373_v23, %v24951_v55 }
0x12f3   : > { %v20375_v2 = vpop.eup %20374 }
0x12f4   : > { %v12434_v35 = vmul.f32 %v20375_v2, %v24955_v22  ;;  %18187 = vmatprep.mubr.msk.bf16.mxu1 %vm3958_vm0, %v12449_v0  ;;  %v25123_v11 = vpop.permute.xlu1 %13615 }
0x12f5   : > { %18194 = vmatpush3.bf16.msra.mxu1 %v19705_v32  ;;  %v13639_v23 = vsel %vm3958_vm0, %v25123_v11, 0 }
0x12f6   : > { %v12450_v39 = vpack.c.bf16 %v12434_v35, %v12433_v44  ;;  %v25113_v10 = vpop.permute.xlu0 %13601  ;;  %18195 = vmatprep.subr.bf16.mxu1 %v19709_v7 }
0x12f8   : > { %18188 = vmatmul.mubr.msk.bf16.gmra.mrb[156].mxu1 %vm3958_vm0, %v12450_v39  ;;  %v25125_v14 = vpop.permute.xlu1 %13599 }
0x12f9   : > { %18196 = vmatpush3.bf16.msra.mxu1 %v19709_v7 }
0x12fa   : > { %v25116_v63 = vpop.permute.xlu0 %13726  ;;  %18197 = vmatprep.subr.bf16.mxu1 %v19713_v33 }
0x12fc   : > { %v25127_v26 = vpop.permute.xlu1 %13724 }
0x12fd   : > { %18198 = vmatpush3.bf16.msra.mxu1 %v19713_v33 }
0x12fe   : > { %19231 = vmatprep.subr.msk.bf16.mxu1 %vm3958_vm0, %v25097_v60  ;;  %v25120_v55 = vpop.permute.xlu0 %13710 }
0x1300   : > { %v25131_v41 = vpop.permute.xlu1 %13603 }
0x1302   : > { %v13836_v22 = vpop.permute.xlu0 %13835 }
0x1303   : > { %19239 = vmatprep.subr.msk.bf16.mxu0 %vm3958_vm0, %v13836_v22  ;;  %v13856_v31 = vsel %vm3958_vm0, %v13836_v22, 0 }
0x1304   : > { %v25133_v40 = vpop.permute.xlu1 %13728 }
0x1306   : > { %v25129_v50 = vpop.permute.xlu0 %13714 }
0x1308   : > { %v25137_v24 = vpop.permute.xlu1 %13712 }
0x130a   : > { %v13840_v13 = vpop.permute.xlu0 %13839 }
0x130b   : > { %v13862_v56 = vsel %vm3958_vm0, %v13840_v13, 0 }
0x130c   : > { %v13838_v47 = vpop.permute.xlu1 %13837 }
0x130d   : > { %v13859_v48 = vsel %vm3958_vm0, %v13838_v47, 0 }
0x130e   : > { %v25135_v61 = vpop.permute.xlu0 %13823 }
0x1310   : > { %v25160_v60 = vpop.permute.xlu1 %13716 }
0x1312   : > { %v25139_v27 = vpop.permute.xlu0 %13948 }
0x1314   : > { %v13842_v16 = vpop.permute.xlu1 %13841 }
0x1315   : > { %v13865_v9 = vsel %vm3958_vm0, %v13842_v16, 0 }
0x1316   : > { %v25144_v28 = vpop.permute.xlu0 %13827 }
0x131a   : > { %v25152_v42 = vpop.permute.xlu0 %13952 }
0x131e   : > { %v25164_v29 = vpop.permute.xlu0 %13936 }
0x1322   : > { %v25171_v17 = vpop.permute.xlu0 %13940 }
0x1326   : > { %v25177_v20 = vpop.permute.xlu0 %14449 }
0x1385   : > { %v18137_v37 = vpop.f32.mrb[112].mxu0 }
0x1386   : > { %v12497_v58 = vpop.f32.mrb[113].mxu0 }
0x1387   : > { %v18138_v15 = vpop.f32.mrb[114].mxu0 }
0x1388   : > { %v12760_v5 = vpack.c.bf16 %v18138_v15, %v18137_v37  ;;  %v12500_v4 = vpop.f32.mrb[115].mxu0 }
0x1389   : > { %v12759_v12 = vpack.c.bf16 %v12500_v4, %v12497_v58 }
0x138b   : > { %16590 = vmatmul.mubr.msk.bf16.vlgmr.msra.gmra.mrb[224].mxu0 %vm3958_vm0, %v12759_v12  ;;  %18199 = vmatprep.mubr.msk.bf16.mxu1 %vm3958_vm0, %v12759_v12 }
0x138c   : > { %18264 = vmatpush3.bf16.xpose.msra.mxu0 %v13856_v31  ;;  %18200 = vmatmul.mubr.msk.bf16.vlgmr.msra.gmra.mrb[224].mxu1 %vm3958_vm0, %v12760_v5 }
0x138d   : > { %18232 = vmatpush3.bf16.xpose.msra.mxu1 %v13630_v54  ;;  %19240 = vmatprep.subr.msk.bf16.mxu0 %vm3958_vm0, %v13838_v47 }
0x138e   : > { %v18141_v53 = vpop.f32.mrb[116].mxu0  ;;  %19232 = vmatprep.subr.msk.bf16.mxu1 %vm3958_vm0, %v13612_v45  ;;  %12945 = vmatprep.mubr.bf16.mxu0 %v26707_v18 }
0x138f   : > { %v12513_v62 = vpop.f32.mrb[117].mxu0 }
0x1390   : > { %v18142_v38 = vpop.f32.mrb[118].mxu0 }
0x1391   : > { %v12762_v8 = vpack.c.bf16 %v18142_v38, %v18141_v53  ;;  %v12516_v1 = vpop.f32.mrb[119].mxu0 }
0x1392   : > { %v12761_v52 = vpack.c.bf16 %v12516_v1, %v12513_v62 }
0x1393   : > { %16591 = vmatmul.mubr.msk.bf16.gmra.mrb[228].mxu0 %vm3958_vm0, %v12760_v5 }
0x1394   : > { %18203 = vmatprep.mubr.msk.bf16.mxu1 %vm3958_vm0, %v12761_v52  ;;  %18266 = vmatpush3.bf16.xpose.msra.mxu0 %v13859_v48 }
0x1395   : > { %18204 = vmatmul.mubr.msk.bf16.gmra.mrb[228].mxu1 %vm3958_vm0, %v12762_v8  ;;  %19241 = vmatprep.subr.msk.bf16.mxu0 %vm3958_vm0, %v13840_v13 }
0x1396   : > { %18234 = vmatpush3.bf16.xpose.msra.mxu1 %v13633_v30  ;;  %12955 = vmatprep.mubr.bf16.mxu0 %v26707_v18 }
0x1397   : > { %19233 = vmatprep.subr.msk.bf16.mxu1 %vm3958_vm0, %v13614_v59 }
0x139b   : > { %16592 = vmatmul.mubr.msk.bf16.gmra.mrb[232].mxu0 %vm3958_vm0, %v12761_v52 }
0x139c   : > { %18268 = vmatpush3.bf16.xpose.msra.mxu0 %v13862_v56  ;;  %12965 = vmatprep.mubr.bf16.mxu0 %v26707_v18 }
0x139d   : > { %19242 = vmatprep.subr.msk.bf16.mxu0 %vm3958_vm0, %v13842_v16 }
0x139e   : > { %18236 = vmatpush3.bf16.xpose.msra.mxu1 %v13636_v25 }
0x139f   : > { %19234 = vmatprep.subr.msk.bf16.mxu1 %vm3958_vm0, %v25123_v11 }
0x13a3   : > { %v18153_v32 = vpop.f32.mrb[144].mxu1  ;;  %16593 = vmatmul.mubr.msk.bf16.gmra.mrb[236].mxu0 %vm3958_vm0, %v12762_v8 }
0x13a4   : > { %v12574_v51 = vpop.f32.mrb[145].mxu1  ;;  %18270 = vmatpush3.bf16.xpose.msra.mxu0 %v13865_v9  ;;  %12975 = vmatprep.mubr.bf16.mxu0 %v26707_v18 }
0x13a5   : > { %v18154_v3 = vpop.f32.mrb[146].mxu1  ;;  %18295 = vmatprep.subr.bf16.mxu0 %v25177_v20 }
0x13a6   : > { %v12764_v0 = vpack.c.bf16 %v18154_v3, %v18153_v32  ;;  %18238 = vmatpush3.bf16.xpose.msra.mxu1 %v13639_v23  ;;  %v12577_v7 = vpop.f32.mrb[147].mxu1  ;;  %v13743_v32 = vsel %vm3958_vm0, %v25108_v19, 0 }
0x13a7   : > { %v12763_v2 = vpack.c.bf16 %v12577_v7, %v12574_v51  ;;  %19235 = vmatprep.subr.msk.bf16.mxu1 %vm3958_vm0, %v25108_v19  ;;  %v13826_v19 = vpop.permute.xlu1 %13825  ;;  %v14454_v51 = vpop.permute.xlu0 %14453 }
0x13a9   : > { %18207 = vmatprep.mubr.msk.bf16.mxu1 %vm3958_vm0, %v12763_v2 }
0x13aa   : > { %18208 = vmatmul.mubr.msk.bf16.gmra.mrb[232].mxu1 %vm3958_vm0, %v12764_v0 }
0x13ab   : > { %v18157_v44 = vpop.f32.mrb[148].mxu1  ;;  %16594 = vmatmul.mubr.msk.bf16.gmra.mrb[240].mxu0 %vm3958_vm0, %v12763_v2 }
0x13ac   : > { %v12590_v35 = vpop.f32.mrb[149].mxu1  ;;  %12985 = vmatprep.mubr.bf16.mxu0 %v26707_v18 }
0x13ad   : > { %v18158_v39 = vpop.f32.mrb[150].mxu1 }
0x13ae   : > { %v12766_v33 = vpack.c.bf16 %v18158_v39, %v18157_v44  ;;  %v12593_v22 = vpop.f32.mrb[151].mxu1 }
0x13af   : > { %v12765_v45 = vpack.c.bf16 %v12593_v22, %v12590_v35 }
0x13b1   : > { %18211 = vmatprep.mubr.msk.bf16.mxu1 %vm3958_vm0, %v12765_v45 }
0x13b2   : > { %18212 = vmatmul.mubr.msk.bf16.gmra.mrb[236].mxu1 %vm3958_vm0, %v12766_v33 }
0x13b3   : > { %v18169_v59 = vpop.f32.mrb[120].mxu0  ;;  %16595 = vmatmul.mubr.msk.bf16.gmra.mrb[244].mxu0 %vm3958_vm0, %v12764_v0 }
0x13b4   : > { %v12651_v11 = vpop.f32.mrb[121].mxu0  ;;  %12995 = vmatprep.mubr.bf16.mxu0 %v26707_v18 }
0x13b5   : > { %v18170_v13 = vpop.f32.mrb[122].mxu0 }
0x13b6   : > { %v12768_v37 = vpack.c.bf16 %v18170_v13, %v18169_v59  ;;  %v12654_v58 = vpop.f32.mrb[123].mxu0 }
0x13b7   : > { %v12767_v15 = vpack.c.bf16 %v12654_v58, %v12651_v11 }
0x13b9   : > { %18215 = vmatprep.mubr.msk.bf16.mxu1 %vm3958_vm0, %v12767_v15 }
0x13ba   : > { %18216 = vmatmul.mubr.msk.bf16.gmra.mrb[240].mxu1 %vm3958_vm0, %v12768_v37 }
0x13bb   : > { %v18173_v5 = vpop.f32.mrb[124].mxu0  ;;  %16596 = vmatmul.mubr.msk.bf16.gmra.mrb[248].mxu0 %vm3958_vm0, %v12765_v45 }
0x13bc   : > { %v12667_v4 = vpop.f32.mrb[125].mxu0  ;;  %13005 = vmatprep.mubr.bf16.mxu0 %v26707_v18 }
0x13bd   : > { %v18174_v12 = vpop.f32.mrb[126].mxu0 }
0x13be   : > { %v12770_v31 = vpack.c.bf16 %v18174_v12, %v18173_v5  ;;  %v12670_v47 = vpop.f32.mrb[127].mxu0 }
0x13bf   : > { %v12769_v54 = vpack.c.bf16 %v12670_v47, %v12667_v4 }
0x13c1   : > { %18219 = vmatprep.mubr.msk.bf16.mxu1 %vm3958_vm0, %v12769_v54 }
0x13c2   : > { %18220 = vmatmul.mubr.msk.bf16.gmra.mrb[244].mxu1 %vm3958_vm0, %v12770_v31 }
0x13c3   : > { %v18185_v53 = vpop.f32.mrb[152].mxu1  ;;  %16597 = vmatmul.mubr.msk.bf16.gmra.mrb[252].mxu0 %vm3958_vm0, %v12766_v33 }
0x13c4   : > { %v12728_v62 = vpop.f32.mrb[153].mxu1  ;;  %13015 = vmatprep.mubr.bf16.mxu0 %v26707_v18 }
0x13c5   : > { %v18186_v38 = vpop.f32.mrb[154].mxu1 }
0x13c6   : > { %v12772_v8 = vpack.c.bf16 %v18186_v38, %v18185_v53  ;;  %v12731_v1 = vpop.f32.mrb[155].mxu1 }
0x13c7   : > { %v12771_v52 = vpack.c.bf16 %v12731_v1, %v12728_v62 }
0x13c9   : > { %18223 = vmatprep.mubr.msk.bf16.mxu1 %vm3958_vm0, %v12771_v52 }
0x13ca   : > { %18224 = vmatmul.mubr.msk.bf16.gmra.mrb[248].mxu1 %vm3958_vm0, %v12772_v8 }
0x13cb   : > { %v18189_v48 = vpop.f32.mrb[156].mxu1  ;;  %16598 = vmatmul.mubr.msk.bf16.gmra.mrb[0].mxu0 %vm3958_vm0, %v12767_v15 }
0x13cc   : > { %v12744_v30 = vpop.f32.mrb[157].mxu1  ;;  %13025 = vmatprep.mubr.bf16.mxu0 %v26707_v18 }
0x13cd   : > { %v18190_v56 = vpop.f32.mrb[158].mxu1 }
0x13ce   : > { %v12774_v16 = vpack.c.bf16 %v18190_v56, %v18189_v48  ;;  %v12747_v25 = vpop.f32.mrb[159].mxu1 }
0x13cf   : > { %v12773_v9 = vpack.c.bf16 %v12747_v25, %v12744_v30 }
0x13d1   : > { %18227 = vmatprep.mubr.msk.bf16.mxu1 %vm3958_vm0, %v12773_v9 }
0x13d2   : > { %18228 = vmatmul.mubr.msk.bf16.gmra.mrb[252].mxu1 %vm3958_vm0, %v12774_v16 }
0x13d3   : > { %18239 = vmatprep.mubr.msk.bf16.mxu1 %vm3958_vm0, %v25102_v49  ;;  %16599 = vmatmul.mubr.msk.bf16.gmra.mrb[4].mxu0 %vm3958_vm0, %v12768_v37  ;;  %v13746_v49 = vsel %vm3958_vm0, %v25127_v26, 0 }
0x13d4   : > { %13035 = vmatprep.mubr.bf16.mxu0 %v26707_v18 }
0x13da   : > { %18240 = vmatmul.mubr.msk.bf16.vlgmr.msra.gmra.mrb[160].mxu1 %vm3958_vm0, %v25125_v14  ;;  %v13752_v14 = vsel %vm3958_vm0, %v25133_v40, 0 }
0x13db   : > { %18248 = vmatpush3.bf16.xpose.msra.mxu1 %v13743_v32  ;;  %18243 = vmatprep.mubr.msk.bf16.mxu1 %vm3958_vm0, %v25113_v10  ;;  %v13749_v10 = vsel %vm3958_vm0, %v25116_v63, 0 }
0x13dc   : > { %19236 = vmatprep.subr.msk.bf16.mxu1 %vm3958_vm0, %v25127_v26  ;;  %16600 = vmatmul.mubr.msk.bf16.gmra.mrb[8].mxu0 %vm3958_vm0, %v12769_v54 }
0x13dd   : > { %13045 = vmatprep.mubr.bf16.mxu0 %v26707_v18 }
0x13e2   : > { %18244 = vmatmul.mubr.msk.bf16.gmra.mrb[164].mxu1 %vm3958_vm0, %v25131_v41 }
0x13e3   : > { %18250 = vmatpush3.bf16.xpose.msra.mxu1 %v13746_v49  ;;  %18255 = vmatprep.mubr.msk.bf16.mxu1 %vm3958_vm0, %v25120_v55  ;;  %v13951_v55 = vpop.permute.xlu1 %13950 }
0x13e4   : > { %19237 = vmatprep.subr.msk.bf16.mxu1 %vm3958_vm0, %v25116_v63  ;;  %16601 = vmatmul.mubr.msk.bf16.gmra.mrb[12].mxu0 %vm3958_vm0, %v12770_v31  ;;  %v13969_v63 = vsel %vm3958_vm0, %v25139_v27, 0  ;;  %v13972_v3 = vsel %vm3958_vm0, %v13951_v55, 0 }
0x13e5   : > { %13055 = vmatprep.mubr.bf16.mxu0 %v26707_v18 }
0x13e7   : > { %v13830_v26 = vpop.permute.xlu1 %13829 }
0x13eb   : > { %18252 = vmatpush3.bf16.xpose.msra.mxu1 %v13749_v10  ;;  %v13955_v41 = vpop.permute.xlu1 %13954 }
0x13ec   : > { %19238 = vmatprep.subr.msk.bf16.mxu1 %vm3958_vm0, %v25133_v40  ;;  %16602 = vmatmul.mubr.msk.bf16.gmra.mrb[16].mxu0 %vm3958_vm0, %v12771_v52 }
0x13ed   : > { %13065 = vmatprep.mubr.bf16.mxu0 %v26707_v18 }
0x13ef   : > { %v13939_v40 = vpop.permute.xlu1 %13938 }
0x13f3   : > { %18254 = vmatpush3.bf16.xpose.msra.mxu1 %v13752_v14 }
0x13f4   : > { %19243 = vmatprep.subr.msk.bf16.mxu1 %vm3958_vm0, %v25139_v27  ;;  %16603 = vmatmul.mubr.msk.bf16.gmra.mrb[20].mxu0 %vm3958_vm0, %v12772_v8  ;;  %v13975_v27 = vsel %vm3958_vm0, %v25152_v42, 0 }
0x13f5   : > { %13075 = vmatprep.mubr.bf16.mxu0 %v26707_v18 }
0x13fa   : > { %18256 = vmatmul.mubr.msk.bf16.vlgmr.msra.gmra.mrb[168].mxu1 %vm3958_vm0, %v25137_v24  ;;  %v14456_v24 = vpop.permute.xlu0 %14455 }
0x13fb   : > { %18259 = vmatprep.mubr.msk.bf16.mxu1 %vm3958_vm0, %v25129_v50  ;;  %18280 = vmatpush3.bf16.xpose.msra.mxu1 %v13969_v63  ;;  %v13943_v50 = vpop.permute.xlu1 %13942 }
0x13fc   : > { %19244 = vmatprep.subr.msk.bf16.mxu1 %vm3958_vm0, %v13951_v55  ;;  %16604 = vmatmul.mubr.msk.bf16.gmra.mrb[24].mxu0 %vm3958_vm0, %v12773_v9 }
0x13fd   : > { %13085 = vmatprep.mubr.bf16.mxu0 %v26707_v18 }
0x1402   : > { %18260 = vmatmul.mubr.msk.bf16.gmra.mrb[172].mxu1 %vm3958_vm0, %v25160_v60  ;;  %v14452_v60 = vpop.permute.xlu1 %14451 }
0x1403   : > { %18282 = vmatpush3.bf16.xpose.msra.mxu1 %v13972_v3  ;;  %18287 = vmatprep.mubr.msk.bf16.mxu1 %vm3958_vm0, %v25164_v29  ;;  %v14545_v29 = vpop.permute.xlu0 %14544 }
0x1404   : > { %19245 = vmatprep.subr.msk.bf16.mxu1 %vm3958_vm0, %v25152_v42  ;;  %16605 = vmatmul.mubr.msk.bf16.gmra.mrb[32].mxu0 %vm3958_vm0, %v12774_v16 }
0x1405   : > { %18271 = vmatprep.mubr.msk.bf16.mxu0 %vm3958_vm0, %v25135_v61  ;;  %v13978_v61 = vsel %vm3958_vm0, %v13955_v41, 0 }
0x1406   : > { %v14543_v23 = vpop.permute.xlu1 %14542 }
0x1407   : > { %v14549_v0 = vpop.permute.xlu0 %14548 }
0x140b   : > { %18284 = vmatpush3.bf16.xpose.msra.mxu1 %v13975_v27  ;;  %v25271_v42 = vpop.permute.xlu0 %14635 }
0x140c   : > { %19246 = vmatprep.subr.msk.bf16.mxu1 %vm3958_vm0, %v13955_v41  ;;  %18272 = vmatmul.mubr.msk.bf16.vlgmr.msra.gmra.mrb[128].mxu0 %vm3958_vm0, %v13826_v19 }
0x140d   : > { %18296 = vmatpush3.bf16.msra.mxu0 %v25177_v20  ;;  %18275 = vmatprep.mubr.msk.bf16.mxu0 %vm3958_vm0, %v25144_v28  ;;  %v14547_v28 = vpop.permute.xlu1 %14546 }
0x140e   : > { %18297 = vmatprep.subr.bf16.mxu0 %v14452_v60 }
0x1411   : > { %18298 = vmatpush3.bf16.msra.mxu0 %v14452_v60 }
0x1412   : > { %18299 = vmatprep.subr.bf16.mxu0 %v14454_v51 }
0x1413   : > { %18286 = vmatpush3.bf16.xpose.msra.mxu1 %v13978_v61 }
0x1414   : > { %18311 = vmatprep.subr.bf16.mxu1 %v14543_v23  ;;  %18276 = vmatmul.mubr.msk.bf16.gmra.mrb[132].mxu0 %vm3958_vm0, %v13830_v26 }
0x1415   : > { %18300 = vmatpush3.bf16.msra.mxu0 %v14454_v51 }
0x1416   : > { %18301 = vmatprep.subr.bf16.mxu0 %v14456_v24 }
0x1419   : > { %18302 = vmatpush3.bf16.msra.mxu0 %v14456_v24 }
0x141a   : > { %18288 = vmatmul.mubr.msk.bf16.vlgmr.msra.gmra.mrb[176].mxu1 %vm3958_vm0, %v13939_v40  ;;  %18327 = vmatprep.subr.bf16.mxu0 %v25271_v42 }
0x141b   : > { %18291 = vmatprep.mubr.msk.bf16.mxu1 %vm3958_vm0, %v25171_v17  ;;  %18312 = vmatpush3.bf16.msra.mxu1 %v14543_v23 }
0x141c   : > { %18313 = vmatprep.subr.bf16.mxu1 %v14545_v29 }
0x141f   : > { %18314 = vmatpush3.bf16.msra.mxu1 %v14545_v29 }
0x1420   : > { %18315 = vmatprep.subr.bf16.mxu1 %v14547_v28 }
0x1422   : > { %18292 = vmatmul.mubr.msk.bf16.gmra.mrb[180].mxu1 %vm3958_vm0, %v13943_v50 }
0x1423   : > { %18316 = vmatpush3.bf16.msra.mxu1 %v14547_v28 }
0x1424   : > { %18317 = vmatprep.subr.bf16.mxu1 %v14549_v0 }
0x1427   : > { %18318 = vmatpush3.bf16.msra.mxu1 %v14549_v0 }
0x14ad   : > { %v18241_v20 = vpop.f32.mrb[160].mxu1 }
0x14ae   : > { %v25280_v2 = vsel %vm22061_vm1, %v18241_v20, -1e+30  ;;  %v13675_v44 = vpop.f32.mrb[161].mxu1 }
0x14af   : > { %v14083_v35 = vsel %vm3958_vm0, %v25280_v2, -inf  ;;  %v18242_v17 = vpop.f32.mrb[162].mxu1  ;;  %v25286_v33 = vsel %vm22066_vm2, %v13675_v44, -1e+30 }
0x14b0   : > { %14084 = vmax.xlane.f32.xlu0 %v14083_v35  ;;  %v13678_v22 = vpop.f32.mrb[163].mxu1  ;;  %v14077_v13 = vsel %vm3958_vm0, %v25286_v33, -inf  ;;  %v25298_v58 = vsel %vm22074_vm3, %v18242_v17, -1e+30 }
0x14b1   : > { %v25290_v59 = vsel %vm22084_vm4, %v13678_v22, -1e+30  ;;  %v14086_v4 = vsel %vm3958_vm0, %v25298_v58, -inf }
0x14b2   : > { %v14080_v11 = vsel %vm3958_vm0, %v25290_v59, -inf }
0x14b3   : > { %14081 = vmax.xlane.f32.xlu1 %v14080_v11 }
0x14b4   : > { %14078 = vmax.xlane.f32.xlu0 %v14077_v13 }
0x14b5   : > { %v18245_v15 = vpop.f32.mrb[164].mxu1 }
0x14b6   : > { %v13691_v5 = vpop.f32.mrb[165].mxu1  ;;  %v25304_v47 = vsel %vm22114_vm6, %v18245_v15, -1e+30 }
0x14b7   : > { %v18246_v12 = vpop.f32.mrb[166].mxu1  ;;  %v14095_v52 = vsel %vm3958_vm0, %v25304_v47, -inf  ;;  %v25320_v30 = vsel %vm22105_vm5, %v13691_v5, -1e+30 }
0x14b8   : > { %v25308_v53 = vsel %vm22132_vm8, %v18246_v12, -1e+30  ;;  %14087 = vmax.xlane.f32.xlu0 %v14086_v4  ;;  %v13694_v62 = vpop.f32.mrb[167].mxu1  ;;  %v14089_v16 = vsel %vm3958_vm0, %v25320_v30, -inf }
0x14b9   : > { %v14098_v38 = vsel %vm3958_vm0, %v25308_v53, -inf  ;;  %v25314_v1 = vsel %vm22118_vm7, %v13694_v62, -1e+30 }
0x14ba   : > { %14099 = vmax.xlane.f32.xlu1 %v14098_v38  ;;  %v14092_v56 = vsel %vm3958_vm0, %v25314_v1, -inf }
0x14bc   : > { %14096 = vmax.xlane.f32.xlu0 %v14095_v52 }
0x14be   : > { %14093 = vmax.xlane.f32.xlu1 %v14092_v56 }
0x14c0   : > { %14090 = vmax.xlane.f32.xlu0 %v14089_v16 }
0x14cd   : > { %v18257_v25 = vpop.f32.mrb[168].mxu1 }
0x14ce   : > { %v25328_v9 = vsel %vm22061_vm1, %v18257_v25, -1e+30  ;;  %v13788_v32 = vpop.f32.mrb[169].mxu1 }
0x14cf   : > { %v14107_v49 = vsel %vm3958_vm0, %v25328_v9, -inf  ;;  %v18258_v19 = vpop.f32.mrb[170].mxu1  ;;  %v25334_v10 = vsel %vm22066_vm2, %v13788_v32, -1e+30 }
0x14d0   : > { %v25338_v55 = vsel %vm22074_vm3, %v18258_v19, -1e+30  ;;  %14108 = vmax.xlane.f32.xlu0 %v14107_v49  ;;  %v13791_v14 = vpop.f32.mrb[171].mxu1  ;;  %v14101_v41 = vsel %vm3958_vm0, %v25334_v10, -inf }
0x14d1   : > { %v14110_v26 = vsel %vm3958_vm0, %v25338_v55, -inf  ;;  %v25344_v63 = vsel %vm22084_vm4, %v13791_v14, -1e+30 }
0x14d2   : > { %14111 = vmax.xlane.f32.xlu1 %v14110_v26  ;;  %v14104_v40 = vsel %vm3958_vm0, %v25344_v63, -inf }
0x14d4   : > { %14102 = vmax.xlane.f32.xlu0 %v14101_v41 }
0x14d5   : > { %v18261_v51 = vpop.f32.mrb[172].mxu1 }
0x14d6   : > { %v25352_v3 = vsel %vm22114_vm6, %v18261_v51, -1e+30  ;;  %14105 = vmax.xlane.f32.xlu1 %v14104_v40  ;;  %v13804_v50 = vpop.f32.mrb[173].mxu1 }
0x14d7   : > { %v14119_v24 = vsel %vm3958_vm0, %v25352_v3, -inf  ;;  %v18262_v27 = vpop.f32.mrb[174].mxu1  ;;  %v25358_v60 = vsel %vm22105_vm5, %v13804_v50, -1e+30 }
0x14d8   : > { %v25362_v29 = vsel %vm22132_vm8, %v18262_v27, -1e+30  ;;  %14120 = vmax.xlane.f32.xlu0 %v14119_v24  ;;  %v13807_v61 = vpop.f32.mrb[175].mxu1  ;;  %v14113_v28 = vsel %vm3958_vm0, %v25358_v60, -inf }
0x14d9   : > { %v14122_v23 = vsel %vm3958_vm0, %v25362_v29, -inf  ;;  %v25368_v0 = vsel %vm22118_vm7, %v13807_v61, -1e+30 }
0x14da   : > { %14123 = vmax.xlane.f32.xlu1 %v14122_v23  ;;  %v14116_v20 = vsel %vm3958_vm0, %v25368_v0, -inf }
0x14dc   : > { %14114 = vmax.xlane.f32.xlu0 %v14113_v28 }
0x14de   : > { %14117 = vmax.xlane.f32.xlu1 %v14116_v20 }
0x14df   : > { %v18273_v44 = vpop.f32.mrb[128].mxu0 }
0x14e0   : > { %v25376_v35 = vsel %vm22061_vm1, %v18273_v44, -1e+30  ;;  %v13901_v17 = vpop.f32.mrb[129].mxu0 }
0x14e1   : > { %v14131_v22 = vsel %vm3958_vm0, %v25376_v35, -inf  ;;  %v18274_v11 = vpop.f32.mrb[130].mxu0  ;;  %v25382_v13 = vsel %vm22066_vm2, %v13901_v17, -1e+30 }
0x14e2   : > { %v25386_v15 = vsel %vm22074_vm3, %v18274_v11, -1e+30  ;;  %14132 = vmax.xlane.f32.xlu0 %v14131_v22  ;;  %v13904_v5 = vpop.f32.mrb[131].mxu0  ;;  %v14125_v62 = vsel %vm3958_vm0, %v25382_v13, -inf }
0x14e3   : > { %v14134_v4 = vsel %vm3958_vm0, %v25386_v15, -inf  ;;  %v25392_v12 = vsel %vm22084_vm4, %v13904_v5, -1e+30 }
0x14e4   : > { %14135 = vmax.xlane.f32.xlu1 %v14134_v4  ;;  %v14128_v38 = vsel %vm3958_vm0, %v25392_v12, -inf }
0x14e6   : > { %14126 = vmax.xlane.f32.xlu0 %v14125_v62 }
0x14e7   : > { %v18277_v52 = vpop.f32.mrb[132].mxu0 }
0x14e8   : > { %v25400_v56 = vsel %vm22114_vm6, %v18277_v52, -1e+30  ;;  %14129 = vmax.xlane.f32.xlu1 %v14128_v38  ;;  %v13917_v16 = vpop.f32.mrb[133].mxu0 }
0x14e9   : > { %v14143_v25 = vsel %vm3958_vm0, %v25400_v56, -inf  ;;  %v18278_v32 = vpop.f32.mrb[134].mxu0  ;;  %v25406_v49 = vsel %vm22105_vm5, %v13917_v16, -1e+30 }
0x14ea   : > { %v25410_v19 = vsel %vm22132_vm8, %v18278_v32, -1e+30  ;;  %14144 = vmax.xlane.f32.xlu0 %v14143_v25  ;;  %v13920_v14 = vpop.f32.mrb[135].mxu0  ;;  %v14137_v40 = vsel %vm3958_vm0, %v25406_v49, -inf }
0x14eb   : > { %v14146_v26 = vsel %vm3958_vm0, %v25410_v19, -inf  ;;  %v25416_v41 = vsel %vm22118_vm7, %v13920_v14, -1e+30 }
0x14ec   : > { %14147 = vmax.xlane.f32.xlu1 %v14146_v26  ;;  %v14140_v27 = vsel %vm3958_vm0, %v25416_v41, -inf }
0x14ed   : > { %v18289_v51 = vpop.f32.mrb[176].mxu1 }
0x14ee   : > { %v25422_v50 = vsel %vm22061_vm1, %v18289_v51, -1e+30  ;;  %v14014_v24 = vpop.f32.mrb[177].mxu1  ;;  %14138 = vmax.xlane.f32.xlu0 %v14137_v40 }
0x14ef   : > { %v18290_v61 = vpop.f32.mrb[178].mxu1  ;;  %v14155_v20 = vsel %vm3958_vm0, %v25422_v50, -inf  ;;  %v25434_v7 = vsel %vm22066_vm2, %v14014_v24, -1e+30 }
0x14f0   : > { %v25428_v23 = vsel %vm22074_vm3, %v18290_v61, -1e+30  ;;  %v14017_v28 = vpop.f32.mrb[179].mxu1  ;;  %14141 = vmax.xlane.f32.xlu1 %v14140_v27  ;;  %v14149_v37 = vsel %vm3958_vm0, %v25434_v7, -inf }
0x14f1   : > { %v14158_v44 = vsel %vm3958_vm0, %v25428_v23, -inf  ;;  %v25440_v17 = vsel %vm22084_vm4, %v14017_v28, -1e+30 }
0x14f2   : > { %14156 = vmax.xlane.f32.xlu0 %v14155_v20  ;;  %v14152_v5 = vsel %vm3958_vm0, %v25440_v17, -inf }
0x14f4   : > { %14159 = vmax.xlane.f32.xlu1 %v14158_v44 }
0x14f5   : > { %v18293_v22 = vpop.f32.mrb[180].mxu1 }
0x14f6   : > { %v25446_v11 = vsel %vm22114_vm6, %v18293_v22, -1e+30  ;;  %v14030_v39 = vpop.f32.mrb[181].mxu1  ;;  %14150 = vmax.xlane.f32.xlu0 %v14149_v37 }
0x14f7   : > { %v18294_v4 = vpop.f32.mrb[182].mxu1  ;;  %v14167_v45 = vsel %vm3958_vm0, %v25446_v11, -inf  ;;  %v25458_v31 = vsel %vm22105_vm5, %v14030_v39, -1e+30 }
0x14f8   : > { %v14033_v62 = vpop.f32.mrb[183].mxu1  ;;  %14153 = vmax.xlane.f32.xlu1 %v14152_v5  ;;  %v14161_v16 = vsel %vm3958_vm0, %v25458_v31, -inf  ;;  %v25466_v25 = vsel %vm22132_vm8, %v18294_v4, -1e+30 }
0x14f9   : > { %v25454_v38 = vsel %vm22118_vm7, %v14033_v62, -1e+30  ;;  %v14170_v8 = vsel %vm3958_vm0, %v25466_v25, -inf }
0x14fa   : > { %14168 = vmax.xlane.f32.xlu0 %v14167_v45  ;;  %v14164_v52 = vsel %vm3958_vm0, %v25454_v38, -inf }
0x14fc   : > { %14165 = vmax.xlane.f32.xlu1 %v14164_v52 }
0x14fe   : > { %14162 = vmax.xlane.f32.xlu0 %v14161_v16 }
0x1502   : > { %14171 = vmax.xlane.f32.xlu0 %v14170_v8 }
0x153d   : > { %v14085_v48 = vpop.xlane.xlu0 %14084 }
0x153e   : > { %v14175_v32 = vsub.f32 %v25280_v2, %v14085_v48 }
0x1540   : > { %v14209_v14 = vmul.f32 1.442695, %v14175_v32  ;;  %v14082_v26 = vpop.xlane.xlu1 %14081 }
0x1541   : > { %v14079_v40 = vpop.xlane.xlu0 %14078  ;;  %v14174_v24 = vsub.f32 %v25290_v59, %v14082_v26 }
0x1542   : > { %20376 = vpow2.f32 %v14209_v14  ;;  %v14173_v51 = vsub.f32 %v25286_v33, %v14079_v40 }
0x1543   : > { %v14207_v28 = vmul.f32 1.442695, %v14174_v24 }
0x1544   : > { %v14205_v27 = vmul.f32 1.442695, %v14173_v51 }
0x1545   : > { %v14088_v54 = vpop.xlane.xlu0 %14087 }
0x1546   : > { %20378 = vpow2.f32 %v14205_v27  ;;  %v14176_v61 = vsub.f32 %v25298_v58, %v14088_v54 }
0x1547   : > { %v14100_v2 = vpop.xlane.xlu1 %14099 }
0x1548   : > { %v14211_v20 = vmul.f32 1.442695, %v14176_v61  ;;  %v14180_v58 = vsub.f32 %v25308_v53, %v14100_v2 }
0x1549   : > { %v14097_v44 = vpop.xlane.xlu0 %14096 }
0x154a   : > { %20380 = vpow2.f32 %v14211_v20  ;;  %v14179_v37 = vsub.f32 %v25304_v47, %v14097_v44  ;;  %v14219_v16 = vmul.f32 1.442695, %v14180_v58 }
0x154b   : > { %20382 = vpow2.f32 %v14207_v28  ;;  %v14094_v45 = vpop.xlane.xlu1 %14093 }
0x154c   : > { %v25475_v22 = vpop.eup %20376  ;;  %v14217_v39 = vmul.f32 1.442695, %v14179_v37  ;;  %v14178_v8 = vsub.f32 %v25314_v1, %v14094_v45 }
0x154d   : > { %v14091_v5 = vpop.xlane.xlu0 %14090  ;;  %v14275_v33 = vsel %vm3958_vm0, %v25475_v22, 0.0 }
0x154e   : > { %v14177_v59 = vsub.f32 %v25320_v30, %v14091_v5  ;;  %14276 = vadd.xlane.f32.xlu0 %v14275_v33  ;;  %20384 = vpow2.f32 %v14217_v39  ;;  %v14215_v53 = vmul.f32 1.442695, %v14178_v8 }
0x1550   : > { %v25480_v4 = vpop.eup %20378  ;;  %v14213_v62 = vmul.f32 1.442695, %v14177_v59 }
0x1551   : > { %v14269_v47 = vsel %vm3958_vm0, %v25480_v4, 0.0 }
0x1552   : > { %14270 = vadd.xlane.f32.xlu0 %v14269_v47  ;;  %20386 = vpow2.f32 %v14213_v62 }
0x1553   : > { %20388 = vpow2.f32 %v14219_v16 }
0x1554   : > { %v25485_v52 = vpop.eup %20380  ;;  %20390 = vpow2.f32 %v14215_v53 }
0x1555   : > { %v14278_v30 = vsel %vm3958_vm0, %v25485_v52, 0.0  ;;  %v25490_v48 = vpop.eup %20382 }
0x1556   : > { %14279 = vadd.xlane.f32.xlu1 %v14278_v30  ;;  %v14272_v32 = vsel %vm3958_vm0, %v25490_v48, 0.0 }
0x1558   : > { %v25494_v14 = vpop.eup %20384 }
0x1559   : > { %v14287_v1 = vsel %vm3958_vm0, %v25494_v14, 0.0 }
0x155a   : > { %14273 = vadd.xlane.f32.xlu1 %v14272_v32 }
0x155c   : > { %v25498_v40 = vpop.eup %20386 }
0x155d   : > { %v14109_v26 = vpop.xlane.xlu0 %14108  ;;  %v14281_v28 = vsel %vm3958_vm0, %v25498_v40, 0.0  ;;  %v25504_v20 = vpop.eup %20388 }
0x155e   : > { %v14183_v51 = vsub.f32 %v25328_v9, %v14109_v26  ;;  %14288 = vadd.xlane.f32.xlu1 %v14287_v1  ;;  %v14290_v5 = vsel %vm3958_vm0, %v25504_v20, 0.0  ;;  %v25510_v33 = vpop.eup %20390 }
0x155f   : > { %v14112_v24 = vpop.xlane.xlu1 %14111 }
0x1560   : > { %v14225_v27 = vmul.f32 1.442695, %v14183_v51  ;;  %v14184_v54 = vsub.f32 %v25338_v55, %v14112_v24 }
0x1561   : > { %v14103_v61 = vpop.xlane.xlu0 %14102 }
0x1562   : > { %20392 = vpow2.f32 %v14225_v27  ;;  %v14181_v44 = vsub.f32 %v25334_v10, %v14103_v61  ;;  %14282 = vadd.xlane.f32.xlu1 %v14281_v28  ;;  %v14227_v2 = vmul.f32 1.442695, %v14184_v54  ;;  %v14284_v10 = vsel %vm3958_vm0, %v25510_v33, 0.0 }
0x1563   : > { %v14106_v37 = vpop.xlane.xlu1 %14105 }
0x1564   : > { %v14221_v39 = vmul.f32 1.442695, %v14181_v44  ;;  %v14182_v9 = vsub.f32 %v25344_v63, %v14106_v37 }
0x1565   : > { %v14121_v62 = vpop.xlane.xlu0 %14120 }
0x1566   : > { %20394 = vpow2.f32 %v14221_v39  ;;  %14291 = vadd.xlane.f32.xlu1 %v14290_v5  ;;  %v14223_v55 = vmul.f32 1.442695, %v14182_v9  ;;  %v14187_v47 = vsub.f32 %v25352_v3, %v14121_v62 }
0x1567   : > { %20396 = vpow2.f32 %v14227_v2  ;;  %v14124_v26 = vpop.xlane.xlu1 %14123 }
0x1568   : > { %14639 = vrot.lane.b32.xlu0 %v26700_v36, %s20672_s21  ;;  %20398 = vpow2.f32 %v14223_v55  ;;  %v14233_v30 = vmul.f32 1.442695, %v14187_v47  ;;  %v14188_v51 = vsub.f32 %v25362_v29, %v14124_v26 }
0x156a   : > { %14285 = vadd.xlane.f32.xlu1 %v14284_v10  ;;  %20400 = vpow2.f32 %v14233_v30  ;;  %v14235_v24 = vmul.f32 1.442695, %v14188_v51 }
0x156b   : > { %v14118_v54 = vpop.xlane.xlu1 %14117 }
0x156c   : > { %v25516_v59 = vpop.eup %20392  ;;  %14641 = vrot.lane.b32.xlu0 %v26702_v6, %s20672_s21  ;;  %v14115_v6 = vpop.xlane.xlu0 %14114 }
0x156d   : > { %v14299_v63 = vsel %vm3958_vm0, %v25516_v59, 0.0  ;;  %v14185_v53 = vsub.f32 %v25358_v60, %v14115_v6 }
0x156e   : > { %14300 = vadd.xlane.f32.xlu1 %v14299_v63 }
0x156f   : > { %v14229_v3 = vmul.f32 1.442695, %v14185_v53 }
0x1570   : > { %v25522_v58 = vpop.eup %20394  ;;  %v14133_v1 = vpop.xlane.xlu0 %14132 }
0x1571   : > { %v14293_v36 = vsel %vm3958_vm0, %v25522_v58, 0.0  ;;  %v25526_v45 = vpop.eup %20396  ;;  %20402 = vpow2.f32 %v14229_v3  ;;  %v14191_v27 = vsub.f32 %v25376_v35, %v14133_v1  ;;  %v14136_v44 = vpop.xlane.xlu1 %14135 }
0x1572   : > { %14294 = vadd.xlane.f32.xlu1 %v14293_v36  ;;  %v14302_v16 = vsel %vm3958_vm0, %v25526_v45, 0.0  ;;  %v25531_v8 = vpop.eup %20398  ;;  %20404 = vpow2.f32 %v14235_v24  ;;  %v14192_v2 = vsub.f32 %v25386_v15, %v14136_v44  ;;  %v14186_v36 = vsub.f32 %v25368_v0, %v14118_v54 }
0x1573   : > { %v14296_v32 = vsel %vm3958_vm0, %v25531_v8, 0.0  ;;  %v14241_v28 = vmul.f32 1.442695, %v14191_v27 }
0x1574   : > { %v14127_v61 = vpop.xlane.xlu0 %14126  ;;  %v25539_v37 = vpop.eup %20400  ;;  %v14243_v35 = vmul.f32 1.442695, %v14192_v2  ;;  %v14231_v53 = vmul.f32 1.442695, %v14186_v36 }
0x1575   : > { %v14189_v60 = vsub.f32 %v25382_v13, %v14127_v61  ;;  %20406 = vpow2.f32 %v14241_v28  ;;  %v14311_v29 = vsel %vm3958_vm0, %v25539_v37, 0.0  ;;  %v14130_v10 = vpop.xlane.xlu1 %14129 }
0x1576   : > { %14303 = vadd.xlane.f32.xlu1 %v14302_v16 }
0x1577   : > { %v14237_v39 = vmul.f32 1.442695, %v14189_v60 }
0x1578   : > { %v14145_v63 = vpop.xlane.xlu0 %14144 }
0x1579   : > { %20408 = vpow2.f32 %v14237_v39  ;;  %v14148_v6 = vpop.xlane.xlu1 %14147  ;;  %v14195_v51 = vsub.f32 %v25400_v56, %v14145_v63 }
0x157a   : > { %14297 = vadd.xlane.f32.xlu1 %v14296_v32  ;;  %20410 = vpow2.f32 %v14243_v35  ;;  %v14190_v32 = vsub.f32 %v25392_v12, %v14130_v10  ;;  %v14196_v28 = vsub.f32 %v25410_v19, %v14148_v6 }
0x157b   : > { %v25544_v9 = vpop.eup %20402  ;;  %20412 = vpow2.f32 %v14231_v53  ;;  %v14249_v24 = vmul.f32 1.442695, %v14195_v51 }
0x157c   : > { %v14305_v13 = vsel %vm3958_vm0, %v25544_v9, 0.0  ;;  %v25550_v5 = vpop.eup %20404  ;;  %v14139_v30 = vpop.xlane.xlu0 %14138  ;;  %v14239_v1 = vmul.f32 1.442695, %v14190_v32  ;;  %v14251_v44 = vmul.f32 1.442695, %v14196_v28 }
0x157d   : > { %v14314_v15 = vsel %vm3958_vm0, %v25550_v5, 0.0  ;;  %v14142_v0 = vpop.xlane.xlu1 %14141  ;;  %v14193_v27 = vsub.f32 %v25406_v49, %v14139_v30 }
0x157e   : > { %20414 = vpow2.f32 %v14239_v1  ;;  %v14194_v2 = vsub.f32 %v25416_v41, %v14142_v0 }
0x157f   : > { %v25554_v55 = vpop.eup %20406  ;;  %20416 = vpow2.f32 %v14249_v24  ;;  %v14245_v12 = vmul.f32 1.442695, %v14193_v27 }
0x1580   : > { %v14157_v3 = vpop.xlane.xlu0 %14156  ;;  %v14247_v49 = vmul.f32 1.442695, %v14194_v2 }
0x1581   : > { %v14160_v54 = vpop.xlane.xlu1 %14159  ;;  %20418 = vpow2.f32 %v14245_v12  ;;  %v14199_v32 = vsub.f32 %v25422_v50, %v14157_v3 }
0x1582   : > { %20420 = vpow2.f32 %v14251_v44  ;;  %v14200_v3 = vsub.f32 %v25428_v23, %v14160_v54 }
0x1583   : > { %v25558_v62 = vpop.eup %20408  ;;  %20422 = vpow2.f32 %v14247_v49  ;;  %v14257_v24 = vmul.f32 1.442695, %v14199_v32 }
0x1584   : > { %v14317_v47 = vsel %vm3958_vm0, %v25558_v62, 0.0  ;;  %v25563_v16 = vpop.eup %20410  ;;  %v14151_v61 = vpop.xlane.xlu0 %14150 }
0x1585   : > { %v14326_v26 = vsel %vm3958_vm0, %v25563_v16, 0.0  ;;  %v25571_v60 = vpop.eup %20412  ;;  %v14154_v39 = vpop.xlane.xlu1 %14153  ;;  %v14197_v27 = vsub.f32 %v25434_v7, %v14151_v61  ;;  %v14259_v7 = vmul.f32 1.442695, %v14200_v3 }
0x1587   : > { %v14253_v12 = vmul.f32 1.442695, %v14197_v27 }
0x1588   : > { %v14169_v56 = vpop.xlane.xlu0 %14168  ;;  %v25576_v35 = vpop.eup %20414 }
0x1589   : > { %v14320_v19 = vsel %vm3958_vm0, %v25576_v35, 0.0  ;;  %v14203_v63 = vsub.f32 %v25446_v11, %v14169_v56 }
0x158b   : > { %14312 = vadd.xlane.f32.xlu0 %v14311_v29  ;;  %14637 = vrot.lane.b32.xlu1 %v26696_v43, %s20672_s21  ;;  %v14323_v43 = vsel %vm3958_vm0, %v25554_v55, 0.0  ;;  %v14308_v29 = vsel %vm3958_vm0, %v25571_v60, 0.0 }
0x158c   : > { %v14163_v10 = vpop.xlane.xlu0 %14162 }
0x158f   : > { %14306 = vadd.xlane.f32.xlu0 %v14305_v13  ;;  %v14198_v13 = vsub.f32 %v25440_v17, %v14154_v39  ;;  %v14265_v17 = vmul.f32 1.442695, %v14203_v63 }
0x1590   : > { %v14172_v6 = vpop.xlane.xlu0 %14171 }
0x1591   : > { %v14255_v41 = vmul.f32 1.442695, %v14198_v13 }
0x1593   : > { %14315 = vadd.xlane.f32.xlu0 %v14314_v15  ;;  %v25581_v15 = vpop.eup %20416  ;;  %20424 = vpow2.f32 %v14255_v41 }
0x1594   : > { %v25588_v36 = vpop.eup %20418  ;;  %20426 = vpow2.f32 %v14265_v17 }
0x1595   : > { %v14329_v30 = vsel %vm3958_vm0, %v25588_v36, 0.0  ;;  %v25593_v53 = vpop.eup %20420 }
0x1596   : > { %v14338_v1 = vsel %vm3958_vm0, %v25593_v53, 0.0  ;;  %v25599_v51 = vpop.eup %20422 }
0x1597   : > { %14324 = vadd.xlane.f32.xlu0 %v14323_v43  ;;  %v14335_v43 = vsel %vm3958_vm0, %v25581_v15, 0.0  ;;  %v14332_v28 = vsel %vm3958_vm0, %v25599_v51, 0.0 }
0x159b   : > { %14318 = vadd.xlane.f32.xlu0 %v14317_v47  ;;  %v14201_v47 = vsub.f32 %v25458_v31, %v14163_v10 }
0x159d   : > { %v14261_v11 = vmul.f32 1.442695, %v14201_v47 }
0x159f   : > { %14327 = vadd.xlane.f32.xlu0 %v14326_v26  ;;  %v14166_v26 = vpop.xlane.xlu1 %14165  ;;  %20428 = vpow2.f32 %v14261_v11 }
0x15a0   : > { %v14202_v31 = vsub.f32 %v25454_v38, %v14166_v26 }
0x15a2   : > { %v14263_v50 = vmul.f32 1.442695, %v14202_v31 }
0x15af   : > { %14309 = vadd.xlane.f32.xlu1 %v14308_v29 }
0x15b3   : > { %14321 = vadd.xlane.f32.xlu1 %v14320_v19 }
0x15b5   : > { %14728 = vrot.lane.b32.xlu0 %v26703_v46, %s20672_s21  ;;  %v14204_v46 = vsub.f32 %v25466_v25, %v14172_v6  ;;  %v25605_v25 = vpop.eup %20424 }
0x15b6   : > { %v14344_v38 = vsel %vm3958_vm0, %v25605_v25, 0.0  ;;  %v25610_v44 = vpop.eup %20426 }
0x15b7   : > { %14336 = vadd.xlane.f32.xlu1 %v14335_v43  ;;  %v14267_v0 = vmul.f32 1.442695, %v14204_v46  ;;  %v14359_v61 = vsel %vm3958_vm0, %v25610_v44, 0.0  ;;  %v25614_v2 = vpop.eup %20428 }
0x15b8   : > { %v14353_v23 = vsel %vm3958_vm0, %v25614_v2, 0.0 }
0x15b9   : > { %20430 = vpow2.f32 %v14267_v0 }
0x15ba   : > { %20432 = vpow2.f32 %v14257_v24 }
0x15bb   : > { %14330 = vadd.xlane.f32.xlu1 %v14329_v30  ;;  %20434 = vpow2.f32 %v14263_v50 }
0x15bc   : > { %20436 = vpow2.f32 %v14253_v12 }
0x15bd   : > { %20438 = vpow2.f32 %v14259_v7 }
0x15bf   : > { %14339 = vadd.xlane.f32.xlu1 %v14338_v1 }
0x15c3   : > { %14333 = vadd.xlane.f32.xlu1 %v14332_v28  ;;  %v25618_v54 = vpop.eup %20430 }
0x15c4   : > { %v25620_v39 = vpop.eup %20432  ;;  %v14362_v56 = vsel %vm3958_vm0, %v25618_v54, 0.0 }
0x15c5   : > { %v25624_v29 = vpop.eup %20434  ;;  %v14347_v49 = vsel %vm3958_vm0, %v25620_v39, 0.0 }
0x15c6   : > { %v25628_v13 = vpop.eup %20436  ;;  %v14356_v19 = vsel %vm3958_vm0, %v25624_v29, 0.0 }
0x15c7   : > { %14345 = vadd.xlane.f32.xlu1 %v14344_v38  ;;  %v14341_v10 = vsel %vm3958_vm0, %v25628_v13, 0.0  ;;  %v25634_v41 = vpop.eup %20438 }
0x15c8   : > { %v14350_v63 = vsel %vm3958_vm0, %v25634_v41, 0.0 }
0x15cb   : > { %14360 = vadd.xlane.f32.xlu1 %v14359_v61 }
0x15cf   : > { %14354 = vadd.xlane.f32.xlu1 %v14353_v23 }
0x15d3   : > { %14363 = vadd.xlane.f32.xlu1 %v14362_v56 }
0x15d4   : > { %14348 = vadd.xlane.f32.xlu0 %v14347_v49 }
0x15d7   : > { %14357 = vadd.xlane.f32.xlu1 %v14356_v19 }
0x15d8   : > { %14342 = vadd.xlane.f32.xlu0 %v14341_v10 }
0x15db   : > { %v14277_v43 = vpop.xlane.xlu0 %14276 }
0x15dc   : > { %14351 = vadd.xlane.f32.xlu0 %v14350_v63 }
0x15df   : > { %v14271_v17 = vpop.xlane.xlu0 %14270 }
0x15e3   : > { %v14280_v47 = vpop.xlane.xlu1 %14279  ;;  %v14640_v19 = vpop.permute.xlu0 %14639 }
0x15e4   : > { %20440 = vrcp.f32 %v14280_v47 }
0x15e5   : > { %20442 = vrcp.f32 %v14271_v17  ;;  %v19722_v17 = vld [vmem:[#allocation9 + $0x1e4] ss:$12 sps:$4 sm:$0xff]  }
0x15e6   : > { %20444 = vrcp.f32 %v14277_v43 }
0x15e7   : > { %v14274_v6 = vpop.xlane.xlu1 %14273 }
0x15e8   : > { %20446 = vrcp.f32 %v14274_v6  ;;  %14730 = vrot.lane.b32.xlu1 %v26704_v34, %s20672_s21 }
0x15eb   : > { %v14289_v30 = vpop.xlane.xlu1 %14288 }
0x15ee   : > { %v20441_v11 = vpop.eup %20440 }
0x15ef   : > { %v14283_v46 = vpop.xlane.xlu1 %14282  ;;  %v20443_v32 = vpop.eup %20442  ;;  %v14400_v31 = vmul.f32 %v20441_v11, %v25485_v52 }
0x15f0   : > { %v20445_v26 = vpop.eup %20444  ;;  %v14397_v24 = vmul.f32 %v20443_v32, %v25480_v4 }
0x15f1   : > { %v14399_v28 = vmul.f32 %v20445_v26, %v25475_v22 }
0x15f2   : > { %v20447_v1 = vpop.eup %20446  ;;  %14732 = vrot.lane.b32.xlu0 %v26705_v57, %s20672_s21 }
0x15f3   : > { %v14292_v0 = vpop.xlane.xlu1 %14291  ;;  %v14398_v27 = vmul.f32 %v20447_v1, %v25490_v48  ;;  %v14430_v50 = vpack.c.bf16 %v14400_v31, %v14399_v28 }
0x15f4   : > { %20448 = vrcp.f32 %v14292_v0 }
0x15f5   : > { %v14429_v34 = vpack.c.bf16 %v14398_v27, %v14397_v24  ;;  %20450 = vrcp.f32 %v14283_v46 }
0x15f6   : > { %14734 = vrot.lane.b32.xlu0 %v26706_v21, %s20672_s21  ;;  %20452 = vrcp.f32 %v14289_v30 }
0x15f7   : > { %18303 = vmatprep.mubr.msk.bf16.mxu0 %vm3958_vm0, %v14429_v34  ;;  %v14286_v52 = vpop.xlane.xlu1 %14285 }
0x15f8   : > { %20454 = vrcp.f32 %v14286_v52  ;;  %18304 = vmatmul.mubr.msk.bf16.vlgmr.msra.gmra.mrb[136].mxu0 %vm3958_vm0, %v14430_v50 }
0x15f9   : > { %18328 = vmatpush3.bf16.msra.mxu0 %v25271_v42 }
0x15fb   : > { %v14301_v57 = vpop.xlane.xlu1 %14300 }
0x15fe   : > { %v20449_v4 = vpop.eup %20448 }
0x15ff   : > { %v14295_v48 = vpop.xlane.xlu1 %14294  ;;  %v20451_v22 = vpop.eup %20450  ;;  %v14404_v38 = vmul.f32 %v20449_v4, %v25504_v20 }
0x1600   : > { %v20453_v3 = vpop.eup %20452  ;;  %v14401_v21 = vmul.f32 %v20451_v22, %v25498_v40 }
0x1601   : > { %v14403_v23 = vmul.f32 %v20453_v3, %v25494_v14  ;;  %v14642_v14 = vpop.permute.xlu0 %14641 }
0x1602   : > { %v20455_v12 = vpop.eup %20454 }
0x1603   : > { %v14304_v7 = vpop.xlane.xlu1 %14303  ;;  %v14402_v61 = vmul.f32 %v20455_v12, %v25510_v33  ;;  %v14432_v49 = vpack.c.bf16 %v14404_v38, %v14403_v23 }
0x1604   : > { %20456 = vrcp.f32 %v14304_v7 }
0x1605   : > { %v14431_v56 = vpack.c.bf16 %v14402_v61, %v14401_v21  ;;  %20458 = vrcp.f32 %v14295_v48 }
0x1606   : > { %20460 = vrcp.f32 %v14301_v57 }
0x1607   : > { %18307 = vmatprep.mubr.msk.bf16.mxu0 %vm3958_vm0, %v14431_v56  ;;  %v14298_v42 = vpop.xlane.xlu1 %14297 }
0x1608   : > { %20462 = vrcp.f32 %v14298_v42  ;;  %18308 = vmatmul.mubr.msk.bf16.gmra.mrb[140].mxu0 %vm3958_vm0, %v14432_v49 }
0x160b   : > { %v14638_v20 = vpop.permute.xlu1 %14637 }
0x160c   : > { %18329 = vmatprep.subr.bf16.mxu0 %v14638_v20 }
0x160d   : > { %18330 = vmatpush3.bf16.msra.mxu0 %v14638_v20  ;;  %v19728_v20 = vld [vmem:[#allocation9 + $0x210] ss:$12 sps:$4 sm:$0xff]  }
0x160e   : > { %18331 = vmatprep.subr.bf16.mxu0 %v14640_v19  ;;  %v20457_v40 = vpop.eup %20456 }
0x160f   : > { %v20459_v33 = vpop.eup %20458  ;;  %v14408_v43 = vmul.f32 %v20457_v40, %v25526_v45  ;;  %v19734_v40 = vld [vmem:[#allocation9 + $0x22c] ss:$12 sps:$4 sm:$0xff]  }
0x1610   : > { %v20461_v10 = vpop.eup %20460  ;;  %v14405_v47 = vmul.f32 %v20459_v33, %v25522_v58 }
0x1611   : > { %18332 = vmatpush3.bf16.msra.mxu0 %v14640_v19  ;;  %v14407_v30 = vmul.f32 %v20461_v10, %v25516_v59  ;;  %v19726_v19 = vld [vmem:[#allocation9 + $0x1fc] ss:$12 sps:$4 sm:$0xff]  }
0x1612   : > { %v20463_v63 = vpop.eup %20462  ;;  %18333 = vmatprep.subr.bf16.mxu0 %v14642_v14 }
0x1613   : > { %v14406_v6 = vmul.f32 %v20463_v63, %v25531_v8  ;;  %v14434_v46 = vpack.c.bf16 %v14408_v43, %v14407_v30  ;;  %v19732_v43 = vld [vmem:[#allocation9 + $0x228] ss:$12 sps:$4 sm:$0xff]  }
0x1615   : > { %18334 = vmatpush3.bf16.msra.mxu0 %v14642_v14  ;;  %v14433_v11 = vpack.c.bf16 %v14406_v6, %v14405_v47 }
0x1616   : > { %14961 = vmatprep.subr.bf16.mxu0 %v19722_v17 }
0x1617   : > { %18319 = vmatprep.mubr.msk.bf16.mxu1 %vm3958_vm0, %v14433_v11 }
0x1618   : > { %v14313_v32 = vpop.xlane.xlu0 %14312  ;;  %18320 = vmatmul.mubr.msk.bf16.vlgmr.msra.gmra.mrb[184].mxu1 %vm3958_vm0, %v14434_v46 }
0x161c   : > { %v14307_v26 = vpop.xlane.xlu0 %14306 }
0x1620   : > { %v14316_v1 = vpop.xlane.xlu0 %14315 }
0x1621   : > { %20464 = vrcp.f32 %v14316_v1 }
0x1622   : > { %20466 = vrcp.f32 %v14307_v26 }
0x1623   : > { %20468 = vrcp.f32 %v14313_v32 }
0x1624   : > { %v14325_v45 = vpop.xlane.xlu0 %14324 }
0x1628   : > { %v14319_v31 = vpop.xlane.xlu0 %14318 }
0x162b   : > { %v20465_v8 = vpop.eup %20464 }
0x162c   : > { %v14328_v0 = vpop.xlane.xlu0 %14327  ;;  %v20467_v28 = vpop.eup %20466  ;;  %v14412_v52 = vmul.f32 %v20465_v8, %v25550_v5 }
0x162d   : > { %v20469_v34 = vpop.eup %20468  ;;  %v14409_v48 = vmul.f32 %v20467_v28, %v25544_v9 }
0x162e   : > { %v14411_v12 = vmul.f32 %v20469_v34, %v25539_v37  ;;  %v19720_v37 = vld [vmem:[#allocation9 + $0x1e0] ss:$12 sps:$4 sm:$0xff]  }
0x1630   : > { %v14729_v24 = vpop.permute.xlu0 %14728  ;;  %v14436_v61 = vpack.c.bf16 %v14412_v52, %v14411_v12  ;;  %v19727_v12 = vld [vmem:[#allocation9 + $0x200] ss:$12 sps:$4 sm:$0xff]  }
0x1631   : > { %18343 = vmatprep.subr.bf16.mxu1 %v14729_v24 }
0x1632   : > { %18344 = vmatpush3.bf16.msra.mxu1 %v14729_v24 }
0x163c   : > { %v14310_v59 = vpop.xlane.xlu1 %14309 }
0x163d   : > { %20470 = vrcp.f32 %v14310_v59  ;;  %v19723_v59 = vld [vmem:[#allocation9 + $0x1e8] ss:$12 sps:$4 sm:$0xff]  }
0x163e   : > { %20472 = vrcp.f32 %v14328_v0 }
0x163f   : > { %20474 = vrcp.f32 %v14319_v31 }
0x1640   : > { %20476 = vrcp.f32 %v14325_v45  ;;  %v14322_v58 = vpop.xlane.xlu1 %14321 }
0x1641   : > { %20478 = vrcp.f32 %v14322_v58 }
0x1644   : > { %v14337_v27 = vpop.xlane.xlu1 %14336 }
0x1647   : > { %v20471_v50 = vpop.eup %20470 }
0x1648   : > { %v20473_v57 = vpop.eup %20472  ;;  %v14331_v4 = vpop.xlane.xlu1 %14330  ;;  %v14410_v22 = vmul.f32 %v20471_v50, %v25571_v60 }
0x1649   : > { %v20475_v3 = vpop.eup %20474  ;;  %v14416_v23 = vmul.f32 %v20473_v57, %v25563_v16 }
0x164a   : > { %v20477_v38 = vpop.eup %20476  ;;  %v14435_v7 = vpack.c.bf16 %v14410_v22, %v14409_v48  ;;  %v14413_v5 = vmul.f32 %v20475_v3, %v25558_v62  ;;  %v19724_v62 = vld [vmem:[#allocation9 + $0x1f8] ss:$12 sps:$4 sm:$0xff]  }
0x164b   : > { %v20479_v21 = vpop.eup %20478  ;;  %v14415_v9 = vmul.f32 %v20477_v38, %v25554_v55 }
0x164c   : > { %18323 = vmatprep.mubr.msk.bf16.mxu1 %vm3958_vm0, %v14435_v7  ;;  %v14340_v56 = vpop.xlane.xlu1 %14339  ;;  %v14414_v49 = vmul.f32 %v20479_v21, %v25576_v35  ;;  %v19730_v35 = vld [vmem:[#allocation9 + $0x214] ss:$12 sps:$4 sm:$0xff]  }
0x164d   : > { %18324 = vmatmul.mubr.msk.bf16.gmra.mrb[188].mxu1 %vm3958_vm0, %v14436_v61  ;;  %20480 = vrcp.f32 %v14340_v56  ;;  %v14438_v42 = vpack.c.bf16 %v14416_v23, %v14415_v9 }
0x164e   : > { %v14437_v60 = vpack.c.bf16 %v14414_v49, %v14413_v5  ;;  %20482 = vrcp.f32 %v14331_v4 }
0x164f   : > { %20484 = vrcp.f32 %v14337_v27 }
0x1650   : > { %18335 = vmatprep.mubr.msk.bf16.mxu0 %vm3958_vm0, %v14437_v60  ;;  %v14334_v16 = vpop.xlane.xlu1 %14333 }
0x1651   : > { %20486 = vrcp.f32 %v14334_v16  ;;  %18336 = vmatmul.mubr.msk.bf16.vlgmr.msra.gmra.mrb[144].mxu0 %vm3958_vm0, %v14438_v42 }
0x1652   : > { %14962 = vmatpush1.bf16.msra.mxu0 %v19720_v37 }
0x1653   : > { %14963 = vmatprep.subr.bf16.mxu0 %v19726_v19 }
0x1654   : > { %v14346_v55 = vpop.xlane.xlu1 %14345 }
0x1655   : > { %20488 = vrcp.f32 %v14346_v55 }
0x1656   : > { %14964 = vmatpush1.bf16.msra.mxu0 %v19724_v62 }
0x1657   : > { %14965 = vmatprep.subr.bf16.mxu0 %v19730_v35  ;;  %v20481_v33 = vpop.eup %20480 }
0x1658   : > { %v14361_v10 = vpop.xlane.xlu1 %14360  ;;  %v20483_v14 = vpop.eup %20482  ;;  %v14420_v47 = vmul.f32 %v20481_v33, %v25593_v53 }
0x1659   : > { %v20485_v63 = vpop.eup %20484  ;;  %v14417_v30 = vmul.f32 %v20483_v14, %v25588_v36 }
0x165a   : > { %14966 = vmatpush1.bf16.msra.mxu0 %v19728_v20  ;;  %v14419_v46 = vmul.f32 %v20485_v63, %v25581_v15 }
0x165b   : > { %v20487_v17 = vpop.eup %20486  ;;  %14967 = vmatprep.subr.bf16.mxu0 %v19734_v40 }
0x165c   : > { %v14355_v6 = vpop.xlane.xlu1 %14354  ;;  %v14418_v11 = vmul.f32 %v20487_v17, %v25599_v51  ;;  %v14440_v26 = vpack.c.bf16 %v14420_v47, %v14419_v46 }
0x165e   : > { %v14439_v32 = vpack.c.bf16 %v14418_v11, %v14417_v30  ;;  %14968 = vmatpush1.bf16.msra.mxu0 %v19732_v43 }
0x165f   : > { %v20489_v0 = vpop.eup %20488 }
0x1660   : > { %18339 = vmatprep.mubr.msk.bf16.mxu0 %vm3958_vm0, %v14439_v32  ;;  %v14364_v1 = vpop.xlane.xlu1 %14363  ;;  %v14422_v28 = vmul.f32 %v20489_v0, %v25605_v25 }
0x1661   : > { %v14349_v45 = vpop.xlane.xlu0 %14348  ;;  %18340 = vmatmul.mubr.msk.bf16.gmra.mrb[148].mxu0 %vm3958_vm0, %v14440_v26 }
0x1662   : > { %14993 = vmatprep.mubr.bf16.mxu0 %v26707_v18 }
0x1664   : > { %v14358_v53 = vpop.xlane.xlu1 %14357 }
0x1665   : > { %v14343_v31 = vpop.xlane.xlu0 %14342 }
0x1666   : > { %20490 = vrcp.f32 %v14343_v31 }
0x1667   : > { %20492 = vrcp.f32 %v14358_v53 }
0x1668   : > { %20494 = vrcp.f32 %v14349_v45  ;;  %v14731_v36 = vpop.permute.xlu1 %14730 }
0x1669   : > { %20496 = vrcp.f32 %v14355_v6  ;;  %v14352_v15 = vpop.xlane.xlu0 %14351  ;;  %18345 = vmatprep.subr.bf16.mxu1 %v14731_v36 }
0x166a   : > { %20498 = vrcp.f32 %v14352_v15  ;;  %18346 = vmatpush3.bf16.msra.mxu1 %v14731_v36 }
0x166b   : > { %20500 = vrcp.f32 %v14364_v1 }
0x166c   : > { %20502 = vrcp.f32 %v14361_v10 }
0x166d   : > { %v14733_v51 = vpop.permute.xlu0 %14732 }
0x166e   : > { %18347 = vmatprep.subr.bf16.mxu1 %v14733_v51 }
0x166f   : > { %18348 = vmatpush3.bf16.msra.mxu1 %v14733_v51 }
0x1670   : > { %v20491_v24 = vpop.eup %20490 }
0x1671   : > { %v20493_v58 = vpop.eup %20492  ;;  %v14735_v8 = vpop.permute.xlu0 %14734  ;;  %v14421_v27 = vmul.f32 %v20491_v24, %v25628_v13 }
0x1672   : > { %v20495_v34 = vpop.eup %20494  ;;  %18349 = vmatprep.subr.bf16.mxu1 %v14735_v8  ;;  %v14426_v4 = vmul.f32 %v20493_v58, %v25624_v29 }
0x1673   : > { %v20497_v50 = vpop.eup %20496  ;;  %18350 = vmatpush3.bf16.msra.mxu1 %v14735_v8  ;;  %v14441_v52 = vpack.c.bf16 %v14422_v28, %v14421_v27  ;;  %v14423_v48 = vmul.f32 %v20495_v34, %v25620_v39  ;;  %v19731_v39 = vld [vmem:[#allocation9 + $0x218] ss:$12 sps:$4 sm:$0xff]  }
0x1674   : > { %v20499_v57 = vpop.eup %20498  ;;  %18359 = vmatprep.subr.bf16.mxu1 %v19723_v59  ;;  %v14425_v3 = vmul.f32 %v20497_v50, %v25614_v2  ;;  %v19735_v2 = vld [vmem:[#allocation9 + $0x230] ss:$12 sps:$4 sm:$0xff]  }
0x1675   : > { %v14424_v22 = vmul.f32 %v20499_v57, %v25634_v41  ;;  %18351 = vmatprep.mubr.msk.bf16.mxu1 %vm3958_vm0, %v14441_v52  ;;  %v20501_v25 = vpop.eup %20500  ;;  %v26716_v57 = vld [vmem:[#allocation138_spill] sm:$0xff] }
0x1676   : > { %v14443_v38 = vpack.c.bf16 %v14426_v4, %v14425_v3  ;;  %v20503_v7 = vpop.eup %20502  ;;  %v14428_v29 = vmul.f32 %v20501_v25, %v25618_v54  ;;  %v15703_v4 = vsub.s32 0, %v26716_v57  ;;  %v15711_v3 = vsub.s32 2, %v26716_v57 }
0x1677   : > { %v14442_v13 = vpack.c.bf16 %v14424_v22, %v14423_v48  ;;  %v14427_v41 = vmul.f32 %v20503_v7, %v25610_v44  ;;  %v15699_v48 = vld [vmem:[%s26003_s3] sm:$0x7]  ;;  %v15707_v22 = vsub.s32 1, %v26716_v57 }
0x1678   : > { %v25751_v25 = vrot.slane %v15699_v48, %v15711_v3 }
0x1679   : > { %18352 = vmatmul.mubr.msk.bf16.vlgmr.msra.gmra.mrb[192].mxu1 %vm3958_vm0, %v14442_v13  ;;  %v14444_v21 = vpack.c.bf16 %v14428_v29, %v14427_v41  ;;  %v25747_v13 = vrot.slane %v15699_v48, %v15703_v4 }
0x167a   : > { %18355 = vmatprep.mubr.msk.bf16.mxu1 %vm3958_vm0, %v14443_v38  ;;  %18360 = vmatpush3.bf16.msra.mxu1 %v19723_v59 }
0x167b   : > { %18361 = vmatprep.subr.bf16.mxu1 %v19727_v12 }
0x167e   : > { %18362 = vmatpush3.bf16.msra.mxu1 %v19727_v12  ;;  %v25749_v12 = vrot.slane %v15699_v48, %v15707_v22 }
0x167f   : > { %18363 = vmatprep.subr.bf16.mxu1 %v19731_v39 }
0x1681   : > { %18356 = vmatmul.mubr.msk.bf16.gmra.mrb[196].mxu1 %vm3958_vm0, %v14444_v21 }
0x1682   : > { %18364 = vmatpush3.bf16.msra.mxu1 %v19731_v39 }
0x1683   : > { %18365 = vmatprep.subr.bf16.mxu1 %v19735_v2 }
0x1686   : > { %18366 = vmatpush3.bf16.msra.mxu1 %v19735_v2 }
0x16cb   : > { %v18305_v61 = vpop.f32.mrb[136].mxu0 }
0x16cc   : > { %v14507_v23 = vpop.f32.mrb[137].mxu0 }
0x16cd   : > { %v18306_v56 = vpop.f32.mrb[138].mxu0 }
0x16ce   : > { %v14818_v5 = vpack.c.bf16 %v18306_v56, %v18305_v61  ;;  %v14510_v49 = vpop.f32.mrb[139].mxu0 }
0x16cf   : > { %v14817_v9 = vpack.c.bf16 %v14510_v49, %v14507_v23 }
0x16d1   : > { %16666 = vmatmul.mubr.msk.bf16.vlgmr.msra.gmra.mrb[224].mxu0 %vm3958_vm0, %v14817_v9  ;;  %18367 = vmatprep.mubr.msk.bf16.mxu1 %vm3958_vm0, %v14817_v9 }
0x16d2   : > { %18368 = vmatmul.mubr.msk.bf16.vlgmr.msra.gmra.mrb[224].mxu1 %vm3958_vm0, %v14818_v5  ;;  %15003 = vmatprep.mubr.bf16.mxu0 %v26707_v18 }
0x16d9   : > { %16667 = vmatmul.mubr.msk.bf16.gmra.mrb[228].mxu0 %vm3958_vm0, %v14818_v5 }
0x16da   : > { %15013 = vmatprep.mubr.bf16.mxu0 %v26707_v18 }
0x16db   : > { %v18309_v44 = vpop.f32.mrb[140].mxu0 }
0x16dc   : > { %v14523_v54 = vpop.f32.mrb[141].mxu0 }
0x16dd   : > { %v18310_v60 = vpop.f32.mrb[142].mxu0 }
0x16de   : > { %v14820_v37 = vpack.c.bf16 %v18310_v60, %v18309_v44  ;;  %v14526_v42 = vpop.f32.mrb[143].mxu0 }
0x16df   : > { %v14819_v19 = vpack.c.bf16 %v14526_v42, %v14523_v54 }
0x16e1   : > { %16668 = vmatmul.mubr.msk.bf16.gmra.mrb[232].mxu0 %vm3958_vm0, %v14819_v19  ;;  %18371 = vmatprep.mubr.msk.bf16.mxu1 %vm3958_vm0, %v14819_v19 }
0x16e2   : > { %18372 = vmatmul.mubr.msk.bf16.gmra.mrb[228].mxu1 %vm3958_vm0, %v14820_v37  ;;  %15023 = vmatprep.mubr.bf16.mxu0 %v26707_v18 }
0x16e9   : > { %16669 = vmatmul.mubr.msk.bf16.gmra.mrb[236].mxu0 %vm3958_vm0, %v14820_v37 }
0x16ea   : > { %15033 = vmatprep.mubr.bf16.mxu0 %v26707_v18 }
0x16eb   : > { %v18321_v16 = vpop.f32.mrb[184].mxu1 }
0x16ec   : > { %v14600_v62 = vpop.f32.mrb[185].mxu1 }
0x16ed   : > { %v18322_v35 = vpop.f32.mrb[186].mxu1 }
0x16ee   : > { %v14822_v55 = vpack.c.bf16 %v18322_v35, %v18321_v16  ;;  %v14603_v20 = vpop.f32.mrb[187].mxu1 }
0x16ef   : > { %v14821_v40 = vpack.c.bf16 %v14603_v20, %v14600_v62 }
0x16f1   : > { %16670 = vmatmul.mubr.msk.bf16.gmra.mrb[240].mxu0 %vm3958_vm0, %v14821_v40  ;;  %18375 = vmatprep.mubr.msk.bf16.mxu1 %vm3958_vm0, %v14821_v40 }
0x16f2   : > { %18376 = vmatmul.mubr.msk.bf16.gmra.mrb[232].mxu1 %vm3958_vm0, %v14822_v55  ;;  %15043 = vmatprep.mubr.bf16.mxu0 %v26707_v18 }
0x16f9   : > { %16671 = vmatmul.mubr.msk.bf16.gmra.mrb[244].mxu0 %vm3958_vm0, %v14822_v55 }
0x16fa   : > { %15053 = vmatprep.mubr.bf16.mxu0 %v26707_v18 }
0x1720   : > { %v18325_v33 = vpop.f32.mrb[188].mxu1 }
0x1721   : > { %v14616_v10 = vpop.f32.mrb[189].mxu1 }
0x1722   : > { %v18326_v14 = vpop.f32.mrb[190].mxu1 }
0x1723   : > { %v14824_v63 = vpack.c.bf16 %v18326_v14, %v18325_v33  ;;  %v14619_v43 = vpop.f32.mrb[191].mxu1 }
0x1724   : > { %v14823_v17 = vpack.c.bf16 %v14619_v43, %v14616_v10  ;;  %v18337_v47 = vpop.f32.mrb[144].mxu0 }
0x1725   : > { %v14693_v6 = vpop.f32.mrb[145].mxu0 }
0x1726   : > { %v18338_v30 = vpop.f32.mrb[146].mxu0  ;;  %16672 = vmatmul.mubr.msk.bf16.gmra.mrb[248].mxu0 %vm3958_vm0, %v14823_v17  ;;  %18379 = vmatprep.mubr.msk.bf16.mxu1 %vm3958_vm0, %v14823_v17 }
0x1727   : > { %v14826_v11 = vpack.c.bf16 %v18338_v30, %v18337_v47  ;;  %v14696_v46 = vpop.f32.mrb[147].mxu0  ;;  %18380 = vmatmul.mubr.msk.bf16.gmra.mrb[236].mxu1 %vm3958_vm0, %v14824_v63  ;;  %15063 = vmatprep.mubr.bf16.mxu0 %v26707_v18 }
0x1728   : > { %v14825_v32 = vpack.c.bf16 %v14696_v46, %v14693_v6 }
0x172a   : > { %18383 = vmatprep.mubr.msk.bf16.mxu1 %vm3958_vm0, %v14825_v32 }
0x172e   : > { %16673 = vmatmul.mubr.msk.bf16.gmra.mrb[252].mxu0 %vm3958_vm0, %v14824_v63 }
0x172f   : > { %18384 = vmatmul.mubr.msk.bf16.gmra.mrb[240].mxu1 %vm3958_vm0, %v14826_v11  ;;  %15073 = vmatprep.mubr.bf16.mxu0 %v26707_v18 }
0x1734   : > { %v18341_v26 = vpop.f32.mrb[148].mxu0 }
0x1735   : > { %v14709_v1 = vpop.f32.mrb[149].mxu0 }
0x1736   : > { %v18342_v45 = vpop.f32.mrb[150].mxu0  ;;  %16674 = vmatmul.mubr.msk.bf16.gmra.mrb[0].mxu0 %vm3958_vm0, %v14825_v32 }
0x1737   : > { %v14828_v53 = vpack.c.bf16 %v18342_v45, %v18341_v26  ;;  %v14712_v31 = vpop.f32.mrb[151].mxu0  ;;  %15083 = vmatprep.mubr.bf16.mxu0 %v26707_v18 }
0x1738   : > { %v14827_v36 = vpack.c.bf16 %v14712_v31, %v14709_v1 }
0x173a   : > { %18387 = vmatprep.mubr.msk.bf16.mxu1 %vm3958_vm0, %v14827_v36 }
0x173b   : > { %18388 = vmatmul.mubr.msk.bf16.gmra.mrb[244].mxu1 %vm3958_vm0, %v14828_v53 }
0x173e   : > { %16675 = vmatmul.mubr.msk.bf16.gmra.mrb[4].mxu0 %vm3958_vm0, %v14826_v11 }
0x173f   : > { %15093 = vmatprep.mubr.bf16.mxu0 %v26707_v18 }
0x1746   : > { %16676 = vmatmul.mubr.msk.bf16.gmra.mrb[8].mxu0 %vm3958_vm0, %v14827_v36 }
0x1747   : > { %15103 = vmatprep.mubr.bf16.mxu0 %v26707_v18 }
0x174c   : > { %v18353_v15 = vpop.f32.mrb[192].mxu1 }
0x174d   : > { %v14786_v51 = vpop.f32.mrb[193].mxu1 }
0x174e   : > { %v18354_v0 = vpop.f32.mrb[194].mxu1  ;;  %16677 = vmatmul.mubr.msk.bf16.gmra.mrb[12].mxu0 %vm3958_vm0, %v14828_v53 }
0x174f   : > { %v14830_v24 = vpack.c.bf16 %v18354_v0, %v18353_v15  ;;  %v14789_v59 = vpop.f32.mrb[195].mxu1  ;;  %15113 = vmatprep.mubr.bf16.mxu0 %v26707_v18 }
0x1750   : > { %v14829_v58 = vpack.c.bf16 %v14789_v59, %v14786_v51 }
0x1752   : > { %18391 = vmatprep.mubr.msk.bf16.mxu1 %vm3958_vm0, %v14829_v58 }
0x1753   : > { %18392 = vmatmul.mubr.msk.bf16.gmra.mrb[248].mxu1 %vm3958_vm0, %v14830_v24 }
0x1754   : > { %v18357_v8 = vpop.f32.mrb[196].mxu1 }
0x1755   : > { %v14802_v27 = vpop.f32.mrb[197].mxu1 }
0x1756   : > { %v18358_v28 = vpop.f32.mrb[198].mxu1  ;;  %16678 = vmatmul.mubr.msk.bf16.gmra.mrb[16].mxu0 %vm3958_vm0, %v14829_v58 }
0x1757   : > { %v14832_v34 = vpack.c.bf16 %v18358_v28, %v18357_v8  ;;  %v14805_v50 = vpop.f32.mrb[199].mxu1  ;;  %15123 = vmatprep.mubr.bf16.mxu0 %v26707_v18 }
0x1758   : > { %v14831_v52 = vpack.c.bf16 %v14805_v50, %v14802_v27 }
0x175a   : > { %18395 = vmatprep.mubr.msk.bf16.mxu1 %vm3958_vm0, %v14831_v52 }
0x175b   : > { %18396 = vmatmul.mubr.msk.bf16.gmra.mrb[252].mxu1 %vm3958_vm0, %v14832_v34 }
0x175e   : > { %16679 = vmatmul.mubr.msk.bf16.gmra.mrb[20].mxu0 %vm3958_vm0, %v14830_v24 }
0x175f   : > { %15133 = vmatprep.mubr.bf16.mxu0 %v26707_v18 }
0x1766   : > { %16680 = vmatmul.mubr.msk.bf16.gmra.mrb[24].mxu0 %vm3958_vm0, %v14831_v52 }
0x1767   : > { %15143 = vmatprep.mubr.bf16.mxu0 %v26707_v18 }
0x176e   : > { %16681 = vmatmul.mubr.msk.bf16.gmra.mrb[32].mxu0 %vm3958_vm0, %v14832_v34 }
0x17a4   : > { %v14995_v18 = vpop.f32.mrb[224].mxu0 }
0x17a5   : > { %v15716_v38 = vadd.f32 %v25747_v13, %v14995_v18  ;;  %v14997_v7 = vpop.f32.mrb[225].mxu0  ;;  %v18369_v29 = vpop.f32.mrb[224].mxu1 }
0x17a6   : > { %v15717_v39 = vadd.f32 %v25749_v12, %v14997_v7  ;;  %v15724_v41 = vadd.f32 %v18369_v29, %v25751_v25  ;;  %v14999_v21 = vpop.f32.mrb[226].mxu0  ;;  %v15188_v2 = vpop.f32.mrb[225].mxu1 }
0x17a7   : > { %15812 = vst [vmem:[%s25758_s5] sm:$0xff] %v15716_v38  ;;  %v15719_v61 = vadd.f32 %v25747_v13, %v14999_v21  ;;  %v15718_v23 = vadd.f32 %v25751_v25, %v15188_v2  ;;  %v15001_v56 = vpop.f32.mrb[227].mxu0  ;;  %v18370_v5 = vpop.f32.mrb[226].mxu1 }
0x17a8   : > { %15813 = vst [vmem:[%s25758_s5 + $0x8] sm:$0xff] %v15717_v39  ;;  %15820 = vst [vmem:[%s25758_s5 + $0x40] sm:$0xff] %v15724_v41  ;;  %v15720_v49 = vadd.f32 %v25749_v12, %v15001_v56  ;;  %v15727_v9 = vadd.f32 %v18370_v5, %v25751_v25  ;;  %v15191_v44 = vpop.f32.mrb[227].mxu1 }
0x17a9   : > { %15815 = vst [vmem:[%s25758_s5 + $0x18] sm:$0xff] %v15719_v61  ;;  %15814 = vst [vmem:[%s25758_s5 + $0x10] sm:$0xff] %v15718_v23  ;;  %v15721_v54 = vadd.f32 %v25751_v25, %v15191_v44 }
0x17aa   : > { %15816 = vst [vmem:[%s25758_s5 + $0x20] sm:$0xff] %v15720_v49  ;;  %15823 = vst [vmem:[%s25758_s5 + $0x58] sm:$0xff] %v15727_v9 }
0x17ab   : > { %15817 = vst [vmem:[%s25758_s5 + $0x28] sm:$0xff] %v15721_v54 }
0x17ac   : > { %v15005_v60 = vpop.f32.mrb[228].mxu0 }
0x17ad   : > { %v15722_v37 = vadd.f32 %v25747_v13, %v15005_v60  ;;  %v15007_v42 = vpop.f32.mrb[229].mxu0 }
0x17ae   : > { %v15723_v19 = vadd.f32 %v25749_v12, %v15007_v42  ;;  %v15009_v16 = vpop.f32.mrb[230].mxu0 }
0x17af   : > { %15818 = vst [vmem:[%s25758_s5 + $0x30] sm:$0xff] %v15722_v37  ;;  %v15725_v62 = vadd.f32 %v25747_v13, %v15009_v16  ;;  %v15011_v35 = vpop.f32.mrb[231].mxu0 }
0x17b0   : > { %15819 = vst [vmem:[%s25758_s5 + $0x38] sm:$0xff] %v15723_v19  ;;  %v15726_v55 = vadd.f32 %v25749_v12, %v15011_v35 }
0x17b1   : > { %15821 = vst [vmem:[%s25758_s5 + $0x48] sm:$0xff] %v15725_v62 }
0x17b2   : > { %15822 = vst [vmem:[%s25758_s5 + $0x50] sm:$0xff] %v15726_v55 }
0x17b4   : > { %v15015_v20 = vpop.f32.mrb[232].mxu0 }
0x17b5   : > { %v15728_v40 = vadd.f32 %v25747_v13, %v15015_v20  ;;  %v15017_v33 = vpop.f32.mrb[233].mxu0  ;;  %v18373_v10 = vpop.f32.mrb[228].mxu1 }
0x17b6   : > { %v15729_v14 = vadd.f32 %v25749_v12, %v15017_v33  ;;  %v15736_v63 = vadd.f32 %v18373_v10, %v25751_v25  ;;  %v15019_v43 = vpop.f32.mrb[234].mxu0  ;;  %v15204_v17 = vpop.f32.mrb[229].mxu1 }
0x17b7   : > { %15824 = vst [vmem:[%s25758_s5 + $0x60] sm:$0xff] %v15728_v40  ;;  %v15731_v47 = vadd.f32 %v25747_v13, %v15019_v43  ;;  %v15730_v6 = vadd.f32 %v25751_v25, %v15204_v17  ;;  %v15021_v30 = vpop.f32.mrb[235].mxu0  ;;  %v18374_v11 = vpop.f32.mrb[230].mxu1 }
0x17b8   : > { %15825 = vst [vmem:[%s25758_s5 + $0x68] sm:$0xff] %v15729_v14  ;;  %15832 = vst [vmem:[%s25758_s5 + $0xa0] sm:$0xff] %v15736_v63  ;;  %v15732_v46 = vadd.f32 %v25749_v12, %v15021_v30  ;;  %v15739_v32 = vadd.f32 %v18374_v11, %v25751_v25  ;;  %v15207_v26 = vpop.f32.mrb[231].mxu1 }
0x17b9   : > { %15827 = vst [vmem:[%s25758_s5 + $0x78] sm:$0xff] %v15731_v47  ;;  %15826 = vst [vmem:[%s25758_s5 + $0x70] sm:$0xff] %v15730_v6  ;;  %v15733_v1 = vadd.f32 %v25751_v25, %v15207_v26 }
0x17ba   : > { %15828 = vst [vmem:[%s25758_s5 + $0x80] sm:$0xff] %v15732_v46  ;;  %15835 = vst [vmem:[%s25758_s5 + $0xb8] sm:$0xff] %v15739_v32 }
0x17bb   : > { %15829 = vst [vmem:[%s25758_s5 + $0x88] sm:$0xff] %v15733_v1 }
0x17bc   : > { %v15025_v45 = vpop.f32.mrb[236].mxu0 }
0x17bd   : > { %v15734_v53 = vadd.f32 %v25747_v13, %v15025_v45  ;;  %v15027_v31 = vpop.f32.mrb[237].mxu0 }
0x17be   : > { %v15735_v36 = vadd.f32 %v25749_v12, %v15027_v31  ;;  %v15029_v15 = vpop.f32.mrb[238].mxu0 }
0x17bf   : > { %15830 = vst [vmem:[%s25758_s5 + $0x90] sm:$0xff] %v15734_v53  ;;  %v15737_v51 = vadd.f32 %v25747_v13, %v15029_v15  ;;  %v15031_v0 = vpop.f32.mrb[239].mxu0 }
0x17c0   : > { %15831 = vst [vmem:[%s25758_s5 + $0x98] sm:$0xff] %v15735_v36  ;;  %v15738_v24 = vadd.f32 %v25749_v12, %v15031_v0 }
0x17c1   : > { %15833 = vst [vmem:[%s25758_s5 + $0xa8] sm:$0xff] %v15737_v51 }
0x17c2   : > { %15834 = vst [vmem:[%s25758_s5 + $0xb0] sm:$0xff] %v15738_v24 }
0x17c4   : > { %v15035_v59 = vpop.f32.mrb[240].mxu0 }
0x17c5   : > { %v15740_v58 = vadd.f32 %v25747_v13, %v15035_v59  ;;  %v15037_v8 = vpop.f32.mrb[241].mxu0  ;;  %v18377_v27 = vpop.f32.mrb[232].mxu1 }
0x17c6   : > { %v15741_v28 = vadd.f32 %v25749_v12, %v15037_v8  ;;  %v15748_v34 = vadd.f32 %v18377_v27, %v25751_v25  ;;  %v15039_v50 = vpop.f32.mrb[242].mxu0  ;;  %v15220_v52 = vpop.f32.mrb[233].mxu1 }
0x17c7   : > { %15836 = vst [vmem:[%s25758_s5 + $0xc0] sm:$0xff] %v15740_v58  ;;  %v15743_v57 = vadd.f32 %v25747_v13, %v15039_v50  ;;  %v15742_v4 = vadd.f32 %v25751_v25, %v15220_v52  ;;  %v15041_v48 = vpop.f32.mrb[243].mxu0  ;;  %v18378_v22 = vpop.f32.mrb[234].mxu1 }
0x17c8   : > { %15837 = vst [vmem:[%s25758_s5 + $0xc8] sm:$0xff] %v15741_v28  ;;  %15844 = vst [vmem:[%s25758_s5 + $0x100] sm:$0xff] %v15748_v34  ;;  %v15744_v3 = vadd.f32 %v25749_v12, %v15041_v48  ;;  %v15751_v18 = vadd.f32 %v18378_v22, %v25751_v25  ;;  %v15223_v38 = vpop.f32.mrb[235].mxu1 }
0x17c9   : > { %15839 = vst [vmem:[%s25758_s5 + $0xd8] sm:$0xff] %v15743_v57  ;;  %15838 = vst [vmem:[%s25758_s5 + $0xd0] sm:$0xff] %v15742_v4  ;;  %v15745_v7 = vadd.f32 %v25751_v25, %v15223_v38 }
0x17ca   : > { %15840 = vst [vmem:[%s25758_s5 + $0xe0] sm:$0xff] %v15744_v3  ;;  %15847 = vst [vmem:[%s25758_s5 + $0x118] sm:$0xff] %v15751_v18 }
0x17cb   : > { %15841 = vst [vmem:[%s25758_s5 + $0xe8] sm:$0xff] %v15745_v7 }
0x17cc   : > { %v15045_v29 = vpop.f32.mrb[244].mxu0 }
0x17cd   : > { %v15746_v39 = vadd.f32 %v25747_v13, %v15045_v29  ;;  %v15047_v41 = vpop.f32.mrb[245].mxu0 }
0x17ce   : > { %v15747_v21 = vadd.f32 %v25749_v12, %v15047_v41  ;;  %v15049_v2 = vpop.f32.mrb[246].mxu0 }
0x17cf   : > { %15842 = vst [vmem:[%s25758_s5 + $0xf0] sm:$0xff] %v15746_v39  ;;  %v15749_v61 = vadd.f32 %v25747_v13, %v15049_v2  ;;  %v15051_v23 = vpop.f32.mrb[247].mxu0 }
0x17d0   : > { %15843 = vst [vmem:[%s25758_s5 + $0xf8] sm:$0xff] %v15747_v21  ;;  %v15750_v56 = vadd.f32 %v25749_v12, %v15051_v23 }
0x17d1   : > { %15845 = vst [vmem:[%s25758_s5 + $0x108] sm:$0xff] %v15749_v61 }
0x17d2   : > { %15846 = vst [vmem:[%s25758_s5 + $0x110] sm:$0xff] %v15750_v56 }
0x17f9   : > { %v15055_v5 = vpop.f32.mrb[248].mxu0 }
0x17fa   : > { %v15752_v49 = vadd.f32 %v25747_v13, %v15055_v5  ;;  %v15057_v9 = vpop.f32.mrb[249].mxu0  ;;  %v18381_v44 = vpop.f32.mrb[236].mxu1 }
0x17fb   : > { %v15753_v54 = vadd.f32 %v25749_v12, %v15057_v9  ;;  %v15760_v60 = vadd.f32 %v18381_v44, %v25751_v25  ;;  %v15059_v37 = vpop.f32.mrb[250].mxu0  ;;  %v15236_v42 = vpop.f32.mrb[237].mxu1 }
0x17fc   : > { %15848 = vst [vmem:[%s25758_s5 + $0x120] sm:$0xff] %v15752_v49  ;;  %v15755_v19 = vadd.f32 %v25747_v13, %v15059_v37  ;;  %v15754_v16 = vadd.f32 %v25751_v25, %v15236_v42  ;;  %v15061_v62 = vpop.f32.mrb[251].mxu0  ;;  %v18382_v35 = vpop.f32.mrb[238].mxu1 }
0x17fd   : > { %15849 = vst [vmem:[%s25758_s5 + $0x128] sm:$0xff] %v15753_v54  ;;  %15856 = vst [vmem:[%s25758_s5 + $0x160] sm:$0xff] %v15760_v60  ;;  %v15756_v55 = vadd.f32 %v25749_v12, %v15061_v62  ;;  %v15763_v20 = vadd.f32 %v18382_v35, %v25751_v25  ;;  %v15239_v40 = vpop.f32.mrb[239].mxu1 }
0x17fe   : > { %15851 = vst [vmem:[%s25758_s5 + $0x138] sm:$0xff] %v15755_v19  ;;  %15850 = vst [vmem:[%s25758_s5 + $0x130] sm:$0xff] %v15754_v16  ;;  %v15757_v33 = vadd.f32 %v25751_v25, %v15239_v40 }
0x17ff   : > { %15852 = vst [vmem:[%s25758_s5 + $0x140] sm:$0xff] %v15756_v55  ;;  %15859 = vst [vmem:[%s25758_s5 + $0x178] sm:$0xff] %v15763_v20 }
0x1800   : > { %15853 = vst [vmem:[%s25758_s5 + $0x148] sm:$0xff] %v15757_v33 }
0x1801   : > { %v15065_v10 = vpop.f32.mrb[252].mxu0 }
0x1802   : > { %v15758_v14 = vadd.f32 %v25747_v13, %v15065_v10  ;;  %v15067_v63 = vpop.f32.mrb[253].mxu0  ;;  %v18385_v43 = vpop.f32.mrb[240].mxu1 }
0x1803   : > { %v15759_v17 = vadd.f32 %v25749_v12, %v15067_v63  ;;  %v15772_v47 = vadd.f32 %v18385_v43, %v25751_v25  ;;  %v15069_v6 = vpop.f32.mrb[254].mxu0  ;;  %v15252_v30 = vpop.f32.mrb[241].mxu1 }
0x1804   : > { %15854 = vst [vmem:[%s25758_s5 + $0x150] sm:$0xff] %v15758_v14  ;;  %v15761_v11 = vadd.f32 %v25747_v13, %v15069_v6  ;;  %v15766_v46 = vadd.f32 %v25751_v25, %v15252_v30  ;;  %v15071_v32 = vpop.f32.mrb[255].mxu0  ;;  %v18386_v26 = vpop.f32.mrb[242].mxu1 }
0x1805   : > { %15855 = vst [vmem:[%s25758_s5 + $0x158] sm:$0xff] %v15759_v17  ;;  %15868 = vst [vmem:[%s25758_s5 + $0x1c0] sm:$0xff] %v15772_v47  ;;  %v15762_v1 = vadd.f32 %v25749_v12, %v15071_v32  ;;  %v15775_v45 = vadd.f32 %v18386_v26, %v25751_v25  ;;  %v15255_v53 = vpop.f32.mrb[243].mxu1 }
0x1806   : > { %15857 = vst [vmem:[%s25758_s5 + $0x168] sm:$0xff] %v15761_v11  ;;  %15862 = vst [vmem:[%s25758_s5 + $0x190] sm:$0xff] %v15766_v46  ;;  %v15769_v31 = vadd.f32 %v25751_v25, %v15255_v53 }
0x1807   : > { %15858 = vst [vmem:[%s25758_s5 + $0x170] sm:$0xff] %v15762_v1  ;;  %15871 = vst [vmem:[%s25758_s5 + $0x1d8] sm:$0xff] %v15775_v45 }
0x1808   : > { %15865 = vst [vmem:[%s25758_s5 + $0x1a8] sm:$0xff] %v15769_v31 }
0x1809   : > { %v15075_v36 = vpop.f32.mrb[0].mxu0 }
0x180a   : > { %v15764_v15 = vadd.f32 %v25747_v13, %v15075_v36  ;;  %v15077_v51 = vpop.f32.mrb[1].mxu0 }
0x180b   : > { %v15765_v0 = vadd.f32 %v25749_v12, %v15077_v51  ;;  %v15079_v24 = vpop.f32.mrb[2].mxu0 }
0x180c   : > { %15860 = vst [vmem:[%s25758_s5 + $0x180] sm:$0xff] %v15764_v15  ;;  %v15767_v59 = vadd.f32 %v25747_v13, %v15079_v24  ;;  %v15081_v58 = vpop.f32.mrb[3].mxu0 }
0x180d   : > { %15861 = vst [vmem:[%s25758_s5 + $0x188] sm:$0xff] %v15765_v0  ;;  %v15768_v8 = vadd.f32 %v25749_v12, %v15081_v58 }
0x180e   : > { %15863 = vst [vmem:[%s25758_s5 + $0x198] sm:$0xff] %v15767_v59  ;;  %v18389_v27 = vpop.f32.mrb[244].mxu1 }
0x180f   : > { %15864 = vst [vmem:[%s25758_s5 + $0x1a0] sm:$0xff] %v15768_v8  ;;  %v15784_v28 = vadd.f32 %v18389_v27, %v25751_v25  ;;  %v15268_v34 = vpop.f32.mrb[245].mxu1 }
0x1810   : > { %v15778_v50 = vadd.f32 %v25751_v25, %v15268_v34  ;;  %v18390_v52 = vpop.f32.mrb[246].mxu1 }
0x1811   : > { %15880 = vst [vmem:[%s25758_s5 + $0x220] sm:$0xff] %v15784_v28  ;;  %v15787_v57 = vadd.f32 %v18390_v52, %v25751_v25  ;;  %v15085_v4 = vpop.f32.mrb[4].mxu0  ;;  %v15271_v48 = vpop.f32.mrb[247].mxu1 }
0x1812   : > { %15874 = vst [vmem:[%s25758_s5 + $0x1f0] sm:$0xff] %v15778_v50  ;;  %v15770_v22 = vadd.f32 %v25747_v13, %v15085_v4  ;;  %v15781_v3 = vadd.f32 %v25751_v25, %v15271_v48  ;;  %v15087_v18 = vpop.f32.mrb[5].mxu0 }
0x1813   : > { %15883 = vst [vmem:[%s25758_s5 + $0x238] sm:$0xff] %v15787_v57  ;;  %v15771_v38 = vadd.f32 %v25749_v12, %v15087_v18  ;;  %v15089_v7 = vpop.f32.mrb[6].mxu0 }
0x1814   : > { %15866 = vst [vmem:[%s25758_s5 + $0x1b0] sm:$0xff] %v15770_v22  ;;  %15877 = vst [vmem:[%s25758_s5 + $0x208] sm:$0xff] %v15781_v3  ;;  %v15773_v29 = vadd.f32 %v25747_v13, %v15089_v7  ;;  %v15091_v39 = vpop.f32.mrb[7].mxu0 }
0x1815   : > { %15867 = vst [vmem:[%s25758_s5 + $0x1b8] sm:$0xff] %v15771_v38  ;;  %v15774_v41 = vadd.f32 %v25749_v12, %v15091_v39 }
0x1816   : > { %15869 = vst [vmem:[%s25758_s5 + $0x1c8] sm:$0xff] %v15773_v29 }
0x1817   : > { %15870 = vst [vmem:[%s25758_s5 + $0x1d0] sm:$0xff] %v15774_v41 }
0x1819   : > { %v15095_v21 = vpop.f32.mrb[8].mxu0 }
0x181a   : > { %v15776_v2 = vadd.f32 %v25747_v13, %v15095_v21  ;;  %v15097_v61 = vpop.f32.mrb[9].mxu0 }
0x181b   : > { %v15777_v23 = vadd.f32 %v25749_v12, %v15097_v61  ;;  %v15099_v56 = vpop.f32.mrb[10].mxu0 }
0x181c   : > { %15872 = vst [vmem:[%s25758_s5 + $0x1e0] sm:$0xff] %v15776_v2  ;;  %v15779_v5 = vadd.f32 %v25747_v13, %v15099_v56  ;;  %v15101_v49 = vpop.f32.mrb[11].mxu0 }
0x181d   : > { %15873 = vst [vmem:[%s25758_s5 + $0x1e8] sm:$0xff] %v15777_v23  ;;  %v15780_v9 = vadd.f32 %v25749_v12, %v15101_v49 }
0x181e   : > { %15875 = vst [vmem:[%s25758_s5 + $0x1f8] sm:$0xff] %v15779_v5 }
0x181f   : > { %15876 = vst [vmem:[%s25758_s5 + $0x200] sm:$0xff] %v15780_v9 }
0x1821   : > { %v15105_v44 = vpop.f32.mrb[12].mxu0 }
0x1822   : > { %v15782_v54 = vadd.f32 %v25747_v13, %v15105_v44  ;;  %v15107_v60 = vpop.f32.mrb[13].mxu0 }
0x1823   : > { %v15783_v37 = vadd.f32 %v25749_v12, %v15107_v60  ;;  %v15109_v42 = vpop.f32.mrb[14].mxu0 }
0x1824   : > { %15878 = vst [vmem:[%s25758_s5 + $0x210] sm:$0xff] %v15782_v54  ;;  %v15785_v19 = vadd.f32 %v25747_v13, %v15109_v42  ;;  %v15111_v16 = vpop.f32.mrb[15].mxu0 }
0x1825   : > { %15879 = vst [vmem:[%s25758_s5 + $0x218] sm:$0xff] %v15783_v37  ;;  %v15786_v62 = vadd.f32 %v25749_v12, %v15111_v16 }
0x1826   : > { %15881 = vst [vmem:[%s25758_s5 + $0x228] sm:$0xff] %v15785_v19  ;;  %v18393_v35 = vpop.f32.mrb[248].mxu1 }
0x1827   : > { %15882 = vst [vmem:[%s25758_s5 + $0x230] sm:$0xff] %v15786_v62  ;;  %v15796_v55 = vadd.f32 %v18393_v35, %v25751_v25  ;;  %v15284_v20 = vpop.f32.mrb[249].mxu1 }
0x1828   : > { %v15790_v40 = vadd.f32 %v25751_v25, %v15284_v20  ;;  %v18394_v33 = vpop.f32.mrb[250].mxu1 }
0x1829   : > { %15892 = vst [vmem:[%s25758_s5 + $0x280] sm:$0xff] %v15796_v55  ;;  %v15799_v10 = vadd.f32 %v18394_v33, %v25751_v25  ;;  %v15115_v14 = vpop.f32.mrb[16].mxu0  ;;  %v15287_v63 = vpop.f32.mrb[251].mxu1 }
0x182a   : > { %15886 = vst [vmem:[%s25758_s5 + $0x250] sm:$0xff] %v15790_v40  ;;  %v15788_v43 = vadd.f32 %v25747_v13, %v15115_v14  ;;  %v15793_v17 = vadd.f32 %v25751_v25, %v15287_v63  ;;  %v15117_v47 = vpop.f32.mrb[17].mxu0 }
0x182b   : > { %15895 = vst [vmem:[%s25758_s5 + $0x298] sm:$0xff] %v15799_v10  ;;  %v15789_v6 = vadd.f32 %v25749_v12, %v15117_v47  ;;  %v15119_v30 = vpop.f32.mrb[18].mxu0 }
0x182c   : > { %15884 = vst [vmem:[%s25758_s5 + $0x240] sm:$0xff] %v15788_v43  ;;  %15889 = vst [vmem:[%s25758_s5 + $0x268] sm:$0xff] %v15793_v17  ;;  %v15791_v11 = vadd.f32 %v25747_v13, %v15119_v30  ;;  %v15121_v46 = vpop.f32.mrb[19].mxu0 }
0x182d   : > { %15885 = vst [vmem:[%s25758_s5 + $0x248] sm:$0xff] %v15789_v6  ;;  %v15792_v32 = vadd.f32 %v25749_v12, %v15121_v46 }
0x182e   : > { %15887 = vst [vmem:[%s25758_s5 + $0x258] sm:$0xff] %v15791_v11  ;;  %v18397_v26 = vpop.f32.mrb[252].mxu1 }
0x182f   : > { %15888 = vst [vmem:[%s25758_s5 + $0x260] sm:$0xff] %v15792_v32  ;;  %v15808_v1 = vadd.f32 %v18397_v26, %v25751_v25  ;;  %v15300_v45 = vpop.f32.mrb[253].mxu1 }
0x1830   : > { %v15802_v53 = vadd.f32 %v25751_v25, %v15300_v45  ;;  %v18398_v31 = vpop.f32.mrb[254].mxu1 }
0x1831   : > { %15904 = vst [vmem:[%s25758_s5 + $0x2e0] sm:$0xff] %v15808_v1  ;;  %v15811_v36 = vadd.f32 %v18398_v31, %v25751_v25  ;;  %v15125_v15 = vpop.f32.mrb[20].mxu0  ;;  %v15303_v51 = vpop.f32.mrb[255].mxu1 }
0x1832   : > { %15898 = vst [vmem:[%s25758_s5 + $0x2b0] sm:$0xff] %v15802_v53  ;;  %v15794_v0 = vadd.f32 %v25747_v13, %v15125_v15  ;;  %v15805_v24 = vadd.f32 %v25751_v25, %v15303_v51  ;;  %v15127_v59 = vpop.f32.mrb[21].mxu0 }
0x1833   : > { %15907 = vst [vmem:[%s25758_s5 + $0x2f8] sm:$0xff] %v15811_v36  ;;  %v15795_v58 = vadd.f32 %v25749_v12, %v15127_v59  ;;  %v15129_v8 = vpop.f32.mrb[22].mxu0 }
0x1834   : > { %15890 = vst [vmem:[%s25758_s5 + $0x270] sm:$0xff] %v15794_v0  ;;  %15901 = vst [vmem:[%s25758_s5 + $0x2c8] sm:$0xff] %v15805_v24  ;;  %v15797_v27 = vadd.f32 %v25747_v13, %v15129_v8  ;;  %v15131_v28 = vpop.f32.mrb[23].mxu0 }
0x1835   : > { %15891 = vst [vmem:[%s25758_s5 + $0x278] sm:$0xff] %v15795_v58  ;;  %v15798_v34 = vadd.f32 %v25749_v12, %v15131_v28 }
0x1836   : > { %15893 = vst [vmem:[%s25758_s5 + $0x288] sm:$0xff] %v15797_v27 }
0x1837   : > { %15894 = vst [vmem:[%s25758_s5 + $0x290] sm:$0xff] %v15798_v34 }
0x1839   : > { %v15135_v25 = vpop.f32.mrb[24].mxu0 }
0x183a   : > { %v15800_v50 = vadd.f32 %v25747_v13, %v15135_v25  ;;  %v15137_v52 = vpop.f32.mrb[25].mxu0 }
0x183b   : > { %v15801_v57 = vadd.f32 %v25749_v12, %v15137_v52  ;;  %v15139_v4 = vpop.f32.mrb[26].mxu0 }
0x183c   : > { %15896 = vst [vmem:[%s25758_s5 + $0x2a0] sm:$0xff] %v15800_v50  ;;  %v15803_v48 = vadd.f32 %v25747_v13, %v15139_v4  ;;  %v15141_v22 = vpop.f32.mrb[27].mxu0 }
0x183d   : > { %15897 = vst [vmem:[%s25758_s5 + $0x2a8] sm:$0xff] %v15801_v57  ;;  %v15804_v3 = vadd.f32 %v25749_v12, %v15141_v22 }
0x183e   : > { %15899 = vst [vmem:[%s25758_s5 + $0x2b8] sm:$0xff] %v15803_v48 }
0x183f   : > { %15900 = vst [vmem:[%s25758_s5 + $0x2c0] sm:$0xff] %v15804_v3 }
0x1841   : > { %v15145_v18 = vpop.f32.mrb[32].mxu0 }
0x1842   : > { %v15806_v38 = vadd.f32 %v25747_v13, %v15145_v18  ;;  %v15147_v7 = vpop.f32.mrb[33].mxu0 }
0x1843   : > { %v15807_v29 = vadd.f32 %v25749_v12, %v15147_v7  ;;  %v15149_v39 = vpop.f32.mrb[34].mxu0 }
0x1844   : > { %15902 = vst [vmem:[%s25758_s5 + $0x2d0] sm:$0xff] %v15806_v38  ;;  %v15809_v41 = vadd.f32 %v25747_v13, %v15149_v39  ;;  %v15151_v21 = vpop.f32.mrb[35].mxu0 }
0x1845   : > { %15903 = vst [vmem:[%s25758_s5 + $0x2d8] sm:$0xff] %v15807_v29  ;;  %v15810_v2 = vadd.f32 %v25749_v12, %v15151_v21 }
0x1846   : > { %15905 = vst [vmem:[%s25758_s5 + $0x2e8] sm:$0xff] %v15809_v41 }
0x1847   : > { %15906 = vst [vmem:[%s25758_s5 + $0x2f0] sm:$0xff] %v15810_v2 }
0x1848   : > { %20603 = shalt.err (!%p20600_p2)
}
0x1849   : > { %s20604_s10 = scalar_lea.hbm %s25950_s24, 12288  ;;  %s20608_s21 = scalar_lea.hbm %s26004_s4, 24576 }
0x184a   : > { %p20605_p13 = scmp.ne.s32.totalorder %s25950_s24, %s20604_s10  ;;  %p20609_p4 = scmp.lt.u32.totalorder %s25950_s24, %s26004_s4 }
0x184b   : > { %p20610_p7 = scmp.lt.u32.totalorder %s20608_s21, %s20604_s10  ;;  %p20612_p11 = scmp.lt.u32.totalorder %s20604_s10, %s25950_s24 }
0x184c   : > { %p20606_p6 = pnand %p20605_p13, %p26717_p0 }
0x184d   : > { %p20611_p8 = por %p20610_p7, %p20609_p4 }
0x184e   : > { %p20607_p10 = pneg %p20606_p6 }
0x184f   : > { %p20613_p1 = por %p20612_p11, %p20611_p8 }
0x1851   : > { %p20614_p3 = pnand %p20613_p1, %p20607_p10 }
0x1853   : > { %20617 = shalt.err (!%p20614_p3)
}
0x1854   : > { %s20674_s5 = smov 384   ;;  %s20675_s25 = smov 24  }
0x1855   : > { %19261 = dma.vmem_to_hbm [thread:$0]  (%p26717_p0), %s25952_s7, 12288, %s25950_s24, %s15909_s19, %s20674_s5, %s20674_s5, %s20675_s25  }
0x1856 PF: > { %s15938_s28 = sand.u32 1, %s20648_s15   ;;  %p26718_p5 = scmp.ne.s32.totalorder %s26264_s22, 0 }
0x1857   : > { %p26719_p9 = scmp.ge.s32.totalorder %s20660_s18, 2  ;;  %s15939_s26 = scalar_lea.sflag [#allocation6], %s15938_s28 }
0x1859   : > { %p19275_p12 = pnand %p26719_p9, %p26718_p5 }
0x185b   : > { %20643 = dma.done.wait (!%p19275_p12), %s15939_s26, 12288  }
0x185c   : > { %20645 = vsyncadd (!%p19275_p12), %s15939_s26, 4294955008  ;;  %p18_p2 = scmp.ge.s32.totalorder %s20811_s11, 4   ;;  %s26720_s15 = smov %s20652_s16 }
0x185d   : > { %s26721_s16 = smov %s20656_s17  ;;  %s26722_s17 = smov %s20820_s14 }
0x185e   : > { %s26723_s18 = smov %s20811_s11  ;;  %20 = sbr.rel (!%p18_p2) target bundleno = 6 (0x6), region = 89 }
0x1865   :  { %15944 = vsyncpa [#allocation5], 1 }
0x1866   :  { %15946 = vsyncpa [#allocation5 + $0x1], 1 }
0x1867   :  { %15947 = vsyncpa [#allocation8], 1 }
0x1868   :  { %15948 = vsyncpa [#allocation6], 1 }
0x1869   :  { %15950 = vsyncpa [#allocation6 + $0x1], 1 }

</bundles_post_ra>
